<compile_context>
chip_gen: v7x
topology: tpu7x:2x2x1
jax: 0.10.0
libtpu: 0.0.40
codegen_flags: <defaults>
</compile_context>

<pallas_src>
import jax
import jax.numpy as jnp
from jax.experimental import pallas as pl
from jax.experimental.pallas import tpu as pltpu

N_EMBED = 384
N_HEAD = 6
HEAD_DIM = N_EMBED // N_HEAD          # 64
BLOCK_SIZE = 256                      # max positions supported by the tril buffer
NEG_BIG = -1e30                       # finite "masked" additive bias


# ------------------------------- kernel -------------------------------------

def mha_kernel(x_ref, mask_ref, wqkv_ref, wp_ref, bp_ref, o_ref, qkv_ref, ctx_ref):
    Bb, T, D = x_ref.shape
    BT = Bb * T

    # Fused Q|K|V projection over the whole batch block: one (Bb*T,384)x(384,1152)
    # bf16 MXU pass, f32 accumulation.  1/sqrt(384) already folded into Q columns.
    xb = x_ref[...].reshape(BT, D).astype(jnp.bfloat16)
    qkv_ref[...] = jnp.dot(
        xb, wqkv_ref[...], preferred_element_type=jnp.float32
    ).astype(jnp.bfloat16)

    mask = mask_ref[...]                              # (T, T) additive causal bias, f32

    for h in range(N_HEAD):                           # static 6-iteration head loop
        lo = h * HEAD_DIM
        qh = qkv_ref[:, lo:lo + HEAD_DIM].reshape(Bb, T, HEAD_DIM)               # bf16
        kh = qkv_ref[:, D + lo:D + lo + HEAD_DIM].reshape(Bb, T, HEAD_DIM)       # bf16
        vh = qkv_ref[:, 2 * D + lo:2 * D + lo + HEAD_DIM].reshape(Bb, T, HEAD_DIM)

        # scores: (Bb, T, T) f32; q already carries the 1/sqrt(C) scale
        s = jnp.einsum('bqd,bkd->bqk', qh, kh,
                       preferred_element_type=jnp.float32) + mask

        # online-stable, unnormalized softmax (normalization deferred to ctx)
        m = jnp.max(s, axis=-1, keepdims=True)
        e = jnp.exp(s - m)                            # (Bb, T, T) f32
        denom = jnp.sum(e, axis=-1, keepdims=True)    # (Bb, T, 1) f32
        # dropout(p) = identity (eval mode)

        ctx = jnp.einsum('bqk,bkd->bqd', e.astype(jnp.bfloat16), vh,
                         preferred_element_type=jnp.float32)      # (Bb, T, 64) f32
        ctx = ctx * pl.reciprocal(denom, approx=True)             # deferred 1/denom (EUP)
        ctx_ref[:, lo:lo + HEAD_DIM] = ctx.reshape(BT, HEAD_DIM).astype(jnp.bfloat16)

    # Single full-depth output projection: (Bb*T,384) @ (384,384), K = 384
    out = jnp.dot(ctx_ref[...], wp_ref[...], preferred_element_type=jnp.float32)
    out = out + bp_ref[...]                           # (1,384) bias broadcast
    # dropout(out) = identity (eval mode)
    o_ref[...] = out.reshape(Bb, T, D)


# ------------------------------ wrapper -------------------------------------

def multi_head_attention(x, wqkv, wp, bp, mask, *, block_b=None):
    """x: (B, T, 384) f32.  wqkv: (384, 1152) bf16 (Q third pre-scaled by 1/sqrt(384)).
    wp: (384, 384) bf16.  bp: (1, 384) f32.  mask: (T, T) f32 additive causal bias."""
    B, T, D = x.shape
    assert D == N_EMBED and T <= BLOCK_SIZE

    if block_b is None:
        # Amortize the ~0.35us per-step overhead with multiple batch elements per
        # step, but keep >= 2 grid steps so both v7x TensorCores stay busy.
        block_b = 1
        for cand in (8, 4, 2):
            if B % cand == 0 and B // cand >= 2:
                block_b = cand
                break
    assert B % block_b == 0

    return pl.pallas_call(
        mha_kernel,
        out_shape=jax.ShapeDtypeStruct((B, T, D), jnp.float32),
        grid=(B // block_b,),
        in_specs=[
            pl.BlockSpec((block_b, T, D), lambda i: (i, 0, 0)),   # x
            pl.BlockSpec((T, T), lambda i: (0, 0)),               # causal bias
            pl.BlockSpec((D, 3 * D), lambda i: (0, 0)),           # fused Wqkv (bf16)
            pl.BlockSpec((D, D), lambda i: (0, 0)),               # Wp (bf16)
            pl.BlockSpec((1, D), lambda i: (0, 0)),               # proj bias
        ],
        out_specs=pl.BlockSpec((block_b, T, D), lambda i: (i, 0, 0)),
        scratch_shapes=[
            pltpu.VMEM((block_b * T, 3 * D), jnp.bfloat16),       # QKV activations
            pltpu.VMEM((block_b * T, D), jnp.bfloat16),           # per-head ctx slab
        ],
        compiler_params=pltpu.CompilerParams(
            dimension_semantics=("parallel",),        # batch blocks shard across TCs
            vmem_limit_bytes=32 * 1024 * 1024),       # sized for v7x's 64 MiB VMEM
    )(x, mask, wqkv, wp, bp)


# ------------------------------ parameters ----------------------------------

def init_params(key):
    """PyTorch-style Linear init, weights pre-transposed to (in, out)."""
    def uni(k, shape, fan_in):
        bound = 1.0 / (fan_in ** 0.5)
        return jax.random.uniform(k, shape, jnp.float32, -bound, bound)

    kq, kk, kv, kp, kb = jax.random.split(key, 5)
    wq = uni(kq, (N_EMBED, N_EMBED), N_EMBED)
    wk = uni(kk, (N_EMBED, N_EMBED), N_EMBED)
    wv = uni(kv, (N_EMBED, N_EMBED), N_EMBED)
    wp = uni(kp, (N_EMBED, N_EMBED), N_EMBED)
    bp = uni(kb, (1, N_EMBED), N_EMBED)

    # NOTE: reference scales by C**0.5 with C = 384 (not head_dim); fold it into Q.
    scale = 1.0 / (N_EMBED ** 0.5)
    wqkv = jnp.concatenate([wq * scale, wk, wv], axis=1).astype(jnp.bfloat16)  # (384,1152)
    return {"wq": wq, "wk": wk, "wv": wv, "wp": wp, "bp": bp,
            "wqkv": wqkv, "wp_bf16": wp.astype(jnp.bfloat16)}


def causal_bias(T):
    row = jnp.arange(T)[:, None]
    col = jnp.arange(T)[None, :]
    return jnp.where(col <= row, 0.0, NEG_BIG).astype(jnp.float32)             # (T, T)


# --------------------------- pure-JAX reference ------------------------------

def mha_reference(x, wq, wk, wv, wp, bp):
    B, T, C = x.shape
    sub = C // N_HEAD
    q = x @ wq
    k = x @ wk
    v = x @ wv
    qh = q.reshape(B, T, N_HEAD, sub).transpose(0, 2, 1, 3)
    kh = k.reshape(B, T, N_HEAD, sub).transpose(0, 2, 1, 3)
    vh = v.reshape(B, T, N_HEAD, sub).transpose(0, 2, 1, 3)
    att = (qh @ jnp.swapaxes(kh, -1, -2)) / (C ** 0.5)
    tril = jnp.tril(jnp.ones((T, T), bool))
    att = jnp.where(tril, att, -jnp.inf)
    p = jax.nn.softmax(att, axis=-1)
    ctx = (p @ vh).transpose(0, 2, 1, 3).reshape(B, T, C)
    return ctx @ wp + bp


# --------------------------------- main --------------------------------------

if __name__ == "__main__":
    B, T = 2, 128          # T <= block_size (256); C fixed at 384 by the module

    root = jax.random.PRNGKey(0)
    k_params, k_x = jax.random.split(root)
    params = init_params(k_params)
    x = jax.random.normal(k_x, (B, T, N_EMBED), dtype=jnp.float32)
    mask = causal_bias(T)

    out = multi_head_attention(x, params["wqkv"], params["wp_bf16"],
                               params["bp"], mask)
    out = jax.block_until_ready(out)

    assert out.shape == (B, T, N_EMBED) and out.dtype == jnp.float32

    # loose numerical check vs f32 reference (kernel uses bf16 matmul operands
    # and an approx reciprocal, so allow a generous tolerance)
    ref = mha_reference(x, params["wq"], params["wk"], params["wv"],
                        params["wp"], params["bp"])
    max_err = float(jnp.max(jnp.abs(out - ref)))
    assert max_err < 5e-2, f"max abs error too large: {max_err}"

    print("KERNEL_OK")
</pallas_src>

<mosaic_0001>
module attributes {stable_mosaic.version = 11 : i64} {
  func.func @mha_kernel(%arg0: i32, %arg1: memref<1x128x384xf32, #tpu.memory_space<vmem>>, %arg2: memref<128x128xf32, #tpu.memory_space<vmem>>, %arg3: memref<384x1152xbf16, #tpu.memory_space<vmem>>, %arg4: memref<384x384xbf16, #tpu.memory_space<vmem>>, %arg5: memref<1x384xf32, #tpu.memory_space<vmem>>, %arg6: memref<1x128x384xf32, #tpu.memory_space<vmem>>, %arg7: memref<128x1152xbf16, #tpu.memory_space<vmem>>, %arg8: memref<128x384xbf16, #tpu.memory_space<vmem>>) attributes {dimension_semantics = [#tpu.dimension_semantics<parallel>], iteration_bounds = array<i64: 2>, scalar_prefetch = 0 : i64, scratch_operands = 2 : i64, tpu.core_type = #tpu.core_type<tc>, window_params = [{transform_indices = @transform_0, window_bounds = array<i64: 1, 128, 384>}, {pipeline_mode = #tpu.pipeline_mode<synchronous>, transform_indices = @transform_1, window_bounds = array<i64: 128, 128>}, {pipeline_mode = #tpu.pipeline_mode<synchronous>, transform_indices = @transform_2, window_bounds = array<i64: 384, 1152>}, {pipeline_mode = #tpu.pipeline_mode<synchronous>, transform_indices = @transform_3, window_bounds = array<i64: 384, 384>}, {pipeline_mode = #tpu.pipeline_mode<synchronous>, transform_indices = @transform_4, window_bounds = array<i64: 1, 384>}, {transform_indices = @transform_5, window_bounds = array<i64: 1, 128, 384>}]} {
    %c0 = arith.constant 0 : index
    %c0_0 = arith.constant 0 : index
    %c0_1 = arith.constant 0 : index
    %0 = vector.load %arg1[%c0, %c0_0, %c0_1] : memref<1x128x384xf32, #tpu.memory_space<vmem>>, vector<1x128x384xf32>
    %1 = vector.shape_cast %0 : vector<1x128x384xf32> to vector<128x384xf32>
    %2 = arith.truncf %1 : vector<128x384xf32> to vector<128x384xbf16>
    %c0_2 = arith.constant 0 : index
    %c0_3 = arith.constant 0 : index
    %3 = vector.load %arg3[%c0_2, %c0_3] : memref<384x1152xbf16, #tpu.memory_space<vmem>>, vector<384x1152xbf16>
    %cst = arith.constant dense<0.000000e+00> : vector<128x1152xf32>
    %4 = tpu.matmul %2, %3, %cst {dimension_numbers = #tpu.dot_dimension_numbers<[1], [0], [0], [1], [0, 0, 1, 1], [], []>} : vector<128x384xbf16>, vector<384x1152xbf16>, vector<128x1152xf32> -> vector<128x1152xf32>
    %5 = arith.truncf %4 : vector<128x1152xf32> to vector<128x1152xbf16>
    %c0_4 = arith.constant 0 : index
    %c0_5 = arith.constant 0 : index
    %6 = vector.load %arg7[%c0_4, %c0_5] : memref<128x1152xbf16, #tpu.memory_space<vmem>>, vector<128x1152xbf16>
    tpu.vector_store %arg7[%c0_4, %c0_5], %5 {strides = array<i32>} : memref<128x1152xbf16, #tpu.memory_space<vmem>>, vector<128x1152xbf16>,
    %c0_6 = arith.constant 0 : index
    %c0_7 = arith.constant 0 : index
    %7 = vector.load %arg2[%c0_6, %c0_7] : memref<128x128xf32, #tpu.memory_space<vmem>>, vector<128x128xf32>
    %c0_8 = arith.constant 0 : index
    %c0_9 = arith.constant 0 : index
    %8 = vector.load %arg7[%c0_8, %c0_9] : memref<128x1152xbf16, #tpu.memory_space<vmem>>, vector<128x64xbf16>
    %9 = vector.shape_cast %8 : vector<128x64xbf16> to vector<1x128x64xbf16>
    %c0_10 = arith.constant 0 : index
    %c384 = arith.constant 384 : index
    %10 = vector.load %arg7[%c0_10, %c384] : memref<128x1152xbf16, #tpu.memory_space<vmem>>, vector<128x64xbf16>
    %11 = vector.shape_cast %10 : vector<128x64xbf16> to vector<1x128x64xbf16>
    %c0_11 = arith.constant 0 : index
    %c768 = arith.constant 768 : index
    %12 = vector.load %arg7[%c0_11, %c768] : memref<128x1152xbf16, #tpu.memory_space<vmem>>, vector<128x64xbf16>
    %13 = vector.shape_cast %12 : vector<128x64xbf16> to vector<1x128x64xbf16>
    "tpu.trace_start"() <{level = 10 : i32, message = "bqd,bkd->bqk"}> : () -> ()
    %cst_12 = arith.constant dense<0.000000e+00> : vector<1x128x128xf32>
    %14 = tpu.matmul %9, %11, %cst_12 {dimension_numbers = #tpu.dot_dimension_numbers<[2], [2], [1], [1], [0, 0, 0, 1, 1, 1], [0], [0]>} : vector<1x128x64xbf16>, vector<1x128x64xbf16>, vector<1x128x128xf32> -> vector<1x128x128xf32>
    "tpu.trace_stop"() : () -> ()
    %15 = vector.shape_cast %7 : vector<128x128xf32> to vector<1x128x128xf32>
    %16 = arith.addf %14, %15 : vector<1x128x128xf32>
    %cst_13 = arith.constant dense<0xFF800000> : vector<1x128xf32>
    %17 = vector.multi_reduction <maximumf>, %16, %cst_13 [2] : vector<1x128x128xf32> to vector<1x128xf32>
    %18 = vector.shape_cast %17 : vector<1x128xf32> to vector<1x128x1xf32>
    %19 = vector.broadcast %18 : vector<1x128x1xf32> to vector<1x128x128xf32>
    %20 = arith.subf %16, %19 : vector<1x128x128xf32>
    %21 = math.exp %20 : vector<1x128x128xf32>
    %cst_14 = arith.constant dense<0.000000e+00> : vector<1x128xf32>
    %22 = vector.multi_reduction <add>, %21, %cst_14 [2] : vector<1x128x128xf32> to vector<1x128xf32>
    %23 = vector.shape_cast %22 : vector<1x128xf32> to vector<1x128x1xf32>
    %24 = arith.truncf %21 : vector<1x128x128xf32> to vector<1x128x128xbf16>
    "tpu.trace_start"() <{level = 10 : i32, message = "bqk,bkd->bqd"}> : () -> ()
    %cst_15 = arith.constant dense<0.000000e+00> : vector<1x128x64xf32>
    %25 = tpu.matmul %24, %13, %cst_15 {dimension_numbers = #tpu.dot_dimension_numbers<[2], [1], [1], [2], [0, 0, 0, 1, 1, 2], [0], [0]>} : vector<1x128x128xbf16>, vector<1x128x64xbf16>, vector<1x128x64xf32> -> vector<1x128x64xf32>
    "tpu.trace_stop"() : () -> ()
    %26 = tpu.reciprocal %23 {approx = true} : vector<1x128x1xf32> -> vector<1x128x1xf32>
    %27 = vector.broadcast %26 : vector<1x128x1xf32> to vector<1x128x64xf32>
    %28 = arith.mulf %25, %27 : vector<1x128x64xf32>
    %29 = vector.shape_cast %28 : vector<1x128x64xf32> to vector<128x64xf32>
    %30 = arith.truncf %29 : vector<128x64xf32> to vector<128x64xbf16>
    %c0_16 = arith.constant 0 : index
    %c0_17 = arith.constant 0 : index
    %31 = vector.load %arg8[%c0_16, %c0_17] : memref<128x384xbf16, #tpu.memory_space<vmem>>, vector<128x64xbf16>
    tpu.vector_store %arg8[%c0_16, %c0_17], %30 {strides = array<i32>} : memref<128x384xbf16, #tpu.memory_space<vmem>>, vector<128x64xbf16>,
    %c0_18 = arith.constant 0 : index
    %c64 = arith.constant 64 : index
    %32 = vector.load %arg7[%c0_18, %c64] : memref<128x1152xbf16, #tpu.memory_space<vmem>>, vector<128x64xbf16>
    %33 = vector.shape_cast %32 : vector<128x64xbf16> to vector<1x128x64xbf16>
    %c0_19 = arith.constant 0 : index
    %c448 = arith.constant 448 : index
    %34 = vector.load %arg7[%c0_19, %c448] : memref<128x1152xbf16, #tpu.memory_space<vmem>>, vector<128x64xbf16>
    %35 = vector.shape_cast %34 : vector<128x64xbf16> to vector<1x128x64xbf16>
    %c0_20 = arith.constant 0 : index
    %c832 = arith.constant 832 : index
    %36 = vector.load %arg7[%c0_20, %c832] : memref<128x1152xbf16, #tpu.memory_space<vmem>>, vector<128x64xbf16>
    %37 = vector.shape_cast %36 : vector<128x64xbf16> to vector<1x128x64xbf16>
    "tpu.trace_start"() <{level = 10 : i32, message = "bqd,bkd->bqk"}> : () -> ()
    %cst_21 = arith.constant dense<0.000000e+00> : vector<1x128x128xf32>
    %38 = tpu.matmul %33, %35, %cst_21 {dimension_numbers = #tpu.dot_dimension_numbers<[2], [2], [1], [1], [0, 0, 0, 1, 1, 1], [0], [0]>} : vector<1x128x64xbf16>, vector<1x128x64xbf16>, vector<1x128x128xf32> -> vector<1x128x128xf32>
    "tpu.trace_stop"() : () -> ()
    %39 = vector.shape_cast %7 : vector<128x128xf32> to vector<1x128x128xf32>
    %40 = arith.addf %38, %39 : vector<1x128x128xf32>
    %cst_22 = arith.constant dense<0xFF800000> : vector<1x128xf32>
    %41 = vector.multi_reduction <maximumf>, %40, %cst_22 [2] : vector<1x128x128xf32> to vector<1x128xf32>
    %42 = vector.shape_cast %41 : vector<1x128xf32> to vector<1x128x1xf32>
    %43 = vector.broadcast %42 : vector<1x128x1xf32> to vector<1x128x128xf32>
    %44 = arith.subf %40, %43 : vector<1x128x128xf32>
    %45 = math.exp %44 : vector<1x128x128xf32>
    %cst_23 = arith.constant dense<0.000000e+00> : vector<1x128xf32>
    %46 = vector.multi_reduction <add>, %45, %cst_23 [2] : vector<1x128x128xf32> to vector<1x128xf32>
    %47 = vector.shape_cast %46 : vector<1x128xf32> to vector<1x128x1xf32>
    %48 = arith.truncf %45 : vector<1x128x128xf32> to vector<1x128x128xbf16>
    "tpu.trace_start"() <{level = 10 : i32, message = "bqk,bkd->bqd"}> : () -> ()
    %cst_24 = arith.constant dense<0.000000e+00> : vector<1x128x64xf32>
    %49 = tpu.matmul %48, %37, %cst_24 {dimension_numbers = #tpu.dot_dimension_numbers<[2], [1], [1], [2], [0, 0, 0, 1, 1, 2], [0], [0]>} : vector<1x128x128xbf16>, vector<1x128x64xbf16>, vector<1x128x64xf32> -> vector<1x128x64xf32>
    "tpu.trace_stop"() : () -> ()
    %50 = tpu.reciprocal %47 {approx = true} : vector<1x128x1xf32> -> vector<1x128x1xf32>
    %51 = vector.broadcast %50 : vector<1x128x1xf32> to vector<1x128x64xf32>
    %52 = arith.mulf %49, %51 : vector<1x128x64xf32>
    %53 = vector.shape_cast %52 : vector<1x128x64xf32> to vector<128x64xf32>
    %54 = arith.truncf %53 : vector<128x64xf32> to vector<128x64xbf16>
    %c0_25 = arith.constant 0 : index
    %c64_26 = arith.constant 64 : index
    %55 = vector.load %arg8[%c0_25, %c64_26] : memref<128x384xbf16, #tpu.memory_space<vmem>>, vector<128x64xbf16>
    tpu.vector_store %arg8[%c0_25, %c64_26], %54 {strides = array<i32>} : memref<128x384xbf16, #tpu.memory_space<vmem>>, vector<128x64xbf16>,
    %c0_27 = arith.constant 0 : index
    %c128 = arith.constant 128 : index
    %56 = vector.load %arg7[%c0_27, %c128] : memref<128x1152xbf16, #tpu.memory_space<vmem>>, vector<128x64xbf16>
    %57 = vector.shape_cast %56 : vector<128x64xbf16> to vector<1x128x64xbf16>
    %c0_28 = arith.constant 0 : index
    %c512 = arith.constant 512 : index
    %58 = vector.load %arg7[%c0_28, %c512] : memref<128x1152xbf16, #tpu.memory_space<vmem>>, vector<128x64xbf16>
    %59 = vector.shape_cast %58 : vector<128x64xbf16> to vector<1x128x64xbf16>
    %c0_29 = arith.constant 0 : index
    %c896 = arith.constant 896 : index
    %60 = vector.load %arg7[%c0_29, %c896] : memref<128x1152xbf16, #tpu.memory_space<vmem>>, vector<128x64xbf16>
    %61 = vector.shape_cast %60 : vector<128x64xbf16> to vector<1x128x64xbf16>
    "tpu.trace_start"() <{level = 10 : i32, message = "bqd,bkd->bqk"}> : () -> ()
    %cst_30 = arith.constant dense<0.000000e+00> : vector<1x128x128xf32>
    %62 = tpu.matmul %57, %59, %cst_30 {dimension_numbers = #tpu.dot_dimension_numbers<[2], [2], [1], [1], [0, 0, 0, 1, 1, 1], [0], [0]>} : vector<1x128x64xbf16>, vector<1x128x64xbf16>, vector<1x128x128xf32> -> vector<1x128x128xf32>
    "tpu.trace_stop"() : () -> ()
    %63 = vector.shape_cast %7 : vector<128x128xf32> to vector<1x128x128xf32>
    %64 = arith.addf %62, %63 : vector<1x128x128xf32>
    %cst_31 = arith.constant dense<0xFF800000> : vector<1x128xf32>
    %65 = vector.multi_reduction <maximumf>, %64, %cst_31 [2] : vector<1x128x128xf32> to vector<1x128xf32>
    %66 = vector.shape_cast %65 : vector<1x128xf32> to vector<1x128x1xf32>
    %67 = vector.broadcast %66 : vector<1x128x1xf32> to vector<1x128x128xf32>
    %68 = arith.subf %64, %67 : vector<1x128x128xf32>
    %69 = math.exp %68 : vector<1x128x128xf32>
    %cst_32 = arith.constant dense<0.000000e+00> : vector<1x128xf32>
    %70 = vector.multi_reduction <add>, %69, %cst_32 [2] : vector<1x128x128xf32> to vector<1x128xf32>
    %71 = vector.shape_cast %70 : vector<1x128xf32> to vector<1x128x1xf32>
    %72 = arith.truncf %69 : vector<1x128x128xf32> to vector<1x128x128xbf16>
    "tpu.trace_start"() <{level = 10 : i32, message = "bqk,bkd->bqd"}> : () -> ()
    %cst_33 = arith.constant dense<0.000000e+00> : vector<1x128x64xf32>
    %73 = tpu.matmul %72, %61, %cst_33 {dimension_numbers = #tpu.dot_dimension_numbers<[2], [1], [1], [2], [0, 0, 0, 1, 1, 2], [0], [0]>} : vector<1x128x128xbf16>, vector<1x128x64xbf16>, vector<1x128x64xf32> -> vector<1x128x64xf32>
    "tpu.trace_stop"() : () -> ()
    %74 = tpu.reciprocal %71 {approx = true} : vector<1x128x1xf32> -> vector<1x128x1xf32>
    %75 = vector.broadcast %74 : vector<1x128x1xf32> to vector<1x128x64xf32>
    %76 = arith.mulf %73, %75 : vector<1x128x64xf32>
    %77 = vector.shape_cast %76 : vector<1x128x64xf32> to vector<128x64xf32>
    %78 = arith.truncf %77 : vector<128x64xf32> to vector<128x64xbf16>
    %c0_34 = arith.constant 0 : index
    %c128_35 = arith.constant 128 : index
    %79 = vector.load %arg8[%c0_34, %c128_35] : memref<128x384xbf16, #tpu.memory_space<vmem>>, vector<128x64xbf16>
    tpu.vector_store %arg8[%c0_34, %c128_35], %78 {strides = array<i32>} : memref<128x384xbf16, #tpu.memory_space<vmem>>, vector<128x64xbf16>,
    %c0_36 = arith.constant 0 : index
    %c192 = arith.constant 192 : index
    %80 = vector.load %arg7[%c0_36, %c192] : memref<128x1152xbf16, #tpu.memory_space<vmem>>, vector<128x64xbf16>
    %81 = vector.shape_cast %80 : vector<128x64xbf16> to vector<1x128x64xbf16>
    %c0_37 = arith.constant 0 : index
    %c576 = arith.constant 576 : index
    %82 = vector.load %arg7[%c0_37, %c576] : memref<128x1152xbf16, #tpu.memory_space<vmem>>, vector<128x64xbf16>
    %83 = vector.shape_cast %82 : vector<128x64xbf16> to vector<1x128x64xbf16>
    %c0_38 = arith.constant 0 : index
    %c960 = arith.constant 960 : index
    %84 = vector.load %arg7[%c0_38, %c960] : memref<128x1152xbf16, #tpu.memory_space<vmem>>, vector<128x64xbf16>
    %85 = vector.shape_cast %84 : vector<128x64xbf16> to vector<1x128x64xbf16>
    "tpu.trace_start"() <{level = 10 : i32, message = "bqd,bkd->bqk"}> : () -> ()
    %cst_39 = arith.constant dense<0.000000e+00> : vector<1x128x128xf32>
    %86 = tpu.matmul %81, %83, %cst_39 {dimension_numbers = #tpu.dot_dimension_numbers<[2], [2], [1], [1], [0, 0, 0, 1, 1, 1], [0], [0]>} : vector<1x128x64xbf16>, vector<1x128x64xbf16>, vector<1x128x128xf32> -> vector<1x128x128xf32>
    "tpu.trace_stop"() : () -> ()
    %87 = vector.shape_cast %7 : vector<128x128xf32> to vector<1x128x128xf32>
    %88 = arith.addf %86, %87 : vector<1x128x128xf32>
    %cst_40 = arith.constant dense<0xFF800000> : vector<1x128xf32>
    %89 = vector.multi_reduction <maximumf>, %88, %cst_40 [2] : vector<1x128x128xf32> to vector<1x128xf32>
    %90 = vector.shape_cast %89 : vector<1x128xf32> to vector<1x128x1xf32>
    %91 = vector.broadcast %90 : vector<1x128x1xf32> to vector<1x128x128xf32>
    %92 = arith.subf %88, %91 : vector<1x128x128xf32>
    %93 = math.exp %92 : vector<1x128x128xf32>
    %cst_41 = arith.constant dense<0.000000e+00> : vector<1x128xf32>
    %94 = vector.multi_reduction <add>, %93, %cst_41 [2] : vector<1x128x128xf32> to vector<1x128xf32>
    %95 = vector.shape_cast %94 : vector<1x128xf32> to vector<1x128x1xf32>
    %96 = arith.truncf %93 : vector<1x128x128xf32> to vector<1x128x128xbf16>
    "tpu.trace_start"() <{level = 10 : i32, message = "bqk,bkd->bqd"}> : () -> ()
    %cst_42 = arith.constant dense<0.000000e+00> : vector<1x128x64xf32>
    %97 = tpu.matmul %96, %85, %cst_42 {dimension_numbers = #tpu.dot_dimension_numbers<[2], [1], [1], [2], [0, 0, 0, 1, 1, 2], [0], [0]>} : vector<1x128x128xbf16>, vector<1x128x64xbf16>, vector<1x128x64xf32> -> vector<1x128x64xf32>
    "tpu.trace_stop"() : () -> ()
    %98 = tpu.reciprocal %95 {approx = true} : vector<1x128x1xf32> -> vector<1x128x1xf32>
    %99 = vector.broadcast %98 : vector<1x128x1xf32> to vector<1x128x64xf32>
    %100 = arith.mulf %97, %99 : vector<1x128x64xf32>
    %101 = vector.shape_cast %100 : vector<1x128x64xf32> to vector<128x64xf32>
    %102 = arith.truncf %101 : vector<128x64xf32> to vector<128x64xbf16>
    %c0_43 = arith.constant 0 : index
    %c192_44 = arith.constant 192 : index
    %103 = vector.load %arg8[%c0_43, %c192_44] : memref<128x384xbf16, #tpu.memory_space<vmem>>, vector<128x64xbf16>
    tpu.vector_store %arg8[%c0_43, %c192_44], %102 {strides = array<i32>} : memref<128x384xbf16, #tpu.memory_space<vmem>>, vector<128x64xbf16>,
    %c0_45 = arith.constant 0 : index
    %c256 = arith.constant 256 : index
    %104 = vector.load %arg7[%c0_45, %c256] : memref<128x1152xbf16, #tpu.memory_space<vmem>>, vector<128x64xbf16>
    %105 = vector.shape_cast %104 : vector<128x64xbf16> to vector<1x128x64xbf16>
    %c0_46 = arith.constant 0 : index
    %c640 = arith.constant 640 : index
    %106 = vector.load %arg7[%c0_46, %c640] : memref<128x1152xbf16, #tpu.memory_space<vmem>>, vector<128x64xbf16>
    %107 = vector.shape_cast %106 : vector<128x64xbf16> to vector<1x128x64xbf16>
    %c0_47 = arith.constant 0 : index
    %c1024 = arith.constant 1024 : index
    %108 = vector.load %arg7[%c0_47, %c1024] : memref<128x1152xbf16, #tpu.memory_space<vmem>>, vector<128x64xbf16>
    %109 = vector.shape_cast %108 : vector<128x64xbf16> to vector<1x128x64xbf16>
    "tpu.trace_start"() <{level = 10 : i32, message = "bqd,bkd->bqk"}> : () -> ()
    %cst_48 = arith.constant dense<0.000000e+00> : vector<1x128x128xf32>
    %110 = tpu.matmul %105, %107, %cst_48 {dimension_numbers = #tpu.dot_dimension_numbers<[2], [2], [1], [1], [0, 0, 0, 1, 1, 1], [0], [0]>} : vector<1x128x64xbf16>, vector<1x128x64xbf16>, vector<1x128x128xf32> -> vector<1x128x128xf32>
    "tpu.trace_stop"() : () -> ()
    %111 = vector.shape_cast %7 : vector<128x128xf32> to vector<1x128x128xf32>
    %112 = arith.addf %110, %111 : vector<1x128x128xf32>
    %cst_49 = arith.constant dense<0xFF800000> : vector<1x128xf32>
    %113 = vector.multi_reduction <maximumf>, %112, %cst_49 [2] : vector<1x128x128xf32> to vector<1x128xf32>
    %114 = vector.shape_cast %113 : vector<1x128xf32> to vector<1x128x1xf32>
    %115 = vector.broadcast %114 : vector<1x128x1xf32> to vector<1x128x128xf32>
    %116 = arith.subf %112, %115 : vector<1x128x128xf32>
    %117 = math.exp %116 : vector<1x128x128xf32>
    %cst_50 = arith.constant dense<0.000000e+00> : vector<1x128xf32>
    %118 = vector.multi_reduction <add>, %117, %cst_50 [2] : vector<1x128x128xf32> to vector<1x128xf32>
    %119 = vector.shape_cast %118 : vector<1x128xf32> to vector<1x128x1xf32>
    %120 = arith.truncf %117 : vector<1x128x128xf32> to vector<1x128x128xbf16>
    "tpu.trace_start"() <{level = 10 : i32, message = "bqk,bkd->bqd"}> : () -> ()
    %cst_51 = arith.constant dense<0.000000e+00> : vector<1x128x64xf32>
    %121 = tpu.matmul %120, %109, %cst_51 {dimension_numbers = #tpu.dot_dimension_numbers<[2], [1], [1], [2], [0, 0, 0, 1, 1, 2], [0], [0]>} : vector<1x128x128xbf16>, vector<1x128x64xbf16>, vector<1x128x64xf32> -> vector<1x128x64xf32>
    "tpu.trace_stop"() : () -> ()
    %122 = tpu.reciprocal %119 {approx = true} : vector<1x128x1xf32> -> vector<1x128x1xf32>
    %123 = vector.broadcast %122 : vector<1x128x1xf32> to vector<1x128x64xf32>
    %124 = arith.mulf %121, %123 : vector<1x128x64xf32>
    %125 = vector.shape_cast %124 : vector<1x128x64xf32> to vector<128x64xf32>
    %126 = arith.truncf %125 : vector<128x64xf32> to vector<128x64xbf16>
    %c0_52 = arith.constant 0 : index
    %c256_53 = arith.constant 256 : index
    %127 = vector.load %arg8[%c0_52, %c256_53] : memref<128x384xbf16, #tpu.memory_space<vmem>>, vector<128x64xbf16>
    tpu.vector_store %arg8[%c0_52, %c256_53], %126 {strides = array<i32>} : memref<128x384xbf16, #tpu.memory_space<vmem>>, vector<128x64xbf16>,
    %c0_54 = arith.constant 0 : index
    %c320 = arith.constant 320 : index
    %128 = vector.load %arg7[%c0_54, %c320] : memref<128x1152xbf16, #tpu.memory_space<vmem>>, vector<128x64xbf16>
    %129 = vector.shape_cast %128 : vector<128x64xbf16> to vector<1x128x64xbf16>
    %c0_55 = arith.constant 0 : index
    %c704 = arith.constant 704 : index
    %130 = vector.load %arg7[%c0_55, %c704] : memref<128x1152xbf16, #tpu.memory_space<vmem>>, vector<128x64xbf16>
    %131 = vector.shape_cast %130 : vector<128x64xbf16> to vector<1x128x64xbf16>
    %c0_56 = arith.constant 0 : index
    %c1088 = arith.constant 1088 : index
    %132 = vector.load %arg7[%c0_56, %c1088] : memref<128x1152xbf16, #tpu.memory_space<vmem>>, vector<128x64xbf16>
    %133 = vector.shape_cast %132 : vector<128x64xbf16> to vector<1x128x64xbf16>
    "tpu.trace_start"() <{level = 10 : i32, message = "bqd,bkd->bqk"}> : () -> ()
    %cst_57 = arith.constant dense<0.000000e+00> : vector<1x128x128xf32>
    %134 = tpu.matmul %129, %131, %cst_57 {dimension_numbers = #tpu.dot_dimension_numbers<[2], [2], [1], [1], [0, 0, 0, 1, 1, 1], [0], [0]>} : vector<1x128x64xbf16>, vector<1x128x64xbf16>, vector<1x128x128xf32> -> vector<1x128x128xf32>
    "tpu.trace_stop"() : () -> ()
    %135 = vector.shape_cast %7 : vector<128x128xf32> to vector<1x128x128xf32>
    %136 = arith.addf %134, %135 : vector<1x128x128xf32>
    %cst_58 = arith.constant dense<0xFF800000> : vector<1x128xf32>
    %137 = vector.multi_reduction <maximumf>, %136, %cst_58 [2] : vector<1x128x128xf32> to vector<1x128xf32>
    %138 = vector.shape_cast %137 : vector<1x128xf32> to vector<1x128x1xf32>
    %139 = vector.broadcast %138 : vector<1x128x1xf32> to vector<1x128x128xf32>
    %140 = arith.subf %136, %139 : vector<1x128x128xf32>
    %141 = math.exp %140 : vector<1x128x128xf32>
    %cst_59 = arith.constant dense<0.000000e+00> : vector<1x128xf32>
    %142 = vector.multi_reduction <add>, %141, %cst_59 [2] : vector<1x128x128xf32> to vector<1x128xf32>
    %143 = vector.shape_cast %142 : vector<1x128xf32> to vector<1x128x1xf32>
    %144 = arith.truncf %141 : vector<1x128x128xf32> to vector<1x128x128xbf16>
    "tpu.trace_start"() <{level = 10 : i32, message = "bqk,bkd->bqd"}> : () -> ()
    %cst_60 = arith.constant dense<0.000000e+00> : vector<1x128x64xf32>
    %145 = tpu.matmul %144, %133, %cst_60 {dimension_numbers = #tpu.dot_dimension_numbers<[2], [1], [1], [2], [0, 0, 0, 1, 1, 2], [0], [0]>} : vector<1x128x128xbf16>, vector<1x128x64xbf16>, vector<1x128x64xf32> -> vector<1x128x64xf32>
    "tpu.trace_stop"() : () -> ()
    %146 = tpu.reciprocal %143 {approx = true} : vector<1x128x1xf32> -> vector<1x128x1xf32>
    %147 = vector.broadcast %146 : vector<1x128x1xf32> to vector<1x128x64xf32>
    %148 = arith.mulf %145, %147 : vector<1x128x64xf32>
    %149 = vector.shape_cast %148 : vector<1x128x64xf32> to vector<128x64xf32>
    %150 = arith.truncf %149 : vector<128x64xf32> to vector<128x64xbf16>
    %c0_61 = arith.constant 0 : index
    %c320_62 = arith.constant 320 : index
    %151 = vector.load %arg8[%c0_61, %c320_62] : memref<128x384xbf16, #tpu.memory_space<vmem>>, vector<128x64xbf16>
    tpu.vector_store %arg8[%c0_61, %c320_62], %150 {strides = array<i32>} : memref<128x384xbf16, #tpu.memory_space<vmem>>, vector<128x64xbf16>,
    %c0_63 = arith.constant 0 : index
    %c0_64 = arith.constant 0 : index
    %152 = vector.load %arg8[%c0_63, %c0_64] : memref<128x384xbf16, #tpu.memory_space<vmem>>, vector<128x384xbf16>
    %c0_65 = arith.constant 0 : index
    %c0_66 = arith.constant 0 : index
    %153 = vector.load %arg4[%c0_65, %c0_66] : memref<384x384xbf16, #tpu.memory_space<vmem>>, vector<384x384xbf16>
    %cst_67 = arith.constant dense<0.000000e+00> : vector<128x384xf32>
    %154 = tpu.matmul %152, %153, %cst_67 {dimension_numbers = #tpu.dot_dimension_numbers<[1], [0], [0], [1], [0, 0, 1, 1], [], []>} : vector<128x384xbf16>, vector<384x384xbf16>, vector<128x384xf32> -> vector<128x384xf32>
    %c0_68 = arith.constant 0 : index
    %c0_69 = arith.constant 0 : index
    %155 = vector.load %arg5[%c0_68, %c0_69] : memref<1x384xf32, #tpu.memory_space<vmem>>, vector<1x384xf32>
    %156 = vector.broadcast %155 : vector<1x384xf32> to vector<128x384xf32>
    %157 = arith.addf %154, %156 : vector<128x384xf32>
    %158 = vector.shape_cast %157 : vector<128x384xf32> to vector<1x128x384xf32>
    %c0_70 = arith.constant 0 : index
    %c0_71 = arith.constant 0 : index
    %c0_72 = arith.constant 0 : index
    %159 = vector.load %arg6[%c0_70, %c0_71, %c0_72] : memref<1x128x384xf32, #tpu.memory_space<vmem>>, vector<1x128x384xf32>
    tpu.vector_store %arg6[%c0_70, %c0_71, %c0_72], %158 {strides = array<i32>} : memref<1x128x384xf32, #tpu.memory_space<vmem>>, vector<1x128x384xf32>,
    return
  }
  func.func @transform_0(%arg0: i32) -> (i32, i32, i32) {
    %c0_i32 = arith.constant 0 : i32
    %c0_i32_0 = arith.constant 0 : i32
    %c0_i32_1 = arith.constant 0 : i32
    return %arg0, %c0_i32, %c0_i32_0 : i32, i32, i32
  }
  func.func @transform_1(%arg0: i32) -> (i32, i32) {
    %c0_i32 = arith.constant 0 : i32
    %c0_i32_0 = arith.constant 0 : i32
    %c0_i32_1 = arith.constant 0 : i32
    return %c0_i32, %c0_i32_0 : i32, i32
  }
  func.func @transform_2(%arg0: i32) -> (i32, i32) {
    %c0_i32 = arith.constant 0 : i32
    %c0_i32_0 = arith.constant 0 : i32
    %c0_i32_1 = arith.constant 0 : i32
    return %c0_i32, %c0_i32_0 : i32, i32
  }
  func.func @transform_3(%arg0: i32) -> (i32, i32) {
    %c0_i32 = arith.constant 0 : i32
    %c0_i32_0 = arith.constant 0 : i32
    %c0_i32_1 = arith.constant 0 : i32
    return %c0_i32, %c0_i32_0 : i32, i32
  }
  func.func @transform_4(%arg0: i32) -> (i32, i32) {
    %c0_i32 = arith.constant 0 : i32
    %c0_i32_0 = arith.constant 0 : i32
    %c0_i32_1 = arith.constant 0 : i32
    return %c0_i32, %c0_i32_0 : i32, i32
  }
  func.func @transform_5(%arg0: i32) -> (i32, i32, i32) {
    %c0_i32 = arith.constant 0 : i32
    %c0_i32_0 = arith.constant 0 : i32
    %c0_i32_1 = arith.constant 0 : i32
    return %arg0, %c0_i32, %c0_i32_0 : i32, i32, i32
  }
}

</mosaic_0001>

<bundles_post_ra>
// kernel: tpu_custom_call.1
= control target key start
LH: loop header
LB: loop body
LE: loop exit
PB: predicated region body
PF: predicated region fallthrough
CT: control target
= control target key end

     0   :  { %10 = vsyncpa [#allocation5], 0  ;;  %s12425_s0 = inlined_call_operand.hbm [shape: f32[2,128,384], index: 0, kind: input, shape index: {}]   ;;  %s12426_s1 = inlined_call_operand.hbm [shape: f32[128,128], index: 1, kind: input, shape index: {}]   ;;  %s12427_s2 = inlined_call_operand.hbm [shape: bf16[384,1152], index: 2, kind: input, shape index: {}]   ;;  %s12428_s3 = inlined_call_operand.hbm [shape: bf16[384,384], index: 3, kind: input, shape index: {}]   ;;  %s12429_s4 = inlined_call_operand.vmem [shape: f32[1,384], index: 4, kind: input, shape index: {}]   ;;  %s12430_s5 = inlined_call_operand.hbm [shape: f32[2,128,384], index: 5, kind: output, shape index: {}]  }
   0x1   :  { %12 = vsyncpa [#allocation5 + $0x1], 0 }
   0x2   :  { %13 = vsyncpa [#allocation8], 0 }
   0x3   :  { %14 = vsyncpa [#allocation11], 0 }
   0x4   :  { %15 = vsyncpa [#allocation6], 0 }
   0x5   :  { %17 = vsyncpa [#allocation6 + $0x1], 0  ;;  %s9585_s18 = smov 0   ;;  %s9587_s19 = smov 0  }
   0x6   :  { %s9589_s20 = smov 0   ;;  %s9591_s21 = smov 0  }
   0x7 LB: > { %s9606_s22 = sadd.s32 4294967295, %s9536_s21   ;;  %s7009_s23 = sadd.s32 4294967294, %s9536_s21   ;;  %s9536_s21 = sphi %s9591_s21, %s12880_s21   ;;  %s9532_s20 = sphi %s9589_s20, %s12879_s20   ;;  %s9528_s19 = sphi %s9587_s19, %s12878_s19   ;;  %s9524_s18 = sphi %s9585_s18, %s12877_s18  }
   0x8   : > { %p43_p0 = scmp.ne.s32.totalorder %s9528_s19, %s9524_s18  ;;  %p12431_p1 = scmp.eq.s32.totalorder %s9606_s22, 0 }
   0x9   : > { %p157_p3 = scmp.eq.s32.totalorder %s7009_s23, 1  ;;  %p7010_p5 = scmp.ge.s32.totalorder %s9536_s21, 1 }
   0xa   : > { %p9615_p4 = por %p12431_p1, %p43_p0  ;;  %p164_p7 = scmp.lt.s32.totalorder %s9536_s21, 3 }
   0xb   : > { %p9620_p6 = por %p157_p3, %p43_p0  ;;  %s9538_s27 = smov [#allocation7]  }
   0xc   : > { %s12529_s24 = scalar_select %p9615_p4, 1, 0 }
   0xd   : > { %s12530_s25 = scalar_select %p9620_p6, 1, 0 }
   0xe   : > { %p9625_p8 = pnand %p7010_p5, %p164_p7  ;;  %s176_s28 = sshll.u32 %s9538_s27, 4  ;;  %s9629_s28 = int_to_ptr.vmem [resolvable:$true] %s176_s28 }
   0xf   : > { %s9539_s30 = smov [#allocation9]   ;;  %s9348_s9 = scalar_lea.hbm %s12426_s1, 2048 }
  0x10   : > { %s12531_s26 = scalar_select %p9625_p8, 1, 0 }
  0x11   : > { %p8435_p9 = pneg %p9625_p8  ;;  %s189_s6 = sshll.u32 %s9539_s30, 4  ;;  %s9640_s6 = int_to_ptr.vmem [resolvable:$true] %s189_s6 }
  0x12   : > { %p9349_p12 = scmp.ne.s32.totalorder %s12426_s1, %s9348_s9  ;;  %p9355_p5 = scmp.lt.u32.totalorder %s9348_s9, %s12426_s1 }
  0x13   : > { %p9636_p11 = pnand %p8435_p9, %p12431_p1 }
  0x15   : > { %p9650_p13 = pneg %p9636_p11 }
  0x17   : > { %p9351_p0 = pnand %p9650_p13, %p9349_p12 }
  0x19   : > { %p9352_p3 = pneg %p9351_p0 }
  0x1b   : > { %p9357_p7 = pnand %p9355_p5, %p9352_p3 }
  0x1d   : > { %9360 = shalt.err (!%p9357_p7)
}
  0x1e   : > { %s9361_s15 = scalar_lea.vmem %s9629_s28, 2048  ;;  %p9369_p2 = scmp.lt.s32.totalorder %s9629_s28, %s9629_s28 }
  0x1f   : > { %p9362_p9 = scmp.ne.s32.totalorder %s9629_s28, %s9361_s15  ;;  %p9370_p6 = scmp.lt.s32.totalorder %s9361_s15, %s9361_s15 }
  0x21   : > { %p9364_p10 = pnand %p9362_p9, %p9650_p13  ;;  %p9371_p12 = por %p9370_p6, %p9369_p2 }
  0x23   : > { %p9365_p1 = pneg %p9364_p10 }
  0x25   : > { %p9372_p0 = pnand %p9371_p12, %p9365_p1 }
  0x27   : > { %9375 = shalt.err (!%p9372_p0)
}
  0x28   : > { %s9540_s16 = smov 128   ;;  %s9541_s17 = smov 8  }
  0x29   : > { %8438 = dma.hbm_to_vmem [thread:$0]  (!%p9636_p11), %s12426_s1, 2048, %s9629_s28, [#allocation8], %s9540_s16, %s9540_s16, %s9541_s17  }
  0x2a   : > { %s9376_s8 = scalar_lea.hbm %s12427_s2, 27648 }
  0x2b   : > { %p9377_p2 = scmp.ne.s32.totalorder %s12427_s2, %s9376_s8  ;;  %p9383_p10 = scmp.lt.u32.totalorder %s9376_s8, %s12427_s2 }
  0x2d   : > { %p9379_p1 = pnand %p9377_p2, %p9650_p13 }
  0x2f   : > { %p9380_p6 = pneg %p9379_p1 }
  0x31   : > { %p9385_p3 = pnand %p9383_p10, %p9380_p6 }
  0x33   : > { %9388 = shalt.err (!%p9385_p3)
}
  0x34   : > { %s9389_s28 = scalar_lea.vmem %s9640_s6, 27648  ;;  %p9397_p12 = scmp.lt.s32.totalorder %s9640_s6, %s9640_s6 }
  0x35   : > { %p9390_p5 = scmp.ne.s32.totalorder %s9640_s6, %s9389_s28  ;;  %p9398_p0 = scmp.lt.s32.totalorder %s9389_s28, %s9389_s28 }
  0x37   : > { %p9392_p7 = pnand %p9390_p5, %p9650_p13  ;;  %p9399_p2 = por %p9398_p0, %p9397_p12 }
  0x39   : > { %p9393_p9 = pneg %p9392_p7 }
  0x3b   : > { %p9400_p1 = pnand %p9399_p2, %p9393_p9 }
  0x3d   : > { %9403 = shalt.err (!%p9400_p1)
}
  0x3e   : > { %s9542_s14 = smov 576   ;;  %s9543_s15 = smov 36  }
  0x3f   : > { %8441 = dma.hbm_to_vmem [thread:$0]  (!%p9636_p11), %s12427_s2, 27648, %s9640_s6, [#allocation8], %s9542_s14, %s9542_s14, %s9543_s15  }
  0x40   : > { %s9544_s23 = smov [#allocation10]   ;;  %s9404_s8 = scalar_lea.hbm %s12428_s3, 9216 }
  0x41   : > { %s202_s27 = sshll.u32 %s9544_s23, 4  ;;  %p9405_p6 = scmp.ne.s32.totalorder %s12428_s3, %s9404_s8  ;;  %s203_s27 = int_to_ptr.vmem [resolvable:$true] %s202_s27 }
  0x42   : > { %p9411_p5 = scmp.lt.u32.totalorder %s9404_s8, %s12428_s3 }
  0x43   : > { %p9407_p10 = pnand %p9405_p6, %p9650_p13 }
  0x45   : > { %p9408_p3 = pneg %p9407_p10 }
  0x47   : > { %p9413_p7 = pnand %p9411_p5, %p9408_p3 }
  0x49   : > { %9416 = shalt.err (!%p9413_p7)
}
  0x4a   : > { %s9417_s6 = scalar_lea.vmem %s203_s27, 9216  ;;  %p9425_p2 = scmp.lt.s32.totalorder %s203_s27, %s203_s27 }
  0x4b   : > { %p9418_p9 = scmp.ne.s32.totalorder %s203_s27, %s9417_s6  ;;  %p9426_p1 = scmp.lt.s32.totalorder %s9417_s6, %s9417_s6 }
  0x4d   : > { %p9420_p12 = pnand %p9418_p9, %p9650_p13  ;;  %p9427_p4 = por %p9426_p1, %p9425_p2 }
  0x4f   : > { %p9421_p0 = pneg %p9420_p12 }
  0x51   : > { %p9428_p8 = pnand %p9427_p4, %p9421_p0 }
  0x53   : > { %9431 = shalt.err (!%p9428_p8)
}
  0x54   : > { %s9545_s28 = smov 192   ;;  %s9546_s12 = smov 12  }
  0x55   : > { %8444 = dma.hbm_to_vmem [thread:$0]  (!%p9636_p11), %s12428_s3, 9216, %s203_s27, [#allocation11], %s9545_s28, %s9545_s28, %s9546_s12  }
  0x56   : > { %s9713_s16 = sadd.s32 1, %s9536_s21   ;;  %s30_s23 = sadd.s32 1, %s9532_s20 }
  0x57   : > { %s27_s17 = ssub.s32 %s9536_s21, %s9713_s16  ;;  %p37_p8 = scmp.ne.s32.totalorder %s9532_s20, %s9528_s19 }
  0x58   : > { %p28_p4 = scmp.eq.s32.totalorder %s27_s17, 0  ;;  %p38_p13 = scmp.eq.s32.totalorder %s9536_s21, 0 }
  0x59   : > { %p8456_p6 = scmp.lt.s32.totalorder %s9536_s21, 2  ;;  %p12534_p3 = scmp.eq.s32.totalorder %s9606_s22, 1 }
  0x5a   : > { %s9723_s30 = scalar_select %p28_p4, %s9532_s20, %s30_s23  }
  0x5b   : > { %p39_p10 = por %p38_p13, %p37_p8  ;;  %p9727_p5 = por %p12534_p3, %p37_p8 }
  0x5c   : > { %s219_s29 = sand.u32 1, %s9532_s20   ;;  %s8416_s8 = smul.u32 6144, %s9536_s21 }
  0x5d   : > { %s8415_s27 = smul.u32 384, %s219_s29  ;;  %p9738_p11 = pnand %p8456_p6, %p39_p10 }
  0x5e   : > { %s9736_s11 = scalar_lea.hbm %s12425_s0, %s8416_s8  ;;  %s9744_s12 = scalar_lea.sflag [#allocation5], %s219_s29 }
  0x5f   : > { %s223_s6 = scalar_lea.vmem [#allocation4], %s8415_s27  ;;  %s9432_s14 = scalar_lea.hbm %s9736_s11, 6144 }
  0x60   : > { %s230_s28 = sshll.u32 %s223_s6, 4  ;;  %p9433_p7 = scmp.ne.s32.totalorder %s9736_s11, %s9432_s14  ;;  %s9742_s28 = int_to_ptr.vmem [resolvable:$true] %s230_s28 }
  0x61   : > { %p9434_p9 = pneg %p9738_p11  ;;  %s9437_s23 = scalar_lea.hbm %s12425_s0, 12288 }
  0x62   : > { %p9438_p2 = scmp.lt.u32.totalorder %s9736_s11, %s12425_s0  ;;  %p9439_p1 = scmp.lt.u32.totalorder %s9437_s23, %s9432_s14 }
  0x63   : > { %p9435_p12 = pnand %p9434_p9, %p9433_p7  ;;  %p9441_p8 = scmp.lt.u32.totalorder %s9432_s14, %s9736_s11 }
  0x64   : > { %p9440_p4 = por %p9439_p1, %p9438_p2 }
  0x65   : > { %p9436_p0 = pneg %p9435_p12 }
  0x66   : > { %p9442_p13 = por %p9441_p8, %p9440_p4 }
  0x68   : > { %p9443_p6 = pnand %p9442_p13, %p9436_p0 }
  0x6a   : > { %9446 = shalt.err (!%p9443_p6)
}
  0x6b   : > { %s9447_s29 = scalar_lea.vmem %s9742_s28, 6144  ;;  %s9547_s27 = smov [#allocation4]  }
  0x6c   : > { %p9448_p10 = scmp.ne.s32.totalorder %s9742_s28, %s9447_s29  ;;  %s9452_s10 = sshll.u32 %s9547_s27, 4  ;;  %s9453_s10 = int_to_ptr.vmem [resolvable:$false] %s9452_s10 }
  0x6d   : > { %s9454_s6 = scalar_lea.vmem %s9453_s10, 12288  ;;  %p9455_p12 = scmp.lt.s32.totalorder %s9742_s28, %s9453_s10 }
  0x6e   : > { %p9450_p3 = pnand %p9448_p10, %p9434_p9  ;;  %p9456_p2 = scmp.lt.s32.totalorder %s9454_s6, %s9447_s29 }
  0x70   : > { %p9451_p7 = pneg %p9450_p3  ;;  %p9457_p1 = por %p9456_p2, %p9455_p12 }
  0x72   : > { %p9458_p4 = pnand %p9457_p1, %p9451_p7 }
  0x74   : > { %9461 = shalt.err (!%p9458_p4)
}
  0x75   : > { %s9548_s14 = smov 384   ;;  %s9549_s15 = smov 24  }
  0x76   : > { %8448 = dma.hbm_to_vmem [thread:$0]  (!%p9738_p11), %s9736_s11, 6144, %s9742_s28, %s9744_s12, %s9548_s14, %s9548_s14, %s9549_s15  }
  0x77   : > { %p12537_p9 = scmp.ne.s32.totalorder %s12531_s26, 0 }
  0x79   : > { %242 = sbr.rel (%p12537_p9) target bundleno = 4048 (0xfd0), region = 40 }
  0x80   : > { %s9775_s17 = sand.u32 1, %s9528_s19   ;;  %p12538_p0 = scmp.ne.s32.totalorder %s12529_s24, 0 }
  0x81   : > { %s8417_s23 = smul.u32 384, %s9775_s17  ;;  %s245_s8 = scalar_lea.sflag [#allocation5], %s9775_s17 }
  0x83   : > { %s9781_s9 = scalar_lea.vmem [#allocation4], %s8417_s23 }
  0x84   : > { %9507 = dma.done.wait (%p12538_p0), %s245_s8, 6144  }
  0x85   : > { %9509 = vsyncadd (%p12538_p0), %s245_s8, 4294961152  ;;  %p12539_p11 = scmp.eq.s32.totalorder %s9606_s22, 0 }
  0x87   : > { %9511 = dma.done.wait (%p12539_p11), [#allocation8], 29696   ;;  %p12540_p8 = pmov %p12539_p11 }
  0x89   : > { %9513 = vsyncadd (%p12540_p8), [#allocation8], 4294937600  ;;  %p12541_p13 = pmov %p12540_p8 }
  0x8a   : > { %p12542_p6 = pmov %p12540_p8 }
  0x8b   : > { %9515 = dma.done.wait (%p12541_p13), [#allocation11], 9216  }
  0x8c   : > { %9517 = vsyncadd (%p12542_p6), [#allocation11], 4294958080  ;;  %v12434_v0 = vmov 0   ;;  %v8508_v1 = vld [vmem:[#allocation9 + $0x4] ss:$36 sps:$4 sm:$0xff]   ;;  %v290_v34 = vld [vmem:[%s9781_s9 + $0x10] sm:$0xff] }
  0x8d   : > { %1849 = vmatprep.mubr.bf16.mxu1 %v12434_v0  ;;  %v8510_v2 = vld [vmem:[#allocation9 + $0x484] ss:$36 sps:$4 sm:$0xff]   ;;  %1704 = vmatprep.subr.bf16.mxu0 %v8508_v1  ;;  %v8514_v5 = vld [vmem:[#allocation9 + $0x4c] ss:$36 sps:$4 sm:$0xff]   ;;  %v8520_v9 = vld [vmem:[#allocation9 + $0x94] ss:$36 sps:$4 sm:$0xff]  }
  0x8e   : > { %v8512_v3 = vld [vmem:[#allocation9] ss:$36 sps:$4 sm:$0xff]   ;;  %1817 = vmatprep.subr.bf16.mxu1 %v8510_v2  ;;  %v8516_v6 = vld [vmem:[#allocation9 + $0x4cc] ss:$36 sps:$4 sm:$0xff]   ;;  %v8522_v10 = vld [vmem:[#allocation9 + $0x514] ss:$36 sps:$4 sm:$0xff]  }
  0x8f   : > { %v8513_v4 = vld [vmem:[#allocation9 + $0x480] ss:$36 sps:$4 sm:$0xff]   ;;  %1705 = vmatpush1.bf16.msra.mxu0 %v8512_v3  ;;  %v8518_v7 = vld [vmem:[#allocation9 + $0x48] ss:$36 sps:$4 sm:$0xff]   ;;  %v8524_v11 = vld [vmem:[#allocation9 + $0x90] ss:$36 sps:$4 sm:$0xff]  }
  0x90   : > { %1818 = vmatpush1.bf16.msra.mxu1 %v8513_v4  ;;  %1706 = vmatprep.subr.bf16.mxu0 %v8514_v5  ;;  %v8519_v8 = vld [vmem:[#allocation9 + $0x4c8] ss:$36 sps:$4 sm:$0xff]   ;;  %v8525_v12 = vld [vmem:[#allocation9 + $0x510] ss:$36 sps:$4 sm:$0xff]   ;;  %v8526_v13 = vld [vmem:[#allocation9 + $0xdc] ss:$36 sps:$4 sm:$0xff]  }
  0x91   : > { %1819 = vmatprep.subr.bf16.mxu1 %v8516_v6  ;;  %v8528_v14 = vld [vmem:[#allocation9 + $0x55c] ss:$36 sps:$4 sm:$0xff]   ;;  %v8532_v17 = vld [vmem:[#allocation9 + $0x124] ss:$36 sps:$4 sm:$0xff]   ;;  %v8538_v21 = vld [vmem:[#allocation9 + $0x16c] ss:$36 sps:$4 sm:$0xff]  }
  0x92   : > { %v8530_v15 = vld [vmem:[#allocation9 + $0xd8] ss:$36 sps:$4 sm:$0xff]   ;;  %v8534_v18 = vld [vmem:[#allocation9 + $0x5a4] ss:$36 sps:$4 sm:$0xff]   ;;  %v8540_v22 = vld [vmem:[#allocation9 + $0x5ec] ss:$36 sps:$4 sm:$0xff]  }
  0x93   : > { %1707 = vmatpush1.bf16.msra.mxu0 %v8518_v7  ;;  %v8531_v16 = vld [vmem:[#allocation9 + $0x558] ss:$36 sps:$4 sm:$0xff]   ;;  %v8536_v19 = vld [vmem:[#allocation9 + $0x120] ss:$36 sps:$4 sm:$0xff]   ;;  %v8542_v23 = vld [vmem:[#allocation9 + $0x168] ss:$36 sps:$4 sm:$0xff]  }
  0x94   : > { %1820 = vmatpush1.bf16.msra.mxu1 %v8519_v8  ;;  %1708 = vmatprep.subr.bf16.mxu0 %v8520_v9  ;;  %v8537_v20 = vld [vmem:[#allocation9 + $0x5a0] ss:$36 sps:$4 sm:$0xff]   ;;  %v8543_v24 = vld [vmem:[#allocation9 + $0x5e8] ss:$36 sps:$4 sm:$0xff]   ;;  %v8544_v25 = vld [vmem:[#allocation9 + $0x1b4] ss:$36 sps:$4 sm:$0xff]  }
  0x95   : > { %1821 = vmatprep.subr.bf16.mxu1 %v8522_v10  ;;  %v8546_v26 = vld [vmem:[#allocation9 + $0x634] ss:$36 sps:$4 sm:$0xff]   ;;  %v8550_v29 = vld [vmem:[#allocation9 + $0x1fc] ss:$36 sps:$4 sm:$0xff]   ;;  %v8556_v33 = vld [vmem:[#allocation9 + $0x244] ss:$36 sps:$4 sm:$0xff]  }
  0x96   : > { %v8548_v27 = vld [vmem:[#allocation9 + $0x1b0] ss:$36 sps:$4 sm:$0xff]   ;;  %v8552_v30 = vld [vmem:[#allocation9 + $0x67c] ss:$36 sps:$4 sm:$0xff]   ;;  %v293_v35 = vld [vmem:[%s9781_s9 + $0x28] sm:$0xff]  ;;  %vm2986_vm0 = vcmask 523264  }
  0x97   : > { %1709 = vmatpush1.bf16.msra.mxu0 %v8524_v11  ;;  %v8549_v28 = vld [vmem:[#allocation9 + $0x630] ss:$36 sps:$4 sm:$0xff]   ;;  %v8554_v31 = vld [vmem:[#allocation9 + $0x1f8] ss:$36 sps:$4 sm:$0xff]   ;;  %v9798_v37 = vpack.c.bf16 %v293_v35, %v290_v34  ;;  %v8558_v38 = vld [vmem:[#allocation9 + $0x8] ss:$36 sps:$4 sm:$0xff]  }
  0x98   : > { %1822 = vmatpush1.bf16.msra.mxu1 %v8525_v12  ;;  %1710 = vmatprep.subr.bf16.mxu0 %v8526_v13  ;;  %v8555_v32 = vld [vmem:[#allocation9 + $0x678] ss:$36 sps:$4 sm:$0xff]   ;;  %v8560_v36 = vld [vmem:[#allocation9 + $0xc] ss:$36 sps:$4 sm:$0xff]   ;;  %v8561_v39 = vld [vmem:[#allocation9 + $0x240] ss:$36 sps:$4 sm:$0xff]  }
  0x99   : > { %1823 = vmatprep.subr.bf16.mxu1 %v8528_v14  ;;  %v8562_v40 = vld [vmem:[#allocation9 + $0x28c] ss:$36 sps:$4 sm:$0xff]   ;;  %v8566_v41 = vld [vmem:[#allocation9 + $0x54] ss:$36 sps:$4 sm:$0xff]   ;;  %v296_v45 = vld [vmem:[%s9781_s9 + $0x40] sm:$0xff]  ;;  %s9551_s24 = smov 64  }
  0x9a   : > { %v8564_v42 = vld [vmem:[#allocation9 + $0x50] ss:$36 sps:$4 sm:$0xff]   ;;  %v8567_v43 = vld [vmem:[#allocation9 + $0x288] ss:$36 sps:$4 sm:$0xff]   ;;  %v299_v46 = vld [vmem:[%s9781_s9 + $0x58] sm:$0xff]  ;;  %vm3935_vm1 = vcmask 1048064  }
  0x9b   : > { %1711 = vmatpush1.bf16.msra.mxu0 %v8530_v15  ;;  %v8568_v44 = vld [vmem:[#allocation9 + $0x2d4] ss:$36 sps:$4 sm:$0xff]   ;;  %v8572_v47 = vld [vmem:[#allocation9 + $0x9c] ss:$36 sps:$4 sm:$0xff]   ;;  %v9804_v48 = vpack.c.bf16 %v299_v46, %v296_v45  ;;  %v8578_v52 = vld [vmem:[#allocation9 + $0xe4] ss:$36 sps:$4 sm:$0xff]  }
  0x9c   : > { %1824 = vmatpush1.bf16.msra.mxu1 %v8531_v16  ;;  %1712 = vmatprep.subr.bf16.mxu0 %v8532_v17  ;;  %v8570_v49 = vld [vmem:[#allocation9 + $0x98] ss:$36 sps:$4 sm:$0xff]   ;;  %v8573_v50 = vld [vmem:[#allocation9 + $0x2d0] ss:$36 sps:$4 sm:$0xff]   ;;  %v8576_v53 = vld [vmem:[#allocation9 + $0xe0] ss:$36 sps:$4 sm:$0xff]  }
  0x9d   : > { %1825 = vmatprep.subr.bf16.mxu1 %v8534_v18  ;;  %v8574_v51 = vld [vmem:[#allocation9 + $0x31c] ss:$36 sps:$4 sm:$0xff]   ;;  %v8580_v55 = vld [vmem:[#allocation9 + $0x364] ss:$36 sps:$4 sm:$0xff]   ;;  %v302_v56 = vld [vmem:[%s9781_s9 + $0x70] sm:$0xff]  ;;  %s12256_s13 = scalar_lea.vmem [#allocation12], %s8417_s23 }
  0x9e   : > { %v8579_v54 = vld [vmem:[#allocation9 + $0x318] ss:$36 sps:$4 sm:$0xff]   ;;  %v305_v57 = vld [vmem:[%s9781_s9 + $0x88] sm:$0xff]  ;;  %v292_v60 = vld [vmem:[%s9781_s9 + $0x20] sm:$0xff]  ;;  %s8418_s28 = smul.u32 6144, %s9606_s22  ;;  %s6907_s12 = sshll.u32 %s12256_s13, 4  ;;  %s12378_s12 = int_to_ptr.vmem [resolvable:$true] %s6907_s12 }
  0x9f   : > { %1713 = vmatpush1.bf16.msra.mxu0 %v8536_v19  ;;  %v8584_v58 = vld [vmem:[#allocation9 + $0x12c] ss:$36 sps:$4 sm:$0xff]   ;;  %v9814_v62 = vpack.c.bf16 %v305_v57, %v302_v56  ;;  %v8585_v1 = vld [vmem:[#allocation9 + $0x360] ss:$36 sps:$4 sm:$0xff]   ;;  %v8590_v3 = vld [vmem:[#allocation9 + $0x174] ss:$36 sps:$4 sm:$0xff]  }
  0xa0   : > { %1826 = vmatpush1.bf16.msra.mxu1 %v8537_v20  ;;  %1714 = vmatprep.subr.bf16.mxu0 %v8538_v21  ;;  %v289_v59 = vld [vmem:[%s9781_s9 + $0x8] sm:$0xff]  ;;  %v8588_v4 = vld [vmem:[#allocation9 + $0x170] ss:$36 sps:$4 sm:$0xff]   ;;  %v308_v6 = vld [vmem:[%s9781_s9 + $0xa0] sm:$0xff]  ;;  %s12376_s10 = scalar_lea.hbm %s12430_s5, %s8418_s28  ;;  %s6894_s22 = scalar_lea.sflag [#allocation6], %s9775_s17 }
  0xa1   : > { %1827 = vmatprep.subr.bf16.mxu1 %v8540_v22  ;;  %v9812_v61 = vpack.c.bf16 %v292_v60, %v289_v59  ;;  %v8582_v63 = vld [vmem:[#allocation9 + $0x128] ss:$36 sps:$4 sm:$0xff]   ;;  %v311_v7 = vld [vmem:[%s9781_s9 + $0xb8] sm:$0xff]  ;;  %v8597_v12 = vld [vmem:[#allocation9 + $0x3f0] ss:$36 sps:$4 sm:$0xff]   ;;  %s9462_s6 = scalar_lea.vmem %s12378_s12, 6144 }
  0xa2   : > { %v8586_v2 = vld [vmem:[#allocation9 + $0x3ac] ss:$36 sps:$4 sm:$0xff]   ;;  %v8592_v8 = vld [vmem:[#allocation9 + $0x3f4] ss:$36 sps:$4 sm:$0xff]   ;;  %v8596_v9 = vld [vmem:[#allocation9 + $0x1bc] ss:$36 sps:$4 sm:$0xff]   ;;  %v9821_v10 = vpack.c.bf16 %v311_v7, %v308_v6  ;;  %p9463_p10 = scmp.ne.s32.totalorder %s12378_s12, %s9462_s6 }
  0xa3   : > { %1715 = vmatpush1.bf16.msra.mxu0 %v8542_v23  ;;  %1736 = vmatprep.mubr.bf16.mxu0 %v9812_v61  ;;  %v8591_v5 = vld [vmem:[#allocation9 + $0x3a8] ss:$36 sps:$4 sm:$0xff]   ;;  %v8594_v11 = vld [vmem:[#allocation9 + $0x1b8] ss:$36 sps:$4 sm:$0xff]   ;;  %v8600_v15 = vld [vmem:[#allocation9 + $0x200] ss:$36 sps:$4 sm:$0xff]  }
  0xa4   : > { %1828 = vmatpush1.bf16.msra.mxu1 %v8543_v24  ;;  %1716 = vmatprep.subr.bf16.mxu0 %v8544_v25  ;;  %v8598_v13 = vld [vmem:[#allocation9 + $0x43c] ss:$36 sps:$4 sm:$0xff]   ;;  %v8602_v14 = vld [vmem:[#allocation9 + $0x204] ss:$36 sps:$4 sm:$0xff]   ;;  %v314_v19 = vld [vmem:[%s9781_s9 + $0xd0] sm:$0xff]  ;;  %p9464_p3 = pnand %p9463_p10, %p9727_p5  ;;  %s9552_s14 = smov [#allocation12]  }
  0xa5   : > { %1829 = vmatprep.subr.bf16.mxu1 %v8546_v26  ;;  %v8603_v16 = vld [vmem:[#allocation9 + $0x438] ss:$36 sps:$4 sm:$0xff]   ;;  %v288_v17 = vld [vmem:[%s9781_s9] sm:$0xff]  ;;  %v317_v20 = vld [vmem:[%s9781_s9 + $0xe8] sm:$0xff]  ;;  %s9466_s15 = sshll.u32 %s9552_s14, 4  ;;  %s9467_s15 = int_to_ptr.vmem [resolvable:$false] %s9466_s15 }
  0xa6   : > { %v291_v18 = vld [vmem:[%s9781_s9 + $0x18] sm:$0xff]  ;;  %v8606_v21 = vld [vmem:[#allocation9 + $0x24c] ss:$36 sps:$4 sm:$0xff]   ;;  %v9832_v25 = vpack.c.bf16 %v317_v20, %v314_v19  ;;  %v304_v46 = vld [vmem:[%s9781_s9 + $0x80] sm:$0xff]  ;;  %p9465_p7 = pneg %p9464_p3  ;;  %s9468_s23 = scalar_lea.vmem %s9467_s15, 12288 }
  0xa7   : > { %1717 = vmatpush1.bf16.msra.mxu0 %v8548_v27  ;;  %v8609_v22 = vld [vmem:[#allocation9 + $0x14] ss:$36 sps:$4 sm:$0xff]   ;;  %v9830_v24 = vpack.c.bf16 %v291_v18, %v288_v17  ;;  %v8604_v27 = vld [vmem:[#allocation9 + $0x248] ss:$36 sps:$4 sm:$0xff]   ;;  %v8643_v17 = vld [vmem:[#allocation9 + $0x1c0] ss:$36 sps:$4 sm:$0xff]   ;;  %p9469_p12 = scmp.lt.s32.totalorder %s12378_s12, %s9467_s15  ;;  %p9470_p2 = scmp.lt.s32.totalorder %s9468_s23, %s9462_s6 }
  0xa8   : > { %1830 = vmatpush1.bf16.msra.mxu1 %v8549_v28  ;;  %1718 = vmatprep.subr.bf16.mxu0 %v8550_v29  ;;  %v295_v23 = vld [vmem:[%s9781_s9 + $0x38] sm:$0xff]  ;;  %v298_v26 = vld [vmem:[%s9781_s9 + $0x50] sm:$0xff]  ;;  %v297_v35 = vld [vmem:[%s9781_s9 + $0x48] sm:$0xff] }
  0xa9   : > { %1831 = vmatprep.subr.bf16.mxu1 %v8552_v30  ;;  %v8607_v28 = vld [vmem:[#allocation9 + $0x10] ss:$36 sps:$4 sm:$0xff]   ;;  %v8615_v30 = vld [vmem:[#allocation9 + $0x5c] ss:$36 sps:$4 sm:$0xff]   ;;  %v301_v45 = vld [vmem:[%s9781_s9 + $0x68] sm:$0xff]  ;;  %p9471_p1 = por %p9470_p2, %p9469_p12 }
  0xaa   : > { %v8612_v29 = vld [vmem:[#allocation9 + $0x294] ss:$36 sps:$4 sm:$0xff]   ;;  %v329_v56 = vld [vmem:[%s9781_s9 + $0x148] sm:$0xff] }
  0xab   : > { %1719 = vmatpush1.bf16.msra.mxu0 %v8554_v31  ;;  %v8610_v31 = vld [vmem:[#allocation9 + $0x290] ss:$36 sps:$4 sm:$0xff]   ;;  %v8637_v7 = vld [vmem:[#allocation9 + $0x178] ss:$36 sps:$4 sm:$0xff]   ;;  %v313_v20 = vld [vmem:[%s9781_s9 + $0xc8] sm:$0xff]  ;;  %p9472_p4 = pnand %p9471_p1, %p9465_p7 }
  0xac   : > { %1832 = vmatpush1.bf16.msra.mxu1 %v8555_v32  ;;  %1720 = vmatprep.subr.bf16.mxu0 %v8556_v33  ;;  %v9835_v32 = vpack.c.bf16 %v298_v26, %v295_v23  ;;  %v8613_v33 = vld [vmem:[#allocation9 + $0x58] ss:$36 sps:$4 sm:$0xff]   ;;  %v294_v34 = vld [vmem:[%s9781_s9 + $0x30] sm:$0xff]  ;;  %v8646_v26 = vld [vmem:[#allocation9 + $0x440] ss:$36 sps:$4 sm:$0xff]  }
  0xad   : > { %1930 = vmatprep.subr.bf16.mxu1 %v8560_v36  ;;  %v320_v36 = vld [vmem:[%s9781_s9 + $0x100] sm:$0xff]  ;;  %v8630_v57 = vld [vmem:[#allocation9 + $0x36c] ss:$36 sps:$4 sm:$0xff]  }
  0xae   : > { %v8634_v6 = vld [vmem:[#allocation9 + $0x3b0] ss:$36 sps:$4 sm:$0xff]  }
  0xaf   : > { %1850 = vmatmul.mubr.bf16.vlgmr.msra.gmra.mrb[0].mxu1 %v9798_v37  ;;  %1721 = vmatpush1.bf16.msra.mxu0 %v8561_v39  ;;  %v8618_v39 = vld [vmem:[#allocation9 + $0x2dc] ss:$36 sps:$4 sm:$0xff]   ;;  %v8651_v23 = vld [vmem:[#allocation9 + $0x20c] ss:$36 sps:$4 sm:$0xff]  }
  0xb0   : > { %1931 = vmatpush1.bf16.msra.mxu1 %v8558_v38  ;;  %1722 = vmatprep.subr.bf16.mxu0 %v8562_v40  ;;  %v323_v38 = vld [vmem:[%s9781_s9 + $0x118] sm:$0xff]  ;;  %v8621_v40 = vld [vmem:[#allocation9 + $0xa4] ss:$36 sps:$4 sm:$0xff]  }
  0xb1   : > { %1932 = vmatprep.subr.bf16.mxu1 %v8566_v41  ;;  %1859 = vmatprep.mubr.bf16.mxu1 %v12434_v0  ;;  %v8616_v41 = vld [vmem:[#allocation9 + $0x2d8] ss:$36 sps:$4 sm:$0xff]  }
  0xb3   : > { %1723 = vmatpush1.bf16.msra.mxu0 %v8567_v43  ;;  %v9845_v43 = vpack.c.bf16 %v297_v35, %v294_v34  ;;  %v319_v34 = vld [vmem:[%s9781_s9 + $0xf8] sm:$0xff]  ;;  %v322_v35 = vld [vmem:[%s9781_s9 + $0x110] sm:$0xff] }
  0xb4   : > { %1933 = vmatpush1.bf16.msra.mxu1 %v8564_v42  ;;  %1724 = vmatprep.subr.bf16.mxu0 %v8568_v44  ;;  %v8619_v42 = vld [vmem:[#allocation9 + $0xa0] ss:$36 sps:$4 sm:$0xff]   ;;  %v9847_v44 = vpack.c.bf16 %v323_v38, %v320_v36  ;;  %v8652_v38 = vld [vmem:[#allocation9 + $0x488] ss:$36 sps:$4 sm:$0xff]  }
  0xb5   : > { %1934 = vmatprep.subr.bf16.mxu1 %v8572_v47  ;;  %v8624_v47 = vld [vmem:[#allocation9 + $0x324] ss:$36 sps:$4 sm:$0xff]  }
  0xb7   : > { %1860 = vmatmul.mubr.bf16.gmra.mrb[4].mxu1 %v9804_v48  ;;  %1725 = vmatpush1.bf16.msra.mxu0 %v8573_v50  ;;  %v8622_v50 = vld [vmem:[#allocation9 + $0x320] ss:$36 sps:$4 sm:$0xff]  }
  0xb8   : > { %1935 = vmatpush1.bf16.msra.mxu1 %v8570_v49  ;;  %1726 = vmatprep.subr.bf16.mxu0 %v8574_v51  ;;  %v8627_v49 = vld [vmem:[#allocation9 + $0xec] ss:$36 sps:$4 sm:$0xff]  }
  0xb9   : > { %1936 = vmatprep.subr.bf16.mxu1 %v8578_v52  ;;  %1869 = vmatprep.mubr.bf16.mxu1 %v12434_v0  ;;  %v8625_v51 = vld [vmem:[#allocation9 + $0xe8] ss:$36 sps:$4 sm:$0xff]   ;;  %v9851_v52 = vpack.c.bf16 %v304_v46, %v301_v45  ;;  %v318_v45 = vld [vmem:[%s9781_s9 + $0xf0] sm:$0xff] }
  0xba   : > { %v321_v46 = vld [vmem:[%s9781_s9 + $0x108] sm:$0xff] }
  0xbb   : > { %1727 = vmatpush1.bf16.msra.mxu0 %v8579_v54  ;;  %v303_v54 = vld [vmem:[%s9781_s9 + $0x78] sm:$0xff] }
  0xbc   : > { %1937 = vmatpush1.bf16.msra.mxu1 %v8576_v53  ;;  %1728 = vmatprep.subr.bf16.mxu0 %v8580_v55  ;;  %v300_v53 = vld [vmem:[%s9781_s9 + $0x60] sm:$0xff]  ;;  %v326_v55 = vld [vmem:[%s9781_s9 + $0x130] sm:$0xff] }
  0xbd   : > { %1938 = vmatprep.subr.bf16.mxu1 %v8584_v58  ;;  %v8633_v58 = vld [vmem:[#allocation9 + $0x134] ss:$36 sps:$4 sm:$0xff]   ;;  %v9861_v59 = vpack.c.bf16 %v303_v54, %v300_v53  ;;  %v9863_v60 = vpack.c.bf16 %v329_v56, %v326_v55  ;;  %v328_v53 = vld [vmem:[%s9781_s9 + $0x140] sm:$0xff]  ;;  %v9905_v55 = vpack.c.bf16 %v321_v46, %v318_v45 }
  0xbe   : > { %v8672_v54 = vld [vmem:[#allocation9 + $0x51c] ss:$36 sps:$4 sm:$0xff]  }
  0xbf   : > { %1870 = vmatmul.mubr.bf16.gmra.mrb[8].mxu1 %v9814_v62  ;;  %1729 = vmatpush1.bf16.msra.mxu0 %v8585_v1  ;;  %v310_v1 = vld [vmem:[%s9781_s9 + $0xb0] sm:$0xff]  ;;  %v8664_v56 = vld [vmem:[#allocation9 + $0x2e0] ss:$36 sps:$4 sm:$0xff]   ;;  %v8706_v46 = vld [vmem:[#allocation9 + $0x4d8] ss:$36 sps:$4 sm:$0xff]  }
  0xc0   : > { %1939 = vmatpush1.bf16.msra.mxu1 %v8582_v63  ;;  %1730 = vmatprep.subr.bf16.mxu0 %v8586_v2  ;;  %v307_v63 = vld [vmem:[%s9781_s9 + $0x98] sm:$0xff]  ;;  %v8628_v2 = vld [vmem:[#allocation9 + $0x368] ss:$36 sps:$4 sm:$0xff]  }
  0xc1   : > { %1940 = vmatprep.subr.bf16.mxu1 %v8590_v3  ;;  %1879 = vmatprep.mubr.bf16.mxu1 %v12434_v0  ;;  %v8631_v3 = vld [vmem:[#allocation9 + $0x130] ss:$36 sps:$4 sm:$0xff]   ;;  %v8705_v45 = vld [vmem:[#allocation9 + $0x1c] ss:$36 sps:$4 sm:$0xff]  }
  0xc3   : > { %1731 = vmatpush1.bf16.msra.mxu0 %v8591_v5  ;;  %v8639_v5 = vld [vmem:[#allocation9 + $0x17c] ss:$36 sps:$4 sm:$0xff]  }
  0xc4   : > { %1941 = vmatpush1.bf16.msra.mxu1 %v8588_v4  ;;  %1732 = vmatprep.subr.bf16.mxu0 %v8592_v8  ;;  %v8636_v4 = vld [vmem:[#allocation9 + $0x3b4] ss:$36 sps:$4 sm:$0xff]   ;;  %v9867_v8 = vpack.c.bf16 %v310_v1, %v307_v63  ;;  %v8667_v63 = vld [vmem:[#allocation9 + $0x328] ss:$36 sps:$4 sm:$0xff]   ;;  %v324_v1 = vld [vmem:[%s9781_s9 + $0x120] sm:$0xff] }
  0xc5   : > { %1942 = vmatprep.subr.bf16.mxu1 %v8596_v9  ;;  %v306_v9 = vld [vmem:[%s9781_s9 + $0x90] sm:$0xff] }
  0xc7   : > { %1880 = vmatmul.mubr.bf16.gmra.mrb[12].mxu1 %v9821_v10  ;;  %1733 = vmatpush1.bf16.msra.mxu0 %v8597_v12  ;;  %v332_v12 = vld [vmem:[%s9781_s9 + $0x160] sm:$0xff] }
  0xc8   : > { %1943 = vmatpush1.bf16.msra.mxu1 %v8594_v11  ;;  %1734 = vmatprep.subr.bf16.mxu0 %v8598_v13  ;;  %v309_v11 = vld [vmem:[%s9781_s9 + $0xa8] sm:$0xff]  ;;  %v335_v13 = vld [vmem:[%s9781_s9 + $0x178] sm:$0xff] }
  0xc9   : > { %1944 = vmatprep.subr.bf16.mxu1 %v8602_v14  ;;  %1889 = vmatprep.mubr.bf16.mxu1 %v12434_v0  ;;  %v8642_v14 = vld [vmem:[#allocation9 + $0x3fc] ss:$36 sps:$4 sm:$0xff]   ;;  %v9877_v18 = vpack.c.bf16 %v309_v11, %v306_v9  ;;  %v9879_v19 = vpack.c.bf16 %v335_v13, %v332_v12  ;;  %v8673_v12 = vld [vmem:[#allocation9 + $0x370] ss:$36 sps:$4 sm:$0xff]  }
  0xca   : > { %v8679_v9 = vld [vmem:[#allocation9 + $0x560] ss:$36 sps:$4 sm:$0xff]  }
  0xcb   : > { %1735 = vmatpush1.bf16.msra.mxu0 %v8603_v16  ;;  %v8640_v16 = vld [vmem:[#allocation9 + $0x3f8] ss:$36 sps:$4 sm:$0xff]  }
  0xcc   : > { %1945 = vmatpush1.bf16.msra.mxu1 %v8600_v15  ;;  %2156 = vmatprep.subr.bf16.mxu0 %v8609_v22  ;;  %v8645_v15 = vld [vmem:[#allocation9 + $0x1c4] ss:$36 sps:$4 sm:$0xff]  }
  0xcd   : > { %1946 = vmatprep.subr.bf16.mxu1 %v8606_v21  ;;  %v316_v21 = vld [vmem:[%s9781_s9 + $0xe0] sm:$0xff] }
  0xce   : > { %1737 = vmatmul.mubr.bf16.vlgmr.msra.gmra.mrb[0].mxu0 %v9830_v24  ;;  %v8648_v22 = vld [vmem:[#allocation9 + $0x444] ss:$36 sps:$4 sm:$0xff]  }
  0xcf   : > { %1890 = vmatmul.mubr.bf16.gmra.mrb[16].mxu1 %v9832_v25  ;;  %2157 = vmatpush1.bf16.msra.mxu0 %v8607_v28  ;;  %v8649_v28 = vld [vmem:[#allocation9 + $0x208] ss:$36 sps:$4 sm:$0xff]  }
  0xd0   : > { %1947 = vmatpush1.bf16.msra.mxu1 %v8604_v27  ;;  %2158 = vmatprep.subr.bf16.mxu0 %v8615_v30  ;;  %v9883_v27 = vpack.c.bf16 %v316_v21, %v313_v20  ;;  %v315_v30 = vld [vmem:[%s9781_s9 + $0xd8] sm:$0xff]  ;;  %v333_v20 = vld [vmem:[%s9781_s9 + $0x168] sm:$0xff] }
  0xd1   : > { %1948 = vmatprep.subr.bf16.mxu1 %v8612_v29  ;;  %1746 = vmatprep.mubr.bf16.mxu0 %v9835_v32  ;;  %v312_v29 = vld [vmem:[%s9781_s9 + $0xc0] sm:$0xff]  ;;  %v8688_v21 = vld [vmem:[#allocation9 + $0x5a8] ss:$36 sps:$4 sm:$0xff]  }
  0xd2   : > { %1899 = vmatprep.mubr.bf16.mxu1 %v12434_v0  ;;  %v9893_v36 = vpack.c.bf16 %v315_v30, %v312_v29  ;;  %v8687_v29 = vld [vmem:[#allocation9 + $0x44c] ss:$36 sps:$4 sm:$0xff]  }
  0xd3   : > { %2159 = vmatpush1.bf16.msra.mxu0 %v8613_v33  ;;  %v8657_v33 = vld [vmem:[#allocation9 + $0x254] ss:$36 sps:$4 sm:$0xff]  }
  0xd4   : > { %1949 = vmatpush1.bf16.msra.mxu1 %v8610_v31  ;;  %2160 = vmatprep.subr.bf16.mxu0 %v8621_v40  ;;  %v8654_v31 = vld [vmem:[#allocation9 + $0x48c] ss:$36 sps:$4 sm:$0xff]   ;;  %v8660_v40 = vld [vmem:[#allocation9 + $0x29c] ss:$36 sps:$4 sm:$0xff]  }
  0xd5   : > { %1950 = vmatprep.subr.bf16.mxu1 %v8618_v39  ;;  %v8655_v39 = vld [vmem:[#allocation9 + $0x250] ss:$36 sps:$4 sm:$0xff]  }
  0xd6   : > { %1747 = vmatmul.mubr.bf16.gmra.mrb[4].mxu0 %v9845_v43  ;;  %v8691_v30 = vld [vmem:[#allocation9 + $0x5f0] ss:$36 sps:$4 sm:$0xff]  }
  0xd7   : > { %1900 = vmatmul.mubr.bf16.gmra.mrb[20].mxu1 %v9847_v44  ;;  %2161 = vmatpush1.bf16.msra.mxu0 %v8619_v42  ;;  %v8658_v42 = vld [vmem:[#allocation9 + $0x298] ss:$36 sps:$4 sm:$0xff]  }
  0xd8   : > { %1951 = vmatpush1.bf16.msra.mxu1 %v8616_v41  ;;  %2162 = vmatprep.subr.bf16.mxu0 %v8627_v49  ;;  %v9895_v41 = vpack.c.bf16 %v322_v35, %v319_v34  ;;  %v8663_v49 = vld [vmem:[#allocation9 + $0x4d4] ss:$36 sps:$4 sm:$0xff]  }
  0xd9   : > { %1952 = vmatprep.subr.bf16.mxu1 %v8624_v47  ;;  %1756 = vmatprep.mubr.bf16.mxu0 %v9851_v52  ;;  %v8661_v47 = vld [vmem:[#allocation9 + $0x4d0] ss:$36 sps:$4 sm:$0xff]   ;;  %v8694_v35 = vld [vmem:[#allocation9 + $0x638] ss:$36 sps:$4 sm:$0xff]  }
  0xda   : > { %1909 = vmatprep.mubr.bf16.mxu1 %v12434_v0  ;;  %v8702_v34 = vld [vmem:[#allocation9 + $0x494] ss:$36 sps:$4 sm:$0xff]  }
  0xdb   : > { %2163 = vmatpush1.bf16.msra.mxu0 %v8625_v51  ;;  %v325_v51 = vld [vmem:[%s9781_s9 + $0x128] sm:$0xff] }
  0xdc   : > { %1953 = vmatpush1.bf16.msra.mxu1 %v8622_v50  ;;  %2164 = vmatprep.subr.bf16.mxu0 %v8633_v58  ;;  %v8666_v50 = vld [vmem:[#allocation9 + $0x2e4] ss:$36 sps:$4 sm:$0xff]   ;;  %v8669_v58 = vld [vmem:[#allocation9 + $0x32c] ss:$36 sps:$4 sm:$0xff]  }
  0xdd   : > { %1954 = vmatprep.subr.bf16.mxu1 %v8630_v57  ;;  %v9907_v57 = vpack.c.bf16 %v328_v53, %v325_v51  ;;  %v8718_v51 = vld [vmem:[#allocation9 + $0x568] ss:$36 sps:$4 sm:$0xff]   ;;  %v8726_v53 = vld [vmem:[#allocation9 + $0x5b4] ss:$36 sps:$4 sm:$0xff]  }
  0xde   : > { %1757 = vmatmul.mubr.bf16.gmra.mrb[8].mxu0 %v9861_v59 }
  0xdf   : > { %1910 = vmatmul.mubr.bf16.gmra.mrb[24].mxu1 %v9863_v60  ;;  %2165 = vmatpush1.bf16.msra.mxu0 %v8631_v3  ;;  %v8670_v3 = vld [vmem:[#allocation9 + $0x518] ss:$36 sps:$4 sm:$0xff]  }
  0xe0   : > { %1955 = vmatpush1.bf16.msra.mxu1 %v8628_v2  ;;  %2166 = vmatprep.subr.bf16.mxu0 %v8639_v5  ;;  %v327_v2 = vld [vmem:[%s9781_s9 + $0x138] sm:$0xff]  ;;  %v8681_v5 = vld [vmem:[#allocation9 + $0x564] ss:$36 sps:$4 sm:$0xff]  }
  0xe1   : > { %1956 = vmatprep.subr.bf16.mxu1 %v8636_v4  ;;  %1766 = vmatprep.mubr.bf16.mxu0 %v9867_v8  ;;  %v8675_v4 = vld [vmem:[#allocation9 + $0x374] ss:$36 sps:$4 sm:$0xff]   ;;  %v9917_v11 = vpack.c.bf16 %v327_v2, %v324_v1  ;;  %v8736_v1 = vld [vmem:[#allocation9 + $0x640] ss:$36 sps:$4 sm:$0xff]   ;;  %v8744_v2 = vld [vmem:[#allocation9 + $0x68c] ss:$36 sps:$4 sm:$0xff]  }
  0xe2   : > { %1919 = vmatprep.mubr.bf16.mxu1 %v12434_v0 }
  0xe3   : > { %2167 = vmatpush1.bf16.msra.mxu0 %v8637_v7  ;;  %v334_v7 = vld [vmem:[%s9781_s9 + $0x170] sm:$0xff] }
  0xe4   : > { %1957 = vmatpush1.bf16.msra.mxu1 %v8634_v6  ;;  %2168 = vmatprep.subr.bf16.mxu0 %v8645_v15  ;;  %v331_v6 = vld [vmem:[%s9781_s9 + $0x158] sm:$0xff] }
  0xe5   : > { %1958 = vmatprep.subr.bf16.mxu1 %v8642_v14  ;;  %v9919_v13 = vpack.c.bf16 %v334_v7, %v331_v6  ;;  %v8678_v14 = vld [vmem:[#allocation9 + $0x3bc] ss:$36 sps:$4 sm:$0xff]   ;;  %v8711_v6 = vld [vmem:[#allocation9 + $0x64] ss:$36 sps:$4 sm:$0xff]  }
  0xe6   : > { %1767 = vmatmul.mubr.bf16.gmra.mrb[12].mxu0 %v9877_v18  ;;  %v8676_v15 = vld [vmem:[#allocation9 + $0x3b8] ss:$36 sps:$4 sm:$0xff]   ;;  %v8709_v7 = vld [vmem:[#allocation9 + $0x60] ss:$36 sps:$4 sm:$0xff]  }
  0xe7   : > { %1920 = vmatmul.mubr.bf16.gmra.mrb[28].mxu1 %v9879_v19  ;;  %2169 = vmatpush1.bf16.msra.mxu0 %v8643_v17  ;;  %v8690_v17 = vld [vmem:[#allocation9 + $0x5ac] ss:$36 sps:$4 sm:$0xff]  }
  0xe8   : > { %1959 = vmatpush1.bf16.msra.mxu1 %v8640_v16  ;;  %2170 = vmatprep.subr.bf16.mxu0 %v8651_v23  ;;  %v330_v16 = vld [vmem:[%s9781_s9 + $0x150] sm:$0xff]  ;;  %v8684_v23 = vld [vmem:[#allocation9 + $0x404] ss:$36 sps:$4 sm:$0xff]  }
  0xe9   : > { %1960 = vmatprep.subr.bf16.mxu1 %v8648_v22  ;;  %1776 = vmatprep.mubr.bf16.mxu0 %v9883_v27  ;;  %v8693_v22 = vld [vmem:[#allocation9 + $0x5f4] ss:$36 sps:$4 sm:$0xff]  }
  0xea   : > { %1962 = vmatprep.mubr.bf16.mxu1 %v9812_v61 }
  0xeb   : > { %2171 = vmatpush1.bf16.msra.mxu0 %v8649_v28  ;;  %v8682_v28 = vld [vmem:[#allocation9 + $0x400] ss:$36 sps:$4 sm:$0xff]  }
  0xec   : > { %1961 = vmatpush1.bf16.msra.mxu1 %v8646_v26  ;;  %2172 = vmatprep.subr.bf16.mxu0 %v8657_v33  ;;  %v9927_v26 = vpack.c.bf16 %v333_v20, %v330_v16  ;;  %v8685_v33 = vld [vmem:[#allocation9 + $0x448] ss:$36 sps:$4 sm:$0xff]   ;;  %v8729_v16 = vld [vmem:[#allocation9 + $0x13c] ss:$36 sps:$4 sm:$0xff]  }
  0xed   : > { %2043 = vmatprep.subr.bf16.mxu1 %v8654_v31  ;;  %v8696_v31 = vld [vmem:[#allocation9 + $0x63c] ss:$36 sps:$4 sm:$0xff]   ;;  %v8735_v20 = vld [vmem:[#allocation9 + $0x184] ss:$36 sps:$4 sm:$0xff]  }
  0xee   : > { %1777 = vmatmul.mubr.bf16.gmra.mrb[16].mxu0 %v9893_v36 }
  0xef   : > { %1963 = vmatmul.mubr.bf16.vlgmr.msra.gmra.mrb[32].mxu1 %v9830_v24  ;;  %2173 = vmatpush1.bf16.msra.mxu0 %v8655_v39  ;;  %v8700_v39 = vld [vmem:[#allocation9 + $0x490] ss:$36 sps:$4 sm:$0xff]  }
  0xf0   : > { %2044 = vmatpush1.bf16.msra.mxu1 %v8652_v38  ;;  %2174 = vmatprep.subr.bf16.mxu0 %v8660_v40  ;;  %v8699_v38 = vld [vmem:[#allocation9 + $0x684] ss:$36 sps:$4 sm:$0xff]  }
  0xf1   : > { %1786 = vmatprep.mubr.bf16.mxu0 %v9895_v41  ;;  %1972 = vmatprep.mubr.bf16.mxu1 %v9835_v32  ;;  %v8697_v40 = vld [vmem:[#allocation9 + $0x680] ss:$36 sps:$4 sm:$0xff]  }
  0xf2   : > { %2045 = vmatprep.subr.bf16.mxu1 %v8663_v49  ;;  %v8712_v49 = vld [vmem:[#allocation9 + $0x520] ss:$36 sps:$4 sm:$0xff]  }
  0xf3   : > { %2175 = vmatpush1.bf16.msra.mxu0 %v8658_v42  ;;  %v8708_v42 = vld [vmem:[#allocation9 + $0x4dc] ss:$36 sps:$4 sm:$0xff]  }
  0xf4   : > { %2046 = vmatpush1.bf16.msra.mxu1 %v8661_v47  ;;  %2176 = vmatprep.subr.bf16.mxu0 %v8666_v50  ;;  %v8714_v47 = vld [vmem:[#allocation9 + $0x524] ss:$36 sps:$4 sm:$0xff]   ;;  %v8720_v50 = vld [vmem:[#allocation9 + $0x56c] ss:$36 sps:$4 sm:$0xff]  }
  0xf5   : > { %2047 = vmatprep.subr.bf16.mxu1 %v8672_v54  ;;  %v8724_v54 = vld [vmem:[#allocation9 + $0x5b0] ss:$36 sps:$4 sm:$0xff]  }
  0xf6   : > { %1787 = vmatmul.mubr.bf16.gmra.mrb[20].mxu0 %v9905_v55 }
  0xf7   : > { %1973 = vmatmul.mubr.bf16.gmra.mrb[36].mxu1 %v9845_v43  ;;  %2177 = vmatpush1.bf16.msra.mxu0 %v8664_v56  ;;  %v8732_v56 = vld [vmem:[#allocation9 + $0x5fc] ss:$36 sps:$4 sm:$0xff]  }
  0xf8   : > { %1796 = vmatprep.mubr.bf16.mxu0 %v9907_v57  ;;  %2178 = vmatprep.subr.bf16.mxu0 %v8669_v58  ;;  %v8730_v58 = vld [vmem:[#allocation9 + $0x5f8] ss:$36 sps:$4 sm:$0xff]  }
  0xf9   : > { %1982 = vmatprep.mubr.bf16.mxu1 %v9851_v52  ;;  %2048 = vmatpush1.bf16.msra.mxu1 %v8670_v3  ;;  %v8742_v3 = vld [vmem:[#allocation9 + $0x688] ss:$36 sps:$4 sm:$0xff]  }
  0xfa   : > { %2049 = vmatprep.subr.bf16.mxu1 %v8681_v5  ;;  %v8703_v5 = vld [vmem:[#allocation9 + $0x18] ss:$36 sps:$4 sm:$0xff]  }
  0xfb   : > { %2179 = vmatpush1.bf16.msra.mxu0 %v8667_v63  ;;  %v8738_v63 = vld [vmem:[#allocation9 + $0x644] ss:$36 sps:$4 sm:$0xff]  }
  0xfc   : > { %2180 = vmatprep.subr.bf16.mxu0 %v8675_v4  ;;  %v8772_v4 = vld [vmem:[#allocation9 + $0x260] ss:$36 sps:$4 sm:$0xff]  }
  0xfd   : > { %2050 = vmatpush1.bf16.msra.mxu1 %v8679_v9  ;;  %v8717_v9 = vld [vmem:[#allocation9 + $0xac] ss:$36 sps:$4 sm:$0xff]  }
  0xfe   : > { %1797 = vmatmul.mubr.bf16.gmra.mrb[24].mxu0 %v9917_v11  ;;  %2051 = vmatprep.subr.bf16.mxu1 %v8690_v17  ;;  %v8727_v17 = vld [vmem:[#allocation9 + $0x138] ss:$36 sps:$4 sm:$0xff]  }
  0xff   : > { %1983 = vmatmul.mubr.bf16.gmra.mrb[40].mxu1 %v9861_v59  ;;  %2181 = vmatpush1.bf16.msra.mxu0 %v8673_v12  ;;  %v8715_v12 = vld [vmem:[#allocation9 + $0xa8] ss:$36 sps:$4 sm:$0xff]  }
 0x100   : > { %1806 = vmatprep.mubr.bf16.mxu0 %v9919_v13  ;;  %2182 = vmatprep.subr.bf16.mxu0 %v8678_v14  ;;  %v8723_v14 = vld [vmem:[#allocation9 + $0xf4] ss:$36 sps:$4 sm:$0xff]  }
 0x101   : > { %1992 = vmatprep.mubr.bf16.mxu1 %v9867_v8  ;;  %2052 = vmatpush1.bf16.msra.mxu1 %v8688_v21  ;;  %v8733_v21 = vld [vmem:[#allocation9 + $0x180] ss:$36 sps:$4 sm:$0xff]  }
 0x102   : > { %2053 = vmatprep.subr.bf16.mxu1 %v8693_v22  ;;  %v8741_v22 = vld [vmem:[#allocation9 + $0x1cc] ss:$36 sps:$4 sm:$0xff]  }
 0x103   : > { %2183 = vmatpush1.bf16.msra.mxu0 %v8676_v15  ;;  %v8721_v15 = vld [vmem:[#allocation9 + $0xf0] ss:$36 sps:$4 sm:$0xff]  }
 0x104   : > { %2184 = vmatprep.subr.bf16.mxu0 %v8684_v23  ;;  %v8739_v23 = vld [vmem:[#allocation9 + $0x1c8] ss:$36 sps:$4 sm:$0xff]  }
 0x105   : > { %2054 = vmatpush1.bf16.msra.mxu1 %v8691_v30  ;;  %v8750_v30 = vld [vmem:[#allocation9 + $0x25c] ss:$36 sps:$4 sm:$0xff]  }
 0x106   : > { %1807 = vmatmul.mubr.bf16.gmra.mrb[28].mxu0 %v9927_v26  ;;  %2055 = vmatprep.subr.bf16.mxu1 %v8696_v31  ;;  %v8748_v31 = vld [vmem:[#allocation9 + $0x258] ss:$36 sps:$4 sm:$0xff]  }
 0x107   : > { %1993 = vmatmul.mubr.bf16.gmra.mrb[44].mxu1 %v9877_v18  ;;  %2185 = vmatpush1.bf16.msra.mxu0 %v8682_v28  ;;  %v8747_v28 = vld [vmem:[#allocation9 + $0x214] ss:$36 sps:$4 sm:$0xff]  }
 0x108   : > { %2002 = vmatprep.mubr.bf16.mxu1 %v9883_v27  ;;  %2186 = vmatprep.subr.bf16.mxu0 %v8687_v29  ;;  %v8745_v29 = vld [vmem:[#allocation9 + $0x210] ss:$36 sps:$4 sm:$0xff]  }
 0x109   : > { %2188 = vmatprep.mubr.bf16.mxu0 %v9812_v61  ;;  %2056 = vmatpush1.bf16.msra.mxu1 %v8694_v35  ;;  %v8774_v35 = vld [vmem:[#allocation9 + $0x2a8] ss:$36 sps:$4 sm:$0xff]  }
 0x10a   : > { %2057 = vmatprep.subr.bf16.mxu1 %v8699_v38  ;;  %v8751_v38 = vld [vmem:[#allocation9 + $0x2a0] ss:$36 sps:$4 sm:$0xff]  }
 0x10b   : > { %2187 = vmatpush1.bf16.msra.mxu0 %v8685_v33  ;;  %v8753_v33 = vld [vmem:[#allocation9 + $0x2a4] ss:$36 sps:$4 sm:$0xff]  }
 0x10c   : > { %2269 = vmatprep.subr.bf16.mxu0 %v8702_v34  ;;  %v8773_v34 = vld [vmem:[#allocation9 + $0x20] ss:$36 sps:$4 sm:$0xff]  }
 0x10d   : > { %2058 = vmatpush1.bf16.msra.mxu1 %v8697_v40  ;;  %v8775_v40 = vld [vmem:[#allocation9 + $0x68] ss:$36 sps:$4 sm:$0xff]  }
 0x10e   : > { %2189 = vmatmul.mubr.bf16.vlgmr.msra.gmra.mrb[32].mxu0 %v9830_v24  ;;  %2382 = vmatprep.subr.bf16.mxu1 %v8705_v45  ;;  %v8759_v45 = vld [vmem:[#allocation9 + $0x334] ss:$36 sps:$4 sm:$0xff]  }
 0x10f   : > { %2003 = vmatmul.mubr.bf16.gmra.mrb[48].mxu1 %v9893_v36  ;;  %2198 = vmatprep.mubr.bf16.mxu0 %v9835_v32 }
 0x110   : > { %2012 = vmatprep.mubr.bf16.mxu1 %v9895_v41  ;;  %2270 = vmatpush1.bf16.msra.mxu0 %v8700_v39  ;;  %v8756_v39 = vld [vmem:[#allocation9 + $0x2ec] ss:$36 sps:$4 sm:$0xff]  }
 0x111   : > { %2271 = vmatprep.subr.bf16.mxu0 %v8708_v42  ;;  %v8754_v42 = vld [vmem:[#allocation9 + $0x2e8] ss:$36 sps:$4 sm:$0xff]  }
 0x114   : > { %2272 = vmatpush1.bf16.msra.mxu0 %v8706_v46  ;;  %v8776_v46 = vld [vmem:[#allocation9 + $0x2f0] ss:$36 sps:$4 sm:$0xff]  }
 0x115   : > { %2273 = vmatprep.subr.bf16.mxu0 %v8714_v47  ;;  %v8777_v47 = vld [vmem:[#allocation9 + $0xb0] ss:$36 sps:$4 sm:$0xff]  }
 0x116   : > { %2199 = vmatmul.mubr.bf16.gmra.mrb[36].mxu0 %v9845_v43 }
 0x117   : > { %2013 = vmatmul.mubr.bf16.gmra.mrb[52].mxu1 %v9905_v55  ;;  %2208 = vmatprep.mubr.bf16.mxu0 %v9851_v52 }
 0x118   : > { %2022 = vmatprep.mubr.bf16.mxu1 %v9907_v57  ;;  %2274 = vmatpush1.bf16.msra.mxu0 %v8712_v49  ;;  %v8757_v49 = vld [vmem:[#allocation9 + $0x330] ss:$36 sps:$4 sm:$0xff]  }
 0x119   : > { %2275 = vmatprep.subr.bf16.mxu0 %v8720_v50  ;;  %v8778_v50 = vld [vmem:[#allocation9 + $0x338] ss:$36 sps:$4 sm:$0xff]  }
 0x11c   : > { %2276 = vmatpush1.bf16.msra.mxu0 %v8718_v51  ;;  %v8762_v51 = vld [vmem:[#allocation9 + $0x37c] ss:$36 sps:$4 sm:$0xff]  }
 0x11d   : > { %2277 = vmatprep.subr.bf16.mxu0 %v8726_v53  ;;  %v8760_v53 = vld [vmem:[#allocation9 + $0x378] ss:$36 sps:$4 sm:$0xff]  }
 0x11e   : > { %2209 = vmatmul.mubr.bf16.gmra.mrb[40].mxu0 %v9861_v59 }
 0x11f   : > { %2023 = vmatmul.mubr.bf16.gmra.mrb[56].mxu1 %v9917_v11  ;;  %2218 = vmatprep.mubr.bf16.mxu0 %v9867_v8 }
 0x120   : > { %2032 = vmatprep.mubr.bf16.mxu1 %v9919_v13  ;;  %2278 = vmatpush1.bf16.msra.mxu0 %v8724_v54  ;;  %v8765_v54 = vld [vmem:[#allocation9 + $0x3c4] ss:$36 sps:$4 sm:$0xff]  }
 0x121   : > { %2279 = vmatprep.subr.bf16.mxu0 %v8732_v56  ;;  %v8779_v56 = vld [vmem:[#allocation9 + $0xf8] ss:$36 sps:$4 sm:$0xff]  }
 0x124   : > { %2280 = vmatpush1.bf16.msra.mxu0 %v8730_v58  ;;  %v8780_v58 = vld [vmem:[#allocation9 + $0x380] ss:$36 sps:$4 sm:$0xff]  }
 0x125   : > { %2281 = vmatprep.subr.bf16.mxu0 %v8738_v63  ;;  %v8763_v63 = vld [vmem:[#allocation9 + $0x3c0] ss:$36 sps:$4 sm:$0xff]  }
 0x126   : > { %2219 = vmatmul.mubr.bf16.gmra.mrb[44].mxu0 %v9877_v18 }
 0x127   : > { %2033 = vmatmul.mubr.bf16.gmra.mrb[60].mxu1 %v9927_v26  ;;  %2228 = vmatprep.mubr.bf16.mxu0 %v9883_v27 }
 0x128   : > { %2075 = vmatprep.mubr.bf16.mxu1 %v12434_v0  ;;  %2282 = vmatpush1.bf16.msra.mxu0 %v8736_v1  ;;  %v8768_v1 = vld [vmem:[#allocation9 + $0x40c] ss:$36 sps:$4 sm:$0xff]  }
 0x129   : > { %2283 = vmatprep.subr.bf16.mxu0 %v8744_v2  ;;  %v8781_v2 = vld [vmem:[#allocation9 + $0x140] ss:$36 sps:$4 sm:$0xff]  }
 0x12c   : > { %2284 = vmatpush1.bf16.msra.mxu0 %v8742_v3  ;;  %v8766_v3 = vld [vmem:[#allocation9 + $0x408] ss:$36 sps:$4 sm:$0xff]  }
 0x12d   : > { %7359 = vmatprep.subr.bf16.mxu0 %v8772_v4  ;;  %v8771_v4 = vld [vmem:[#allocation9 + $0x454] ss:$36 sps:$4 sm:$0xff]  }
 0x12e   : > { %2229 = vmatmul.mubr.bf16.gmra.mrb[48].mxu0 %v9893_v36 }
 0x12f   : > { %2076 = vmatmul.mubr.bf16.vlgmr.msra.gmra.mrb[32].mxu1 %v9798_v37  ;;  %2238 = vmatprep.mubr.bf16.mxu0 %v9895_v41 }
 0x130   : > { %2383 = vmatpush1.bf16.msra.mxu1 %v8703_v5  ;;  %2085 = vmatprep.mubr.bf16.mxu1 %v12434_v0  ;;  %v8782_v5 = vld [vmem:[#allocation9 + $0x3c8] ss:$36 sps:$4 sm:$0xff]  }
 0x131   : > { %2384 = vmatprep.subr.bf16.mxu1 %v8711_v6  ;;  %v8783_v6 = vld [vmem:[#allocation9 + $0x188] ss:$36 sps:$4 sm:$0xff]  }
 0x134   : > { %2385 = vmatpush1.bf16.msra.mxu1 %v8709_v7  ;;  %v8769_v7 = vld [vmem:[#allocation9 + $0x450] ss:$36 sps:$4 sm:$0xff]  }
 0x135   : > { %2386 = vmatprep.subr.bf16.mxu1 %v8717_v9  ;;  %v8784_v9 = vld [vmem:[#allocation9 + $0x410] ss:$36 sps:$4 sm:$0xff]  }
 0x136   : > { %2239 = vmatmul.mubr.bf16.gmra.mrb[52].mxu0 %v9905_v55 }
 0x137   : > { %2086 = vmatmul.mubr.bf16.gmra.mrb[36].mxu1 %v9804_v48  ;;  %2248 = vmatprep.mubr.bf16.mxu0 %v9907_v57 }
 0x138   : > { %2387 = vmatpush1.bf16.msra.mxu1 %v8715_v12  ;;  %2095 = vmatprep.mubr.bf16.mxu1 %v12434_v0  ;;  %v8790_v12 = vld [vmem:[#allocation9 + $0x49c] ss:$36 sps:$4 sm:$0xff]  }
 0x139   : > { %2388 = vmatprep.subr.bf16.mxu1 %v8723_v14  ;;  %v8785_v14 = vld [vmem:[#allocation9 + $0x1d0] ss:$36 sps:$4 sm:$0xff]  }
 0x13c   : > { %2389 = vmatpush1.bf16.msra.mxu1 %v8721_v15  ;;  %v8788_v15 = vld [vmem:[#allocation9 + $0x498] ss:$36 sps:$4 sm:$0xff]  }
 0x13d   : > { %2390 = vmatprep.subr.bf16.mxu1 %v8729_v16  ;;  %v8786_v16 = vld [vmem:[#allocation9 + $0x458] ss:$36 sps:$4 sm:$0xff]  }
 0x13e   : > { %2249 = vmatmul.mubr.bf16.gmra.mrb[56].mxu0 %v9917_v11 }
 0x13f   : > { %2096 = vmatmul.mubr.bf16.gmra.mrb[40].mxu1 %v9814_v62  ;;  %2258 = vmatprep.mubr.bf16.mxu0 %v9919_v13 }
 0x140   : > { %2391 = vmatpush1.bf16.msra.mxu1 %v8727_v17  ;;  %2105 = vmatprep.mubr.bf16.mxu1 %v12434_v0  ;;  %v8793_v17 = vld [vmem:[#allocation9 + $0x4e4] ss:$36 sps:$4 sm:$0xff]  }
 0x141   : > { %2392 = vmatprep.subr.bf16.mxu1 %v8735_v20  ;;  %v8787_v20 = vld [vmem:[#allocation9 + $0x218] ss:$36 sps:$4 sm:$0xff]  }
 0x144   : > { %2393 = vmatpush1.bf16.msra.mxu1 %v8733_v21  ;;  %v8791_v21 = vld [vmem:[#allocation9 + $0x4e0] ss:$36 sps:$4 sm:$0xff]  }
 0x145   : > { %2394 = vmatprep.subr.bf16.mxu1 %v8741_v22  ;;  %v8796_v22 = vld [vmem:[#allocation9 + $0x52c] ss:$36 sps:$4 sm:$0xff]  }
 0x146   : > { %2259 = vmatmul.mubr.bf16.gmra.mrb[60].mxu0 %v9927_v26 }
 0x147   : > { %2106 = vmatmul.mubr.bf16.gmra.mrb[44].mxu1 %v9821_v10  ;;  %2301 = vmatprep.mubr.bf16.mxu0 %v12434_v0 }
 0x148   : > { %2395 = vmatpush1.bf16.msra.mxu1 %v8739_v23  ;;  %2115 = vmatprep.mubr.bf16.mxu1 %v12434_v0  ;;  %v8794_v23 = vld [vmem:[#allocation9 + $0x528] ss:$36 sps:$4 sm:$0xff]  }
 0x149   : > { %2396 = vmatprep.subr.bf16.mxu1 %v8747_v28  ;;  %v8799_v28 = vld [vmem:[#allocation9 + $0x574] ss:$36 sps:$4 sm:$0xff]  }
 0x14c   : > { %2397 = vmatpush1.bf16.msra.mxu1 %v8745_v29  ;;  %v8797_v29 = vld [vmem:[#allocation9 + $0x570] ss:$36 sps:$4 sm:$0xff]  }
 0x14d   : > { %2398 = vmatprep.subr.bf16.mxu1 %v8750_v30  ;;  %v8802_v30 = vld [vmem:[#allocation9 + $0x5bc] ss:$36 sps:$4 sm:$0xff]  }
 0x14e   : > { %2302 = vmatmul.mubr.bf16.vlgmr.msra.gmra.mrb[32].mxu0 %v9798_v37 }
 0x14f   : > { %2116 = vmatmul.mubr.bf16.gmra.mrb[48].mxu1 %v9832_v25  ;;  %2311 = vmatprep.mubr.bf16.mxu0 %v12434_v0 }
 0x150   : > { %2399 = vmatpush1.bf16.msra.mxu1 %v8748_v31  ;;  %2125 = vmatprep.mubr.bf16.mxu1 %v12434_v0  ;;  %v8800_v31 = vld [vmem:[#allocation9 + $0x5b8] ss:$36 sps:$4 sm:$0xff]  }
 0x151   : > { %2400 = vmatprep.subr.bf16.mxu1 %v8753_v33  ;;  %7360 = vmatpush3.bf16.msra.mxu0 %v8773_v34  ;;  %v8805_v33 = vld [vmem:[#allocation9 + $0x604] ss:$36 sps:$4 sm:$0xff]  }
 0x152   : > { %7361 = vmatprep.subr.bf16.mxu0 %v8774_v35  ;;  %v8803_v34 = vld [vmem:[#allocation9 + $0x600] ss:$36 sps:$4 sm:$0xff]  }
 0x154   : > { %2401 = vmatpush1.bf16.msra.mxu1 %v8751_v38  ;;  %v8808_v38 = vld [vmem:[#allocation9 + $0x64c] ss:$36 sps:$4 sm:$0xff]  }
 0x155   : > { %2402 = vmatprep.subr.bf16.mxu1 %v8756_v39  ;;  %7362 = vmatpush3.bf16.msra.mxu0 %v8775_v40 }
 0x156   : > { %2312 = vmatmul.mubr.bf16.gmra.mrb[36].mxu0 %v9804_v48  ;;  %7363 = vmatprep.subr.bf16.mxu0 %v8776_v46  ;;  %v8811_v46 = vld [vmem:[#allocation9 + $0x694] ss:$36 sps:$4 sm:$0xff]  }
 0x157   : > { %2126 = vmatmul.mubr.bf16.gmra.mrb[52].mxu1 %v9847_v44  ;;  %2321 = vmatprep.mubr.bf16.mxu0 %v12434_v0 }
 0x158   : > { %2403 = vmatpush1.bf16.msra.mxu1 %v8754_v42  ;;  %2135 = vmatprep.mubr.bf16.mxu1 %v12434_v0 }
 0x159   : > { %2404 = vmatprep.subr.bf16.mxu1 %v8759_v45  ;;  %7364 = vmatpush3.bf16.msra.mxu0 %v8777_v47  ;;  %v8806_v45 = vld [vmem:[#allocation9 + $0x648] ss:$36 sps:$4 sm:$0xff]   ;;  %v8809_v47 = vld [vmem:[#allocation9 + $0x690] ss:$36 sps:$4 sm:$0xff]  }
 0x15a   : > { %7365 = vmatprep.subr.bf16.mxu0 %v8778_v50  ;;  %v8812_v50 = vld [vmem:[#allocation9 + $0x4a0] ss:$36 sps:$4 sm:$0xff]  }
 0x15c   : > { %2405 = vmatpush1.bf16.msra.mxu1 %v8757_v49 }
 0x15d   : > { %2406 = vmatprep.subr.bf16.mxu1 %v8762_v51  ;;  %7366 = vmatpush3.bf16.msra.mxu0 %v8779_v56 }
 0x15e   : > { %2322 = vmatmul.mubr.bf16.gmra.mrb[40].mxu0 %v9814_v62  ;;  %7367 = vmatprep.subr.bf16.mxu0 %v8780_v58 }
 0x15f   : > { %2136 = vmatmul.mubr.bf16.gmra.mrb[56].mxu1 %v9863_v60  ;;  %2331 = vmatprep.mubr.bf16.mxu0 %v12434_v0 }
 0x160   : > { %2407 = vmatpush1.bf16.msra.mxu1 %v8760_v53  ;;  %2145 = vmatprep.mubr.bf16.mxu1 %v12434_v0 }
 0x161   : > { %2408 = vmatprep.subr.bf16.mxu1 %v8765_v54  ;;  %7368 = vmatpush3.bf16.msra.mxu0 %v8781_v2 }
 0x162   : > { %7369 = vmatprep.subr.bf16.mxu0 %v8782_v5 }
 0x164   : > { %2409 = vmatpush1.bf16.msra.mxu1 %v8763_v63 }
 0x165   : > { %2410 = vmatprep.subr.bf16.mxu1 %v8768_v1  ;;  %7370 = vmatpush3.bf16.msra.mxu0 %v8783_v6 }
 0x166   : > { %2332 = vmatmul.mubr.bf16.gmra.mrb[44].mxu0 %v9821_v10  ;;  %7371 = vmatprep.subr.bf16.mxu0 %v8784_v9 }
 0x167   : > { %2146 = vmatmul.mubr.bf16.gmra.mrb[60].mxu1 %v9879_v19  ;;  %2341 = vmatprep.mubr.bf16.mxu0 %v12434_v0 }
 0x168   : > { %2411 = vmatpush1.bf16.msra.mxu1 %v8766_v3  ;;  %2414 = vmatprep.mubr.bf16.mxu1 %v9812_v61 }
 0x169   : > { %2412 = vmatprep.subr.bf16.mxu1 %v8771_v4  ;;  %7372 = vmatpush3.bf16.msra.mxu0 %v8785_v14 }
 0x16a   : > { %7373 = vmatprep.subr.bf16.mxu0 %v8786_v16 }
 0x16c   : > { %2413 = vmatpush1.bf16.msra.mxu1 %v8769_v7 }
 0x16d   : > { %2495 = vmatprep.subr.bf16.mxu1 %v8790_v12  ;;  %7374 = vmatpush3.bf16.msra.mxu0 %v8787_v20 }
 0x16e   : > { %2342 = vmatmul.mubr.bf16.gmra.mrb[48].mxu0 %v9832_v25 }
 0x16f   : > { %2415 = vmatmul.mubr.bf16.vlgmr.msra.gmra.mrb[64].mxu1 %v9830_v24  ;;  %2351 = vmatprep.mubr.bf16.mxu0 %v12434_v0 }
 0x170   : > { %2424 = vmatprep.mubr.bf16.mxu1 %v9835_v32  ;;  %2496 = vmatpush1.bf16.msra.mxu1 %v8788_v15 }
 0x171   : > { %2497 = vmatprep.subr.bf16.mxu1 %v8793_v17 }
 0x174   : > { %2498 = vmatpush1.bf16.msra.mxu1 %v8791_v21 }
 0x175   : > { %2499 = vmatprep.subr.bf16.mxu1 %v8796_v22 }
 0x176   : > { %2352 = vmatmul.mubr.bf16.gmra.mrb[52].mxu0 %v9847_v44 }
 0x177   : > { %2425 = vmatmul.mubr.bf16.gmra.mrb[68].mxu1 %v9845_v43  ;;  %2361 = vmatprep.mubr.bf16.mxu0 %v12434_v0 }
 0x178   : > { %2434 = vmatprep.mubr.bf16.mxu1 %v9851_v52  ;;  %2500 = vmatpush1.bf16.msra.mxu1 %v8794_v23 }
 0x179   : > { %2501 = vmatprep.subr.bf16.mxu1 %v8799_v28 }
 0x17c   : > { %2502 = vmatpush1.bf16.msra.mxu1 %v8797_v29 }
 0x17d   : > { %2503 = vmatprep.subr.bf16.mxu1 %v8802_v30 }
 0x17e   : > { %2362 = vmatmul.mubr.bf16.gmra.mrb[56].mxu0 %v9863_v60 }
 0x17f   : > { %2435 = vmatmul.mubr.bf16.gmra.mrb[72].mxu1 %v9861_v59  ;;  %2371 = vmatprep.mubr.bf16.mxu0 %v12434_v0 }
 0x180   : > { %2444 = vmatprep.mubr.bf16.mxu1 %v9867_v8  ;;  %2504 = vmatpush1.bf16.msra.mxu1 %v8800_v31 }
 0x181   : > { %2505 = vmatprep.subr.bf16.mxu1 %v8805_v33 }
 0x182   : > { %v1851_v35 = vpop.f32.mrb[0].mxu1 }
 0x183   : > { %v1853_v39 = vpop.f32.mrb[1].mxu1 }
 0x184   : > { %v1855_v40 = vpop.f32.mrb[2].mxu1  ;;  %2506 = vmatpush1.bf16.msra.mxu1 %v8803_v34 }
 0x185   : > { %v1857_v42 = vpop.f32.mrb[3].mxu1  ;;  %2507 = vmatprep.subr.bf16.mxu1 %v8808_v38 }
 0x186   : > { %2372 = vmatmul.mubr.bf16.gmra.mrb[60].mxu0 %v9879_v19 }
 0x187   : > { %2445 = vmatmul.mubr.bf16.gmra.mrb[76].mxu1 %v9877_v18  ;;  %2640 = vmatprep.mubr.bf16.mxu0 %v9812_v61 }
 0x188   : > { %2454 = vmatprep.mubr.bf16.mxu1 %v9883_v27  ;;  %2508 = vmatpush1.bf16.msra.mxu1 %v8806_v45 }
 0x189   : > { %2509 = vmatprep.subr.bf16.mxu1 %v8811_v46 }
 0x18a   : > { %v1861_v49 = vpop.f32.mrb[4].mxu1 }
 0x18b   : > { %v1863_v51 = vpop.f32.mrb[5].mxu1 }
 0x18c   : > { %v1865_v53 = vpop.f32.mrb[6].mxu1  ;;  %2510 = vmatpush1.bf16.msra.mxu1 %v8809_v47 }
 0x18d   : > { %v1867_v54 = vpop.f32.mrb[7].mxu1  ;;  %7711 = vmatprep.subr.bf16.mxu1 %v8812_v50 }
 0x18e   : > { %2641 = vmatmul.mubr.bf16.vlgmr.msra.gmra.mrb[64].mxu0 %v9830_v24 }
 0x18f   : > { %2455 = vmatmul.mubr.bf16.gmra.mrb[80].mxu1 %v9893_v36  ;;  %2648 = vmatprep.mubr.bf16.mxu0 %v9835_v32 }
 0x190   : > { %2464 = vmatprep.mubr.bf16.mxu1 %v9895_v41 }
 0x192   : > { %v1871_v56 = vpop.f32.mrb[8].mxu1 }
 0x193   : > { %v1873_v61 = vpop.f32.mrb[9].mxu1 }
 0x194   : > { %v1875_v58 = vpop.f32.mrb[10].mxu1 }
 0x195   : > { %v10001_v63 = vpop.f32.mrb[11].mxu1 }
 0x196   : > { %2649 = vmatmul.mubr.bf16.gmra.mrb[68].mxu0 %v9845_v43 }
 0x197   : > { %2465 = vmatmul.mubr.bf16.gmra.mrb[84].mxu1 %v9905_v55  ;;  %2656 = vmatprep.mubr.bf16.mxu0 %v9851_v52 }
 0x198   : > { %2474 = vmatprep.mubr.bf16.mxu1 %v9907_v57 }
 0x19a   : > { %v10007_v1 = vpop.f32.mrb[12].mxu1 }
 0x19b   : > { %v10009_v24 = vpop.f32.mrb[13].mxu1 }
 0x19c   : > { %v10011_v2 = vpop.f32.mrb[14].mxu1 }
 0x19d   : > { %v10013_v32 = vpop.f32.mrb[15].mxu1 }
 0x19e   : > { %2657 = vmatmul.mubr.bf16.gmra.mrb[72].mxu0 %v9861_v59 }
 0x19f   : > { %2475 = vmatmul.mubr.bf16.gmra.mrb[88].mxu1 %v9917_v11  ;;  %2664 = vmatprep.mubr.bf16.mxu0 %v9867_v8 }
 0x1a0   : > { %2484 = vmatprep.mubr.bf16.mxu1 %v9919_v13 }
 0x1a1   : > { %v1738_v43 = vpop.f32.mrb[0].mxu0 }
 0x1a2   : > { %v10019_v3 = vpop.f32.mrb[16].mxu1  ;;  %v1852_v52 = vadd.f32 %v1851_v35, %v1738_v43  ;;  %v1740_v4 = vpop.f32.mrb[1].mxu0  ;;  %v8813_v35 = vld [vmem:[#allocation9 + $0x4e8] ss:$36 sps:$4 sm:$0xff]  }
 0x1a3   : > { %v10021_v5 = vpop.f32.mrb[17].mxu1  ;;  %v1854_v6 = vadd.f32 %v1853_v39, %v1740_v4  ;;  %v1742_v7 = vpop.f32.mrb[2].mxu0 }
 0x1a4   : > { %v10023_v9 = vpop.f32.mrb[18].mxu1  ;;  %v1856_v12 = vadd.f32 %v1855_v40, %v1742_v7  ;;  %v1744_v14 = vpop.f32.mrb[3].mxu0 }
 0x1a5   : > { %v10025_v15 = vpop.f32.mrb[19].mxu1  ;;  %v1858_v59 = vadd.f32 %v1857_v42, %v1744_v14  ;;  %v8814_v42 = vld [vmem:[#allocation9 + $0x530] ss:$36 sps:$4 sm:$0xff]  }
 0x1a6   : > { %v10027_v16 = vpack.c.bf16 %v1856_v12, %v1852_v52  ;;  %2665 = vmatmul.mubr.bf16.gmra.mrb[76].mxu0 %v9877_v18 }
 0x1a7   : > { %2485 = vmatmul.mubr.bf16.gmra.mrb[92].mxu1 %v9927_v26  ;;  %v10031_v8 = vpack.c.bf16 %v1858_v59, %v1854_v6  ;;  %2672 = vmatprep.mubr.bf16.mxu0 %v9883_v27 }
 0x1a8   : > { %2527 = vmatprep.mubr.bf16.mxu1 %v12434_v0 }
 0x1a9   : > { %12543 = vst [vmem:[#allocation17_spill] sm:$0xff] %v10031_v8  ;;  %v1748_v17 = vpop.f32.mrb[4].mxu0 }
 0x1aa   : > { %v10035_v20 = vpop.f32.mrb[20].mxu1  ;;  %v1862_v21 = vadd.f32 %v1861_v49, %v1748_v17  ;;  %v1750_v22 = vpop.f32.mrb[5].mxu0 }
 0x1ab   : > { %v10037_v23 = vpop.f32.mrb[21].mxu1  ;;  %v1864_v28 = vadd.f32 %v1863_v51, %v1750_v22  ;;  %v1752_v29 = vpop.f32.mrb[6].mxu0  ;;  %v8817_v22 = vld [vmem:[#allocation9 + $0x608] ss:$36 sps:$4 sm:$0xff]  }
 0x1ac   : > { %v10039_v30 = vpop.f32.mrb[22].mxu1  ;;  %v1866_v31 = vadd.f32 %v1865_v53, %v1752_v29  ;;  %v1754_v33 = vpop.f32.mrb[7].mxu0 }
 0x1ad   : > { %v10041_v18 = vpop.f32.mrb[23].mxu1  ;;  %v1868_v34 = vadd.f32 %v1867_v54, %v1754_v33 }
 0x1ae   : > { %v10043_v38 = vpack.c.bf16 %v1866_v31, %v1862_v21  ;;  %2673 = vmatmul.mubr.bf16.gmra.mrb[80].mxu0 %v9893_v36 }
 0x1af   : > { %2528 = vmatmul.mubr.bf16.vlgmr.msra.gmra.mrb[64].mxu1 %v9798_v37  ;;  %v10047_v27 = vpack.c.bf16 %v1868_v34, %v1864_v28  ;;  %2680 = vmatprep.mubr.bf16.mxu0 %v9895_v41 }
 0x1b0   : > { %2537 = vmatprep.mubr.bf16.mxu1 %v12434_v0  ;;  %7712 = vmatpush3.bf16.msra.mxu1 %v8812_v50  ;;  %v8815_v50 = vld [vmem:[#allocation9 + $0x578] ss:$36 sps:$4 sm:$0xff]  }
 0x1b1   : > { %12544 = vst [vmem:[#allocation18_spill] sm:$0xff] %v10047_v27  ;;  %v1758_v39 = vpop.f32.mrb[8].mxu0  ;;  %7713 = vmatprep.subr.bf16.mxu1 %v8813_v35 }
 0x1b2   : > { %v10051_v40 = vpop.f32.mrb[24].mxu1  ;;  %v1872_v45 = vadd.f32 %v1871_v56, %v1758_v39  ;;  %v1760_v46 = vpop.f32.mrb[9].mxu0  ;;  %v8819_v39 = vld [vmem:[#allocation9 + $0x698] ss:$36 sps:$4 sm:$0xff]  }
 0x1b3   : > { %v10053_v47 = vpop.f32.mrb[25].mxu1  ;;  %v1874_v49 = vadd.f32 %v1873_v61, %v1760_v46  ;;  %v1762_v51 = vpop.f32.mrb[10].mxu0 }
 0x1b4   : > { %v10055_v53 = vpop.f32.mrb[26].mxu1  ;;  %v1876_v36 = vadd.f32 %v1875_v58, %v1762_v51  ;;  %v1764_v54 = vpop.f32.mrb[11].mxu0  ;;  %7714 = vmatpush3.bf16.msra.mxu1 %v8813_v35 }
 0x1b5   : > { %v10057_v43 = vpop.f32.mrb[27].mxu1  ;;  %v1878_v41 = vadd.f32 %v10001_v63, %v1764_v54  ;;  %7715 = vmatprep.subr.bf16.mxu1 %v8814_v42  ;;  %v8816_v63 = vld [vmem:[#allocation9 + $0x5c0] ss:$36 sps:$4 sm:$0xff]  }
 0x1b6   : > { %v10060_v52 = vpack.c.bf16 %v1876_v36, %v1872_v45  ;;  %2681 = vmatmul.mubr.bf16.gmra.mrb[84].mxu0 %v9905_v55 }
 0x1b7   : > { %2538 = vmatmul.mubr.bf16.gmra.mrb[68].mxu1 %v9804_v48  ;;  %v10064_v56 = vpack.c.bf16 %v1878_v41, %v1874_v49  ;;  %2688 = vmatprep.mubr.bf16.mxu0 %v9907_v57 }
 0x1b8   : > { %2547 = vmatprep.mubr.bf16.mxu1 %v12434_v0  ;;  %7716 = vmatpush3.bf16.msra.mxu1 %v8814_v42 }
 0x1b9   : > { %12545 = vst [vmem:[#allocation19_spill] sm:$0xff] %v10064_v56  ;;  %v1768_v61 = vpop.f32.mrb[12].mxu0  ;;  %7717 = vmatprep.subr.bf16.mxu1 %v8815_v50 }
 0x1ba   : > { %v10068_v58 = vpop.f32.mrb[28].mxu1  ;;  %v1882_v4 = vadd.f32 %v10007_v1, %v1768_v61  ;;  %v1770_v6 = vpop.f32.mrb[13].mxu0 }
 0x1bb   : > { %v10071_v7 = vpop.f32.mrb[29].mxu1  ;;  %v1884_v12 = vadd.f32 %v10009_v24, %v1770_v6  ;;  %v1772_v55 = vpop.f32.mrb[14].mxu0 }
 0x1bc   : > { %v10074_v14 = vpop.f32.mrb[30].mxu1  ;;  %v1886_v59 = vadd.f32 %v10011_v2, %v1772_v55  ;;  %v1774_v17 = vpop.f32.mrb[15].mxu0  ;;  %7718 = vmatpush3.bf16.msra.mxu1 %v8815_v50  ;;  %v8818_v2 = vld [vmem:[#allocation9 + $0x650] ss:$36 sps:$4 sm:$0xff]  }
 0x1bd   : > { %v10077_v57 = vpop.f32.mrb[31].mxu1  ;;  %v1888_v21 = vadd.f32 %v10013_v32, %v1774_v17  ;;  %7719 = vmatprep.subr.bf16.mxu1 %v8816_v63 }
 0x1be   : > { %v10080_v28 = vpack.c.bf16 %v1886_v59, %v1882_v4  ;;  %2689 = vmatmul.mubr.bf16.gmra.mrb[88].mxu0 %v9917_v11 }
 0x1bf   : > { %2548 = vmatmul.mubr.bf16.gmra.mrb[72].mxu1 %v9814_v62  ;;  %v10084_v1 = vpack.c.bf16 %v1888_v21, %v1884_v12  ;;  %2696 = vmatprep.mubr.bf16.mxu0 %v9919_v13 }
 0x1c0   : > { %2557 = vmatprep.mubr.bf16.mxu1 %v12434_v0  ;;  %7720 = vmatpush3.bf16.msra.mxu1 %v8816_v63 }
 0x1c1   : > { %12546 = vst [vmem:[#allocation20_spill] sm:$0xff] %v10084_v1  ;;  %v1778_v24 = vpop.f32.mrb[16].mxu0  ;;  %7721 = vmatprep.subr.bf16.mxu1 %v8817_v22 }
 0x1c2   : > { %v1892_v32 = vadd.f32 %v10019_v3, %v1778_v24  ;;  %v1780_v29 = vpop.f32.mrb[17].mxu0 }
 0x1c3   : > { %v1894_v31 = vadd.f32 %v10021_v5, %v1780_v29  ;;  %v1782_v33 = vpop.f32.mrb[18].mxu0 }
 0x1c4   : > { %v1896_v34 = vadd.f32 %v10023_v9, %v1782_v33  ;;  %v1784_v35 = vpop.f32.mrb[19].mxu0  ;;  %7722 = vmatpush3.bf16.msra.mxu1 %v8817_v22 }
 0x1c5   : > { %v1898_v11 = vadd.f32 %v10025_v15, %v1784_v35  ;;  %7723 = vmatprep.subr.bf16.mxu1 %v8818_v2 }
 0x1c6   : > { %v10092_v13 = vpack.c.bf16 %v1896_v34, %v1892_v32  ;;  %2697 = vmatmul.mubr.bf16.gmra.mrb[92].mxu0 %v9927_v26 }
 0x1c7   : > { %2558 = vmatmul.mubr.bf16.gmra.mrb[76].mxu1 %v9821_v10  ;;  %v10096_v3 = vpack.c.bf16 %v1898_v11, %v1894_v31  ;;  %7759 = vmatprep.mubr.msk.bf16.mxu0 %vm2986_vm0, %v10027_v16 }
 0x1c8   : > { %2567 = vmatprep.mubr.bf16.mxu1 %v12434_v0  ;;  %7724 = vmatpush3.bf16.msra.mxu1 %v8818_v2 }
 0x1c9   : > { %12547 = vst [vmem:[#allocation21_spill] sm:$0xff] %v10096_v3  ;;  %v1788_v5 = vpop.f32.mrb[20].mxu0  ;;  %7725 = vmatprep.subr.bf16.mxu1 %v8819_v39 }
 0x1ca   : > { %v1902_v9 = vadd.f32 %v10035_v20, %v1788_v5  ;;  %v1790_v15 = vpop.f32.mrb[21].mxu0 }
 0x1cb   : > { %v1904_v42 = vadd.f32 %v10037_v23, %v1790_v15  ;;  %v1792_v45 = vpop.f32.mrb[22].mxu0 }
 0x1cc   : > { %v1906_v46 = vadd.f32 %v10039_v30, %v1792_v45  ;;  %v1794_v49 = vpop.f32.mrb[23].mxu0  ;;  %7726 = vmatpush3.bf16.msra.mxu1 %v8819_v39 }
 0x1cd   : > { %v1908_v26 = vadd.f32 %v10041_v18, %v1794_v49 }
 0x1ce   : > { %v10105_v51 = vpack.c.bf16 %v1906_v46, %v1902_v9 }
 0x1cf   : > { %2568 = vmatmul.mubr.bf16.gmra.mrb[80].mxu1 %v9832_v25  ;;  %v10108_v36 = vpack.c.bf16 %v1908_v26, %v1904_v42 }
 0x1d0   : > { %2577 = vmatprep.mubr.bf16.mxu1 %v12434_v0 }
 0x1d1   : > { %12548 = vst [vmem:[#allocation22_spill] sm:$0xff] %v10108_v36  ;;  %v1798_v54 = vpop.f32.mrb[24].mxu0 }
 0x1d2   : > { %v1912_v20 = vadd.f32 %v10051_v40, %v1798_v54  ;;  %v1800_v41 = vpop.f32.mrb[25].mxu0 }
 0x1d3   : > { %v1914_v23 = vadd.f32 %v10053_v47, %v1800_v41  ;;  %v1802_v50 = vpop.f32.mrb[26].mxu0 }
 0x1d4   : > { %v1916_v30 = vadd.f32 %v10055_v53, %v1802_v50  ;;  %v1804_v61 = vpop.f32.mrb[27].mxu0 }
 0x1d5   : > { %v1918_v18 = vadd.f32 %v10057_v43, %v1804_v61 }
 0x1d6   : > { %v10115_v63 = vpack.c.bf16 %v1916_v30, %v1912_v20 }
 0x1d7   : > { %2578 = vmatmul.mubr.bf16.gmra.mrb[84].mxu1 %v9847_v44  ;;  %v10118_v4 = vpack.c.bf16 %v1918_v18, %v1914_v23 }
 0x1d8   : > { %2587 = vmatprep.mubr.bf16.mxu1 %v12434_v0 }
 0x1d9   : > { %12549 = vst [vmem:[#allocation23_spill] sm:$0xff] %v10118_v4  ;;  %v1808_v6 = vpop.f32.mrb[28].mxu0 }
 0x1da   : > { %v1922_v40 = vadd.f32 %v10068_v58, %v1808_v6  ;;  %v1810_v12 = vpop.f32.mrb[29].mxu0 }
 0x1db   : > { %v1924_v47 = vadd.f32 %v10071_v7, %v1810_v12  ;;  %v1812_v55 = vpop.f32.mrb[30].mxu0 }
 0x1dc   : > { %v1926_v53 = vadd.f32 %v10074_v14, %v1812_v55  ;;  %v1814_v59 = vpop.f32.mrb[31].mxu0 }
 0x1dd   : > { %v1928_v43 = vadd.f32 %v10077_v57, %v1814_v59 }
 0x1de   : > { %v10125_v17 = vpack.c.bf16 %v1926_v53, %v1922_v40 }
 0x1df   : > { %2588 = vmatmul.mubr.bf16.gmra.mrb[88].mxu1 %v9863_v60  ;;  %v10128_v21 = vpack.c.bf16 %v1928_v43, %v1924_v47 }
 0x1e0   : > { %2597 = vmatprep.mubr.bf16.mxu1 %v12434_v0 }
 0x1e1   : > { %12550 = vst [vmem:[#allocation24_spill] sm:$0xff] %v10128_v21 }
 0x1e7   : > { %2598 = vmatmul.mubr.bf16.gmra.mrb[92].mxu1 %v9879_v19 }
 0x1e8   : > { %7727 = vmatprep.mubr.bf16.mxu1 %v9798_v37 }
 0x1ef   : > { %7728 = vmatmul.mubr.bf16.vlgmr.msra.gmra.mrb[96].mxu1 %v9804_v48 }
 0x1f0   : > { %7731 = vmatprep.mubr.bf16.mxu1 %v9814_v62 }
 0x1f7   : > { %7732 = vmatmul.mubr.bf16.gmra.mrb[100].mxu1 %v9821_v10 }
 0x1f8   : > { %7735 = vmatprep.mubr.bf16.mxu1 %v9832_v25 }
 0x1ff   : > { %7736 = vmatmul.mubr.bf16.gmra.mrb[104].mxu1 %v9847_v44 }
 0x200   : > { %7739 = vmatprep.mubr.bf16.mxu1 %v9863_v60 }
 0x202   : > { %v2077_v58 = vpop.f32.mrb[32].mxu1 }
 0x203   : > { %v2079_v7 = vpop.f32.mrb[33].mxu1 }
 0x204   : > { %v2081_v14 = vpop.f32.mrb[34].mxu1 }
 0x205   : > { %v10139_v57 = vpack.c.bf16 %v2081_v14, %v2077_v58  ;;  %v2083_v22 = vpop.f32.mrb[35].mxu1 }
 0x206   : > { %v2805_v24 = vpack.c.bf16 %v2083_v22, %v2079_v7 }
 0x207   : > { %12551 = vst [vmem:[#allocation25_spill] sm:$0xff] %v10139_v57  ;;  %7740 = vmatmul.mubr.bf16.gmra.mrb[108].mxu1 %v9879_v19 }
 0x208   : > { %3453 = vrot.lane.b32.xlu0 %v2805_v24, %s9551_s24  ;;  %8367 = vmatprep.subr.msk.bf16.mxu0 %vm2986_vm0, %v2805_v24  ;;  %v3012_v37 = vsel %vm2986_vm0, %v2805_v24, 0 }
 0x209   : > { %7744 = vmatpush3.bf16.xpose.msra.mxu0 %v3012_v37 }
 0x20a   : > { %v2087_v48 = vpop.f32.mrb[36].mxu1 }
 0x20b   : > { %v2089_v62 = vpop.f32.mrb[37].mxu1 }
 0x20c   : > { %v2091_v10 = vpop.f32.mrb[38].mxu1 }
 0x20d   : > { %v10145_v25 = vpack.c.bf16 %v2091_v10, %v2087_v48  ;;  %v2093_v44 = vpop.f32.mrb[39].mxu1 }
 0x20e   : > { %v2814_v60 = vpack.c.bf16 %v2093_v44, %v2089_v62 }
 0x20f   : > { %12552 = vst [vmem:[#allocation26_spill] sm:$0xff] %v10145_v25 }
 0x210   : > { %3455 = vrot.lane.b32.xlu1 %v2814_v60, %s9551_s24  ;;  %8368 = vmatprep.subr.msk.bf16.mxu0 %vm2986_vm0, %v2814_v60  ;;  %v3015_v19 = vsel %vm2986_vm0, %v2814_v60, 0 }
 0x211   : > { %7746 = vmatpush3.bf16.xpose.msra.mxu0 %v3015_v19 }
 0x212   : > { %v2097_v2 = vpop.f32.mrb[40].mxu1 }
 0x213   : > { %v2099_v32 = vpop.f32.mrb[41].mxu1 }
 0x214   : > { %v2101_v29 = vpop.f32.mrb[42].mxu1 }
 0x215   : > { %v10150_v31 = vpack.c.bf16 %v2101_v29, %v2097_v2  ;;  %v2103_v33 = vpop.f32.mrb[43].mxu1 }
 0x216   : > { %v2823_v34 = vpack.c.bf16 %v2103_v33, %v2099_v32 }
 0x217   : > { %12553 = vst [vmem:[#allocation27_spill] sm:$0xff] %v10150_v31 }
 0x218   : > { %3457 = vrot.lane.b32.xlu0 %v2823_v34, %s9551_s24  ;;  %8369 = vmatprep.subr.msk.bf16.mxu0 %vm2986_vm0, %v2823_v34  ;;  %v3018_v35 = vsel %vm2986_vm0, %v2823_v34, 0 }
 0x219   : > { %7748 = vmatpush3.bf16.xpose.msra.mxu0 %v3018_v35 }
 0x21a   : > { %v2107_v11 = vpop.f32.mrb[44].mxu1 }
 0x21b   : > { %v2109_v39 = vpop.f32.mrb[45].mxu1 }
 0x21c   : > { %v2111_v5 = vpop.f32.mrb[46].mxu1 }
 0x21d   : > { %v10155_v9 = vpack.c.bf16 %v2111_v5, %v2107_v11  ;;  %v2113_v15 = vpop.f32.mrb[47].mxu1 }
 0x21e   : > { %v10157_v42 = vpack.c.bf16 %v2113_v15, %v2109_v39 }
 0x21f   : > { %12554 = vst [vmem:[#allocation28_spill] sm:$0xff] %v10155_v9 }
 0x220   : > { %8370 = vmatprep.subr.msk.bf16.mxu0 %vm2986_vm0, %v10157_v42  ;;  %v3021_v45 = vsel %vm2986_vm0, %v10157_v42, 0 }
 0x221   : > { %7750 = vmatpush3.bf16.xpose.msra.mxu0 %v3021_v45  ;;  %v2303_v49 = vpop.f32.mrb[32].mxu0 }
 0x222   : > { %v2117_v46 = vpop.f32.mrb[48].mxu1  ;;  %v2305_v54 = vpop.f32.mrb[33].mxu0 }
 0x223   : > { %v2119_v26 = vpop.f32.mrb[49].mxu1  ;;  %v2307_v41 = vpop.f32.mrb[34].mxu0 }
 0x224   : > { %v2121_v20 = vpop.f32.mrb[50].mxu1  ;;  %v10165_v30 = vpack.c.bf16 %v2307_v41, %v2303_v49  ;;  %v2309_v61 = vpop.f32.mrb[35].mxu0 }
 0x225   : > { %v10163_v23 = vpack.c.bf16 %v2121_v20, %v2117_v46  ;;  %v2123_v50 = vpop.f32.mrb[51].mxu1  ;;  %v10169_v6 = vpack.c.bf16 %v2309_v61, %v2305_v54 }
 0x226   : > { %12556 = vst [vmem:[#allocation30_spill] sm:$0xff] %v10165_v30  ;;  %v10167_v18 = vpack.c.bf16 %v2123_v50, %v2119_v26  ;;  %v10450_v30 = vld [vmem:[#allocation7 + $0x68] sm:$0xff] }
 0x227   : > { %12555 = vst [vmem:[#allocation29_spill] sm:$0xff] %v10163_v23  ;;  %12557 = vst [vmem:[#allocation31_spill] sm:$0xff] %v10169_v6 }
 0x228   : > { %8371 = vmatprep.subr.msk.bf16.mxu0 %vm2986_vm0, %v10167_v18  ;;  %v3024_v40 = vsel %vm2986_vm0, %v10167_v18, 0 }
 0x229   : > { %7752 = vmatpush3.bf16.xpose.msra.mxu0 %v3024_v40  ;;  %v2313_v47 = vpop.f32.mrb[36].mxu0 }
 0x22a   : > { %v2127_v12 = vpop.f32.mrb[52].mxu1  ;;  %v2315_v53 = vpop.f32.mrb[37].mxu0 }
 0x22b   : > { %v2129_v55 = vpop.f32.mrb[53].mxu1  ;;  %v2317_v43 = vpop.f32.mrb[38].mxu0 }
 0x22c   : > { %v2131_v59 = vpop.f32.mrb[54].mxu1  ;;  %v10177_v14 = vpack.c.bf16 %v2317_v43, %v2313_v47  ;;  %v2319_v22 = vpop.f32.mrb[39].mxu0 }
 0x22d   : > { %v10175_v58 = vpack.c.bf16 %v2131_v59, %v2127_v12  ;;  %v2133_v7 = vpop.f32.mrb[55].mxu1  ;;  %v10181_v37 = vpack.c.bf16 %v2319_v22, %v2315_v53 }
 0x22e   : > { %v10179_v24 = vpack.c.bf16 %v2133_v7, %v2129_v55 }
 0x22f   : > { %12558 = vst [vmem:[#allocation32_spill] sm:$0xff] %v10175_v58  ;;  %12559 = vst [vmem:[#allocation33_spill] sm:$0xff] %v10181_v37 }
 0x230   : > { %8372 = vmatprep.subr.msk.bf16.mxu0 %vm2986_vm0, %v10179_v24  ;;  %v3027_v48 = vsel %vm2986_vm0, %v10179_v24, 0 }
 0x231   : > { %7754 = vmatpush3.bf16.xpose.msra.mxu0 %v3027_v48  ;;  %v2323_v10 = vpop.f32.mrb[40].mxu0 }
 0x232   : > { %v2137_v62 = vpop.f32.mrb[56].mxu1  ;;  %v2325_v60 = vpop.f32.mrb[41].mxu0 }
 0x233   : > { %v2139_v44 = vpop.f32.mrb[57].mxu1  ;;  %v2327_v2 = vpop.f32.mrb[42].mxu0 }
 0x234   : > { %v2141_v19 = vpop.f32.mrb[58].mxu1  ;;  %v10189_v33 = vpack.c.bf16 %v2327_v2, %v2323_v10  ;;  %v2329_v34 = vpop.f32.mrb[43].mxu0 }
 0x235   : > { %v10187_v32 = vpack.c.bf16 %v2141_v19, %v2137_v62  ;;  %v2143_v29 = vpop.f32.mrb[59].mxu1  ;;  %v10193_v11 = vpack.c.bf16 %v2329_v34, %v2325_v60 }
 0x236   : > { %12561 = vst [vmem:[#allocation35_spill] sm:$0xff] %v10189_v33  ;;  %v10191_v35 = vpack.c.bf16 %v2143_v29, %v2139_v44 }
 0x237   : > { %12560 = vst [vmem:[#allocation34_spill] sm:$0xff] %v10187_v32  ;;  %12562 = vst [vmem:[#allocation36_spill] sm:$0xff] %v10193_v11 }
 0x238   : > { %8373 = vmatprep.subr.msk.bf16.mxu0 %vm2986_vm0, %v10191_v35  ;;  %v3030_v39 = vsel %vm2986_vm0, %v10191_v35, 0 }
 0x239   : > { %7756 = vmatpush3.bf16.xpose.msra.mxu0 %v3030_v39  ;;  %v2333_v15 = vpop.f32.mrb[44].mxu0 }
 0x23a   : > { %v2147_v5 = vpop.f32.mrb[60].mxu1  ;;  %v2335_v46 = vpop.f32.mrb[45].mxu0 }
 0x23b   : > { %v2149_v45 = vpop.f32.mrb[61].mxu1  ;;  %v2337_v26 = vpop.f32.mrb[46].mxu0 }
 0x23c   : > { %v2151_v49 = vpop.f32.mrb[62].mxu1  ;;  %v10201_v41 = vpack.c.bf16 %v2337_v26, %v2333_v15  ;;  %v2339_v50 = vpop.f32.mrb[47].mxu0 }
 0x23d   : > { %v10199_v54 = vpack.c.bf16 %v2151_v49, %v2147_v5  ;;  %v2153_v20 = vpop.f32.mrb[63].mxu1  ;;  %v10205_v40 = vpack.c.bf16 %v2339_v50, %v2335_v46 }
 0x23e   : > { %12564 = vst [vmem:[#allocation38_spill] sm:$0xff] %v10201_v41  ;;  %v10203_v61 = vpack.c.bf16 %v2153_v20, %v2149_v45 }
 0x23f   : > { %12563 = vst [vmem:[#allocation37_spill] sm:$0xff] %v10199_v54  ;;  %12565 = vst [vmem:[#allocation39_spill] sm:$0xff] %v10205_v40 }
 0x240   : > { %8374 = vmatprep.subr.msk.bf16.mxu0 %vm2986_vm0, %v10203_v61  ;;  %v3033_v12 = vsel %vm2986_vm0, %v10203_v61, 0 }
 0x241   : > { %7758 = vmatpush3.bf16.xpose.msra.mxu0 %v3033_v12  ;;  %v2343_v47 = vpop.f32.mrb[48].mxu0 }
 0x242   : > { %v2345_v55 = vpop.f32.mrb[49].mxu0 }
 0x243   : > { %v2347_v53 = vpop.f32.mrb[50].mxu0 }
 0x244   : > { %v10211_v59 = vpack.c.bf16 %v2347_v53, %v2343_v47  ;;  %v2349_v43 = vpop.f32.mrb[51].mxu0 }
 0x245   : > { %v10213_v7 = vpack.c.bf16 %v2349_v43, %v2345_v55 }
 0x246   : > { %12566 = vst [vmem:[#allocation40_spill] sm:$0xff] %v10211_v59 }
 0x247   : > { %12567 = vst [vmem:[#allocation41_spill] sm:$0xff] %v10213_v7 }
 0x248   : > { %7760 = vmatmul.mubr.msk.bf16.vlgmr.msra.gmra.mrb[96].mxu0 %vm2986_vm0, %v10043_v38 }
 0x249   : > { %7763 = vmatprep.mubr.msk.bf16.mxu0 %vm2986_vm0, %v10060_v52  ;;  %v2353_v22 = vpop.f32.mrb[52].mxu0 }
 0x24a   : > { %v2355_v48 = vpop.f32.mrb[53].mxu0 }
 0x24b   : > { %v2357_v62 = vpop.f32.mrb[54].mxu0 }
 0x24c   : > { %v10219_v10 = vpack.c.bf16 %v2357_v62, %v2353_v22  ;;  %v2359_v44 = vpop.f32.mrb[55].mxu0 }
 0x24d   : > { %v10221_v60 = vpack.c.bf16 %v2359_v44, %v2355_v48 }
 0x24e   : > { %12568 = vst [vmem:[#allocation42_spill] sm:$0xff] %v10219_v10 }
 0x24f   : > { %12569 = vst [vmem:[#allocation43_spill] sm:$0xff] %v10221_v60 }
 0x250   : > { %7764 = vmatmul.mubr.msk.bf16.gmra.mrb[100].mxu0 %vm2986_vm0, %v10080_v28 }
 0x251   : > { %7767 = vmatprep.mubr.msk.bf16.mxu0 %vm2986_vm0, %v10092_v13  ;;  %v2363_v19 = vpop.f32.mrb[56].mxu0 }
 0x252   : > { %v2365_v2 = vpop.f32.mrb[57].mxu0 }
 0x253   : > { %v2367_v29 = vpop.f32.mrb[58].mxu0 }
 0x254   : > { %v10227_v34 = vpack.c.bf16 %v2367_v29, %v2363_v19  ;;  %v2369_v39 = vpop.f32.mrb[59].mxu0 }
 0x255   : > { %v10229_v5 = vpack.c.bf16 %v2369_v39, %v2365_v2 }
 0x256   : > { %12570 = vst [vmem:[#allocation44_spill] sm:$0xff] %v10227_v34 }
 0x257   : > { %12571 = vst [vmem:[#allocation45_spill] sm:$0xff] %v10229_v5 }
 0x258   : > { %7768 = vmatmul.mubr.msk.bf16.gmra.mrb[104].mxu0 %vm2986_vm0, %v10105_v51 }
 0x259   : > { %7771 = vmatprep.mubr.msk.bf16.mxu0 %vm2986_vm0, %v10115_v63  ;;  %v2373_v15 = vpop.f32.mrb[60].mxu0 }
 0x25a   : > { %v2375_v45 = vpop.f32.mrb[61].mxu0 }
 0x25b   : > { %v2377_v46 = vpop.f32.mrb[62].mxu0 }
 0x25c   : > { %v10235_v49 = vpack.c.bf16 %v2377_v46, %v2373_v15  ;;  %v2379_v26 = vpop.f32.mrb[63].mxu0 }
 0x25d   : > { %v10237_v20 = vpack.c.bf16 %v2379_v26, %v2375_v45 }
 0x25e   : > { %12572 = vst [vmem:[#allocation46_spill] sm:$0xff] %v10235_v49 }
 0x25f   : > { %12573 = vst [vmem:[#allocation47_spill] sm:$0xff] %v10237_v20 }
 0x260   : > { %7772 = vmatmul.mubr.msk.bf16.gmra.mrb[108].mxu0 %vm2986_vm0, %v10125_v17 }
 0x261   : > { %v7375_v50 = vpop.f32.mrb[64].mxu0 }
 0x262   : > { %v7376_v12 = vpop.f32.mrb[65].mxu0 }
 0x263   : > { %v10241_v47 = vadd.f32 %v7376_v12, %v7375_v50  ;;  %v7378_v55 = vpop.f32.mrb[66].mxu0 }
 0x264   : > { %v7379_v53 = vpop.f32.mrb[67].mxu0 }
 0x265   : > { %v10243_v43 = vadd.f32 %v7379_v53, %v7378_v55 }
 0x269   : > { %v7381_v22 = vpop.f32.mrb[68].mxu0 }
 0x26a   : > { %v7382_v48 = vpop.f32.mrb[69].mxu0 }
 0x26b   : > { %v10245_v62 = vadd.f32 %v7382_v48, %v7381_v22  ;;  %v7384_v44 = vpop.f32.mrb[70].mxu0 }
 0x26c   : > { %v7385_v19 = vpop.f32.mrb[71].mxu0 }
 0x26d   : > { %v10247_v2 = vadd.f32 %v7385_v19, %v7384_v44 }
 0x271   : > { %v7387_v29 = vpop.f32.mrb[72].mxu0 }
 0x272   : > { %v7388_v39 = vpop.f32.mrb[73].mxu0 }
 0x273   : > { %v10249_v15 = vadd.f32 %v7388_v39, %v7387_v29  ;;  %v7390_v45 = vpop.f32.mrb[74].mxu0 }
 0x274   : > { %v7391_v46 = vpop.f32.mrb[75].mxu0 }
 0x275   : > { %v10251_v26 = vadd.f32 %v7391_v46, %v7390_v45 }
 0x279   : > { %v7393_v50 = vpop.f32.mrb[76].mxu0 }
 0x27a   : > { %v7394_v12 = vpop.f32.mrb[77].mxu0  ;;  %v10320_v56 = vpop.permute.xlu0 %3453 }
 0x27b   : > { %v10253_v55 = vadd.f32 %v7394_v12, %v7393_v50  ;;  %v7396_v53 = vpop.f32.mrb[78].mxu0 }
 0x27c   : > { %v7397_v0 = vpop.f32.mrb[79].mxu0 }
 0x27d   : > { %v10255_v22 = vadd.f32 %v7397_v0, %v7396_v53 }
 0x281   : > { %v7399_v44 = vpop.f32.mrb[80].mxu0 }
 0x282   : > { %v2529_v48 = vpop.f32.mrb[64].mxu1  ;;  %v7400_v23 = vpop.f32.mrb[81].mxu0 }
 0x283   : > { %v2531_v32 = vpop.f32.mrb[65].mxu1  ;;  %v10259_v39 = vadd.f32 %v7400_v23, %v7399_v44  ;;  %v7402_v45 = vpop.f32.mrb[82].mxu0 }
 0x284   : > { %v2533_v19 = vpop.f32.mrb[66].mxu1  ;;  %v7403_v57 = vpop.f32.mrb[83].mxu0 }
 0x285   : > { %v10257_v31 = vpack.c.bf16 %v2533_v19, %v2529_v48  ;;  %v2535_v29 = vpop.f32.mrb[67].mxu1  ;;  %v10264_v50 = vadd.f32 %v7403_v57, %v7402_v45 }
 0x286   : > { %v10261_v46 = vpack.c.bf16 %v2535_v29, %v2531_v32 }
 0x287   : > { %7775 = vmatprep.subr.bf16.mxu1 %v10257_v31 }
 0x288   : > { %7776 = vmatpush3.bf16.msra.mxu1 %v10257_v31 }
 0x289   : > { %v7405_v53 = vpop.f32.mrb[84].mxu0 }
 0x28a   : > { %v2539_v0 = vpop.f32.mrb[68].mxu1  ;;  %v7406_v5 = vpop.f32.mrb[85].mxu0 }
 0x28b   : > { %v2541_v12 = vpop.f32.mrb[69].mxu1  ;;  %v10269_v23 = vadd.f32 %v7406_v5, %v7405_v53  ;;  %v7408_v44 = vpop.f32.mrb[86].mxu0 }
 0x28c   : > { %v2543_v20 = vpop.f32.mrb[70].mxu1  ;;  %v7409_v29 = vpop.f32.mrb[87].mxu0 }
 0x28d   : > { %v10267_v48 = vpack.c.bf16 %v2543_v20, %v2539_v0  ;;  %v2545_v19 = vpop.f32.mrb[71].mxu1  ;;  %v10274_v57 = vadd.f32 %v7409_v29, %v7408_v44 }
 0x28e   : > { %v10271_v32 = vpack.c.bf16 %v2545_v19, %v2541_v12 }
 0x28f   : > { %7777 = vmatprep.subr.bf16.mxu1 %v10267_v48 }
 0x290   : > { %7778 = vmatpush3.bf16.msra.mxu1 %v10267_v48 }
 0x291   : > { %v7411_v7 = vpop.f32.mrb[88].mxu0 }
 0x292   : > { %v2549_v45 = vpop.f32.mrb[72].mxu1  ;;  %v7412_v11 = vpop.f32.mrb[89].mxu0 }
 0x293   : > { %v2551_v54 = vpop.f32.mrb[73].mxu1  ;;  %v10277_v20 = vadd.f32 %v7412_v11, %v7411_v7  ;;  %v7414_v0 = vpop.f32.mrb[90].mxu0 }
 0x294   : > { %v2553_v58 = vpop.f32.mrb[74].mxu1  ;;  %v7415_v12 = vpop.f32.mrb[91].mxu0 }
 0x295   : > { %v10279_v5 = vpack.c.bf16 %v2553_v58, %v2549_v45  ;;  %v2555_v53 = vpop.f32.mrb[75].mxu1  ;;  %v10283_v6 = vadd.f32 %v7415_v12, %v7414_v0 }
 0x296   : > { %v10281_v19 = vpack.c.bf16 %v2555_v53, %v2551_v54 }
 0x297   : > { %7779 = vmatprep.subr.bf16.mxu1 %v10279_v5 }
 0x298   : > { %7780 = vmatpush3.bf16.msra.mxu1 %v10279_v5 }
 0x299   : > { %v7417_v29 = vpop.f32.mrb[92].mxu0 }
 0x29a   : > { %v2559_v44 = vpop.f32.mrb[76].mxu1  ;;  %v7418_v25 = vpop.f32.mrb[93].mxu0 }
 0x29b   : > { %v2561_v9 = vpop.f32.mrb[77].mxu1  ;;  %v10287_v11 = vadd.f32 %v7418_v25, %v7417_v29  ;;  %v7420_v7 = vpop.f32.mrb[94].mxu0 }
 0x29c   : > { %v2563_v60 = vpop.f32.mrb[78].mxu1  ;;  %v7421_v40 = vpop.f32.mrb[95].mxu0 }
 0x29d   : > { %v10289_v58 = vpack.c.bf16 %v2563_v60, %v2559_v44  ;;  %v2565_v45 = vpop.f32.mrb[79].mxu1  ;;  %v10293_v0 = vadd.f32 %v7421_v40, %v7420_v7 }
 0x29e   : > { %v10291_v54 = vpack.c.bf16 %v2565_v45, %v2561_v9 }
 0x29f   : > { %7781 = vmatprep.subr.bf16.mxu1 %v10289_v58 }
 0x2a0   : > { %7782 = vmatpush3.bf16.msra.mxu1 %v10289_v58 }
 0x2a2   : > { %v2569_v53 = vpop.f32.mrb[80].mxu1 }
 0x2a3   : > { %v2571_v12 = vpop.f32.mrb[81].mxu1 }
 0x2a4   : > { %v2573_v37 = vpop.f32.mrb[82].mxu1 }
 0x2a5   : > { %v10297_v21 = vpack.c.bf16 %v2573_v37, %v2569_v53  ;;  %v2575_v25 = vpop.f32.mrb[83].mxu1 }
 0x2a6   : > { %v10299_v29 = vpack.c.bf16 %v2575_v25, %v2571_v12 }
 0x2a7   : > { %7783 = vmatprep.subr.bf16.mxu1 %v10297_v21 }
 0x2a8   : > { %7784 = vmatpush3.bf16.msra.mxu1 %v10297_v21 }
 0x2aa   : > { %v2579_v9 = vpop.f32.mrb[84].mxu1 }
 0x2ab   : > { %v2581_v60 = vpop.f32.mrb[85].mxu1 }
 0x2ac   : > { %v2583_v40 = vpop.f32.mrb[86].mxu1 }
 0x2ad   : > { %v10303_v44 = vpack.c.bf16 %v2583_v40, %v2579_v9  ;;  %v2585_v7 = vpop.f32.mrb[87].mxu1 }
 0x2ae   : > { %v10305_v45 = vpack.c.bf16 %v2585_v7, %v2581_v60 }
 0x2af   : > { %7785 = vmatprep.subr.bf16.mxu1 %v10303_v44 }
 0x2b0   : > { %7786 = vmatpush3.bf16.msra.mxu1 %v10303_v44 }
 0x2b2   : > { %v2589_v37 = vpop.f32.mrb[88].mxu1 }
 0x2b3   : > { %v2591_v53 = vpop.f32.mrb[89].mxu1 }
 0x2b4   : > { %v2593_v12 = vpop.f32.mrb[90].mxu1 }
 0x2b5   : > { %v10309_v25 = vpack.c.bf16 %v2593_v12, %v2589_v37  ;;  %v2595_v4 = vpop.f32.mrb[91].mxu1 }
 0x2b6   : > { %v10311_v36 = vpack.c.bf16 %v2595_v4, %v2591_v53 }
 0x2b7   : > { %7787 = vmatprep.subr.bf16.mxu1 %v10309_v25 }
 0x2b8   : > { %7788 = vmatpush3.bf16.msra.mxu1 %v10309_v25 }
 0x2ba   : > { %v2599_v9 = vpop.f32.mrb[92].mxu1 }
 0x2bb   : > { %v2601_v40 = vpop.f32.mrb[93].mxu1 }
 0x2bc   : > { %v2603_v60 = vpop.f32.mrb[94].mxu1 }
 0x2bd   : > { %v10315_v7 = vpack.c.bf16 %v2603_v60, %v2599_v9  ;;  %v2605_v3 = vpop.f32.mrb[95].mxu1 }
 0x2be   : > { %v10317_v1 = vpack.c.bf16 %v2605_v3, %v2601_v40 }
 0x2bf   : > { %7789 = vmatprep.subr.bf16.mxu1 %v10315_v7 }
 0x2c0   : > { %7790 = vmatpush3.bf16.msra.mxu1 %v10315_v7 }
 0x2c1   : > { %8375 = vmatprep.subr.msk.bf16.mxu1 %vm2986_vm0, %v10320_v56 }
 0x2c2   : > { %v7729_v4 = vpop.f32.mrb[96].mxu1 }
 0x2c3   : > { %v2739_v37 = vpop.f32.mrb[97].mxu1  ;;  %v2748_v53 = vadd.f32 %v7729_v4, %v10245_v62 }
 0x2c4   : > { %v2740_v12 = vadd.f32 %v10241_v47, %v2739_v37  ;;  %v7730_v9 = vpop.f32.mrb[98].mxu1 }
 0x2c5   : > { %v2742_v60 = vpop.f32.mrb[99].mxu1  ;;  %v2751_v3 = vadd.f32 %v7730_v9, %v10247_v2 }
 0x2c6   : > { %v2743_v40 = vadd.f32 %v10243_v43, %v2742_v60 }
 0x2c7   : > { %v10329_v27 = vpack.c.bf16 %v2751_v3, %v2748_v53 }
 0x2c8   : > { %v10331_v8 = vpack.c.bf16 %v2743_v40, %v2740_v12 }
 0x2c9   : > { %12574 = vst [vmem:[#allocation48_spill] sm:$0xff] %v10329_v27  ;;  %v10428_v27 = vld [vmem:[#allocation7 + $0x58] sm:$0xff] }
 0x2ca   : > { %12575 = vst [vmem:[#allocation49_spill] sm:$0xff] %v10331_v8  ;;  %v7733_v49 = vpop.f32.mrb[100].mxu1 }
 0x2cb   : > { %v2755_v34 = vpop.f32.mrb[101].mxu1  ;;  %v2764_v10 = vadd.f32 %v7733_v49, %v10253_v55 }
 0x2cc   : > { %v2756_v59 = vadd.f32 %v10249_v15, %v2755_v34  ;;  %v7734_v41 = vpop.f32.mrb[102].mxu1 }
 0x2cd   : > { %v2758_v62 = vpop.f32.mrb[103].mxu1  ;;  %v2767_v47 = vadd.f32 %v7734_v41, %v10255_v22 }
 0x2ce   : > { %v2759_v4 = vadd.f32 %v10251_v26, %v2758_v62 }
 0x2cf   : > { %v10337_v37 = vpack.c.bf16 %v2767_v47, %v2764_v10  ;;  %v10359_v47 = vld [vmem:[#allocation7] sm:$0xff] }
 0x2d0   : > { %v10339_v2 = vpack.c.bf16 %v2759_v4, %v2756_v59 }
 0x2d1   : > { %12576 = vst [vmem:[#allocation50_spill] sm:$0xff] %v10337_v37  ;;  %v10416_v37 = vld [vmem:[#allocation7 + $0x50] sm:$0xff] }
 0x2d2   : > { %12577 = vst [vmem:[#allocation51_spill] sm:$0xff] %v10339_v2  ;;  %v7737_v43 = vpop.f32.mrb[104].mxu1 }
 0x2d3   : > { %v2771_v53 = vpop.f32.mrb[105].mxu1  ;;  %v2780_v12 = vadd.f32 %v7737_v43, %v10269_v23 }
 0x2d4   : > { %v2772_v9 = vadd.f32 %v10259_v39, %v2771_v53  ;;  %v7738_v60 = vpop.f32.mrb[106].mxu1  ;;  %v10367_v53 = vld [vmem:[#allocation7 + $0x18] sm:$0xff] }
 0x2d5   : > { %v2774_v49 = vpop.f32.mrb[107].mxu1  ;;  %v2783_v34 = vadd.f32 %v7738_v60, %v10274_v57 }
 0x2d6   : > { %v2775_v15 = vadd.f32 %v10264_v50, %v2774_v49  ;;  %v10357_v50 = vld [vmem:[#allocation7 + $0x10] sm:$0xff] }
 0x2d7   : > { %v10345_v55 = vpack.c.bf16 %v2783_v34, %v2780_v12  ;;  %v10370_v12 = vld [vmem:[#allocation7 + $0x8] sm:$0xff] }
 0x2d8   : > { %v10347_v41 = vpack.c.bf16 %v2775_v15, %v2772_v9 }
 0x2d9   : > { %12578 = vst [vmem:[#allocation52_spill] sm:$0xff] %v10345_v55  ;;  %v10404_v55 = vld [vmem:[#allocation7 + $0x28] sm:$0xff] }
 0x2da   : > { %12579 = vst [vmem:[#allocation53_spill] sm:$0xff] %v10347_v41  ;;  %v7741_v10 = vpop.f32.mrb[108].mxu1 }
 0x2db   : > { %v2787_v26 = vpop.f32.mrb[109].mxu1  ;;  %v2796_v59 = vadd.f32 %v7741_v10, %v10287_v11 }
 0x2dc   : > { %v2788_v22 = vadd.f32 %v10277_v20, %v2787_v26  ;;  %v7742_v3 = vpop.f32.mrb[110].mxu1 }
 0x2dd   : > { %v2790_v23 = vpop.f32.mrb[111].mxu1  ;;  %v2799_v39 = vadd.f32 %v7742_v3, %v10293_v0 }
 0x2de   : > { %v2791_v40 = vadd.f32 %v10283_v6, %v2790_v23 }
 0x2df   : > { %v10353_v62 = vpack.c.bf16 %v2799_v39, %v2796_v59 }
 0x2e0   : > { %v10355_v57 = vpack.c.bf16 %v2791_v40, %v2788_v22 }
 0x2e1   : > { %12580 = vst [vmem:[#allocation54_spill] sm:$0xff] %v10353_v62 }
 0x2e2   : > { %12581 = vst [vmem:[#allocation55_spill] sm:$0xff] %v10355_v57  ;;  %v10395_v57 = vld [vmem:[#allocation7 + $0x38] sm:$0xff] }
 0x31b   : > { %v7761_v4 = vpop.f32.mrb[96].mxu0 }
 0x31c   : > { %v10362_v43 = vadd.f32 %v7761_v4, %v10357_v50  ;;  %v3069_v11 = vpop.f32.mrb[97].mxu0 }
 0x31d   : > { %v10365_v20 = vadd.f32 %v3069_v11, %v10359_v47  ;;  %v7762_v0 = vpop.f32.mrb[98].mxu0  ;;  %v10385_v11 = vld [vmem:[#allocation7 + $0x20] sm:$0xff] }
 0x31e   : > { %3136 = vmax.xlane.f32.xlu1 %v10362_v43  ;;  %v3072_v6 = vpop.f32.mrb[99].mxu0  ;;  %v10374_v9 = vadd.f32 %v7762_v0, %v10367_v53  ;;  %v10387_v0 = vld [vmem:[#allocation7 + $0x30] sm:$0xff] }
 0x31f   : > { %3132 = vmax.xlane.f32.xlu0 %v10365_v20  ;;  %v10377_v60 = vadd.f32 %v3072_v6, %v10370_v12 }
 0x322   : > { %3138 = vmax.xlane.f32.xlu1 %v10374_v9 }
 0x323   : > { %v7765_v49 = vpop.f32.mrb[100].mxu0  ;;  %3134 = vmax.xlane.f32.xlu0 %v10377_v60 }
 0x324   : > { %v3085_v34 = vpop.f32.mrb[101].mxu0  ;;  %v10393_v62 = vadd.f32 %v7765_v49, %v10387_v0 }
 0x325   : > { %v7766_v15 = vpop.f32.mrb[102].mxu0  ;;  %v10390_v6 = vadd.f32 %v3085_v34, %v10385_v11  ;;  %v10409_v34 = vld [vmem:[#allocation7 + $0x48] sm:$0xff] }
 0x326   : > { %v3088_v10 = vpop.f32.mrb[103].mxu0 }
 0x327   : > { %v10414_v49 = vadd.f32 %v3088_v10, %v10404_v55 }
 0x32b   : > { %v7769_v26 = vpop.f32.mrb[104].mxu0 }
 0x32c   : > { %v3101_v59 = vpop.f32.mrb[105].mxu0 }
 0x32d   : > { %v7770_v22 = vpop.f32.mrb[106].mxu0 }
 0x32e   : > { %v3104_v3 = vpop.f32.mrb[107].mxu0  ;;  %v10436_v10 = vadd.f32 %v7770_v22, %v10428_v27 }
 0x32f   : > { %v10419_v2 = vadd.f32 %v3104_v3, %v10409_v34  ;;  %v10438_v3 = vld [vmem:[#allocation7 + $0x60] sm:$0xff] }
 0x333   : > { %3459 = vrot.lane.b32.xlu1 %v10157_v42, %s9551_s24  ;;  %v7773_v23 = vpop.f32.mrb[108].mxu0  ;;  %v10397_v42 = vld [vmem:[#allocation7 + $0x40] sm:$0xff] }
 0x334   : > { %v3117_v39 = vpop.f32.mrb[109].mxu0  ;;  %v10407_v41 = vadd.f32 %v3101_v59, %v10397_v42  ;;  %v10426_v59 = vadd.f32 %v7769_v26, %v10416_v37  ;;  %v10444_v26 = vld [vmem:[#allocation7 + $0x78] sm:$0xff] }
 0x335   : > { %v7774_v40 = vpop.f32.mrb[110].mxu0  ;;  %v10442_v33 = vadd.f32 %v3117_v39, %v10438_v3 }
 0x336   : > { %v3120_v4 = vpop.f32.mrb[111].mxu0 }
 0x337   : > { %v10454_v22 = vadd.f32 %v3120_v4, %v10450_v30 }
 0x339   : > { %3461 = vrot.lane.b32.xlu0 %v10167_v18, %s9551_s24  ;;  %v10402_v18 = vadd.f32 %v7766_v15, %v10395_v57  ;;  %v10421_v15 = vld [vmem:[#allocation7 + $0x70] sm:$0xff] }
 0x33a   : > { %v10431_v8 = vadd.f32 %v7773_v23, %v10421_v15  ;;  %v10448_v23 = vadd.f32 %v7774_v40, %v10444_v26 }
 0x357   : > { %3140 = vmax.xlane.f32.xlu1 %v10390_v6 }
 0x358   : > { %3144 = vmax.xlane.f32.xlu0 %v10393_v62 }
 0x35b   : > { %3146 = vmax.xlane.f32.xlu1 %v10402_v18 }
 0x35c   : > { %3148 = vmax.xlane.f32.xlu0 %v10407_v41 }
 0x35f   : > { %3142 = vmax.xlane.f32.xlu1 %v10414_v49 }
 0x360   : > { %3150 = vmax.xlane.f32.xlu0 %v10419_v2 }
 0x363   : > { %3152 = vmax.xlane.f32.xlu1 %v10426_v59 }
 0x364   : > { %3160 = vmax.xlane.f32.xlu0 %v10431_v8 }
 0x367   : > { %3154 = vmax.xlane.f32.xlu1 %v10436_v10 }
 0x36b   : > { %3156 = vmax.xlane.f32.xlu1 %v10442_v33 }
 0x36f   : > { %3162 = vmax.xlane.f32.xlu1 %v10448_v23 }
 0x373   : > { %3158 = vmax.xlane.f32.xlu1 %v10454_v22 }
 0x37a   : > { %3465 = vrot.lane.b32.xlu0 %v10191_v35, %s9551_s24 }
 0x37e   : > { %3467 = vrot.lane.b32.xlu0 %v10203_v61, %s9551_s24 }
 0x382   : > { %3429 = vrot.lane.b32.xlu0 %v10027_v16, %s9551_s24  ;;  %v3456_v16 = vpop.permute.xlu1 %3455 }
 0x383   : > { %v3497_v39 = vsel %vm2986_vm0, %v3456_v16, 0 }
 0x384   : > { %3463 = vrot.lane.b32.xlu1 %v10179_v24, %s9551_s24 }
 0x386   : > { %3433 = vrot.lane.b32.xlu0 %v10060_v52, %s9551_s24 }
 0x388   : > { %3431 = vrot.lane.b32.xlu1 %v10043_v38, %s9551_s24  ;;  %v3458_v38 = vpop.permute.xlu0 %3457 }
 0x389   : > { %v3500_v40 = vsel %vm2986_vm0, %v3458_v38, 0 }
 0x38a   : > { %3437 = vrot.lane.b32.xlu0 %v10092_v13, %s9551_s24 }
 0x38c   : > { %3435 = vrot.lane.b32.xlu1 %v10080_v28, %s9551_s24 }
 0x38e   : > { %3441 = vrot.lane.b32.xlu0 %v10115_v63, %s9551_s24 }
 0x390   : > { %3439 = vrot.lane.b32.xlu1 %v10105_v51, %s9551_s24 }
 0x392   : > { %3742 = vrot.lane.b32.xlu0 %v10257_v31, %s9551_s24 }
 0x394   : > { %3443 = vrot.lane.b32.xlu1 %v10125_v17, %s9551_s24 }
 0x396   : > { %3746 = vrot.lane.b32.xlu0 %v10279_v5, %s9551_s24 }
 0x398   : > { %3744 = vrot.lane.b32.xlu1 %v10267_v48, %s9551_s24 }
 0x39c   : > { %3748 = vrot.lane.b32.xlu1 %v10289_v58, %s9551_s24 }
 0x3a0   : > { %3750 = vrot.lane.b32.xlu1 %v10297_v21, %s9551_s24 }
 0x3a4   : > { %3752 = vrot.lane.b32.xlu1 %v10303_v44, %s9551_s24 }
 0x3ab   : > { %v3137_v52 = vpop.xlane.xlu1 %3136 }
 0x3ac   : > { %v3133_v28 = vpop.xlane.xlu0 %3132  ;;  %v3166_v51 = vsub.f32 %v10362_v43, %v3137_v52 }
 0x3ad   : > { %v3164_v13 = vsub.f32 %v10365_v20, %v3133_v28 }
 0x3ae   : > { %v3184_v61 = vmul.f32 1.442695, %v3166_v51 }
 0x3af   : > { %v3180_v63 = vmul.f32 1.442695, %v3164_v13  ;;  %v3139_v17 = vpop.xlane.xlu1 %3138 }
 0x3b0   : > { %v3167_v31 = vsub.f32 %v10374_v9, %v3139_v17  ;;  %v3135_v24 = vpop.xlane.xlu0 %3134 }
 0x3b1   : > { %v3165_v35 = vsub.f32 %v10377_v60, %v3135_v24  ;;  %8916 = vpow2.f32 %v3180_v63  ;;  %v3494_v60 = vsel %vm2986_vm0, %v10320_v56, 0 }
 0x3b2   : > { %v3186_v21 = vmul.f32 1.442695, %v3167_v31 }
 0x3b3   : > { %v3182_v48 = vmul.f32 1.442695, %v3165_v35  ;;  %v3460_v4 = vpop.permute.xlu1 %3459 }
 0x3b4   : > { %8918 = vpow2.f32 %v3186_v21  ;;  %v3503_v52 = vsel %vm2986_vm0, %v3460_v4, 0  ;;  %v3462_v28 = vpop.permute.xlu0 %3461 }
 0x3b5   : > { %8920 = vpow2.f32 %v3182_v48  ;;  %v3506_v56 = vsel %vm2986_vm0, %v3462_v28, 0 }
 0x3b6   : > { %8922 = vpow2.f32 %v3184_v61 }
 0x3bb   : > { %v10495_v5 = vpop.eup %8916 }
 0x3bc   : > { %12582 = vst [vmem:[#allocation56_spill] sm:$0xff] %v10495_v5 }
 0x3be   : > { %v10497_v58 = vpop.eup %8918 }
 0x3bf   : > { %12583 = vst [vmem:[#allocation57_spill] sm:$0xff] %v10497_v58  ;;  %v10499_v44 = vpop.eup %8920 }
 0x3c0   : > { %12584 = vst [vmem:[#allocation58_spill] sm:$0xff] %v10499_v44  ;;  %v10501_v43 = vpop.eup %8922  ;;  %v3244_v20 = vpack.c.bf16 %v10499_v44, %v10495_v5 }
 0x3c1   : > { %12585 = vst [vmem:[#allocation59_spill] sm:$0xff] %v10501_v43  ;;  %v3245_v9 = vpack.c.bf16 %v10497_v58, %v10501_v43 }
 0x3c2   : > { %7791 = vmatprep.mubr.bf16.mxu1 %v3244_v20 }
 0x3c3   : > { %7792 = vmatmul.mubr.bf16.vlgmr.msra.gmra.mrb[112].mxu1 %v3245_v9 }
 0x3c4   : > { %7808 = vmatpush3.bf16.xpose.msra.mxu1 %v3494_v60 }
 0x3c5   : > { %8376 = vmatprep.subr.msk.bf16.mxu1 %vm2986_vm0, %v3456_v16 }
 0x3cc   : > { %7810 = vmatpush3.bf16.xpose.msra.mxu1 %v3497_v39 }
 0x3cd   : > { %8377 = vmatprep.subr.msk.bf16.mxu1 %vm2986_vm0, %v3458_v38 }
 0x3d4   : > { %7812 = vmatpush3.bf16.xpose.msra.mxu1 %v3500_v40 }
 0x3d5   : > { %8378 = vmatprep.subr.msk.bf16.mxu1 %vm2986_vm0, %v3460_v4 }
 0x3dc   : > { %7814 = vmatpush3.bf16.xpose.msra.mxu1 %v3503_v52 }
 0x3dd   : > { %8379 = vmatprep.subr.msk.bf16.mxu1 %vm2986_vm0, %v3462_v28 }
 0x3e4   : > { %7816 = vmatpush3.bf16.xpose.msra.mxu1 %v3506_v56  ;;  %v3141_v13 = vpop.xlane.xlu1 %3140 }
 0x3e5   : > { %v3168_v16 = vsub.f32 %v10390_v6, %v3141_v13  ;;  %v3145_v51 = vpop.xlane.xlu0 %3144 }
 0x3e6   : > { %v3170_v63 = vsub.f32 %v10393_v62, %v3145_v51 }
 0x3e7   : > { %v3188_v17 = vmul.f32 1.442695, %v3168_v16 }
 0x3e8   : > { %v3147_v38 = vpop.xlane.xlu1 %3146  ;;  %v3192_v35 = vmul.f32 1.442695, %v3170_v63 }
 0x3e9   : > { %v3171_v31 = vsub.f32 %v10402_v18, %v3147_v38  ;;  %v3149_v24 = vpop.xlane.xlu0 %3148  ;;  %8924 = vpow2.f32 %v3188_v17 }
 0x3ea   : > { %v3172_v61 = vsub.f32 %v10407_v41, %v3149_v24  ;;  %8926 = vpow2.f32 %v3192_v35 }
 0x3eb   : > { %v3194_v21 = vmul.f32 1.442695, %v3171_v31 }
 0x3ec   : > { %v3196_v48 = vmul.f32 1.442695, %v3172_v61  ;;  %v3143_v20 = vpop.xlane.xlu1 %3142 }
 0x3ed   : > { %v3169_v9 = vsub.f32 %v10414_v49, %v3143_v20  ;;  %v3151_v60 = vpop.xlane.xlu0 %3150  ;;  %8928 = vpow2.f32 %v3194_v21 }
 0x3ee   : > { %v3173_v6 = vsub.f32 %v10419_v2, %v3151_v60  ;;  %8930 = vpow2.f32 %v3196_v48 }
 0x3ef   : > { %v3190_v62 = vmul.f32 1.442695, %v3169_v9 }
 0x3f0   : > { %v3198_v39 = vmul.f32 1.442695, %v3173_v6  ;;  %v3153_v40 = vpop.xlane.xlu1 %3152 }
 0x3f1   : > { %8932 = vpow2.f32 %v3190_v62  ;;  %v3174_v18 = vsub.f32 %v10426_v59, %v3153_v40  ;;  %v3161_v4 = vpop.xlane.xlu0 %3160 }
 0x3f2   : > { %8934 = vpow2.f32 %v3198_v39  ;;  %v3178_v20 = vsub.f32 %v10431_v8, %v3161_v4 }
 0x3f3   : > { %v3200_v41 = vmul.f32 1.442695, %v3174_v18  ;;  %v10525_v49 = vpop.eup %8924 }
 0x3f4   : > { %v3155_v52 = vpop.xlane.xlu1 %3154  ;;  %12586 = vst [vmem:[#allocation60_spill] sm:$0xff] %v10525_v49  ;;  %v10527_v16 = vpop.eup %8926 }
 0x3f5   : > { %v3175_v28 = vsub.f32 %v10436_v10, %v3155_v52  ;;  %v3466_v56 = vpop.permute.xlu0 %3465  ;;  %12587 = vst [vmem:[#allocation61_spill] sm:$0xff] %v10527_v16  ;;  %8936 = vpow2.f32 %v3200_v41 }
 0x3f7   : > { %v3202_v13 = vmul.f32 1.442695, %v3175_v28  ;;  %v10529_v51 = vpop.eup %8928 }
 0x3f8   : > { %v3157_v2 = vpop.xlane.xlu1 %3156  ;;  %12588 = vst [vmem:[#allocation62_spill] sm:$0xff] %v10529_v51  ;;  %v10531_v38 = vpop.eup %8930  ;;  %v3247_v21 = vpack.c.bf16 %v10529_v51, %v10527_v16 }
 0x3f9   : > { %8938 = vpow2.f32 %v3202_v13  ;;  %v3468_v63 = vpop.permute.xlu0 %3467  ;;  %12589 = vst [vmem:[#allocation63_spill] sm:$0xff] %v10531_v38  ;;  %v3176_v17 = vsub.f32 %v10442_v33, %v3157_v2 }
 0x3fb   : > { %v10533_v59 = vpop.eup %8932  ;;  %v3204_v9 = vmul.f32 1.442695, %v3176_v17 }
 0x3fc   : > { %12590 = vst [vmem:[#allocation64_spill] sm:$0xff] %v10533_v59  ;;  %v10536_v31 = vpop.eup %8934  ;;  %v3163_v10 = vpop.xlane.xlu1 %3162  ;;  %v3246_v24 = vpack.c.bf16 %v10533_v59, %v10525_v49 }
 0x3fd   : > { %12591 = vst [vmem:[#allocation65_spill] sm:$0xff] %v10536_v31  ;;  %v3179_v35 = vsub.f32 %v10448_v23, %v3163_v10  ;;  %v3430_v61 = vpop.permute.xlu0 %3429  ;;  %v3248_v48 = vpack.c.bf16 %v10536_v31, %v10531_v38  ;;  %v3208_v23 = vmul.f32 1.442695, %v3178_v20  ;;  %8940 = vpow2.f32 %v3204_v9 }
 0x3fe   : > { %7795 = vmatprep.mubr.bf16.mxu1 %v3246_v24  ;;  %v3512_v10 = vsel %vm2986_vm0, %v3466_v56, 0 }
 0x3ff   : > { %7796 = vmatmul.mubr.bf16.gmra.mrb[116].mxu1 %v3247_v21  ;;  %v3210_v33 = vmul.f32 1.442695, %v3179_v35  ;;  %v10547_v39 = vpop.eup %8936 }
 0x400   : > { %v3159_v60 = vpop.xlane.xlu1 %3158  ;;  %7799 = vmatprep.mubr.bf16.mxu1 %v3248_v48  ;;  %12592 = vst [vmem:[#allocation66_spill] sm:$0xff] %v10547_v39 }
 0x401   : > { %v3177_v6 = vsub.f32 %v10454_v22, %v3159_v60  ;;  %v3434_v62 = vpop.permute.xlu0 %3433  ;;  %8942 = vpow2.f32 %v3210_v33  ;;  %v3515_v33 = vsel %vm2986_vm0, %v3468_v63, 0 }
 0x403   : > { %v10549_v40 = vpop.eup %8938  ;;  %v3206_v18 = vmul.f32 1.442695, %v3177_v6 }
 0x404   : > { %12593 = vst [vmem:[#allocation67_spill] sm:$0xff] %v10549_v40  ;;  %v3464_v41 = vpop.permute.xlu1 %3463  ;;  %v3249_v8 = vpack.c.bf16 %v10549_v40, %v10547_v39 }
 0x405   : > { %8944 = vpow2.f32 %v3206_v18  ;;  %8380 = vmatprep.subr.msk.bf16.mxu1 %vm2986_vm0, %v3464_v41  ;;  %v3438_v4 = vpop.permute.xlu0 %3437  ;;  %v3509_v52 = vsel %vm2986_vm0, %v3464_v41, 0 }
 0x406   : > { %8946 = vpow2.f32 %v3208_v23  ;;  %7818 = vmatpush3.bf16.xpose.msra.mxu1 %v3509_v52 }
 0x407   : > { %7800 = vmatmul.mubr.bf16.gmra.mrb[120].mxu1 %v3249_v8  ;;  %8381 = vmatprep.subr.msk.bf16.mxu1 %vm2986_vm0, %v3466_v56  ;;  %v10556_v2 = vpop.eup %8940 }
 0x408   : > { %v3432_v22 = vpop.permute.xlu1 %3431  ;;  %12594 = vst [vmem:[#allocation68_spill] sm:$0xff] %v10556_v2 }
 0x409   : > { %v3442_v28 = vpop.permute.xlu0 %3441 }
 0x40b   : > { %v10559_v24 = vpop.eup %8942 }
 0x40c   : > { %v3436_v13 = vpop.permute.xlu1 %3435  ;;  %12595 = vst [vmem:[#allocation69_spill] sm:$0xff] %v10559_v24 }
 0x40d   : > { %v3743_v17 = vpop.permute.xlu0 %3742 }
 0x40e   : > { %7820 = vmatpush3.bf16.xpose.msra.mxu1 %v3512_v10  ;;  %7839 = vmatprep.subr.bf16.mxu0 %v3743_v17 }
 0x40f   : > { %v10561_v35 = vpop.eup %8944  ;;  %8382 = vmatprep.subr.msk.bf16.mxu1 %vm2986_vm0, %v3468_v63  ;;  %7840 = vmatpush3.bf16.msra.mxu0 %v3743_v17 }
 0x410   : > { %12596 = vst [vmem:[#allocation70_spill] sm:$0xff] %v10561_v35  ;;  %v10564_v21 = vpop.eup %8946  ;;  %v3440_v48 = vpop.permute.xlu1 %3439  ;;  %v3250_v20 = vpack.c.bf16 %v10561_v35, %v10556_v2 }
 0x411   : > { %12597 = vst [vmem:[#allocation71_spill] sm:$0xff] %v10564_v21  ;;  %v3251_v9 = vpack.c.bf16 %v10559_v24, %v10564_v21  ;;  %v3747_v6 = vpop.permute.xlu0 %3746 }
 0x412   : > { %7803 = vmatprep.mubr.bf16.mxu1 %v3250_v20 }
 0x413   : > { %7804 = vmatmul.mubr.bf16.gmra.mrb[124].mxu1 %v3251_v9 }
 0x414   : > { %v3444_v56 = vpop.permute.xlu1 %3443  ;;  %7823 = vmatprep.mubr.msk.bf16.mxu1 %vm2986_vm0, %v3430_v61 }
 0x416   : > { %7822 = vmatpush3.bf16.xpose.msra.mxu1 %v3515_v33 }
 0x417   : > { %7903 = vmatprep.subr.bf16.mxu1 %v10261_v46 }
 0x418   : > { %v3745_v60 = vpop.permute.xlu1 %3744 }
 0x419   : > { %7841 = vmatprep.subr.bf16.mxu0 %v3745_v60 }
 0x41a   : > { %7842 = vmatpush3.bf16.msra.mxu0 %v3745_v60 }
 0x41b   : > { %7843 = vmatprep.subr.bf16.mxu0 %v3747_v6 }
 0x41c   : > { %v3749_v23 = vpop.permute.xlu1 %3748 }
 0x41d   : > { %7824 = vmatmul.mubr.msk.bf16.vlgmr.msra.gmra.mrb[128].mxu1 %vm2986_vm0, %v3432_v22 }
 0x41e   : > { %7827 = vmatprep.mubr.msk.bf16.mxu1 %vm2986_vm0, %v3434_v62  ;;  %7844 = vmatpush3.bf16.msra.mxu0 %v3747_v6 }
 0x41f   : > { %7904 = vmatpush3.bf16.msra.mxu1 %v10261_v46  ;;  %7845 = vmatprep.subr.bf16.mxu0 %v3749_v23 }
 0x420   : > { %7905 = vmatprep.subr.bf16.mxu1 %v10271_v32  ;;  %v3751_v63 = vpop.permute.xlu1 %3750 }
 0x422   : > { %7846 = vmatpush3.bf16.msra.mxu0 %v3749_v23 }
 0x423   : > { %7906 = vmatpush3.bf16.msra.mxu1 %v10271_v32  ;;  %7847 = vmatprep.subr.bf16.mxu0 %v3751_v63 }
 0x424   : > { %7907 = vmatprep.subr.bf16.mxu1 %v10281_v19  ;;  %v3753_v61 = vpop.permute.xlu1 %3752 }
 0x425   : > { %7828 = vmatmul.mubr.msk.bf16.gmra.mrb[132].mxu1 %vm2986_vm0, %v3436_v13 }
 0x426   : > { %7831 = vmatprep.mubr.msk.bf16.mxu1 %vm2986_vm0, %v3438_v4  ;;  %7848 = vmatpush3.bf16.msra.mxu0 %v3751_v63 }
 0x427   : > { %7908 = vmatpush3.bf16.msra.mxu1 %v10281_v19  ;;  %7849 = vmatprep.subr.bf16.mxu0 %v3753_v61 }
 0x428   : > { %7909 = vmatprep.subr.bf16.mxu1 %v10291_v54 }
 0x42a   : > { %7850 = vmatpush3.bf16.msra.mxu0 %v3753_v61 }
 0x42b   : > { %7910 = vmatpush3.bf16.msra.mxu1 %v10291_v54 }
 0x42c   : > { %7911 = vmatprep.subr.bf16.mxu1 %v10299_v29 }
 0x42d   : > { %7832 = vmatmul.mubr.msk.bf16.gmra.mrb[136].mxu1 %vm2986_vm0, %v3440_v48 }
 0x42e   : > { %7835 = vmatprep.mubr.msk.bf16.mxu1 %vm2986_vm0, %v3442_v28 }
 0x42f   : > { %7912 = vmatpush3.bf16.msra.mxu1 %v10299_v29 }
 0x430   : > { %7913 = vmatprep.subr.bf16.mxu1 %v10305_v45 }
 0x433   : > { %7914 = vmatpush3.bf16.msra.mxu1 %v10305_v45 }
 0x434   : > { %7915 = vmatprep.subr.bf16.mxu1 %v10311_v36 }
 0x435   : > { %7836 = vmatmul.mubr.msk.bf16.gmra.mrb[140].mxu1 %vm2986_vm0, %v3444_v56 }
 0x437   : > { %7916 = vmatpush3.bf16.msra.mxu1 %v10311_v36 }
 0x438   : > { %7917 = vmatprep.subr.bf16.mxu1 %v10317_v1 }
 0x43b   : > { %7918 = vmatpush3.bf16.msra.mxu1 %v10317_v1 }
 0x496   : > { %v10595_v62 = vpop.f32.mrb[112].mxu1 }
 0x497   : > { %12598 = vst [vmem:[#allocation72_spill] sm:$0xff] %v10595_v62  ;;  %v10597_v18 = vpop.f32.mrb[113].mxu1 }
 0x498   : > { %12599 = vst [vmem:[#allocation73_spill] sm:$0xff] %v10597_v18  ;;  %v10599_v41 = vpop.f32.mrb[114].mxu1 }
 0x499   : > { %12600 = vst [vmem:[#allocation74_spill] sm:$0xff] %v10599_v41  ;;  %v10601_v8 = vpop.f32.mrb[115].mxu1 }
 0x49a   : > { %12601 = vst [vmem:[#allocation75_spill] sm:$0xff] %v10601_v8 }
 0x4d2   : > { %v10603_v4 = vpop.f32.mrb[116].mxu1 }
 0x4d3   : > { %12602 = vst [vmem:[#allocation76_spill] sm:$0xff] %v10603_v4  ;;  %v10605_v52 = vpop.f32.mrb[117].mxu1 }
 0x4d4   : > { %12603 = vst [vmem:[#allocation77_spill] sm:$0xff] %v10605_v52  ;;  %v10607_v22 = vpop.f32.mrb[118].mxu1 }
 0x4d5   : > { %12604 = vst [vmem:[#allocation78_spill] sm:$0xff] %v10607_v22  ;;  %v10609_v28 = vpop.f32.mrb[119].mxu1 }
 0x4d6   : > { %12605 = vst [vmem:[#allocation79_spill] sm:$0xff] %v10609_v28 }
 0x4da   : > { %v10611_v13 = vpop.f32.mrb[120].mxu1 }
 0x4db   : > { %12606 = vst [vmem:[#allocation80_spill] sm:$0xff] %v10611_v13  ;;  %v10613_v17 = vpop.f32.mrb[121].mxu1 }
 0x4dc   : > { %12607 = vst [vmem:[#allocation81_spill] sm:$0xff] %v10613_v17  ;;  %v10615_v10 = vpop.f32.mrb[122].mxu1 }
 0x4dd   : > { %12608 = vst [vmem:[#allocation82_spill] sm:$0xff] %v10615_v10  ;;  %v10617_v48 = vpop.f32.mrb[123].mxu1 }
 0x4de   : > { %12609 = vst [vmem:[#allocation83_spill] sm:$0xff] %v10617_v48 }
 0x4e6   : > { %v10619_v20 = vpop.f32.mrb[124].mxu1 }
 0x4e7   : > { %12610 = vst [vmem:[#allocation84_spill] sm:$0xff] %v10619_v20  ;;  %v10621_v9 = vpop.f32.mrb[125].mxu1 }
 0x4e8   : > { %12611 = vst [vmem:[#allocation85_spill] sm:$0xff] %v10621_v9  ;;  %v10623_v56 = vpop.f32.mrb[126].mxu1 }
 0x4e9   : > { %12612 = vst [vmem:[#allocation86_spill] sm:$0xff] %v10623_v56  ;;  %v10625_v33 = vpop.f32.mrb[127].mxu1 }
 0x4ea   : > { %12613 = vst [vmem:[#allocation87_spill] sm:$0xff] %v10625_v33 }
 0x4f0   : > { %v7825_v60 = vpop.f32.mrb[128].mxu1 }
 0x4f1   : > { %v3560_v6 = vadd.f32 %v7825_v60, %v10357_v50  ;;  %v3551_v23 = vpop.f32.mrb[129].mxu1 }
 0x4f2   : > { %v7826_v63 = vpop.f32.mrb[130].mxu1  ;;  %v3552_v10 = vadd.f32 %v3551_v23, %v10359_v47 }
 0x4f3   : > { %3618 = vmax.xlane.f32.xlu0 %v3560_v6  ;;  %v3554_v61 = vpop.f32.mrb[131].mxu1  ;;  %v3563_v9 = vadd.f32 %v7826_v63, %v10367_v53 }
 0x4f4   : > { %v3555_v13 = vadd.f32 %v3554_v61, %v10370_v12 }
 0x4f6   : > { %3616 = vmax.xlane.f32.xlu1 %v3555_v13 }
 0x4f7   : > { %3614 = vmax.xlane.f32.xlu0 %v3552_v10 }
 0x4f8   : > { %v7829_v20 = vpop.f32.mrb[132].mxu1 }
 0x4f9   : > { %v3567_v24 = vpop.f32.mrb[133].mxu1 }
 0x4fa   : > { %v7830_v56 = vpop.f32.mrb[134].mxu1  ;;  %v10643_v22 = vadd.f32 %v3567_v24, %v10385_v11 }
 0x4fb   : > { %3620 = vmax.xlane.f32.xlu0 %v3563_v9  ;;  %v3570_v33 = vpop.f32.mrb[135].mxu1  ;;  %v10659_v24 = vadd.f32 %v7830_v56, %v10395_v57 }
 0x4fc   : > { %v10636_v63 = vadd.f32 %v3570_v33, %v10404_v55 }
 0x500   : > { %v7833_v21 = vpop.f32.mrb[136].mxu1 }
 0x501   : > { %v3583_v48 = vpop.f32.mrb[137].mxu1 }
 0x502   : > { %v7834_v60 = vpop.f32.mrb[138].mxu1 }
 0x503   : > { %v3586_v17 = vpop.f32.mrb[139].mxu1 }
 0x504   : > { %v10640_v4 = vadd.f32 %v3586_v17, %v10409_v34 }
 0x507   : > { %3756 = vrot.lane.b32.xlu1 %v10315_v7, %s9551_s24  ;;  %v10648_v7 = vadd.f32 %v7834_v60, %v10428_v27  ;;  %v10672_v60 = vadd.f32 %v7833_v21, %v10416_v37  ;;  %v12615_v21 = vld [vmem:[#allocation35_spill] sm:$0xff] }
 0x508   : > { %v7837_v35 = vpop.f32.mrb[140].mxu1 }
 0x509   : > { %v3599_v61 = vpop.f32.mrb[141].mxu1 }
 0x50a   : > { %v7838_v2 = vpop.f32.mrb[142].mxu1  ;;  %v10676_v56 = vadd.f32 %v3599_v61, %v10438_v3 }
 0x50b   : > { %v3602_v23 = vpop.f32.mrb[143].mxu1  ;;  %v10664_v33 = vadd.f32 %v7838_v2, %v10444_v26  ;;  %v10680_v2 = vadd.f32 %v7837_v35, %v10421_v15 }
 0x50c   : > { %v10656_v17 = vadd.f32 %v3602_v23, %v10450_v30 }
 0x511   : > { %3754 = vrot.lane.b32.xlu0 %v10309_v25, %s9551_s24  ;;  %v10651_v25 = vadd.f32 %v7829_v20, %v10387_v0  ;;  %v10667_v20 = vadd.f32 %v3583_v48, %v10397_v42  ;;  %v12614_v48 = vld [vmem:[#allocation30_spill] sm:$0xff] }
 0x52b   : > { %3624 = vmax.xlane.f32.xlu1 %v10636_v63 }
 0x52f   : > { %3632 = vmax.xlane.f32.xlu1 %v10640_v4 }
 0x530   : > { %3622 = vmax.xlane.f32.xlu0 %v10643_v22 }
 0x533   : > { %3636 = vmax.xlane.f32.xlu1 %v10648_v7 }
 0x534   : > { %3626 = vmax.xlane.f32.xlu0 %v10651_v25 }
 0x537   : > { %3640 = vmax.xlane.f32.xlu1 %v10656_v17 }
 0x538   : > { %3628 = vmax.xlane.f32.xlu0 %v10659_v24 }
 0x53b   : > { %3644 = vmax.xlane.f32.xlu1 %v10664_v33 }
 0x53c   : > { %3630 = vmax.xlane.f32.xlu0 %v10667_v20 }
 0x540   : > { %3634 = vmax.xlane.f32.xlu0 %v10672_v60 }
 0x544   : > { %3638 = vmax.xlane.f32.xlu0 %v10676_v56 }
 0x548   : > { %3642 = vmax.xlane.f32.xlu0 %v10680_v2 }
 0x54c   : > { %4436 = vrot.lane.b32.xlu1 %v10177_v14, %s9551_s24 }
 0x55e   : > { %4434 = vrot.lane.b32.xlu0 %v12614_v48, %s9551_s24 }
 0x562   : > { %4438 = vrot.lane.b32.xlu0 %v12615_v21, %s9551_s24 }
 0x580   : > { %v3619_v23 = vpop.xlane.xlu0 %3618 }
 0x581   : > { %v3648_v61 = vsub.f32 %v3560_v6, %v3619_v23  ;;  %v12620_v6 = vld [vmem:[#allocation42_spill] sm:$0xff] }
 0x583   : > { %v3617_v40 = vpop.xlane.xlu1 %3616  ;;  %v3666_v41 = vmul.f32 1.442695, %v3648_v61 }
 0x584   : > { %v3647_v52 = vsub.f32 %v3555_v13, %v3617_v40  ;;  %v3615_v28 = vpop.xlane.xlu0 %3614 }
 0x585   : > { %v3646_v39 = vsub.f32 %v3552_v10, %v3615_v28  ;;  %v12619_v28 = vld [vmem:[#allocation40_spill] sm:$0xff] }
 0x586   : > { %v3664_v62 = vmul.f32 1.442695, %v3647_v52  ;;  %v4005_v10 = vsel %vm2986_vm0, %v12619_v28, 0 }
 0x587   : > { %v3662_v35 = vmul.f32 1.442695, %v3646_v39  ;;  %v3757_v16 = vpop.permute.xlu1 %3756 }
 0x588   : > { %8948 = vpow2.f32 %v3664_v62  ;;  %v3621_v18 = vpop.xlane.xlu0 %3620 }
 0x589   : > { %8950 = vpow2.f32 %v3662_v35  ;;  %v3649_v8 = vsub.f32 %v3563_v9, %v3621_v18 }
 0x58a   : > { %8952 = vpow2.f32 %v3666_v41  ;;  %v3999_v41 = vsel %vm2986_vm0, %v12615_v21, 0 }
 0x58b   : > { %v3668_v31 = vmul.f32 1.442695, %v3649_v8  ;;  %v12618_v8 = vld [vmem:[#allocation38_spill] sm:$0xff] }
 0x58c   : > { %v3755_v38 = vpop.permute.xlu0 %3754  ;;  %v4002_v52 = vsel %vm2986_vm0, %v12618_v8, 0 }
 0x58d   : > { %8954 = vpow2.f32 %v3668_v31  ;;  %7851 = vmatprep.subr.bf16.mxu0 %v3755_v38  ;;  %v3996_v31 = vsel %vm2986_vm0, %v10177_v14, 0 }
 0x58e   : > { %7852 = vmatpush3.bf16.msra.mxu0 %v3755_v38 }
 0x58f   : > { %7853 = vmatprep.subr.bf16.mxu0 %v3757_v16 }
 0x592   : > { %v10689_v49 = vpop.eup %8948  ;;  %7854 = vmatpush3.bf16.msra.mxu0 %v3757_v16  ;;  %v3993_v16 = vsel %vm2986_vm0, %v12614_v48, 0 }
 0x593   : > { %v10691_v40 = vpop.eup %8950  ;;  %8383 = vmatprep.subr.msk.bf16.mxu0 %vm2986_vm0, %v12614_v48 }
 0x594   : > { %12616 = vst [vmem:[#allocation30_spill] sm:$0xff] %v10691_v40  ;;  %v3726_v39 = vpack.c.bf16 %v10689_v49, %v10691_v40  ;;  %v10697_v62 = vpop.eup %8952 }
 0x595   : > { %12617 = vst [vmem:[#allocation35_spill] sm:$0xff] %v10697_v62 }
 0x596   : > { %7855 = vmatprep.mubr.bf16.mxu0 %v3726_v39 }
 0x597   : > { %v10699_v18 = vpop.eup %8954 }
 0x598   : > { %v3727_v38 = vpack.c.bf16 %v10699_v18, %v10697_v62 }
 0x59a   : > { %7856 = vmatmul.mubr.bf16.vlgmr.msra.gmra.mrb[112].mxu0 %v3727_v38 }
 0x59b   : > { %7872 = vmatpush3.bf16.xpose.msra.mxu0 %v3993_v16  ;;  %v12621_v16 = vld [vmem:[#allocation44_spill] sm:$0xff] }
 0x59c   : > { %8384 = vmatprep.subr.msk.bf16.mxu0 %vm2986_vm0, %v10177_v14 }
 0x5a3   : > { %7874 = vmatpush3.bf16.xpose.msra.mxu0 %v3996_v31 }
 0x5a4   : > { %8385 = vmatprep.subr.msk.bf16.mxu0 %vm2986_vm0, %v12615_v21 }
 0x5ab   : > { %7876 = vmatpush3.bf16.xpose.msra.mxu0 %v3999_v41 }
 0x5ac   : > { %8386 = vmatprep.subr.msk.bf16.mxu0 %vm2986_vm0, %v12618_v8 }
 0x5b3   : > { %7878 = vmatpush3.bf16.xpose.msra.mxu0 %v4002_v52 }
 0x5b4   : > { %8387 = vmatprep.subr.msk.bf16.mxu0 %vm2986_vm0, %v12619_v28 }
 0x5b8   : > { %v3625_v13 = vpop.xlane.xlu1 %3624 }
 0x5b9   : > { %v3651_v14 = vsub.f32 %v10636_v63, %v3625_v13  ;;  %v4008_v63 = vsel %vm2986_vm0, %v12620_v6, 0 }
 0x5bb   : > { %7880 = vmatpush3.bf16.xpose.msra.mxu0 %v4005_v10  ;;  %v3672_v48 = vmul.f32 1.442695, %v3651_v14 }
 0x5bc   : > { %v3633_v9 = vpop.xlane.xlu1 %3632  ;;  %8388 = vmatprep.subr.msk.bf16.mxu0 %vm2986_vm0, %v12620_v6 }
 0x5bd   : > { %v3623_v21 = vpop.xlane.xlu0 %3622  ;;  %8956 = vpow2.f32 %v3672_v48  ;;  %v3655_v31 = vsub.f32 %v10640_v4, %v3633_v9 }
 0x5be   : > { %v3650_v23 = vsub.f32 %v10643_v22, %v3623_v21 }
 0x5bf   : > { %v3680_v10 = vmul.f32 1.442695, %v3655_v31 }
 0x5c0   : > { %v3670_v61 = vmul.f32 1.442695, %v3650_v23  ;;  %v3637_v39 = vpop.xlane.xlu1 %3636  ;;  %v4011_v23 = vsel %vm2986_vm0, %v12621_v16, 0 }
 0x5c1   : > { %v3627_v35 = vpop.xlane.xlu0 %3626  ;;  %v3657_v48 = vsub.f32 %v10648_v7, %v3637_v39 }
 0x5c2   : > { %8958 = vpow2.f32 %v3670_v61  ;;  %v3652_v38 = vsub.f32 %v10651_v25, %v3627_v35 }
 0x5c3   : > { %7882 = vmatpush3.bf16.xpose.msra.mxu0 %v4008_v63  ;;  %v3684_v35 = vmul.f32 1.442695, %v3657_v48 }
 0x5c4   : > { %8389 = vmatprep.subr.msk.bf16.mxu0 %vm2986_vm0, %v12621_v16  ;;  %v3674_v41 = vmul.f32 1.442695, %v3652_v38  ;;  %v3641_v13 = vpop.xlane.xlu1 %3640 }
 0x5c5   : > { %v3629_v52 = vpop.xlane.xlu0 %3628  ;;  %v3659_v7 = vsub.f32 %v10656_v17, %v3641_v13 }
 0x5c6   : > { %v3653_v22 = vsub.f32 %v10659_v24, %v3629_v52  ;;  %8960 = vpow2.f32 %v3674_v41  ;;  %v12623_v24 = vld [vmem:[#allocation46_spill] sm:$0xff] }
 0x5c7   : > { %v10736_v61 = vpop.eup %8956  ;;  %v3688_v41 = vmul.f32 1.442695, %v3659_v7  ;;  %v4014_v17 = vsel %vm2986_vm0, %v12623_v24, 0 }
 0x5c8   : > { %v3676_v14 = vmul.f32 1.442695, %v3653_v22  ;;  %v3645_v38 = vpop.xlane.xlu1 %3644 }
 0x5c9   : > { %v3631_v25 = vpop.xlane.xlu0 %3630  ;;  %v3661_v52 = vsub.f32 %v10664_v33, %v3645_v38 }
 0x5ca   : > { %8962 = vpow2.f32 %v3676_v14  ;;  %v3654_v21 = vsub.f32 %v10667_v20, %v3631_v25 }
 0x5cb   : > { %7884 = vmatpush3.bf16.xpose.msra.mxu0 %v4011_v23  ;;  %8964 = vpow2.f32 %v3680_v10 }
 0x5cc   : > { %v10738_v4 = vpop.eup %8958  ;;  %v3678_v9 = vmul.f32 1.442695, %v3654_v21  ;;  %8390 = vmatprep.subr.msk.bf16.mxu0 %vm2986_vm0, %v12623_v24 }
 0x5cd   : > { %12622 = vst [vmem:[#allocation38_spill] sm:$0xff] %v10738_v4  ;;  %v3635_v39 = vpop.xlane.xlu0 %3634  ;;  %v3728_v20 = vpack.c.bf16 %v10736_v61, %v10738_v4 }
 0x5ce   : > { %8966 = vpow2.f32 %v3678_v9  ;;  %v3656_v63 = vsub.f32 %v10672_v60, %v3635_v39  ;;  %v3692_v60 = vmul.f32 1.442695, %v3661_v52 }
 0x5cf   : > { %7859 = vmatprep.mubr.bf16.mxu0 %v3728_v20  ;;  %8968 = vpow2.f32 %v3684_v35 }
 0x5d0   : > { %v3682_v31 = vmul.f32 1.442695, %v3656_v63  ;;  %v10750_v13 = vpop.eup %8960 }
 0x5d1   : > { %v3639_v22 = vpop.xlane.xlu0 %3638  ;;  %12624 = vst [vmem:[#allocation40_spill] sm:$0xff] %v10750_v13 }
 0x5d2   : > { %8970 = vpow2.f32 %v3682_v31  ;;  %v3658_v14 = vsub.f32 %v10676_v56, %v3639_v22 }
 0x5d3   : > { %7886 = vmatpush3.bf16.xpose.msra.mxu0 %v4014_v17  ;;  %8972 = vpow2.f32 %v3688_v41  ;;  %v12632_v17 = vld [vmem:[#allocation18_spill] sm:$0xff] }
 0x5d4   : > { %v10752_v10 = vpop.eup %8962  ;;  %v3686_v48 = vmul.f32 1.442695, %v3658_v14  ;;  %v12631_v14 = vld [vmem:[#allocation17_spill] sm:$0xff] }
 0x5d5   : > { %v3643_v25 = vpop.xlane.xlu0 %3642  ;;  %v3729_v21 = vpack.c.bf16 %v10752_v10, %v10750_v13  ;;  %v10757_v23 = vpop.eup %8964 }
 0x5d6   : > { %8974 = vpow2.f32 %v3686_v48  ;;  %v3660_v33 = vsub.f32 %v10680_v2, %v3643_v25  ;;  %v12633_v48 = vld [vmem:[#allocation19_spill] sm:$0xff]  ;;  %v12635_v25 = vld [vmem:[#allocation21_spill] sm:$0xff] }
 0x5d7   : > { %7860 = vmatmul.mubr.bf16.gmra.mrb[116].mxu0 %v3729_v21  ;;  %8976 = vpow2.f32 %v3692_v60  ;;  %v12634_v60 = vld [vmem:[#allocation20_spill] sm:$0xff]  ;;  %v12636_v21 = vld [vmem:[#allocation22_spill] sm:$0xff] }
 0x5d8   : > { %v10759_v56 = vpop.eup %8966  ;;  %v3690_v9 = vmul.f32 1.442695, %v3660_v33  ;;  %v12637_v33 = vld [vmem:[#allocation23_spill] sm:$0xff] }
 0x5d9   : > { %12625 = vst [vmem:[#allocation42_spill] sm:$0xff] %v10759_v56  ;;  %v10761_v35 = vpop.permute.xlu0 %4434  ;;  %v3730_v7 = vpack.c.bf16 %v10757_v23, %v10759_v56  ;;  %v10767_v39 = vpop.eup %8968 }
 0x5da   : > { %8978 = vpow2.f32 %v3690_v9  ;;  %8391 = vmatprep.subr.msk.bf16.mxu1 %vm2986_vm0, %v10761_v35  ;;  %v12638_v9 = vld [vmem:[#allocation24_spill] sm:$0xff] }
 0x5db   : > { %7863 = vmatprep.mubr.bf16.mxu0 %v3730_v7 }
 0x5dc   : > { %v10769_v2 = vpop.eup %8970 }
 0x5dd   : > { %12626 = vst [vmem:[#allocation44_spill] sm:$0xff] %v10769_v2  ;;  %v3731_v20 = vpack.c.bf16 %v10767_v39, %v10769_v2  ;;  %v10773_v38 = vpop.eup %8972 }
 0x5de   : > { %12627 = vst [vmem:[#allocation46_spill] sm:$0xff] %v10773_v38 }
 0x5df   : > { %7864 = vmatmul.mubr.bf16.gmra.mrb[120].mxu0 %v3731_v20 }
 0x5e0   : > { %v10775_v63 = vpop.eup %8974 }
 0x5e1   : > { %12628 = vst [vmem:[#allocation88_spill] sm:$0xff] %v10775_v63  ;;  %v3732_v31 = vpack.c.bf16 %v10773_v38, %v10775_v63  ;;  %v10779_v41 = vpop.eup %8976 }
 0x5e2   : > { %12629 = vst [vmem:[#allocation89_spill] sm:$0xff] %v10779_v41 }
 0x5e3   : > { %7867 = vmatprep.mubr.bf16.mxu0 %v3732_v31 }
 0x5e4   : > { %v10781_v52 = vpop.eup %8978 }
 0x5e5   : > { %12630 = vst [vmem:[#allocation90_spill] sm:$0xff] %v10781_v52  ;;  %v3733_v22 = vpack.c.bf16 %v10779_v41, %v10781_v52 }
 0x5e7   : > { %7868 = vmatmul.mubr.bf16.gmra.mrb[124].mxu0 %v3733_v22 }
 0x5e8   : > { %7887 = vmatprep.mubr.msk.bf16.mxu0 %vm2986_vm0, %v12631_v14 }
 0x5ef   : > { %7888 = vmatmul.mubr.msk.bf16.vlgmr.msra.gmra.mrb[128].mxu0 %vm2986_vm0, %v12632_v17 }
 0x5f0   : > { %7891 = vmatprep.mubr.msk.bf16.mxu0 %vm2986_vm0, %v12633_v48 }
 0x5f7   : > { %7892 = vmatmul.mubr.msk.bf16.gmra.mrb[132].mxu0 %vm2986_vm0, %v12634_v60 }
 0x5f8   : > { %7895 = vmatprep.mubr.msk.bf16.mxu0 %vm2986_vm0, %v12635_v25 }
 0x5ff   : > { %7896 = vmatmul.mubr.msk.bf16.gmra.mrb[136].mxu0 %vm2986_vm0, %v12636_v21 }
 0x600   : > { %7899 = vmatprep.mubr.msk.bf16.mxu0 %vm2986_vm0, %v12637_v33 }
 0x607   : > { %7900 = vmatmul.mubr.msk.bf16.gmra.mrb[140].mxu0 %vm2986_vm0, %v12638_v9 }
 0x66d   : > { %v10801_v7 = vpop.f32.mrb[112].mxu0 }
 0x66e   : > { %12639 = vst [vmem:[#allocation17_spill] sm:$0xff] %v10801_v7  ;;  %v10803_v20 = vpop.f32.mrb[113].mxu0 }
 0x66f   : > { %12640 = vst [vmem:[#allocation18_spill] sm:$0xff] %v10803_v20  ;;  %v10805_v31 = vpop.f32.mrb[114].mxu0 }
 0x670   : > { %12641 = vst [vmem:[#allocation19_spill] sm:$0xff] %v10805_v31  ;;  %v10807_v22 = vpop.f32.mrb[115].mxu0 }
 0x671   : > { %12642 = vst [vmem:[#allocation20_spill] sm:$0xff] %v10807_v22 }
 0x6aa   : > { %v10809_v43 = vpop.f32.mrb[116].mxu0 }
 0x6ab   : > { %12643 = vst [vmem:[#allocation21_spill] sm:$0xff] %v10809_v43  ;;  %v10811_v5 = vpop.f32.mrb[117].mxu0 }
 0x6ac   : > { %12644 = vst [vmem:[#allocation22_spill] sm:$0xff] %v10811_v5  ;;  %v10813_v52 = vpop.f32.mrb[118].mxu0 }
 0x6ad   : > { %12645 = vst [vmem:[#allocation23_spill] sm:$0xff] %v10813_v52  ;;  %v10815_v63 = vpop.f32.mrb[119].mxu0 }
 0x6ae   : > { %12646 = vst [vmem:[#allocation24_spill] sm:$0xff] %v10815_v63 }
 0x6b2   : > { %v10817_v2 = vpop.f32.mrb[120].mxu0 }
 0x6b3   : > { %12647 = vst [vmem:[#allocation91_spill] sm:$0xff] %v10817_v2  ;;  %v10819_v56 = vpop.f32.mrb[121].mxu0 }
 0x6b4   : > { %12648 = vst [vmem:[#allocation92_spill] sm:$0xff] %v10819_v56  ;;  %v10821_v51 = vpop.f32.mrb[122].mxu0 }
 0x6b5   : > { %12649 = vst [vmem:[#allocation93_spill] sm:$0xff] %v10821_v51  ;;  %v10823_v7 = vpop.f32.mrb[123].mxu0 }
 0x6b6   : > { %12650 = vst [vmem:[#allocation94_spill] sm:$0xff] %v10823_v7 }
 0x6ba   : > { %v10825_v20 = vpop.f32.mrb[124].mxu0 }
 0x6bb   : > { %12651 = vst [vmem:[#allocation95_spill] sm:$0xff] %v10825_v20  ;;  %v10827_v31 = vpop.f32.mrb[125].mxu0 }
 0x6bc   : > { %12652 = vst [vmem:[#allocation96_spill] sm:$0xff] %v10827_v31  ;;  %v10829_v22 = vpop.f32.mrb[126].mxu0 }
 0x6bd   : > { %12653 = vst [vmem:[#allocation97_spill] sm:$0xff] %v10829_v22  ;;  %v10831_v43 = vpop.f32.mrb[127].mxu0 }
 0x6be   : > { %12654 = vst [vmem:[#allocation98_spill] sm:$0xff] %v10831_v43 }
 0x6c2   : > { %v7889_v5 = vpop.f32.mrb[128].mxu0 }
 0x6c3   : > { %v10834_v52 = vadd.f32 %v7889_v5, %v10357_v50  ;;  %v4050_v63 = vpop.f32.mrb[129].mxu0 }
 0x6c4   : > { %v7890_v2 = vpop.f32.mrb[130].mxu0  ;;  %v10841_v20 = vadd.f32 %v4050_v63, %v10359_v47 }
 0x6c5   : > { %v10837_v56 = vadd.f32 %v7890_v2, %v10367_v53  ;;  %4117 = vmax.xlane.f32.xlu0 %v10834_v52  ;;  %v4053_v51 = vpop.f32.mrb[131].mxu0 }
 0x6c6   : > { %v10845_v22 = vadd.f32 %v4053_v51, %v10370_v12 }
 0x6c7   : > { %4119 = vmax.xlane.f32.xlu1 %v10837_v56 }
 0x6c9   : > { %4113 = vmax.xlane.f32.xlu0 %v10841_v20 }
 0x6ca   : > { %v7893_v50 = vpop.f32.mrb[132].mxu0 }
 0x6cb   : > { %v4066_v5 = vpop.f32.mrb[133].mxu0  ;;  %4115 = vmax.xlane.f32.xlu1 %v10845_v22  ;;  %v10854_v51 = vadd.f32 %v7893_v50, %v10387_v0 }
 0x6cc   : > { %v7894_v43 = vpop.f32.mrb[134].mxu0  ;;  %v10857_v58 = vadd.f32 %v4066_v5, %v10385_v11 }
 0x6cd   : > { %v4069_v53 = vpop.f32.mrb[135].mxu0 }
 0x6ce   : > { %v10873_v11 = vadd.f32 %v4069_v53, %v10404_v55 }
 0x6d2   : > { %v7897_v2 = vpop.f32.mrb[136].mxu0 }
 0x6d3   : > { %v4082_v31 = vpop.f32.mrb[137].mxu0 }
 0x6d4   : > { %v7898_v7 = vpop.f32.mrb[138].mxu0  ;;  %v10861_v44 = vadd.f32 %v4082_v31, %v10397_v42 }
 0x6d5   : > { %v4085_v59 = vpop.f32.mrb[139].mxu0  ;;  %v10886_v42 = vadd.f32 %v7898_v7, %v10428_v27  ;;  %v4439_v27 = vpop.permute.xlu0 %4438 }
 0x6da   : > { %v7901_v13 = vpop.f32.mrb[140].mxu0 }
 0x6db   : > { %v4098_v47 = vpop.f32.mrb[141].mxu0  ;;  %v10877_v0 = vadd.f32 %v7901_v13, %v10421_v15 }
 0x6dc   : > { %4440 = vrot.lane.b32.xlu1 %v12618_v8, %s9551_s24  ;;  %v7902_v63 = vpop.f32.mrb[142].mxu0  ;;  %v10865_v8 = vadd.f32 %v7894_v43, %v10395_v57  ;;  %v10881_v57 = vadd.f32 %v7897_v2, %v10416_v37  ;;  %v10890_v55 = vadd.f32 %v4098_v47, %v10438_v3 }
 0x6dd   : > { %v4101_v12 = vpop.f32.mrb[143].mxu0 }
 0x6de   : > { %v10898_v37 = vadd.f32 %v4101_v12, %v10450_v30  ;;  %v4437_v30 = vpop.permute.xlu1 %4436 }
 0x6df   : > { %4442 = vrot.lane.b32.xlu0 %v12619_v28, %s9551_s24  ;;  %v10869_v28 = vadd.f32 %v4085_v59, %v10409_v34  ;;  %v10894_v34 = vadd.f32 %v7902_v63, %v10444_v26 }
 0x6fe   : > { %4125 = vmax.xlane.f32.xlu0 %v10854_v51 }
 0x700   : > { %4121 = vmax.xlane.f32.xlu1 %v10857_v58 }
 0x702   : > { %4129 = vmax.xlane.f32.xlu0 %v10861_v44 }
 0x704   : > { %4127 = vmax.xlane.f32.xlu1 %v10865_v8 }
 0x706   : > { %4131 = vmax.xlane.f32.xlu0 %v10869_v28 }
 0x708   : > { %4123 = vmax.xlane.f32.xlu1 %v10873_v11 }
 0x70a   : > { %4141 = vmax.xlane.f32.xlu0 %v10877_v0 }
 0x70c   : > { %4133 = vmax.xlane.f32.xlu1 %v10881_v57 }
 0x710   : > { %4135 = vmax.xlane.f32.xlu1 %v10886_v42 }
 0x714   : > { %4137 = vmax.xlane.f32.xlu1 %v10890_v55 }
 0x718   : > { %4143 = vmax.xlane.f32.xlu1 %v10894_v34 }
 0x71c   : > { %4139 = vmax.xlane.f32.xlu1 %v10898_v37 }
 0x720   : > { %4446 = vrot.lane.b32.xlu0 %v12621_v16, %s9551_s24 }
 0x724   : > { %4448 = vrot.lane.b32.xlu0 %v12623_v24, %s9551_s24 }
 0x728   : > { %4410 = vrot.lane.b32.xlu0 %v12631_v14, %s9551_s24 }
 0x72c   : > { %4414 = vrot.lane.b32.xlu0 %v12633_v48, %s9551_s24  ;;  %v4478_v48 = vsel %vm2986_vm0, %v4437_v30, 0 }
 0x72d   : > { %4444 = vrot.lane.b32.xlu1 %v12620_v6, %s9551_s24 }
 0x730   : > { %4418 = vrot.lane.b32.xlu0 %v12635_v25, %s9551_s24 }
 0x731   : > { %4412 = vrot.lane.b32.xlu1 %v12632_v17, %s9551_s24  ;;  %v4475_v17 = vsel %vm2986_vm0, %v10761_v35, 0 }
 0x734   : > { %4422 = vrot.lane.b32.xlu0 %v12637_v33, %s9551_s24 }
 0x735   : > { %4416 = vrot.lane.b32.xlu1 %v12634_v60, %s9551_s24  ;;  %v4481_v60 = vsel %vm2986_vm0, %v4439_v27, 0 }
 0x738   : > { %4723 = vrot.lane.b32.xlu0 %v10261_v46, %s9551_s24 }
 0x739   : > { %4420 = vrot.lane.b32.xlu1 %v12636_v21, %s9551_s24 }
 0x73c   : > { %4727 = vrot.lane.b32.xlu0 %v10281_v19, %s9551_s24 }
 0x73d   : > { %4424 = vrot.lane.b32.xlu1 %v12638_v9, %s9551_s24 }
 0x741   : > { %4725 = vrot.lane.b32.xlu1 %v10271_v32, %s9551_s24 }
 0x745   : > { %4729 = vrot.lane.b32.xlu1 %v10291_v54, %s9551_s24 }
 0x749   : > { %4731 = vrot.lane.b32.xlu1 %v10299_v29, %s9551_s24 }
 0x74d   : > { %4733 = vrot.lane.b32.xlu1 %v10305_v45, %s9551_s24 }
 0x752   : > { %v4118_v46 = vpop.xlane.xlu0 %4117 }
 0x753   : > { %v4147_v3 = vsub.f32 %v10834_v52, %v4118_v46 }
 0x754   : > { %v4120_v15 = vpop.xlane.xlu1 %4119 }
 0x755   : > { %v4148_v19 = vsub.f32 %v10837_v56, %v4120_v15  ;;  %v4165_v29 = vmul.f32 1.442695, %v4147_v3 }
 0x756   : > { %v4114_v26 = vpop.xlane.xlu0 %4113 }
 0x757   : > { %v4167_v43 = vmul.f32 1.442695, %v4148_v19  ;;  %v4145_v32 = vsub.f32 %v10841_v20, %v4114_v26 }
 0x758   : > { %v4116_v59 = vpop.xlane.xlu1 %4115 }
 0x759   : > { %v4161_v54 = vmul.f32 1.442695, %v4145_v32  ;;  %v4146_v6 = vsub.f32 %v10845_v22, %v4116_v59  ;;  %8980 = vpow2.f32 %v4167_v43 }
 0x75a   : > { %v4443_v33 = vpop.permute.xlu0 %4442 }
 0x75b   : > { %v4163_v16 = vmul.f32 1.442695, %v4146_v6  ;;  %8982 = vpow2.f32 %v4161_v54  ;;  %v4487_v35 = vsel %vm2986_vm0, %v4443_v33, 0 }
 0x75c   : > { %v4441_v25 = vpop.permute.xlu1 %4440 }
 0x75d   : > { %8984 = vpow2.f32 %v4163_v16  ;;  %v4484_v21 = vsel %vm2986_vm0, %v4441_v25, 0 }
 0x75e   : > { %8986 = vpow2.f32 %v4165_v29 }
 0x763   : > { %v10939_v45 = vpop.eup %8980 }
 0x764   : > { %12655 = vst [vmem:[#allocation99_spill] sm:$0xff] %v10939_v45 }
 0x765   : > { %v10941_v24 = vpop.eup %8982 }
 0x766   : > { %12656 = vst [vmem:[#allocation100_spill] sm:$0xff] %v10941_v24 }
 0x767   : > { %v10943_v13 = vpop.eup %8984 }
 0x768   : > { %12657 = vst [vmem:[#allocation101_spill] sm:$0xff] %v10943_v13  ;;  %v10945_v56 = vpop.eup %8986  ;;  %v4225_v52 = vpack.c.bf16 %v10943_v13, %v10941_v24  ;;  %v12710_v24 = vld [vmem:[#allocation37_spill] sm:$0xff] }
 0x769   : > { %12658 = vst [vmem:[#allocation102_spill] sm:$0xff] %v10945_v56  ;;  %v4226_v14 = vpack.c.bf16 %v10939_v45, %v10945_v56  ;;  %v12709_v56 = vld [vmem:[#allocation36_spill] sm:$0xff]  ;;  %v12716_v45 = vld [vmem:[#allocation29_spill] sm:$0xff] }
 0x76a   : > { %7919 = vmatprep.mubr.bf16.mxu1 %v4225_v52 }
 0x76b   : > { %7920 = vmatmul.mubr.bf16.vlgmr.msra.gmra.mrb[144].mxu1 %v4226_v14 }
 0x76c   : > { %7936 = vmatpush3.bf16.xpose.msra.mxu1 %v4475_v17 }
 0x76d   : > { %8392 = vmatprep.subr.msk.bf16.mxu1 %vm2986_vm0, %v4437_v30 }
 0x774   : > { %7938 = vmatpush3.bf16.xpose.msra.mxu1 %v4478_v48 }
 0x775   : > { %8393 = vmatprep.subr.msk.bf16.mxu1 %vm2986_vm0, %v4439_v27 }
 0x77c   : > { %7940 = vmatpush3.bf16.xpose.msra.mxu1 %v4481_v60 }
 0x77d   : > { %8394 = vmatprep.subr.msk.bf16.mxu1 %vm2986_vm0, %v4441_v25 }
 0x784   : > { %7942 = vmatpush3.bf16.xpose.msra.mxu1 %v4484_v21 }
 0x785   : > { %8395 = vmatprep.subr.msk.bf16.mxu1 %vm2986_vm0, %v4443_v33 }
 0x78b   : > { %v4126_v9 = vpop.xlane.xlu0 %4125 }
 0x78c   : > { %7944 = vmatpush3.bf16.xpose.msra.mxu1 %v4487_v35  ;;  %v4151_v5 = vsub.f32 %v10854_v51, %v4126_v9 }
 0x78d   : > { %v4122_v7 = vpop.xlane.xlu1 %4121 }
 0x78e   : > { %v4149_v20 = vsub.f32 %v10857_v58, %v4122_v7  ;;  %v4173_v15 = vmul.f32 1.442695, %v4151_v5 }
 0x78f   : > { %v4130_v31 = vpop.xlane.xlu0 %4129 }
 0x790   : > { %v4169_v53 = vmul.f32 1.442695, %v4149_v20  ;;  %v4153_v47 = vsub.f32 %v10861_v44, %v4130_v31 }
 0x791   : > { %v4128_v22 = vpop.xlane.xlu1 %4127 }
 0x792   : > { %v4152_v50 = vsub.f32 %v10865_v8, %v4128_v22  ;;  %8988 = vpow2.f32 %v4169_v53  ;;  %v4177_v19 = vmul.f32 1.442695, %v4153_v47 }
 0x793   : > { %v4132_v2 = vpop.xlane.xlu0 %4131 }
 0x794   : > { %v4175_v63 = vmul.f32 1.442695, %v4152_v50  ;;  %v4154_v12 = vsub.f32 %v10869_v28, %v4132_v2 }
 0x795   : > { %v4124_v27 = vpop.xlane.xlu1 %4123 }
 0x796   : > { %v4179_v30 = vmul.f32 1.442695, %v4154_v12  ;;  %v4150_v46 = vsub.f32 %v10873_v11, %v4124_v27  ;;  %8990 = vpow2.f32 %v4175_v63 }
 0x797   : > { %v4142_v58 = vpop.xlane.xlu0 %4141 }
 0x798   : > { %v4171_v3 = vmul.f32 1.442695, %v4150_v46  ;;  %8992 = vpow2.f32 %v4179_v30  ;;  %v4159_v21 = vsub.f32 %v10877_v0, %v4142_v58 }
 0x799   : > { %v4134_v8 = vpop.xlane.xlu1 %4133 }
 0x79a   : > { %8994 = vpow2.f32 %v4171_v3  ;;  %v4155_v51 = vsub.f32 %v10881_v57, %v4134_v8 }
 0x79b   : > { %8996 = vpow2.f32 %v4173_v15  ;;  %v4447_v44 = vpop.permute.xlu0 %4446 }
 0x79c   : > { %8998 = vpow2.f32 %v4177_v19  ;;  %v4181_v26 = vmul.f32 1.442695, %v4155_v51  ;;  %v10971_v59 = vpop.eup %8988  ;;  %v4493_v30 = vsel %vm2986_vm0, %v4447_v44, 0 }
 0x79d   : > { %v4136_v28 = vpop.xlane.xlu1 %4135  ;;  %12659 = vst [vmem:[#allocation103_spill] sm:$0xff] %v10971_v59 }
 0x79e   : > { %v4156_v43 = vsub.f32 %v10886_v42, %v4136_v28  ;;  %9000 = vpow2.f32 %v4181_v26  ;;  %v12671_v26 = vld [vmem:[#allocation49_spill] sm:$0xff] }
 0x79f   : > { %v10969_v32 = vpop.permute.xlu0 %4448 }
 0x7a0   : > { %v4183_v11 = vmul.f32 1.442695, %v4156_v43  ;;  %v10973_v6 = vpop.eup %8990 }
 0x7a1   : > { %v4138_v54 = vpop.xlane.xlu1 %4137  ;;  %12660 = vst [vmem:[#allocation104_spill] sm:$0xff] %v10973_v6 }
 0x7a2   : > { %9002 = vpow2.f32 %v4183_v11  ;;  %v10975_v29 = vpop.eup %8992  ;;  %v4157_v52 = vsub.f32 %v10890_v55, %v4138_v54  ;;  %v12672_v54 = vld [vmem:[#allocation48_spill] sm:$0xff] }
 0x7a3   : > { %12661 = vst [vmem:[#allocation105_spill] sm:$0xff] %v10975_v29  ;;  %v4411_v57 = vpop.permute.xlu0 %4410 }
 0x7a4   : > { %v10977_v16 = vpop.eup %8994  ;;  %v4185_v35 = vmul.f32 1.442695, %v4157_v52 }
 0x7a5   : > { %12662 = vst [vmem:[#allocation106_spill] sm:$0xff] %v10977_v16  ;;  %v10980_v14 = vpop.eup %8996  ;;  %v4144_v42 = vpop.xlane.xlu1 %4143  ;;  %v4227_v17 = vpack.c.bf16 %v10977_v16, %v10971_v59  ;;  %v12708_v59 = vld [vmem:[#allocation32_spill] sm:$0xff]  ;;  %v12713_v16 = vld [vmem:[#allocation47_spill] sm:$0xff] }
 0x7a6   : > { %12663 = vst [vmem:[#allocation107_spill] sm:$0xff] %v10980_v14  ;;  %v10984_v48 = vpop.eup %8998  ;;  %v4160_v60 = vsub.f32 %v10894_v34, %v4144_v42  ;;  %v4228_v25 = vpack.c.bf16 %v10973_v6, %v10980_v14  ;;  %v4189_v34 = vmul.f32 1.442695, %v4159_v21  ;;  %9004 = vpow2.f32 %v4185_v35  ;;  %v12674_v42 = vld [vmem:[#allocation50_spill] sm:$0xff]  ;;  %v12706_v14 = vld [vmem:[#allocation28_spill] sm:$0xff]  ;;  %v12711_v6 = vld [vmem:[#allocation41_spill] sm:$0xff] }
 0x7a7   : > { %12664 = vst [vmem:[#allocation108_spill] sm:$0xff] %v10984_v48  ;;  %7923 = vmatprep.mubr.bf16.mxu1 %v4227_v17  ;;  %v4415_v33 = vpop.permute.xlu0 %4414  ;;  %v4229_v55 = vpack.c.bf16 %v10975_v29, %v10984_v48  ;;  %v12675_v17 = vld [vmem:[#allocation53_spill] sm:$0xff]  ;;  %v12678_v21 = vld [vmem:[#allocation54_spill] sm:$0xff]  ;;  %v12704_v29 = vld [vmem:[#allocation43_spill] sm:$0xff] }
 0x7a8   : > { %7924 = vmatmul.mubr.bf16.gmra.mrb[148].mxu1 %v4228_v25  ;;  %v4191_v9 = vmul.f32 1.442695, %v4160_v60  ;;  %v10993_v31 = vpop.eup %9000  ;;  %v12676_v60 = vld [vmem:[#allocation52_spill] sm:$0xff]  ;;  %v12677_v25 = vld [vmem:[#allocation55_spill] sm:$0xff]  ;;  %v12702_v48 = vld [vmem:[#allocation33_spill] sm:$0xff] }
 0x7a9   : > { %7927 = vmatprep.mubr.bf16.mxu1 %v4229_v55  ;;  %v4140_v7 = vpop.xlane.xlu1 %4139  ;;  %12665 = vst [vmem:[#allocation109_spill] sm:$0xff] %v10993_v31 }
 0x7aa   : > { %v4158_v20 = vsub.f32 %v10898_v37, %v4140_v7  ;;  %9006 = vpow2.f32 %v4191_v9 }
 0x7ab   : > { %v4419_v22 = vpop.permute.xlu0 %4418 }
 0x7ac   : > { %v10995_v50 = vpop.eup %9002  ;;  %v4187_v0 = vmul.f32 1.442695, %v4158_v20 }
 0x7ad   : > { %12666 = vst [vmem:[#allocation110_spill] sm:$0xff] %v10995_v50  ;;  %v4445_v5 = vpop.permute.xlu1 %4444  ;;  %v4230_v53 = vpack.c.bf16 %v10995_v50, %v10993_v31  ;;  %v11126_v31 = vld [vmem:[#allocation7 + $0x30] sm:$0xff] }
 0x7ae   : > { %9008 = vpow2.f32 %v4187_v0  ;;  %8396 = vmatprep.subr.msk.bf16.mxu1 %vm2986_vm0, %v4445_v5  ;;  %v4490_v2 = vsel %vm2986_vm0, %v4445_v5, 0  ;;  %12696 = vst [vmem:[#allocation124_spill] sm:$0xff] %v11126_v31 }
 0x7af   : > { %9010 = vpow2.f32 %v4189_v34  ;;  %v4423_v37 = vpop.permute.xlu0 %4422  ;;  %7946 = vmatpush3.bf16.xpose.msra.mxu1 %v4490_v2 }
 0x7b0   : > { %7928 = vmatmul.mubr.bf16.gmra.mrb[152].mxu1 %v4230_v53  ;;  %8397 = vmatprep.subr.msk.bf16.mxu1 %vm2986_vm0, %v4447_v44  ;;  %v11002_v27 = vpop.eup %9004  ;;  %v4496_v44 = vsel %vm2986_vm0, %v10969_v32, 0 }
 0x7b1   : > { %v4413_v47 = vpop.permute.xlu1 %4412  ;;  %12667 = vst [vmem:[#allocation111_spill] sm:$0xff] %v11002_v27 }
 0x7b3   : > { %v4724_v63 = vpop.permute.xlu0 %4723 }
 0x7b4   : > { %7967 = vmatprep.subr.bf16.mxu0 %v4724_v63  ;;  %v11005_v46 = vpop.eup %9006 }
 0x7b5   : > { %7968 = vmatpush3.bf16.msra.mxu0 %v4724_v63  ;;  %v4417_v12 = vpop.permute.xlu1 %4416  ;;  %12668 = vst [vmem:[#allocation112_spill] sm:$0xff] %v11005_v46 }
 0x7b7   : > { %7948 = vmatpush3.bf16.xpose.msra.mxu1 %v4493_v30  ;;  %v4728_v43 = vpop.permute.xlu0 %4727 }
 0x7b8   : > { %v11007_v15 = vpop.eup %9008  ;;  %8398 = vmatprep.subr.msk.bf16.mxu1 %vm2986_vm0, %v10969_v32 }
 0x7b9   : > { %12669 = vst [vmem:[#allocation113_spill] sm:$0xff] %v11007_v15  ;;  %v11011_v58 = vpop.eup %9010  ;;  %v4421_v19 = vpop.permute.xlu1 %4420  ;;  %v4231_v3 = vpack.c.bf16 %v11007_v15, %v11002_v27  ;;  %v11109_v15 = vld [vmem:[#allocation7 + $0x48] sm:$0xff] }
 0x7ba   : > { %12670 = vst [vmem:[#allocation114_spill] sm:$0xff] %v11011_v58  ;;  %v4232_v8 = vpack.c.bf16 %v11005_v46, %v11011_v58  ;;  %12695 = vst [vmem:[#allocation123_spill] sm:$0xff] %v11109_v15 }
 0x7bb   : > { %7931 = vmatprep.mubr.bf16.mxu1 %v4231_v3 }
 0x7bc   : > { %7932 = vmatmul.mubr.bf16.gmra.mrb[156].mxu1 %v4232_v8 }
 0x7bd   : > { %7951 = vmatprep.mubr.msk.bf16.mxu1 %vm2986_vm0, %v4411_v57  ;;  %v4425_v51 = vpop.permute.xlu1 %4424  ;;  %v12673_v57 = vld [vmem:[#allocation51_spill] sm:$0xff] }
 0x7bf   : > { %7950 = vmatpush3.bf16.xpose.msra.mxu1 %v4496_v44 }
 0x7c0   : > { %8031 = vmatprep.subr.bf16.mxu1 %v12671_v26 }
 0x7c1   : > { %v4726_v28 = vpop.permute.xlu1 %4725 }
 0x7c2   : > { %7969 = vmatprep.subr.bf16.mxu0 %v4726_v28 }
 0x7c3   : > { %7970 = vmatpush3.bf16.msra.mxu0 %v4726_v28  ;;  %v11081_v28 = vld [vmem:[#allocation7 + $0x8] sm:$0xff] }
 0x7c4   : > { %7971 = vmatprep.subr.bf16.mxu0 %v4728_v43 }
 0x7c5   : > { %v4730_v11 = vpop.permute.xlu1 %4729 }
 0x7c6   : > { %7952 = vmatmul.mubr.msk.bf16.vlgmr.msra.gmra.mrb[160].mxu1 %vm2986_vm0, %v4413_v47 }
 0x7c7   : > { %7955 = vmatprep.mubr.msk.bf16.mxu1 %vm2986_vm0, %v4415_v33  ;;  %7972 = vmatpush3.bf16.msra.mxu0 %v4728_v43 }
 0x7c8   : > { %8032 = vmatpush3.bf16.msra.mxu1 %v12671_v26  ;;  %7973 = vmatprep.subr.bf16.mxu0 %v4730_v11 }
 0x7c9   : > { %8033 = vmatprep.subr.bf16.mxu1 %v12672_v54  ;;  %v4732_v32 = vpop.permute.xlu1 %4731 }
 0x7cb   : > { %7974 = vmatpush3.bf16.msra.mxu0 %v4730_v11  ;;  %v11086_v11 = vld [vmem:[#allocation7] sm:$0xff] }
 0x7cc   : > { %8034 = vmatpush3.bf16.msra.mxu1 %v12672_v54  ;;  %7975 = vmatprep.subr.bf16.mxu0 %v4732_v32 }
 0x7cd   : > { %8035 = vmatprep.subr.bf16.mxu1 %v12673_v57  ;;  %v4734_v52 = vpop.permute.xlu1 %4733 }
 0x7ce   : > { %7956 = vmatmul.mubr.msk.bf16.gmra.mrb[164].mxu1 %vm2986_vm0, %v4417_v12 }
 0x7cf   : > { %7959 = vmatprep.mubr.msk.bf16.mxu1 %vm2986_vm0, %v4419_v22  ;;  %7976 = vmatpush3.bf16.msra.mxu0 %v4732_v32 }
 0x7d0   : > { %8036 = vmatpush3.bf16.msra.mxu1 %v12673_v57  ;;  %7977 = vmatprep.subr.bf16.mxu0 %v4734_v52 }
 0x7d1   : > { %8037 = vmatprep.subr.bf16.mxu1 %v12674_v42 }
 0x7d3   : > { %7978 = vmatpush3.bf16.msra.mxu0 %v4734_v52 }
 0x7d4   : > { %8038 = vmatpush3.bf16.msra.mxu1 %v12674_v42 }
 0x7d5   : > { %8039 = vmatprep.subr.bf16.mxu1 %v12675_v17 }
 0x7d6   : > { %7960 = vmatmul.mubr.msk.bf16.gmra.mrb[168].mxu1 %vm2986_vm0, %v4421_v19  ;;  %v11075_v19 = vld [vmem:[#allocation7 + $0x10] sm:$0xff] }
 0x7d7   : > { %7963 = vmatprep.mubr.msk.bf16.mxu1 %vm2986_vm0, %v4423_v37 }
 0x7d8   : > { %8040 = vmatpush3.bf16.msra.mxu1 %v12675_v17 }
 0x7d9   : > { %8041 = vmatprep.subr.bf16.mxu1 %v12676_v60 }
 0x7dc   : > { %8042 = vmatpush3.bf16.msra.mxu1 %v12676_v60 }
 0x7dd   : > { %8043 = vmatprep.subr.bf16.mxu1 %v12677_v25 }
 0x7de   : > { %7964 = vmatmul.mubr.msk.bf16.gmra.mrb[172].mxu1 %vm2986_vm0, %v4425_v51 }
 0x7e0   : > { %8044 = vmatpush3.bf16.msra.mxu1 %v12677_v25 }
 0x7e1   : > { %8045 = vmatprep.subr.bf16.mxu1 %v12678_v21 }
 0x7e4   : > { %8046 = vmatpush3.bf16.msra.mxu1 %v12678_v21 }
 0x83e   : > { %v11043_v33 = vpop.f32.mrb[144].mxu1 }
 0x83f   : > { %12679 = vst [vmem:[#allocation49_spill] sm:$0xff] %v11043_v33  ;;  %v11045_v55 = vpop.f32.mrb[145].mxu1  ;;  %v11150_v33 = vld [vmem:[#allocation7 + $0x40] sm:$0xff] }
 0x840   : > { %12680 = vst [vmem:[#allocation48_spill] sm:$0xff] %v11045_v55  ;;  %v11047_v35 = vpop.f32.mrb[146].mxu1  ;;  %12699 = vst [vmem:[#allocation127_spill] sm:$0xff] %v11150_v33  ;;  %v11163_v55 = vld [vmem:[#allocation7 + $0x60] sm:$0xff] }
 0x841   : > { %12681 = vst [vmem:[#allocation51_spill] sm:$0xff] %v11047_v35  ;;  %v11049_v9 = vpop.f32.mrb[147].mxu1  ;;  %12700 = vst [vmem:[#allocation128_spill] sm:$0xff] %v11163_v55 }
 0x842   : > { %12682 = vst [vmem:[#allocation50_spill] sm:$0xff] %v11049_v9 }
 0x87b   : > { %v11051_v7 = vpop.f32.mrb[148].mxu1 }
 0x87c   : > { %12683 = vst [vmem:[#allocation53_spill] sm:$0xff] %v11051_v7  ;;  %v11053_v20 = vpop.f32.mrb[149].mxu1 }
 0x87d   : > { %12684 = vst [vmem:[#allocation52_spill] sm:$0xff] %v11053_v20  ;;  %v11055_v34 = vpop.f32.mrb[150].mxu1 }
 0x87e   : > { %12685 = vst [vmem:[#allocation55_spill] sm:$0xff] %v11055_v34  ;;  %v11057_v22 = vpop.f32.mrb[151].mxu1 }
 0x87f   : > { %12686 = vst [vmem:[#allocation54_spill] sm:$0xff] %v11057_v22  ;;  %v11138_v22 = vld [vmem:[#allocation7 + $0x38] sm:$0xff] }
 0x883   : > { %v11059_v0 = vpop.f32.mrb[152].mxu1 }
 0x884   : > { %12687 = vst [vmem:[#allocation115_spill] sm:$0xff] %v11059_v0  ;;  %v11061_v5 = vpop.f32.mrb[153].mxu1 }
 0x885   : > { %12688 = vst [vmem:[#allocation116_spill] sm:$0xff] %v11061_v5  ;;  %v11063_v53 = vpop.f32.mrb[154].mxu1 }
 0x886   : > { %12689 = vst [vmem:[#allocation117_spill] sm:$0xff] %v11063_v53  ;;  %v11065_v2 = vpop.f32.mrb[155].mxu1 }
 0x887   : > { %12690 = vst [vmem:[#allocation118_spill] sm:$0xff] %v11065_v2 }
 0x88f   : > { %v11067_v37 = vpop.f32.mrb[156].mxu1 }
 0x890   : > { %12691 = vst [vmem:[#allocation119_spill] sm:$0xff] %v11067_v37  ;;  %v11069_v47 = vpop.f32.mrb[157].mxu1 }
 0x891   : > { %12692 = vst [vmem:[#allocation120_spill] sm:$0xff] %v11069_v47  ;;  %v11071_v63 = vpop.f32.mrb[158].mxu1 }
 0x892   : > { %12693 = vst [vmem:[#allocation121_spill] sm:$0xff] %v11071_v63  ;;  %v11073_v12 = vpop.f32.mrb[159].mxu1 }
 0x893   : > { %12694 = vst [vmem:[#allocation122_spill] sm:$0xff] %v11073_v12 }
 0x899   : > { %v7953_v30 = vpop.f32.mrb[160].mxu1 }
 0x89a   : > { %v11078_v3 = vadd.f32 %v11075_v19, %v7953_v30  ;;  %v4532_v8 = vpop.f32.mrb[161].mxu1  ;;  %v11093_v30 = vld [vmem:[#allocation7 + $0x18] sm:$0xff] }
 0x89b   : > { %v7954_v51 = vpop.f32.mrb[162].mxu1  ;;  %v11089_v32 = vadd.f32 %v11086_v11, %v4532_v8 }
 0x89c   : > { %4599 = vmax.xlane.f32.xlu0 %v11078_v3  ;;  %v4535_v44 = vpop.f32.mrb[163].mxu1  ;;  %v11096_v37 = vadd.f32 %v11093_v30, %v7954_v51  ;;  %v11103_v51 = vld [vmem:[#allocation7 + $0x28] sm:$0xff] }
 0x89d   : > { %v11084_v43 = vadd.f32 %v11081_v28, %v4535_v44 }
 0x89f   : > { %4597 = vmax.xlane.f32.xlu1 %v11084_v43 }
 0x8a0   : > { %4595 = vmax.xlane.f32.xlu0 %v11089_v32 }
 0x8a1   : > { %v7957_v52 = vpop.f32.mrb[164].mxu1 }
 0x8a2   : > { %v4548_v63 = vpop.f32.mrb[165].mxu1  ;;  %v11129_v20 = vadd.f32 %v11126_v31, %v7957_v52 }
 0x8a3   : > { %v7958_v47 = vpop.f32.mrb[166].mxu1 }
 0x8a4   : > { %4601 = vmax.xlane.f32.xlu0 %v11096_v37  ;;  %v4551_v44 = vpop.f32.mrb[167].mxu1  ;;  %v11141_v50 = vadd.f32 %v11138_v22, %v7958_v47 }
 0x8a5   : > { %v11106_v27 = vadd.f32 %v11103_v51, %v4551_v44 }
 0x8a9   : > { %v7961_v12 = vpop.f32.mrb[168].mxu1 }
 0x8aa   : > { %v4564_v0 = vpop.f32.mrb[169].mxu1 }
 0x8ab   : > { %v7962_v53 = vpop.f32.mrb[170].mxu1  ;;  %v11153_v35 = vadd.f32 %v11150_v33, %v4564_v0  ;;  %v11169_v0 = vld [vmem:[#allocation7 + $0x70] sm:$0xff] }
 0x8ac   : > { %v4567_v8 = vpop.f32.mrb[171].mxu1  ;;  %12701 = vst [vmem:[#allocation129_spill] sm:$0xff] %v11169_v0  ;;  %v12715_v33 = vld [vmem:[#allocation27_spill] sm:$0xff] }
 0x8ad   : > { %v11112_v7 = vadd.f32 %v11109_v15, %v4567_v8  ;;  %v12714_v15 = vld [vmem:[#allocation25_spill] sm:$0xff] }
 0x8b0   : > { %4737 = vrot.lane.b32.xlu1 %v10317_v1, %s9551_s24  ;;  %v11114_v1 = vld [vmem:[#allocation7 + $0x20] sm:$0xff] }
 0x8b1   : > { %v7965_v58 = vpop.f32.mrb[172].mxu1  ;;  %v11117_v34 = vadd.f32 %v11114_v1, %v4548_v63  ;;  %v11133_v63 = vld [vmem:[#allocation7 + $0x68] sm:$0xff] }
 0x8b2   : > { %v4580_v46 = vpop.f32.mrb[173].mxu1  ;;  %12697 = vst [vmem:[#allocation125_spill] sm:$0xff] %v11133_v63  ;;  %v11172_v9 = vadd.f32 %v11169_v0, %v7965_v58  ;;  %v12707_v58 = vld [vmem:[#allocation31_spill] sm:$0xff]  ;;  %v12712_v0 = vld [vmem:[#allocation45_spill] sm:$0xff] }
 0x8b3   : > { %v7966_v5 = vpop.f32.mrb[174].mxu1 }
 0x8b4   : > { %v4583_v2 = vpop.f32.mrb[175].mxu1 }
 0x8b5   : > { %v11136_v8 = vadd.f32 %v11133_v63, %v4583_v2  ;;  %v11157_v2 = vld [vmem:[#allocation7 + $0x50] sm:$0xff] }
 0x8b6   : > { %v11160_v47 = vadd.f32 %v11157_v2, %v7961_v12  ;;  %v12703_v12 = vld [vmem:[#allocation39_spill] sm:$0xff] }
 0x8ba   : > { %4735 = vrot.lane.b32.xlu0 %v10311_v36, %s9551_s24  ;;  %v11121_v36 = vld [vmem:[#allocation7 + $0x58] sm:$0xff] }
 0x8bb   : > { %v11124_v44 = vadd.f32 %v11121_v36, %v7962_v53  ;;  %v11145_v53 = vld [vmem:[#allocation7 + $0x78] sm:$0xff] }
 0x8bc   : > { %12698 = vst [vmem:[#allocation126_spill] sm:$0xff] %v11145_v53  ;;  %v11148_v52 = vadd.f32 %v11145_v53, %v7966_v5  ;;  %v11166_v5 = vadd.f32 %v11163_v55, %v4580_v46  ;;  %v12705_v46 = vld [vmem:[#allocation26_spill] sm:$0xff] }
 0x8d4   : > { %4605 = vmax.xlane.f32.xlu1 %v11106_v27 }
 0x8d8   : > { %4613 = vmax.xlane.f32.xlu1 %v11112_v7 }
 0x8d9   : > { %4603 = vmax.xlane.f32.xlu0 %v11117_v34 }
 0x8dc   : > { %4617 = vmax.xlane.f32.xlu1 %v11124_v44 }
 0x8dd   : > { %4607 = vmax.xlane.f32.xlu0 %v11129_v20 }
 0x8e0   : > { %4621 = vmax.xlane.f32.xlu1 %v11136_v8 }
 0x8e1   : > { %4609 = vmax.xlane.f32.xlu0 %v11141_v50 }
 0x8e4   : > { %4625 = vmax.xlane.f32.xlu1 %v11148_v52 }
 0x8e5   : > { %4611 = vmax.xlane.f32.xlu0 %v11153_v35 }
 0x8e9   : > { %4615 = vmax.xlane.f32.xlu0 %v11160_v47 }
 0x8ed   : > { %4619 = vmax.xlane.f32.xlu0 %v11166_v5 }
 0x8f1   : > { %4623 = vmax.xlane.f32.xlu0 %v11172_v9 }
 0x8f5   : > { %5416 = vrot.lane.b32.xlu1 %v12702_v48, %s9551_s24 }
 0x8f9   : > { %5420 = vrot.lane.b32.xlu1 %v12703_v12, %s9551_s24 }
 0x8fd   : > { %5424 = vrot.lane.b32.xlu1 %v12704_v29, %s9551_s24 }
 0x901   : > { %5392 = vrot.lane.b32.xlu1 %v12705_v46, %s9551_s24 }
 0x905   : > { %5396 = vrot.lane.b32.xlu1 %v12706_v14, %s9551_s24 }
 0x907   : > { %5414 = vrot.lane.b32.xlu0 %v12707_v58, %s9551_s24 }
 0x909   : > { %5400 = vrot.lane.b32.xlu1 %v12708_v59, %s9551_s24 }
 0x90b   : > { %5418 = vrot.lane.b32.xlu0 %v12709_v56, %s9551_s24 }
 0x90d   : > { %5404 = vrot.lane.b32.xlu1 %v12710_v24, %s9551_s24 }
 0x90f   : > { %5422 = vrot.lane.b32.xlu0 %v12711_v6, %s9551_s24 }
 0x911   : > { %5705 = vrot.lane.b32.xlu1 %v12672_v54, %s9551_s24  ;;  %v12717_v54 = vld [vmem:[#allocation34_spill] sm:$0xff] }
 0x913   : > { %5426 = vrot.lane.b32.xlu0 %v12712_v0, %s9551_s24 }
 0x915   : > { %5713 = vrot.lane.b32.xlu1 %v12676_v60, %s9551_s24 }
 0x917   : > { %5428 = vrot.lane.b32.xlu0 %v12713_v16, %s9551_s24 }
 0x91b   : > { %5390 = vrot.lane.b32.xlu0 %v12714_v15, %s9551_s24 }
 0x91f   : > { %5394 = vrot.lane.b32.xlu0 %v12715_v33, %s9551_s24 }
 0x923   : > { %5398 = vrot.lane.b32.xlu0 %v12716_v45, %s9551_s24 }
 0x927   : > { %5402 = vrot.lane.b32.xlu0 %v12717_v54, %s9551_s24 }
 0x929   : > { %v4600_v31 = vpop.xlane.xlu0 %4599 }
 0x92a   : > { %v4629_v13 = vsub.f32 %v11078_v3, %v4600_v31 }
 0x92b   : > { %5703 = vrot.lane.b32.xlu0 %v12671_v26, %s9551_s24 }
 0x92c   : > { %v4598_v60 = vpop.xlane.xlu1 %4597  ;;  %v4647_v63 = vmul.f32 1.442695, %v4629_v13 }
 0x92d   : > { %v4628_v4 = vsub.f32 %v11084_v43, %v4598_v60  ;;  %v4596_v41 = vpop.xlane.xlu0 %4595 }
 0x92e   : > { %v4627_v62 = vsub.f32 %v11089_v32, %v4596_v41 }
 0x92f   : > { %v4645_v38 = vmul.f32 1.442695, %v4628_v4  ;;  %5707 = vrot.lane.b32.xlu0 %v12673_v57, %s9551_s24 }
 0x930   : > { %v4643_v40 = vmul.f32 1.442695, %v4627_v62  ;;  %v4738_v41 = vpop.permute.xlu1 %4737 }
 0x931   : > { %9012 = vpow2.f32 %v4645_v38  ;;  %v4602_v53 = vpop.xlane.xlu0 %4601 }
 0x932   : > { %9014 = vpow2.f32 %v4643_v40  ;;  %v4630_v55 = vsub.f32 %v11096_v37, %v4602_v53 }
 0x933   : > { %5709 = vrot.lane.b32.xlu0 %v12674_v42, %s9551_s24  ;;  %9016 = vpow2.f32 %v4647_v63  ;;  %v4973_v42 = vsel %vm2986_vm0, %v12707_v58, 0 }
 0x934   : > { %v4649_v31 = vmul.f32 1.442695, %v4630_v55  ;;  %v4985_v55 = vsel %vm2986_vm0, %v12711_v6, 0 }
 0x935   : > { %v4736_v26 = vpop.permute.xlu0 %4735 }
 0x936   : > { %9018 = vpow2.f32 %v4649_v31  ;;  %7979 = vmatprep.subr.bf16.mxu0 %v4736_v26 }
 0x937   : > { %5711 = vrot.lane.b32.xlu0 %v12675_v17, %s9551_s24  ;;  %7980 = vmatpush3.bf16.msra.mxu0 %v4736_v26  ;;  %v4976_v17 = vsel %vm2986_vm0, %v12702_v48, 0 }
 0x938   : > { %7981 = vmatprep.subr.bf16.mxu0 %v4738_v41 }
 0x93b   : > { %v9013_v62 = vpop.eup %9012  ;;  %5715 = vrot.lane.b32.xlu0 %v12677_v25, %s9551_s24  ;;  %7982 = vmatpush3.bf16.msra.mxu0 %v4738_v41  ;;  %v4982_v25 = vsel %vm2986_vm0, %v12703_v12, 0 }
 0x93c   : > { %v11225_v40 = vpop.eup %9014  ;;  %4677 = vadd.xlane.f32.xlu1 %v9013_v62  ;;  %8399 = vmatprep.subr.msk.bf16.mxu0 %vm2986_vm0, %v12707_v58 }
 0x93d   : > { %v4707_v4 = vpack.c.bf16 %v9013_v62, %v11225_v40  ;;  %v11230_v38 = vpop.eup %9016 }
 0x93f   : > { %7983 = vmatprep.mubr.bf16.mxu0 %v4707_v4 }
 0x940   : > { %v9019_v13 = vpop.eup %9018  ;;  %3696 = vadd.xlane.f32.xlu1 %v10689_v49  ;;  %v4979_v49 = vsel %vm2986_vm0, %v12709_v56, 0 }
 0x941   : > { %v4708_v57 = vpack.c.bf16 %v9019_v13, %v11230_v38 }
 0x943   : > { %7984 = vmatmul.mubr.bf16.vlgmr.msra.gmra.mrb[144].mxu0 %v4708_v57 }
 0x944   : > { %4681 = vadd.xlane.f32.xlu1 %v9019_v13  ;;  %8000 = vmatpush3.bf16.xpose.msra.mxu0 %v4973_v42  ;;  %v4991_v13 = vsel %vm2986_vm0, %v12712_v0, 0 }
 0x945   : > { %8400 = vmatprep.subr.msk.bf16.mxu0 %vm2986_vm0, %v12702_v48 }
 0x948   : > { %3700 = vadd.xlane.f32.xlu1 %v10699_v18 }
 0x94c   : > { %8002 = vmatpush3.bf16.xpose.msra.mxu0 %v4976_v17 }
 0x94d   : > { %8401 = vmatprep.subr.msk.bf16.mxu0 %vm2986_vm0, %v12709_v56 }
 0x954   : > { %8004 = vmatpush3.bf16.xpose.msra.mxu0 %v4979_v49 }
 0x955   : > { %8402 = vmatprep.subr.msk.bf16.mxu0 %vm2986_vm0, %v12703_v12 }
 0x95c   : > { %8006 = vmatpush3.bf16.xpose.msra.mxu0 %v4982_v25 }
 0x95d   : > { %8403 = vmatprep.subr.msk.bf16.mxu0 %vm2986_vm0, %v12711_v6 }
 0x961   : > { %v4606_v18 = vpop.xlane.xlu1 %4605 }
 0x962   : > { %v4632_v48 = vsub.f32 %v11106_v27, %v4606_v18  ;;  %v4988_v27 = vsel %vm2986_vm0, %v12704_v29, 0 }
 0x964   : > { %v4653_v37 = vmul.f32 1.442695, %v4632_v48  ;;  %8008 = vmatpush3.bf16.xpose.msra.mxu0 %v4985_v55 }
 0x965   : > { %8404 = vmatprep.subr.msk.bf16.mxu0 %vm2986_vm0, %v12704_v29  ;;  %v4614_v56 = vpop.xlane.xlu1 %4613 }
 0x966   : > { %9020 = vpow2.f32 %v4653_v37  ;;  %v4604_v3 = vpop.xlane.xlu0 %4603  ;;  %v4636_v6 = vsub.f32 %v11112_v7, %v4614_v56 }
 0x967   : > { %v4631_v43 = vsub.f32 %v11117_v34, %v4604_v3 }
 0x968   : > { %v4661_v62 = vmul.f32 1.442695, %v4636_v6 }
 0x969   : > { %v4651_v32 = vmul.f32 1.442695, %v4631_v43  ;;  %v4618_v53 = vpop.xlane.xlu1 %4617 }
 0x96a   : > { %v4608_v63 = vpop.xlane.xlu0 %4607 }
 0x96b   : > { %9022 = vpow2.f32 %v4651_v32  ;;  %v4633_v12 = vsub.f32 %v11129_v20, %v4608_v63  ;;  %v4638_v20 = vsub.f32 %v11124_v44, %v4618_v53 }
 0x96c   : > { %8010 = vmatpush3.bf16.xpose.msra.mxu0 %v4988_v27 }
 0x96d   : > { %8405 = vmatprep.subr.msk.bf16.mxu0 %vm2986_vm0, %v12712_v0  ;;  %v4655_v58 = vmul.f32 1.442695, %v4633_v12  ;;  %v4622_v26 = vpop.xlane.xlu1 %4621 }
 0x96e   : > { %v4610_v60 = vpop.xlane.xlu0 %4609  ;;  %v4640_v44 = vsub.f32 %v11136_v8, %v4622_v26  ;;  %v4994_v8 = vsel %vm2986_vm0, %v12713_v16, 0 }
 0x96f   : > { %v4634_v31 = vsub.f32 %v11141_v50, %v4610_v60  ;;  %9024 = vpow2.f32 %v4655_v58  ;;  %v4665_v50 = vmul.f32 1.442695, %v4638_v20 }
 0x970   : > { %v9021_v34 = vpop.eup %9020  ;;  %v4669_v25 = vmul.f32 1.442695, %v4640_v44 }
 0x971   : > { %v4657_v41 = vmul.f32 1.442695, %v4634_v31  ;;  %4685 = vadd.xlane.f32.xlu1 %v9021_v34 }
 0x972   : > { %v4612_v4 = vpop.xlane.xlu0 %4611 }
 0x973   : > { %9026 = vpow2.f32 %v4657_v41  ;;  %v4635_v29 = vsub.f32 %v11153_v35, %v4612_v4  ;;  %v4626_v35 = vpop.xlane.xlu1 %4625 }
 0x974   : > { %8012 = vmatpush3.bf16.xpose.msra.mxu0 %v4991_v13  ;;  %9028 = vpow2.f32 %v4661_v62  ;;  %v4642_v18 = vsub.f32 %v11148_v52, %v4626_v35 }
 0x975   : > { %v11268_v7 = vpop.eup %9022  ;;  %v4659_v57 = vmul.f32 1.442695, %v4635_v29  ;;  %8406 = vmatprep.subr.msk.bf16.mxu0 %vm2986_vm0, %v12713_v16  ;;  %3704 = vadd.xlane.f32.xlu1 %v10736_v61 }
 0x976   : > { %v4616_v42 = vpop.xlane.xlu0 %4615  ;;  %v4709_v17 = vpack.c.bf16 %v9021_v34, %v11268_v7 }
 0x977   : > { %9030 = vpow2.f32 %v4659_v57  ;;  %v4637_v0 = vsub.f32 %v11160_v47, %v4616_v42  ;;  %v4673_v47 = vmul.f32 1.442695, %v4642_v18  ;;  %v11283_v32 = vpop.permute.xlu1 %5416 }
 0x978   : > { %7987 = vmatprep.mubr.bf16.mxu0 %v4709_v17  ;;  %9032 = vpow2.f32 %v4665_v50 }
 0x979   : > { %v4663_v49 = vmul.f32 1.442695, %v4637_v0  ;;  %v11280_v55 = vpop.eup %9024 }
 0x97a   : > { %v4620_v48 = vpop.xlane.xlu0 %4619 }
 0x97b   : > { %9034 = vpow2.f32 %v4663_v49  ;;  %v4639_v61 = vsub.f32 %v11166_v5, %v4620_v48  ;;  %v11300_v6 = vpop.permute.xlu1 %5420 }
 0x97c   : > { %8014 = vmatpush3.bf16.xpose.msra.mxu0 %v4994_v8  ;;  %9036 = vpow2.f32 %v4669_v25 }
 0x97d   : > { %v9027_v37 = vpop.eup %9026  ;;  %v4667_v56 = vmul.f32 1.442695, %v4639_v61 }
 0x97e   : > { %v4624_v3 = vpop.xlane.xlu0 %4623  ;;  %4689 = vadd.xlane.f32.xlu1 %v9027_v37  ;;  %v4710_v43 = vpack.c.bf16 %v9027_v37, %v11280_v55  ;;  %v11286_v5 = vpop.eup %9028 }
 0x97f   : > { %9038 = vpow2.f32 %v4667_v56  ;;  %v4641_v52 = vsub.f32 %v11172_v9, %v4624_v3  ;;  %v11314_v62 = vpop.permute.xlu1 %5424 }
 0x980   : > { %7988 = vmatmul.mubr.bf16.gmra.mrb[148].mxu0 %v4710_v43  ;;  %9040 = vpow2.f32 %v4673_v47 }
 0x981   : > { %v11288_v16 = vpop.eup %9030  ;;  %v4671_v63 = vmul.f32 1.442695, %v4641_v52 }
 0x982   : > { %v11290_v53 = vpop.permute.xlu0 %5414  ;;  %v4711_v12 = vpack.c.bf16 %v11286_v5, %v11288_v16  ;;  %v11296_v27 = vpop.eup %9032 }
 0x983   : > { %9042 = vpow2.f32 %v4671_v63  ;;  %8407 = vmatprep.subr.msk.bf16.mxu1 %vm2986_vm0, %v11290_v53  ;;  %v11324_v57 = vpop.permute.xlu1 %5392 }
 0x984   : > { %7991 = vmatprep.mubr.bf16.mxu0 %v4711_v12 }
 0x985   : > { %v11298_v9 = vpop.eup %9034 }
 0x986   : > { %v11302_v58 = vpop.permute.xlu0 %5418  ;;  %v4712_v60 = vpack.c.bf16 %v11296_v27, %v11298_v9  ;;  %v11306_v31 = vpop.eup %9036 }
 0x987   : > { %v11332_v42 = vpop.permute.xlu1 %5396 }
 0x988   : > { %7992 = vmatmul.mubr.bf16.gmra.mrb[152].mxu0 %v4712_v60 }
 0x989   : > { %v11308_v34 = vpop.eup %9038 }
 0x98a   : > { %v11310_v26 = vpop.permute.xlu0 %5422  ;;  %v4713_v41 = vpack.c.bf16 %v11306_v31, %v11308_v34  ;;  %v11316_v20 = vpop.eup %9040 }
 0x98b   : > { %v11340_v35 = vpop.permute.xlu1 %5400 }
 0x98c   : > { %7995 = vmatprep.mubr.bf16.mxu0 %v4713_v41  ;;  %12718 = vst [vmem:[#allocation33_spill] sm:$0xff] %v11340_v35 }
 0x98d   : > { %v11318_v4 = vpop.eup %9042 }
 0x98e   : > { %v11320_v29 = vpop.permute.xlu0 %5426  ;;  %v4714_v13 = vpack.c.bf16 %v11316_v20, %v11318_v4 }
 0x98f   : > { %v11350_v49 = vpop.permute.xlu1 %5404 }
 0x990   : > { %7996 = vmatmul.mubr.bf16.gmra.mrb[156].mxu0 %v4714_v13  ;;  %12721 = vst [vmem:[#allocation26_spill] sm:$0xff] %v11350_v49 }
 0x991   : > { %8015 = vmatprep.mubr.msk.bf16.mxu0 %vm2986_vm0, %v12714_v15 }
 0x992   : > { %v11328_v50 = vpop.permute.xlu0 %5428 }
 0x996   : > { %v11330_v44 = vpop.permute.xlu0 %5390 }
 0x998   : > { %8016 = vmatmul.mubr.msk.bf16.vlgmr.msra.gmra.mrb[160].mxu0 %vm2986_vm0, %v12705_v46 }
 0x999   : > { %8019 = vmatprep.mubr.msk.bf16.mxu0 %vm2986_vm0, %v12715_v33  ;;  %v5706_v33 = vpop.permute.xlu1 %5705 }
 0x99a   : > { %v11338_v17 = vpop.permute.xlu0 %5394 }
 0x99d   : > { %v5714_v18 = vpop.permute.xlu1 %5713 }
 0x99e   : > { %v11342_v0 = vpop.permute.xlu0 %5398 }
 0x99f   : > { %12719 = vst [vmem:[#allocation39_spill] sm:$0xff] %v11342_v0 }
 0x9a0   : > { %8020 = vmatmul.mubr.msk.bf16.gmra.mrb[164].mxu0 %vm2986_vm0, %v12706_v14 }
 0x9a1   : > { %8023 = vmatprep.mubr.msk.bf16.mxu0 %vm2986_vm0, %v12716_v45 }
 0x9a2   : > { %v11348_v15 = vpop.permute.xlu0 %5402 }
 0x9a3   : > { %12720 = vst [vmem:[#allocation43_spill] sm:$0xff] %v11348_v15 }
 0x9a6   : > { %v5704_v46 = vpop.permute.xlu0 %5703 }
 0x9a7   : > { %8095 = vmatprep.subr.bf16.mxu0 %v5704_v46 }
 0x9a8   : > { %8024 = vmatmul.mubr.msk.bf16.gmra.mrb[168].mxu0 %vm2986_vm0, %v12708_v59 }
 0x9a9   : > { %8096 = vmatpush3.bf16.msra.mxu0 %v5704_v46  ;;  %8027 = vmatprep.mubr.msk.bf16.mxu0 %vm2986_vm0, %v12717_v54 }
 0x9aa   : > { %8097 = vmatprep.subr.bf16.mxu0 %v5706_v33  ;;  %v5708_v25 = vpop.permute.xlu0 %5707 }
 0x9ad   : > { %8098 = vmatpush3.bf16.msra.mxu0 %v5706_v33 }
 0x9ae   : > { %8099 = vmatprep.subr.bf16.mxu0 %v5708_v25  ;;  %v5710_v14 = vpop.permute.xlu0 %5709 }
 0x9b0   : > { %8028 = vmatmul.mubr.msk.bf16.gmra.mrb[172].mxu0 %vm2986_vm0, %v12710_v24 }
 0x9b1   : > { %8100 = vmatpush3.bf16.msra.mxu0 %v5708_v25 }
 0x9b2   : > { %8101 = vmatprep.subr.bf16.mxu0 %v5710_v14  ;;  %v5712_v45 = vpop.permute.xlu0 %5711 }
 0x9b5   : > { %8102 = vmatpush3.bf16.msra.mxu0 %v5710_v14 }
 0x9b6   : > { %8103 = vmatprep.subr.bf16.mxu0 %v5712_v45  ;;  %v5716_v59 = vpop.permute.xlu0 %5715 }
 0x9b9   : > { %8104 = vmatpush3.bf16.msra.mxu0 %v5712_v45 }
 0x9ba   : > { %8105 = vmatprep.subr.bf16.mxu0 %v5714_v18 }
 0x9bd   : > { %8106 = vmatpush3.bf16.msra.mxu0 %v5714_v18 }
 0x9be   : > { %8107 = vmatprep.subr.bf16.mxu0 %v5716_v59 }
 0x9c1   : > { %8108 = vmatpush3.bf16.msra.mxu0 %v5716_v59 }
 0xa16   : > { %v11358_v54 = vpop.f32.mrb[144].mxu0 }
 0xa17   : > { %v11360_v48 = vpop.f32.mrb[145].mxu0 }
 0xa18   : > { %v11362_v61 = vpop.f32.mrb[146].mxu0 }
 0xa19   : > { %v11364_v8 = vpop.f32.mrb[147].mxu0 }
 0xa53   : > { %v11366_v24 = vpop.f32.mrb[148].mxu0 }
 0xa54   : > { %v11368_v37 = vpop.f32.mrb[149].mxu0 }
 0xa55   : > { %v11370_v56 = vpop.f32.mrb[150].mxu0 }
 0xa56   : > { %v11372_v47 = vpop.f32.mrb[151].mxu0 }
 0xa5b   : > { %v11374_v3 = vpop.f32.mrb[152].mxu0 }
 0xa5c   : > { %v11376_v43 = vpop.f32.mrb[153].mxu0 }
 0xa5d   : > { %v11378_v52 = vpop.f32.mrb[154].mxu0 }
 0xa5e   : > { %v11380_v63 = vpop.f32.mrb[155].mxu0 }
 0xa63   : > { %v11382_v12 = vpop.f32.mrb[156].mxu0 }
 0xa64   : > { %12722 = vst [vmem:[#allocation28_spill] sm:$0xff] %v11382_v12  ;;  %v11384_v60 = vpop.f32.mrb[157].mxu0 }
 0xa65   : > { %v11386_v41 = vpop.f32.mrb[158].mxu0 }
 0xa66   : > { %12723 = vst [vmem:[#allocation31_spill] sm:$0xff] %v11386_v41  ;;  %v11388_v13 = vpop.f32.mrb[159].mxu0 }
 0xa6b   : > { %v8017_v46 = vpop.f32.mrb[160].mxu0 }
 0xa6c   : > { %v11391_v33 = vadd.f32 %v11075_v19, %v8017_v46  ;;  %v5030_v25 = vpop.f32.mrb[161].mxu0 }
 0xa6d   : > { %v8018_v14 = vpop.f32.mrb[162].mxu0  ;;  %v11398_v59 = vadd.f32 %v11086_v11, %v5030_v25 }
 0xa6e   : > { %v11394_v45 = vadd.f32 %v11093_v30, %v8018_v14  ;;  %5097 = vmax.xlane.f32.xlu0 %v11391_v33  ;;  %v5033_v18 = vpop.f32.mrb[163].mxu0 }
 0xa6f   : > { %v11402_v49 = vadd.f32 %v11081_v28, %v5033_v18 }
 0xa70   : > { %5099 = vmax.xlane.f32.xlu1 %v11394_v45 }
 0xa72   : > { %5093 = vmax.xlane.f32.xlu0 %v11398_v59 }
 0xa73   : > { %v8021_v19 = vpop.f32.mrb[164].mxu0 }
 0xa74   : > { %v5046_v46 = vpop.f32.mrb[165].mxu0  ;;  %5095 = vmax.xlane.f32.xlu1 %v11402_v49 }
 0xa75   : > { %v11407_v30 = vadd.f32 %v11114_v1, %v5046_v46  ;;  %v8022_v14 = vpop.f32.mrb[166].mxu0 }
 0xa76   : > { %v5049_v15 = vpop.f32.mrb[167].mxu0  ;;  %v11411_v11 = vadd.f32 %v11138_v22, %v8022_v14 }
 0xa77   : > { %v11415_v18 = vadd.f32 %v11103_v51, %v5049_v15  ;;  %v12724_v51 = vld [vmem:[#allocation128_spill] sm:$0xff] }
 0xa78   : > { %5101 = vmax.xlane.f32.xlu1 %v11407_v30 }
 0xa7b   : > { %v8025_v25 = vpop.f32.mrb[168].mxu0 }
 0xa7c   : > { %v5062_v35 = vpop.f32.mrb[169].mxu0  ;;  %5107 = vmax.xlane.f32.xlu1 %v11411_v11  ;;  %v11419_v1 = vadd.f32 %v11157_v2, %v8025_v25  ;;  %v12725_v2 = vld [vmem:[#allocation126_spill] sm:$0xff]  ;;  %v12735_v25 = vld [vmem:[#allocation99_spill] sm:$0xff] }
 0xa7d   : > { %v8026_v28 = vpop.f32.mrb[170].mxu0 }
 0xa7e   : > { %v5065_v41 = vpop.f32.mrb[171].mxu0  ;;  %v11423_v14 = vadd.f32 %v11121_v36, %v8026_v28 }
 0xa80   : > { %5103 = vmax.xlane.f32.xlu1 %v11415_v18 }
 0xa83   : > { %v8029_v46 = vpop.f32.mrb[172].mxu0 }
 0xa84   : > { %v5078_v12 = vpop.f32.mrb[173].mxu0  ;;  %5113 = vmax.xlane.f32.xlu1 %v11419_v1 }
 0xa85   : > { %v8030_v22 = vpop.f32.mrb[174].mxu0  ;;  %v11435_v36 = vadd.f32 %v12724_v51, %v5078_v12  ;;  %v12734_v12 = vld [vmem:[#allocation124_spill] sm:$0xff] }
 0xa86   : > { %v5081_v0 = vpop.f32.mrb[175].mxu0  ;;  %v11439_v15 = vadd.f32 %v12725_v2, %v8030_v22  ;;  %v12738_v22 = vld [vmem:[#allocation123_spill] sm:$0xff]  ;;  %v12741_v2 = vld [vmem:[#allocation64_spill] sm:$0xff] }
 0xa87   : > { %v11469_v51 = vadd.f32 %v12738_v22, %v5065_v41  ;;  %v11482_v41 = vpop.xlane.xlu1 %4677  ;;  %v12750_v22 = vld [vmem:[#allocation56_spill] sm:$0xff] }
 0xa88   : > { %5115 = vmax.xlane.f32.xlu1 %v11423_v14  ;;  %5717 = vrot.lane.b32.xlu0 %v12678_v21, %s9551_s24  ;;  %v12727_v21 = vld [vmem:[#allocation30_spill] sm:$0xff] }
 0xa8c   : > { %3708 = vadd.xlane.f32.xlu1 %v10752_v10  ;;  %v12726_v10 = vld [vmem:[#allocation125_spill] sm:$0xff] }
 0xa90   : > { %4693 = vadd.xlane.f32.xlu1 %v11286_v5  ;;  %v12729_v5 = vld [vmem:[#allocation35_spill] sm:$0xff] }
 0xa94   : > { %3712 = vadd.xlane.f32.xlu1 %v10757_v23  ;;  %v11444_v23 = vadd.f32 %v12726_v10, %v5081_v0  ;;  %v12733_v0 = vld [vmem:[#allocation58_spill] sm:$0xff]  ;;  %v12742_v10 = vld [vmem:[#allocation129_spill] sm:$0xff] }
 0xa98   : > { %4697 = vadd.xlane.f32.xlu1 %v11296_v27  ;;  %v12731_v27 = vld [vmem:[#allocation38_spill] sm:$0xff] }
 0xa9c   : > { %3716 = vadd.xlane.f32.xlu1 %v10767_v39  ;;  %v12728_v39 = vld [vmem:[#allocation46_spill] sm:$0xff] }
 0xaa0   : > { %4701 = vadd.xlane.f32.xlu1 %v11306_v31  ;;  %v12732_v31 = vld [vmem:[#allocation101_spill] sm:$0xff] }
 0xaa4   : > { %5117 = vmax.xlane.f32.xlu1 %v11435_v36 }
 0xaa7   : > { %4675 = vadd.xlane.f32.xlu0 %v11225_v40  ;;  %v12730_v40 = vld [vmem:[#allocation89_spill] sm:$0xff] }
 0xaa8   : > { %5123 = vmax.xlane.f32.xlu1 %v11439_v15 }
 0xaab   : > { %3694 = vadd.xlane.f32.xlu0 %v12727_v21  ;;  %v11476_v21 = vadd.f32 %v12742_v10, %v8029_v46 }
 0xaac   : > { %5119 = vmax.xlane.f32.xlu1 %v11444_v23 }
 0xaaf   : > { %4679 = vadd.xlane.f32.xlu0 %v11230_v38  ;;  %v11459_v38 = vadd.f32 %v12734_v12, %v8021_v19  ;;  %v12740_v19 = vld [vmem:[#allocation40_spill] sm:$0xff]  ;;  %v12748_v12 = vld [vmem:[#allocation90_spill] sm:$0xff] }
 0xab0   : > { %3720 = vadd.xlane.f32.xlu1 %v12728_v39  ;;  %v12744_v39 = vld [vmem:[#allocation62_spill] sm:$0xff] }
 0xab3   : > { %3698 = vadd.xlane.f32.xlu0 %v12729_v5  ;;  %v12745_v5 = vld [vmem:[#allocation42_spill] sm:$0xff] }
 0xab4   : > { %4705 = vadd.xlane.f32.xlu1 %v11316_v20  ;;  %v12736_v20 = vld [vmem:[#allocation127_spill] sm:$0xff] }
 0xab5   : > { %v11464_v28 = vadd.f32 %v12736_v20, %v5062_v35  ;;  %v12743_v35 = vld [vmem:[#allocation104_spill] sm:$0xff] }
 0xab6   : > { %v12749_v20 = vld [vmem:[#allocation100_spill] sm:$0xff] }
 0xab7   : > { %4683 = vadd.xlane.f32.xlu0 %v11268_v7  ;;  %v12737_v7 = vld [vmem:[#allocation57_spill] sm:$0xff] }
 0xab8   : > { %3724 = vadd.xlane.f32.xlu1 %v12730_v40  ;;  %v11485_v40 = vpop.xlane.xlu1 %3696 }
 0xabb   : > { %3702 = vadd.xlane.f32.xlu0 %v12731_v27  ;;  %v12746_v27 = vld [vmem:[#allocation44_spill] sm:$0xff] }
 0xabc   : > { %4195 = vadd.xlane.f32.xlu1 %v12732_v31  ;;  %v11489_v46 = vpop.xlane.xlu1 %4681 }
 0xabf   : > { %4687 = vadd.xlane.f32.xlu0 %v11280_v55  ;;  %v12739_v55 = vld [vmem:[#allocation106_spill] sm:$0xff] }
 0xac0   : > { %3214 = vadd.xlane.f32.xlu1 %v12733_v0  ;;  %v11492_v31 = vpop.xlane.xlu1 %3700  ;;  %v12747_v0 = vld [vmem:[#allocation88_spill] sm:$0xff] }
 0xac3   : > { %5105 = vmax.xlane.f32.xlu0 %v11459_v38 }
 0xac4   : > { %4199 = vadd.xlane.f32.xlu1 %v12735_v25 }
 0xac7   : > { %5109 = vmax.xlane.f32.xlu0 %v11464_v28 }
 0xac8   : > { %3218 = vadd.xlane.f32.xlu1 %v12737_v7 }
 0xacb   : > { %5111 = vmax.xlane.f32.xlu0 %v11469_v51 }
 0xacc   : > { %4203 = vadd.xlane.f32.xlu1 %v12739_v55 }
 0xacf   : > { %3706 = vadd.xlane.f32.xlu0 %v12740_v19 }
 0xad0   : > { %3222 = vadd.xlane.f32.xlu1 %v12741_v2  ;;  %v12751_v2 = vld [vmem:[#allocation102_spill] sm:$0xff] }
 0xad3   : > { %5121 = vmax.xlane.f32.xlu0 %v11476_v21 }
 0xad4   : > { %4207 = vadd.xlane.f32.xlu1 %v12743_v35 }
 0xad7   : > { %4691 = vadd.xlane.f32.xlu0 %v11288_v16  ;;  %v11495_v16 = vpop.xlane.xlu1 %4685 }
 0xad8   : > { %3226 = vadd.xlane.f32.xlu1 %v12744_v39 }
 0xadb   : > { %3710 = vadd.xlane.f32.xlu0 %v12745_v5  ;;  %v11499_v25 = vpop.xlane.xlu1 %3704 }
 0xadf   : > { %4695 = vadd.xlane.f32.xlu0 %v11298_v9  ;;  %v11502_v9 = vpop.xlane.xlu1 %4689 }
 0xae3   : > { %3714 = vadd.xlane.f32.xlu0 %v12746_v27 }
 0xae7   : > { %4699 = vadd.xlane.f32.xlu0 %v11308_v34 }
 0xaeb   : > { %3718 = vadd.xlane.f32.xlu0 %v12747_v0 }
 0xaef   : > { %4703 = vadd.xlane.f32.xlu0 %v11318_v4 }
 0xaf3   : > { %3722 = vadd.xlane.f32.xlu0 %v12748_v12  ;;  %v12752_v12 = vld [vmem:[#allocation59_spill] sm:$0xff] }
 0xaf7   : > { %4193 = vadd.xlane.f32.xlu0 %v12749_v20 }
 0xafb   : > { %v5098_v7 = vpop.xlane.xlu0 %5097  ;;  %3212 = vadd.xlane.f32.xlu0 %v12750_v22 }
 0xafc   : > { %v5127_v19 = vsub.f32 %v11391_v33, %v5098_v7 }
 0xafd   : > { %v5100_v34 = vpop.xlane.xlu1 %5099 }
 0xafe   : > { %v5128_v55 = vsub.f32 %v11394_v45, %v5100_v34  ;;  %v5145_v0 = vmul.f32 1.442695, %v5127_v19  ;;  %v12753_v45 = vld [vmem:[#allocation103_spill] sm:$0xff]  ;;  %v12754_v34 = vld [vmem:[#allocation60_spill] sm:$0xff] }
 0xaff   : > { %4197 = vadd.xlane.f32.xlu0 %v12751_v2  ;;  %v5094_v10 = vpop.xlane.xlu0 %5093 }
 0xb00   : > { %v5147_v4 = vmul.f32 1.442695, %v5128_v55  ;;  %v5125_v35 = vsub.f32 %v11398_v59, %v5094_v10 }
 0xb01   : > { %v5096_v39 = vpop.xlane.xlu1 %5095 }
 0xb02   : > { %v5141_v5 = vmul.f32 1.442695, %v5125_v35  ;;  %v5126_v27 = vsub.f32 %v11402_v49, %v5096_v39  ;;  %9044 = vpow2.f32 %v5147_v4  ;;  %v12755_v4 = vld [vmem:[#allocation107_spill] sm:$0xff] }
 0xb03   : > { %3216 = vadd.xlane.f32.xlu0 %v12752_v12  ;;  %v5718_v20 = vpop.permute.xlu0 %5717  ;;  %v5455_v12 = vsel %vm2986_vm0, %v11290_v53, 0 }
 0xb04   : > { %v5143_v22 = vmul.f32 1.442695, %v5126_v27  ;;  %8109 = vmatprep.subr.bf16.mxu0 %v5718_v20  ;;  %9046 = vpow2.f32 %v5141_v5 }
 0xb05   : > { %8110 = vmatpush3.bf16.msra.mxu0 %v5718_v20  ;;  %v5102_v33 = vpop.xlane.xlu1 %5101 }
 0xb06   : > { %9048 = vpow2.f32 %v5143_v22  ;;  %v5129_v59 = vsub.f32 %v11407_v30, %v5102_v33 }
 0xb07   : > { %9050 = vpow2.f32 %v5145_v0  ;;  %4201 = vadd.xlane.f32.xlu0 %v12753_v45  ;;  %v12756_v0 = vld [vmem:[#allocation61_spill] sm:$0xff]  ;;  %v5458_v45 = vsel %vm2986_vm0, %v11283_v32, 0 }
 0xb08   : > { %v5149_v49 = vmul.f32 1.442695, %v5129_v59 }
 0xb09   : > { %v11513_v7 = vpop.xlane.xlu1 %5107 }
 0xb0a   : > { %9052 = vpow2.f32 %v5149_v49 }
 0xb0b   : > { %3220 = vadd.xlane.f32.xlu0 %v12754_v34  ;;  %v5461_v34 = vsel %vm2986_vm0, %v11302_v58, 0 }
 0xb0c   : > { %v11516_v19 = vpop.eup %9044 }
 0xb0d   : > { %v5104_v55 = vpop.xlane.xlu1 %5103 }
 0xb0e   : > { %v5130_v2 = vsub.f32 %v11415_v18, %v5104_v55  ;;  %v11519_v10 = vpop.eup %9046  ;;  %v5464_v55 = vsel %vm2986_vm0, %v11300_v6, 0 }
 0xb0f   : > { %4205 = vadd.xlane.f32.xlu0 %v12755_v4  ;;  %v5467_v4 = vsel %vm2986_vm0, %v11310_v26, 0 }
 0xb10   : > { %v11522_v35 = vpop.eup %9048  ;;  %v5151_v39 = vmul.f32 1.442695, %v5130_v2 }
 0xb11   : > { %v11524_v5 = vpop.eup %9050  ;;  %v5205_v30 = vpack.c.bf16 %v11522_v35, %v11519_v10  ;;  %v11531_v18 = vpop.xlane.xlu1 %5113 }
 0xb12   : > { %9054 = vpow2.f32 %v5151_v39  ;;  %v5206_v27 = vpack.c.bf16 %v11516_v19, %v11524_v5 }
 0xb13   : > { %3224 = vadd.xlane.f32.xlu0 %v12756_v0  ;;  %8047 = vmatprep.mubr.bf16.mxu1 %v5205_v30  ;;  %9056 = vrcp.f32 %v11482_v41  ;;  %v5470_v41 = vsel %vm2986_vm0, %v11314_v62, 0 }
 0xb14   : > { %8048 = vmatmul.mubr.bf16.vlgmr.msra.gmra.mrb[176].mxu1 %v5206_v27  ;;  %v11539_v22 = vpop.eup %9052 }
 0xb15   : > { %8064 = vmatpush3.bf16.xpose.msra.mxu1 %v5455_v12  ;;  %v11537_v20 = vpop.xlane.xlu1 %5115 }
 0xb16   : > { %8408 = vmatprep.subr.msk.bf16.mxu1 %vm2986_vm0, %v11283_v32 }
 0xb19   : > { %v11549_v53 = vpop.xlane.xlu1 %3708 }
 0xb1c   : > { %v11541_v33 = vpop.eup %9054 }
 0xb1d   : > { %8066 = vmatpush3.bf16.xpose.msra.mxu1 %v5458_v45  ;;  %v5207_v59 = vpack.c.bf16 %v11541_v33, %v11539_v22  ;;  %v11553_v49 = vpop.xlane.xlu1 %4693 }
 0xb1e   : > { %8409 = vmatprep.subr.msk.bf16.mxu1 %vm2986_vm0, %v11302_v58 }
 0xb1f   : > { %8051 = vmatprep.mubr.bf16.mxu1 %v5207_v59 }
 0xb21   : > { %v11557_v32 = vpop.xlane.xlu1 %3712 }
 0xb25   : > { %8068 = vmatpush3.bf16.xpose.msra.mxu1 %v5461_v34  ;;  %v11563_v2 = vpop.xlane.xlu1 %4697 }
 0xb26   : > { %8410 = vmatprep.subr.msk.bf16.mxu1 %vm2986_vm0, %v11300_v6 }
 0xb29   : > { %v11571_v6 = vpop.xlane.xlu1 %3716 }
 0xb2d   : > { %8070 = vmatpush3.bf16.xpose.msra.mxu1 %v5464_v55  ;;  %v11576_v27 = vpop.xlane.xlu1 %4701 }
 0xb2e   : > { %8411 = vmatprep.subr.msk.bf16.mxu1 %vm2986_vm0, %v11310_v26  ;;  %v9057_v26 = vpop.eup %9056 }
 0xb31   : > { %v11584_v34 = vpop.xlane.xlu1 %5117 }
 0xb34   : > { %v4676_v58 = vpop.xlane.xlu0 %4675 }
 0xb35   : > { %9058 = vrcp.f32 %v4676_v58  ;;  %8072 = vmatpush3.bf16.xpose.msra.mxu1 %v5467_v4  ;;  %v5473_v58 = vsel %vm2986_vm0, %v11320_v29, 0 }
 0xb36   : > { %8412 = vmatprep.subr.msk.bf16.mxu1 %vm2986_vm0, %v11314_v62  ;;  %9060 = vrcp.f32 %v11485_v40  ;;  %v4861_v40 = vmul.f32 %v9057_v26, %v11364_v8  ;;  %v12758_v8 = vld [vmem:[#allocation20_spill] sm:$0xff] }
 0xb38   : > { %v3695_v39 = vpop.xlane.xlu0 %3694 }
 0xb39   : > { %9062 = vrcp.f32 %v3695_v39 }
 0xb3a   : > { %9064 = vrcp.f32 %v11489_v46 }
 0xb3c   : > { %v4680_v30 = vpop.xlane.xlu0 %4679 }
 0xb3d   : > { %9066 = vrcp.f32 %v4680_v30  ;;  %8074 = vmatpush3.bf16.xpose.msra.mxu1 %v5470_v41 }
 0xb3e   : > { %8413 = vmatprep.subr.msk.bf16.mxu1 %vm2986_vm0, %v11320_v29  ;;  %9068 = vrcp.f32 %v11492_v31  ;;  %v12757_v31 = vld [vmem:[#allocation18_spill] sm:$0xff] }
 0xb3f   : > { %v9059_v0 = vpop.eup %9058 }
 0xb40   : > { %v3699_v12 = vpop.xlane.xlu0 %3698  ;;  %v4860_v46 = vmul.f32 %v9059_v0, %v11360_v48  ;;  %v9061_v45 = vpop.eup %9060 }
 0xb41   : > { %9070 = vrcp.f32 %v3699_v12  ;;  %v3880_v39 = vmul.f32 %v9061_v45, %v12758_v8  ;;  %v5476_v45 = vsel %vm2986_vm0, %v11328_v50, 0 }
 0xb42   : > { %v4876_v59 = vpack.c.bf16 %v4861_v40, %v4860_v46  ;;  %9072 = vrcp.f32 %v11495_v16  ;;  %v5124_v40 = vpop.xlane.xlu1 %5123 }
 0xb43   : > { %v9063_v62 = vpop.eup %9062 }
 0xb44   : > { %v4684_v55 = vpop.xlane.xlu0 %4683  ;;  %4892 = vrot.lane.b32.xlu0 %v4876_v59, %s9551_s24  ;;  %v3879_v4 = vmul.f32 %v9063_v62, %v12757_v31  ;;  %v9065_v48 = vpop.eup %9064  ;;  %v12759_v59 = vld [vmem:[#allocation17_spill] sm:$0xff] }
 0xb45   : > { %9074 = vrcp.f32 %v4684_v55  ;;  %8076 = vmatpush3.bf16.xpose.msra.mxu1 %v5473_v58  ;;  %v11595_v41 = vmul.f32 %v9065_v48, %v11362_v61  ;;  %v5132_v61 = vsub.f32 %v11411_v11, %v11513_v7  ;;  %v5135_v11 = vsub.f32 %v11419_v1, %v11531_v18 }
 0xb46   : > { %8414 = vmatprep.subr.msk.bf16.mxu1 %vm2986_vm0, %v11328_v50  ;;  %v3895_v30 = vpack.c.bf16 %v3880_v39, %v3879_v4  ;;  %9076 = vrcp.f32 %v11499_v25  ;;  %v5120_v7 = vpop.xlane.xlu1 %5119 }
 0xb47   : > { %v9067_v16 = vpop.eup %9066  ;;  %v5161_v1 = vmul.f32 1.442695, %v5135_v11 }
 0xb48   : > { %v3703_v26 = vpop.xlane.xlu0 %3702  ;;  %3911 = vrot.lane.b32.xlu1 %v3895_v30, %s9551_s24  ;;  %v11599_v29 = vmul.f32 %v9067_v16, %v11358_v54  ;;  %v9069_v0 = vpop.eup %9068  ;;  %v12760_v54 = vld [vmem:[#allocation19_spill] sm:$0xff]  ;;  %v5136_v30 = vsub.f32 %v11423_v14, %v11537_v20 }
 0xb49   : > { %9078 = vrcp.f32 %v3703_v26  ;;  %v11612_v55 = vmul.f32 %v9069_v0, %v12760_v54  ;;  %v5138_v0 = vsub.f32 %v11444_v23, %v5120_v7  ;;  %v5137_v23 = vsub.f32 %v11435_v36, %v11584_v34 }
 0xb4a   : > { %v4877_v12 = vpack.c.bf16 %v11595_v41, %v11599_v29  ;;  %9080 = vrcp.f32 %v11502_v9  ;;  %v5155_v9 = vmul.f32 1.442695, %v5132_v61  ;;  %v12786_v41 = vld [vmem:[#allocation48_spill] sm:$0xff] }
 0xb4b   : > { %v9071_v46 = vpop.eup %9070 }
 0xb4c   : > { %v4688_v25 = vpop.xlane.xlu0 %4687  ;;  %v11609_v62 = vmul.f32 %v9071_v46, %v12759_v59  ;;  %v9073_v58 = vpop.eup %9072  ;;  %v5163_v59 = vmul.f32 1.442695, %v5136_v30 }
 0xb4d   : > { %9082 = vrcp.f32 %v4688_v25  ;;  %8078 = vmatpush3.bf16.xpose.msra.mxu1 %v5476_v45  ;;  %v11617_v50 = vmul.f32 %v9073_v58, %v11372_v47  ;;  %v12761_v45 = vld [vmem:[#allocation22_spill] sm:$0xff]  ;;  %v5167_v58 = vmul.f32 1.442695, %v5138_v0 }
 0xb4e   : > { %v3896_v31 = vpack.c.bf16 %v11612_v55, %v11609_v62  ;;  %9084 = vpow2.f32 %v5155_v9 }
 0xb4f   : > { %v9075_v4 = vpop.eup %9074 }
 0xb50   : > { %v5106_v8 = vpop.xlane.xlu0 %5105  ;;  %v11622_v39 = vmul.f32 %v9075_v4, %v11368_v37  ;;  %v9077_v48 = vpop.eup %9076  ;;  %v12762_v37 = vld [vmem:[#allocation24_spill] sm:$0xff] }
 0xb51   : > { %v5131_v16 = vsub.f32 %v11459_v38, %v5106_v8  ;;  %v11634_v25 = vmul.f32 %v9077_v48, %v12762_v37  ;;  %v5165_v48 = vmul.f32 1.442695, %v5137_v23 }
 0xb52   : > { %v4878_v26 = vpack.c.bf16 %v11617_v50, %v11622_v39  ;;  %v8834_v50 = vld [vmem:[#allocation10 + $0x170] ss:$12 sps:$4 sm:$0xff]  }
 0xb53   : > { %v9079_v47 = vpop.eup %9078  ;;  %v5153_v46 = vmul.f32 1.442695, %v5131_v16  ;;  %v11656_v16 = vpop.xlane.xlu1 %3720  ;;  %v8835_v39 = vld [vmem:[#allocation10 + $0xb0] ss:$12 sps:$4 sm:$0xff]  }
 0xb54   : > { %v5110_v18 = vpop.xlane.xlu0 %5109  ;;  %v11631_v61 = vmul.f32 %v9079_v47, %v12761_v45  ;;  %v9081_v38 = vpop.eup %9080 }
 0xb55   : > { %9086 = vpow2.f32 %v5153_v46  ;;  %v5133_v14 = vsub.f32 %v11464_v28, %v5110_v18  ;;  %v11642_v4 = vmul.f32 %v9081_v38, %v11370_v56  ;;  %v5140_v56 = vsub.f32 %v11439_v15, %v5124_v40  ;;  %v12765_v38 = vld [vmem:[#allocation63_spill] sm:$0xff] }
 0xb56   : > { %v3897_v20 = vpack.c.bf16 %v11634_v25, %v11631_v61  ;;  %9088 = vpow2.f32 %v5161_v1  ;;  %v12763_v1 = vld [vmem:[#allocation105_spill] sm:$0xff] }
 0xb57   : > { %v9083_v54 = vpop.eup %9082  ;;  %v5157_v9 = vmul.f32 1.442695, %v5133_v14  ;;  %9090 = vpow2.f32 %v5163_v59  ;;  %v4706_v14 = vpop.xlane.xlu1 %4705 }
 0xb58   : > { %v5112_v11 = vpop.xlane.xlu0 %5111  ;;  %v11645_v7 = vmul.f32 %v9083_v54, %v11366_v24  ;;  %9092 = vrcp.f32 %v11549_v53  ;;  %v11652_v30 = vpop.eup %9084 }
 0xb59   : > { %v5134_v28 = vsub.f32 %v11469_v51, %v5112_v11  ;;  %9094 = vpow2.f32 %v5167_v58  ;;  %v5171_v51 = vmul.f32 1.442695, %v5140_v56  ;;  %v12766_v11 = vld [vmem:[#allocation21_spill] sm:$0xff] }
 0xb5a   : > { %v4879_v8 = vpack.c.bf16 %v11642_v4, %v11645_v7  ;;  %9096 = vpow2.f32 %v5157_v9  ;;  %v12813_v7 = vld [vmem:[#allocation118_spill] sm:$0xff] }
 0xb5b   : > { %v5159_v36 = vmul.f32 1.442695, %v5134_v28 }
 0xb5c   : > { %v3707_v34 = vpop.xlane.xlu0 %3706 }
 0xb5d   : > { %9098 = vpow2.f32 %v5159_v36 }
 0xb5e   : > { %9100 = vrcp.f32 %v3707_v34  ;;  %v3725_v34 = vpop.xlane.xlu1 %3724 }
 0xb5f   : > { %v11654_v24 = vpop.eup %9086  ;;  %9102 = vpow2.f32 %v5165_v48  ;;  %v12767_v48 = vld [vmem:[#allocation23_spill] sm:$0xff] }
 0xb60   : > { %v5122_v53 = vpop.xlane.xlu0 %5121  ;;  %v5208_v47 = vpack.c.bf16 %v11652_v30, %v11654_v24  ;;  %v11661_v46 = vpop.eup %9088  ;;  %9104 = vrcp.f32 %v11553_v49 }
 0xb61   : > { %v5139_v0 = vsub.f32 %v11476_v21, %v5122_v53  ;;  %v11663_v15 = vpop.eup %9090  ;;  %9106 = vpow2.f32 %v5171_v51  ;;  %v12768_v53 = vld [vmem:[#allocation108_spill] sm:$0xff] }
 0xb62   : > { %8052 = vmatmul.mubr.bf16.gmra.mrb[180].mxu1 %v5208_v47  ;;  %v9093_v18 = vpop.eup %9092  ;;  %v5210_v9 = vpack.c.bf16 %v11663_v15, %v11661_v46 }
 0xb63   : > { %v5169_v40 = vmul.f32 1.442695, %v5139_v0  ;;  %4211 = vadd.xlane.f32.xlu0 %v12763_v1  ;;  %v11667_v37 = vpop.eup %9094  ;;  %v11685_v36 = vmul.f32 %v9093_v18, %v12767_v48  ;;  %v12772_v48 = vld [vmem:[#allocation92_spill] sm:$0xff] }
 0xb64   : > { %v4692_v45 = vpop.xlane.xlu0 %4691  ;;  %12764 = vst [vmem:[#allocation32_spill] sm:$0xff] %v11667_v37  ;;  %v11669_v59 = vpop.eup %9096 }
 0xb65   : > { %9108 = vpow2.f32 %v5169_v40 }
 0xb66   : > { %9110 = vrcp.f32 %v4692_v45 }
 0xb67   : > { %v11671_v21 = vpop.eup %9098  ;;  %9112 = vrcp.f32 %v11557_v32  ;;  %3228 = vadd.xlane.f32.xlu0 %v12765_v38 }
 0xb68   : > { %v9101_v49 = vpop.eup %9100  ;;  %v3711_v54 = vpop.xlane.xlu0 %3710  ;;  %v5209_v23 = vpack.c.bf16 %v11671_v21, %v11669_v59 }
 0xb69   : > { %v11677_v58 = vpop.eup %9102  ;;  %9114 = vrcp.f32 %v3711_v54  ;;  %v11682_v28 = vmul.f32 %v9101_v49, %v12766_v11 }
 0xb6a   : > { %8055 = vmatprep.mubr.bf16.mxu1 %v5209_v23  ;;  %v5211_v32 = vpack.c.bf16 %v11667_v37, %v11677_v58  ;;  %9116 = vrcp.f32 %v11563_v2  ;;  %v9105_v47 = vpop.eup %9104  ;;  %v12771_v2 = vld [vmem:[#allocation65_spill] sm:$0xff]  ;;  %v4196_v23 = vpop.xlane.xlu1 %4195  ;;  %v12843_v37 = vld [vmem:[#allocation87_spill] sm:$0xff] }
 0xb6b   : > { %8056 = vmatmul.mubr.bf16.gmra.mrb[184].mxu1 %v5210_v9  ;;  %v11693_v0 = vpop.eup %9106  ;;  %v11705_v54 = vmul.f32 %v9105_v47, %v11380_v63 }
 0xb6c   : > { %v4696_v51 = vpop.xlane.xlu0 %4695  ;;  %4209 = vadd.xlane.f32.xlu1 %v12768_v53  ;;  %8059 = vmatprep.mubr.bf16.mxu1 %v5211_v32  ;;  %12769 = vst [vmem:[#allocation36_spill] sm:$0xff] %v11693_v0 }
 0xb6d   : > { %9118 = vrcp.f32 %v4696_v51 }
 0xb6e   : > { %9120 = vrcp.f32 %v11571_v6  ;;  %v3215_v47 = vpop.xlane.xlu1 %3214 }
 0xb6f   : > { %v11695_v40 = vpop.eup %9108 }
 0xb70   : > { %12770 = vst [vmem:[#allocation37_spill] sm:$0xff] %v11695_v40  ;;  %v9111_v1 = vpop.eup %9110  ;;  %v3715_v18 = vpop.xlane.xlu0 %3714  ;;  %3230 = vadd.xlane.f32.xlu1 %v12771_v2  ;;  %v5212_v45 = vpack.c.bf16 %v11693_v0, %v11695_v40 }
 0xb71   : > { %v9113_v38 = vpop.eup %9112  ;;  %9122 = vrcp.f32 %v3715_v18  ;;  %v11702_v49 = vmul.f32 %v9111_v1, %v11376_v43  ;;  %v12773_v43 = vld [vmem:[#allocation94_spill] sm:$0xff] }
 0xb72   : > { %9124 = vrcp.f32 %v11576_v27  ;;  %v11716_v51 = vmul.f32 %v9113_v38, %v12773_v43 }
 0xb73   : > { %v9115_v9 = vpop.eup %9114  ;;  %8060 = vmatmul.mubr.bf16.gmra.mrb[188].mxu1 %v5212_v45 }
 0xb74   : > { %v4700_v11 = vpop.xlane.xlu0 %4699  ;;  %8079 = vmatprep.mubr.msk.bf16.mxu1 %vm2986_vm0, %v11330_v44  ;;  %v11713_v32 = vmul.f32 %v9115_v9, %v12772_v48  ;;  %v9117_v63 = vpop.eup %9116 }
 0xb75   : > { %9126 = vrcp.f32 %v4700_v11  ;;  %v11725_v44 = vmul.f32 %v9117_v63, %v11378_v52  ;;  %v12775_v11 = vld [vmem:[#allocation93_spill] sm:$0xff] }
 0xb76   : > { %9128 = vrcp.f32 %v11656_v16  ;;  %v12774_v16 = vld [vmem:[#allocation91_spill] sm:$0xff] }
 0xb77   : > { %v9119_v27 = vpop.eup %9118 }
 0xb78   : > { %v3719_v1 = vpop.xlane.xlu0 %3718  ;;  %v11722_v18 = vmul.f32 %v9119_v27, %v11374_v3  ;;  %v9121_v2 = vpop.eup %9120 }
 0xb79   : > { %9130 = vrcp.f32 %v3719_v1  ;;  %v11737_v52 = vmul.f32 %v9121_v2, %v12775_v11  ;;  %v12780_v11 = vld [vmem:[#allocation31_spill] sm:$0xff] }
 0xb7a   : > { %9132 = vrcp.f32 %v4706_v14  ;;  %v4200_v14 = vpop.xlane.xlu1 %4199 }
 0xb7b   : > { %v9123_v38 = vpop.eup %9122  ;;  %8080 = vmatmul.mubr.msk.bf16.vlgmr.msra.gmra.mrb[192].mxu1 %vm2986_vm0, %v11324_v57  ;;  %v12789_v57 = vld [vmem:[#allocation73_spill] sm:$0xff] }
 0xb7c   : > { %v4704_v9 = vpop.xlane.xlu0 %4703  ;;  %8083 = vmatprep.mubr.msk.bf16.mxu1 %vm2986_vm0, %v11338_v17  ;;  %v11734_v3 = vmul.f32 %v9123_v38, %v12774_v16  ;;  %v9125_v48 = vpop.eup %9124  ;;  %v12778_v38 = vld [vmem:[#allocation98_spill] sm:$0xff] }
 0xb7d   : > { %9134 = vrcp.f32 %v4704_v9  ;;  %4894 = vrot.lane.b32.xlu0 %v4877_v12, %s9551_s24  ;;  %v11749_v27 = vmul.f32 %v9125_v48, %v11388_v13  ;;  %v12777_v13 = vld [vmem:[#allocation96_spill] sm:$0xff] }
 0xb7e   : > { %9136 = vrcp.f32 %v3725_v34  ;;  %v12776_v34 = vld [vmem:[#allocation39_spill] sm:$0xff] }
 0xb7f   : > { %v9127_v43 = vpop.eup %9126 }
 0xb80   : > { %v3723_v17 = vpop.xlane.xlu0 %3722  ;;  %v11746_v63 = vmul.f32 %v9127_v43, %v11384_v60  ;;  %v9129_v1 = vpop.eup %9128 }
 0xb81   : > { %9138 = vrcp.f32 %v3723_v17  ;;  %3913 = vrot.lane.b32.xlu1 %v3896_v31, %s9551_s24  ;;  %v3219_v60 = vpop.xlane.xlu1 %3218  ;;  %v11765_v9 = vmul.f32 %v9129_v1, %v12778_v38 }
 0xb82   : > { %9140 = vrcp.f32 %v4196_v23 }
 0xb83   : > { %v9131_v29 = vpop.eup %9130  ;;  %8084 = vmatmul.mubr.msk.bf16.gmra.mrb[196].mxu1 %vm2986_vm0, %v11332_v42  ;;  %v12779_v42 = vld [vmem:[#allocation28_spill] sm:$0xff] }
 0xb84   : > { %v4194_v12 = vpop.xlane.xlu0 %4193  ;;  %8087 = vmatprep.mubr.msk.bf16.mxu1 %vm2986_vm0, %v12776_v34  ;;  %v11762_v2 = vmul.f32 %v9131_v29, %v12777_v13  ;;  %v9133_v62 = vpop.eup %9132  ;;  %v12783_v13 = vld [vmem:[#allocation95_spill] sm:$0xff] }
 0xb85   : > { %9142 = vrcp.f32 %v4194_v12  ;;  %v11773_v48 = vmul.f32 %v9133_v62, %v12780_v11  ;;  %v4204_v17 = vpop.xlane.xlu1 %4203  ;;  %v12781_v12 = vld [vmem:[#allocation33_spill] sm:$0xff] }
 0xb86   : > { %9144 = vrcp.f32 %v3215_v47  ;;  %v12782_v47 = vld [vmem:[#allocation43_spill] sm:$0xff]  ;;  %v12784_v62 = vld [vmem:[#allocation97_spill] sm:$0xff] }
 0xb87   : > { %v9135_v31 = vpop.eup %9134 }
 0xb88   : > { %v3213_v23 = vpop.xlane.xlu0 %3212  ;;  %v11770_v16 = vmul.f32 %v9135_v31, %v12779_v42  ;;  %v9137_v43 = vpop.eup %9136 }
 0xb89   : > { %9146 = vrcp.f32 %v3213_v23  ;;  %v11785_v31 = vmul.f32 %v9137_v43, %v12784_v62  ;;  %v12787_v43 = vld [vmem:[#allocation26_spill] sm:$0xff] }
 0xb8a   : > { %9148 = vrcp.f32 %v4200_v14  ;;  %v12785_v14 = vld [vmem:[#allocation50_spill] sm:$0xff] }
 0xb8b   : > { %v9139_v29 = vpop.eup %9138  ;;  %8088 = vmatmul.mubr.msk.bf16.gmra.mrb[200].mxu1 %vm2986_vm0, %v12781_v12  ;;  %v3223_v12 = vpop.xlane.xlu1 %3222 }
 0xb8c   : > { %v4198_v34 = vpop.xlane.xlu0 %4197  ;;  %8091 = vmatprep.mubr.msk.bf16.mxu1 %vm2986_vm0, %v12782_v47  ;;  %v11782_v38 = vmul.f32 %v9139_v29, %v12783_v13  ;;  %v9141_v23 = vpop.eup %9140 }
 0xb8d   : > { %9150 = vrcp.f32 %v4198_v34  ;;  %v4347_v1 = vmul.f32 %v9141_v23, %v12785_v14  ;;  %v12788_v34 = vld [vmem:[#allocation75_spill] sm:$0xff] }
 0xb8e   : > { %9152 = vrcp.f32 %v3219_v60 }
 0xb8f   : > { %v9143_v11 = vpop.eup %9142  ;;  %v4208_v23 = vpop.xlane.xlu1 %4207 }
 0xb90   : > { %v4346_v55 = vmul.f32 %v9143_v11, %v12786_v41  ;;  %v3217_v45 = vpop.xlane.xlu0 %3216  ;;  %v9145_v47 = vpop.eup %9144 }
 0xb91   : > { %9154 = vrcp.f32 %v3217_v45  ;;  %v3366_v62 = vmul.f32 %v9145_v47, %v12788_v34  ;;  %v12790_v45 = vld [vmem:[#allocation51_spill] sm:$0xff]  ;;  %v8822_v34 = vld [vmem:[#allocation10 + $0xe0] ss:$12 sps:$4 sm:$0xff]  }
 0xb92   : > { %v4362_v29 = vpack.c.bf16 %v4347_v1, %v4346_v55  ;;  %9156 = vrcp.f32 %v4204_v17  ;;  %v12791_v1 = vld [vmem:[#allocation49_spill] sm:$0xff] }
 0xb93   : > { %v9147_v13 = vpop.eup %9146  ;;  %8092 = vmatmul.mubr.msk.bf16.gmra.mrb[204].mxu1 %vm2986_vm0, %v12787_v43 }
 0xb94   : > { %v3365_v42 = vmul.f32 %v9147_v13, %v12789_v57  ;;  %v4202_v6 = vpop.xlane.xlu0 %4201  ;;  %4370 = vst.msk [vmem:[#allocation3 + $0x8] sm:$0xff] %vm2986_vm0, %v4362_v29  ;;  %v9149_v60 = vpop.eup %9148  ;;  %v8820_v13 = vld [vmem:[#allocation10 + $0xc8] ss:$12 sps:$4 sm:$0xff]  }
 0xb95   : > { %9158 = vrcp.f32 %v4202_v6  ;;  %v4349_v55 = vmul.f32 %v9149_v60, %v12790_v45  ;;  %v8821_v29 = vld [vmem:[#allocation10 + $0x8] ss:$12 sps:$4 sm:$0xff]   ;;  %8159 = vmatprep.subr.bf16.mxu1 %v8820_v13  ;;  %v8823_v45 = vld [vmem:[#allocation10 + $0x20] ss:$12 sps:$4 sm:$0xff]  }
 0xb96   : > { %v3381_v41 = vpack.c.bf16 %v3366_v62, %v3365_v42  ;;  %9160 = vrcp.f32 %v3223_v12  ;;  %v12792_v6 = vld [vmem:[#allocation74_spill] sm:$0xff]  ;;  %v3227_v42 = vpop.xlane.xlu1 %3226  ;;  %v12793_v62 = vld [vmem:[#allocation72_spill] sm:$0xff]  ;;  %8167 = vmatpush3.bf16.msra.mxu1 %v8821_v29  ;;  %v12799_v29 = vld [vmem:[#allocation77_spill] sm:$0xff] }
 0xb97   : > { %v9151_v11 = vpop.eup %9150  ;;  %v12794_v60 = vld [vmem:[#allocation110_spill] sm:$0xff]  ;;  %8160 = vmatprep.subr.bf16.mxu1 %v8822_v34 }
 0xb98   : > { %v4348_v17 = vmul.f32 %v9151_v11, %v12791_v1  ;;  %v3221_v14 = vpop.xlane.xlu0 %3220  ;;  %3389 = vst.msk [vmem:[#allocation3] sm:$0xff] %vm2986_vm0, %v3381_v41  ;;  %v9153_v43 = vpop.eup %9152 }
 0xb99   : > { %9162 = vrcp.f32 %v3221_v14  ;;  %v3368_v53 = vmul.f32 %v9153_v43, %v12792_v6 }
 0xb9a   : > { %v4363_v47 = vpack.c.bf16 %v4349_v55, %v4348_v17  ;;  %9164 = vrcp.f32 %v4208_v23  ;;  %v12795_v55 = vld [vmem:[#allocation54_spill] sm:$0xff]  ;;  %v12796_v17 = vld [vmem:[#allocation52_spill] sm:$0xff]  ;;  %8168 = vmatpush3.bf16.msra.mxu1 %v8823_v45 }
 0xb9b   : > { %v9155_v57 = vpop.eup %9154 }
 0xb9c   : > { %v3367_v12 = vmul.f32 %v9155_v57, %v12793_v62  ;;  %v4206_v56 = vpop.xlane.xlu0 %4205  ;;  %4215 = vadd.xlane.f32.xlu0 %v12794_v60  ;;  %4371 = vst.msk [vmem:[#allocation3 + $0x20] sm:$0xff] %vm2986_vm0, %v4363_v47  ;;  %v9157_v11 = vpop.eup %9156  ;;  %v12797_v57 = vld [vmem:[#allocation66_spill] sm:$0xff] }
 0xb9d   : > { %9166 = vrcp.f32 %v4206_v56  ;;  %v4351_v1 = vmul.f32 %v9157_v11, %v12795_v55  ;;  %v12801_v11 = vld [vmem:[#allocation55_spill] sm:$0xff]  ;;  %v12802_v55 = vld [vmem:[#allocation53_spill] sm:$0xff] }
 0xb9e   : > { %v3382_v41 = vpack.c.bf16 %v3368_v53, %v3367_v12  ;;  %9168 = vrcp.f32 %v3227_v42  ;;  %v12798_v53 = vld [vmem:[#allocation79_spill] sm:$0xff]  ;;  %v12800_v42 = vld [vmem:[#allocation109_spill] sm:$0xff] }
 0xb9f   : > { %v9159_v23 = vpop.eup %9158 }
 0xba0   : > { %v4350_v14 = vmul.f32 %v9159_v23, %v12796_v17  ;;  %v3225_v43 = vpop.xlane.xlu0 %3224  ;;  %3232 = vadd.xlane.f32.xlu0 %v12797_v57  ;;  %3390 = vst.msk [vmem:[#allocation3 + $0x18] sm:$0xff] %vm2986_vm0, %v3382_v41  ;;  %v9161_v6 = vpop.eup %9160  ;;  %v8824_v17 = vld [vmem:[#allocation10 + $0xf8] ss:$12 sps:$4 sm:$0xff]  }
 0xba1   : > { %9170 = vrcp.f32 %v3225_v43  ;;  %v3370_v13 = vmul.f32 %v9161_v6, %v12798_v53  ;;  %v8825_v57 = vld [vmem:[#allocation10 + $0x38] ss:$12 sps:$4 sm:$0xff]   ;;  %v12804_v6 = vld [vmem:[#allocation78_spill] sm:$0xff]  ;;  %8161 = vmatprep.subr.bf16.mxu1 %v8824_v17 }
 0xba2   : > { %v4364_v56 = vpack.c.bf16 %v4351_v1, %v4350_v14  ;;  %v12803_v1 = vld [vmem:[#allocation67_spill] sm:$0xff]  ;;  %8169 = vmatpush3.bf16.msra.mxu1 %v8825_v57  ;;  %v12809_v17 = vld [vmem:[#allocation70_spill] sm:$0xff]  ;;  %v12812_v57 = vpack.c.bf16 %v11685_v36, %v11682_v28 }
 0xba3   : > { %v9163_v47 = vpop.eup %9162 }
 0xba4   : > { %v3369_v62 = vmul.f32 %v9163_v47, %v12799_v29  ;;  %4372 = vst.msk [vmem:[#allocation3 + $0x38] sm:$0xff] %vm2986_vm0, %v4364_v56  ;;  %v9165_v34 = vpop.eup %9164  ;;  %v12805_v47 = vld [vmem:[#allocation76_spill] sm:$0xff] }
 0xba5   : > { %4213 = vadd.xlane.f32.xlu1 %v12800_v42  ;;  %v4353_v23 = vmul.f32 %v9165_v34, %v12801_v11  ;;  %v8828_v34 = vld [vmem:[#allocation10 + $0x128] ss:$12 sps:$4 sm:$0xff]   ;;  %v8831_v11 = vld [vmem:[#allocation10 + $0x80] ss:$12 sps:$4 sm:$0xff]  }
 0xba6   : > { %v3383_v12 = vpack.c.bf16 %v3370_v13, %v3369_v62  ;;  %v8826_v13 = vld [vmem:[#allocation10 + $0x110] ss:$12 sps:$4 sm:$0xff]   ;;  %v8829_v42 = vld [vmem:[#allocation10 + $0x68] ss:$12 sps:$4 sm:$0xff]  }
 0xba7   : > { %v9167_v60 = vpop.eup %9166  ;;  %v8827_v62 = vld [vmem:[#allocation10 + $0x50] ss:$12 sps:$4 sm:$0xff]   ;;  %8162 = vmatprep.subr.bf16.mxu1 %v8826_v13 }
 0xba8   : > { %v4352_v41 = vmul.f32 %v9167_v60, %v12802_v55  ;;  %3391 = vst.msk [vmem:[#allocation3 + $0x30] sm:$0xff] %vm2986_vm0, %v3383_v12  ;;  %v9169_v45 = vpop.eup %9168  ;;  %8170 = vmatpush3.bf16.msra.mxu1 %v8827_v62  ;;  %v8830_v60 = vld [vmem:[#allocation10 + $0x140] ss:$12 sps:$4 sm:$0xff]   ;;  %v8832_v55 = vld [vmem:[#allocation10 + $0x158] ss:$12 sps:$4 sm:$0xff]  }
 0xba9   : > { %3234 = vadd.xlane.f32.xlu1 %v12803_v1  ;;  %v3372_v56 = vmul.f32 %v9169_v45, %v12804_v6  ;;  %8163 = vmatprep.subr.bf16.mxu1 %v8828_v34  ;;  %v12807_v45 = vld [vmem:[#allocation68_spill] sm:$0xff]  ;;  %v12808_v1 = vld [vmem:[#allocation111_spill] sm:$0xff] }
 0xbaa   : > { %v4365_v14 = vpack.c.bf16 %v4353_v23, %v4352_v41  ;;  %v8833_v41 = vld [vmem:[#allocation10 + $0x98] ss:$12 sps:$4 sm:$0xff]  }
 0xbab   : > { %v9171_v43 = vpop.eup %9170  ;;  %v12814_v62 = vld [vmem:[#allocation116_spill] sm:$0xff] }
 0xbac   : > { %v3371_v53 = vmul.f32 %v9171_v43, %v12805_v47  ;;  %4373 = vst.msk [vmem:[#allocation3 + $0x50] sm:$0xff] %vm2986_vm0, %v4365_v14  ;;  %8171 = vmatpush3.bf16.msra.mxu1 %v8829_v42 }
 0xbad   : > { %8164 = vmatprep.subr.bf16.mxu1 %v8830_v60 }
 0xbae   : > { %v3384_v29 = vpack.c.bf16 %v3372_v56, %v3371_v53 }
 0xbb0   : > { %3392 = vst.msk [vmem:[#allocation3 + $0x48] sm:$0xff] %vm2986_vm0, %v3384_v29  ;;  %8172 = vmatpush3.bf16.msra.mxu1 %v8831_v11  ;;  %v12816_v11 = vld [vmem:[#allocation83_spill] sm:$0xff] }
 0xbb1   : > { %8165 = vmatprep.subr.bf16.mxu1 %v8832_v55 }
 0xbb4   : > { %8173 = vmatpush3.bf16.msra.mxu1 %v8833_v41  ;;  %v12817_v41 = vld [vmem:[#allocation112_spill] sm:$0xff] }
 0xbb5   : > { %8166 = vmatprep.subr.bf16.mxu1 %v8834_v50  ;;  %v12818_v50 = vld [vmem:[#allocation71_spill] sm:$0xff] }
 0xbb6   : > { %v4893_v12 = vpop.permute.xlu0 %4892  ;;  %4896 = vrot.lane.b32.xlu0 %v4878_v26, %s9551_s24  ;;  %v12806_v26 = vld [vmem:[#allocation113_spill] sm:$0xff] }
 0xbb7   : > { %4916 = vst.msk [vmem:[#allocation3 + $0x8] sm:$0xff] %vm3935_vm1, %v4893_v12  ;;  %v12815_v12 = vld [vmem:[#allocation81_spill] sm:$0xff] }
 0xbb8   : > { %8174 = vmatpush3.bf16.msra.mxu1 %v8835_v39  ;;  %v12819_v39 = vld [vmem:[#allocation114_spill] sm:$0xff] }
 0xbba   : > { %3915 = vrot.lane.b32.xlu1 %v3897_v20, %s9551_s24  ;;  %v3912_v23 = vpop.permute.xlu1 %3911 }
 0xbbb   : > { %3936 = vst.msk [vmem:[#allocation3] sm:$0xff] %vm3935_vm1, %v3912_v23 }
 0xbd5   : > { %4219 = vadd.xlane.f32.xlu0 %v12806_v26  ;;  %v12820_v26 = vld [vmem:[#allocation69_spill] sm:$0xff] }
 0xbd9   : > { %3236 = vadd.xlane.f32.xlu0 %v12807_v45 }
 0xbde   : > { %4217 = vadd.xlane.f32.xlu1 %v12808_v1 }
 0xbe2   : > { %3238 = vadd.xlane.f32.xlu1 %v12809_v17 }
 0xbe7   : > { %v11833_v61 = vpop.f32.mrb[176].mxu1 }
 0xbe8   : > { %12810 = vst [vmem:[#allocation41_spill] sm:$0xff] %v11833_v61  ;;  %v11835_v25 = vpop.f32.mrb[177].mxu1  ;;  %v12842_v61 = vld [vmem:[#allocation85_spill] sm:$0xff] }
 0xbe9   : > { %v11837_v20 = vpop.f32.mrb[178].mxu1 }
 0xbea   : > { %12811 = vst [vmem:[#allocation45_spill] sm:$0xff] %v11837_v20  ;;  %v11839_v14 = vpop.f32.mrb[179].mxu1 }
 0xbef   : > { %4898 = vrot.lane.b32.xlu0 %v4879_v8, %s9551_s24 }
 0xbf0   : > { %v4212_v43 = vpop.xlane.xlu0 %4211 }
 0xbf1   : > { %9172 = vrcp.f32 %v4212_v43 }
 0xbf3   : > { %3917 = vrot.lane.b32.xlu1 %v12812_v57, %s9551_s24 }
 0xbf4   : > { %v3229_v6 = vpop.xlane.xlu0 %3228 }
 0xbf8   : > { %v4895_v56 = vpop.permute.xlu0 %4894 }
 0xbf9   : > { %4917 = vst.msk [vmem:[#allocation3 + $0x20] sm:$0xff] %vm3935_vm1, %v4895_v56  ;;  %v4210_v47 = vpop.xlane.xlu1 %4209 }
 0xbfa   : > { %9174 = vrcp.f32 %v4210_v47 }
 0xbfb   : > { %9176 = vrcp.f32 %v3229_v6  ;;  %v9173_v29 = vpop.eup %9172 }
 0xbfc   : > { %v4355_v8 = vmul.f32 %v9173_v29, %v12813_v7 }
 0xbfd   : > { %v3231_v53 = vpop.xlane.xlu1 %3230 }
 0xbfe   : > { %9178 = vrcp.f32 %v3231_v53 }
 0xc01   : > { %v3914_v13 = vpop.permute.xlu1 %3913 }
 0xc02   : > { %3937 = vst.msk [vmem:[#allocation3 + $0x18] sm:$0xff] %vm3935_vm1, %v3914_v13 }
 0xc04   : > { %v9175_v4 = vpop.eup %9174 }
 0xc05   : > { %v4354_v28 = vmul.f32 %v9175_v4, %v12814_v62  ;;  %v9177_v36 = vpop.eup %9176 }
 0xc06   : > { %v3373_v60 = vmul.f32 %v9177_v36, %v12815_v12 }
 0xc07   : > { %v4366_v34 = vpack.c.bf16 %v4355_v8, %v4354_v28  ;;  %v12825_v8 = vld [vmem:[#allocation117_spill] sm:$0xff]  ;;  %v12826_v28 = vld [vmem:[#allocation115_spill] sm:$0xff] }
 0xc08   : > { %v9179_v42 = vpop.eup %9178 }
 0xc09   : > { %v3374_v23 = vmul.f32 %v9179_v42, %v12816_v11  ;;  %4374 = vst.msk [vmem:[#allocation3 + $0x68] sm:$0xff] %vm2986_vm0, %v4366_v34 }
 0xc0b   : > { %v3385_v55 = vpack.c.bf16 %v3374_v23, %v3373_v60 }
 0xc0d   : > { %3393 = vst.msk [vmem:[#allocation3 + $0x60] sm:$0xff] %vm2986_vm0, %v3385_v55 }
 0xc0e   : > { %4223 = vadd.xlane.f32.xlu0 %v12817_v41  ;;  %v12831_v41 = vld [vmem:[#allocation80_spill] sm:$0xff] }
 0xc12   : > { %3240 = vadd.xlane.f32.xlu0 %v12818_v50 }
 0xc17   : > { %4221 = vadd.xlane.f32.xlu1 %v12819_v39  ;;  %v12832_v39 = vld [vmem:[#allocation82_spill] sm:$0xff] }
 0xc1b   : > { %3242 = vadd.xlane.f32.xlu1 %v12820_v26 }
 0xc29   : > { %v4216_v45 = vpop.xlane.xlu0 %4215 }
 0xc2a   : > { %9180 = vrcp.f32 %v4216_v45 }
 0xc2d   : > { %v3233_v1 = vpop.xlane.xlu0 %3232 }
 0xc31   : > { %v4897_v17 = vpop.permute.xlu0 %4896 }
 0xc32   : > { %4918 = vst.msk [vmem:[#allocation3 + $0x38] sm:$0xff] %vm3935_vm1, %v4897_v17  ;;  %v4214_v43 = vpop.xlane.xlu1 %4213 }
 0xc33   : > { %9182 = vrcp.f32 %v4214_v43 }
 0xc34   : > { %9184 = vrcp.f32 %v3233_v1  ;;  %v9181_v4 = vpop.eup %9180 }
 0xc35   : > { %v11862_v57 = vpop.f32.mrb[180].mxu1  ;;  %v4357_v62 = vmul.f32 %v9181_v4, %v12825_v8 }
 0xc36   : > { %12821 = vst [vmem:[#allocation47_spill] sm:$0xff] %v11862_v57  ;;  %v11864_v6 = vpop.f32.mrb[181].mxu1  ;;  %v3235_v56 = vpop.xlane.xlu1 %3234 }
 0xc37   : > { %12822 = vst [vmem:[#allocation25_spill] sm:$0xff] %v11864_v6  ;;  %9186 = vrcp.f32 %v3235_v56  ;;  %v11866_v47 = vpop.f32.mrb[182].mxu1  ;;  %v12840_v6 = vld [vmem:[#allocation120_spill] sm:$0xff] }
 0xc38   : > { %12823 = vst [vmem:[#allocation27_spill] sm:$0xff] %v11866_v47  ;;  %v11868_v53 = vpop.f32.mrb[183].mxu1 }
 0xc39   : > { %12824 = vst [vmem:[#allocation29_spill] sm:$0xff] %v11868_v53  ;;  %v11870_v13 = vld [vmem:[#allocation3 + $0x38] sm:$0xff] }
 0xc3a   : > { %6699 = vmatprep.mubr.bf16.mxu1 %v11870_v13  ;;  %v3916_v29 = vpop.permute.xlu1 %3915 }
 0xc3b   : > { %3938 = vst.msk [vmem:[#allocation3 + $0x30] sm:$0xff] %vm3935_vm1, %v3916_v29 }
 0xc3d   : > { %v9183_v7 = vpop.eup %9182 }
 0xc3e   : > { %v4356_v36 = vmul.f32 %v9183_v7, %v12826_v28  ;;  %v11876_v34 = vpop.f32.mrb[184].mxu1  ;;  %v9185_v42 = vpop.eup %9184  ;;  %v9316_v7 = vld [vmem:[#allocation7 + $0x10] sm:$0xff]  ;;  %v9317_v28 = vld [vmem:[#allocation7] sm:$0xff] }
 0xc3f   : > { %12827 = vst [vmem:[#allocation34_spill] sm:$0xff] %v11876_v34  ;;  %v11878_v12 = vpop.f32.mrb[185].mxu1  ;;  %v3375_v50 = vmul.f32 %v9185_v42, %v12831_v41  ;;  %v9327_v34 = vld [vmem:[#allocation7 + $0x48] sm:$0xff] }
 0xc40   : > { %12828 = vst [vmem:[#allocation128_spill] sm:$0xff] %v11878_v12  ;;  %v11880_v60 = vpop.f32.mrb[186].mxu1  ;;  %v4367_v11 = vpack.c.bf16 %v4357_v62, %v4356_v36 }
 0xc41   : > { %12829 = vst [vmem:[#allocation126_spill] sm:$0xff] %v11880_v60  ;;  %v9187_v23 = vpop.eup %9186  ;;  %v11882_v55 = vpop.f32.mrb[187].mxu1 }
 0xc42   : > { %12830 = vst [vmem:[#allocation125_spill] sm:$0xff] %v11882_v55  ;;  %v3376_v26 = vmul.f32 %v9187_v23, %v12832_v39  ;;  %v11886_v45 = vld [vmem:[#allocation3 + $0x30] sm:$0xff]  ;;  %4375 = vst.msk [vmem:[#allocation3 + $0x80] sm:$0xff] %vm2986_vm0, %v4367_v11  ;;  %v9318_v23 = vld [vmem:[#allocation7 + $0x18] sm:$0xff] }
 0xc43   : > { %12833 = vst [vmem:[#allocation30_spill] sm:$0xff] %v11886_v45  ;;  %6700 = vmatmul.mubr.bf16.vlgmr.msra.gmra.mrb[208].mxu1 %v11886_v45  ;;  %v9319_v39 = vld [vmem:[#allocation7 + $0x8] sm:$0xff] }
 0xc44   : > { %v3386_v1 = vpack.c.bf16 %v3376_v26, %v3375_v50 }
 0xc46   : > { %v11890_v17 = vpop.f32.mrb[188].mxu1  ;;  %3394 = vst.msk [vmem:[#allocation3 + $0x78] sm:$0xff] %vm2986_vm0, %v3386_v1 }
 0xc47   : > { %12834 = vst [vmem:[#allocation46_spill] sm:$0xff] %v11890_v17  ;;  %v11893_v43 = vpop.f32.mrb[189].mxu1 }
 0xc48   : > { %12835 = vst [vmem:[#allocation35_spill] sm:$0xff] %v11893_v43  ;;  %v11895_v56 = vpop.f32.mrb[190].mxu1  ;;  %v9324_v43 = vld [vmem:[#allocation7 + $0x28] sm:$0xff] }
 0xc49   : > { %12836 = vst [vmem:[#allocation89_spill] sm:$0xff] %v11895_v56  ;;  %v11897_v29 = vpop.f32.mrb[191].mxu1  ;;  %v9321_v56 = vld [vmem:[#allocation7 + $0x30] sm:$0xff] }
 0xc4a   : > { %12837 = vst [vmem:[#allocation38_spill] sm:$0xff] %v11897_v29 }
 0xc4e   : > { %v8081_v4 = vpop.f32.mrb[192].mxu1 }
 0xc4f   : > { %v11899_v8 = vadd.f32 %v9316_v7, %v8081_v4  ;;  %v5512_v62 = vpop.f32.mrb[193].mxu1  ;;  %v9320_v4 = vld [vmem:[#allocation7 + $0x20] sm:$0xff] }
 0xc50   : > { %v11901_v36 = vadd.f32 %v9317_v28, %v5512_v62  ;;  %v8082_v42 = vpop.f32.mrb[194].mxu1 }
 0xc51   : > { %5579 = vmax.xlane.f32.xlu1 %v11899_v8  ;;  %v5515_v11 = vpop.f32.mrb[195].mxu1  ;;  %v11905_v41 = vadd.f32 %v9318_v23, %v8082_v42  ;;  %v9322_v23 = vld [vmem:[#allocation7 + $0x38] sm:$0xff] }
 0xc52   : > { %5575 = vmax.xlane.f32.xlu0 %v11901_v36  ;;  %v11908_v26 = vadd.f32 %v9319_v39, %v5515_v11  ;;  %v9323_v11 = vld [vmem:[#allocation7 + $0x50] sm:$0xff] }
 0xc55   : > { %5581 = vmax.xlane.f32.xlu1 %v11905_v41 }
 0xc56   : > { %v8085_v50 = vpop.f32.mrb[196].mxu1 }
 0xc57   : > { %v5528_v1 = vpop.f32.mrb[197].mxu1  ;;  %v11914_v17 = vadd.f32 %v9321_v56, %v8085_v50  ;;  %v9325_v50 = vld [vmem:[#allocation7 + $0x40] sm:$0xff] }
 0xc58   : > { %v11910_v7 = vadd.f32 %v9320_v4, %v5528_v1  ;;  %v8086_v62 = vpop.f32.mrb[198].mxu1 }
 0xc59   : > { %v5531_v28 = vpop.f32.mrb[199].mxu1  ;;  %5577 = vmax.xlane.f32.xlu1 %v11908_v26  ;;  %v11917_v0 = vadd.f32 %v9322_v23, %v8086_v62  ;;  %v9326_v23 = vld [vmem:[#allocation7 + $0x58] sm:$0xff] }
 0xc5a   : > { %5583 = vmax.xlane.f32.xlu0 %v11910_v7  ;;  %v11923_v56 = vadd.f32 %v9324_v43, %v5531_v28  ;;  %v9328_v28 = vld [vmem:[#allocation7 + $0x70] sm:$0xff] }
 0xc5d   : > { %5587 = vmax.xlane.f32.xlu1 %v11914_v17 }
 0xc5e   : > { %v8089_v42 = vpop.f32.mrb[200].mxu1 }
 0xc5f   : > { %v11919_v39 = vadd.f32 %v9323_v11, %v8089_v42  ;;  %v5544_v1 = vpop.f32.mrb[201].mxu1 }
 0xc60   : > { %v8090_v4 = vpop.f32.mrb[202].mxu1  ;;  %v11925_v60 = vadd.f32 %v9325_v50, %v5544_v1 }
 0xc61   : > { %v5547_v40 = vpop.f32.mrb[203].mxu1  ;;  %5589 = vmax.xlane.f32.xlu1 %v11917_v0  ;;  %5595 = vmax.xlane.f32.xlu0 %v11919_v39  ;;  %v11929_v11 = vadd.f32 %v9326_v23, %v8090_v4 }
 0xc62   : > { %v4220_v29 = vpop.xlane.xlu0 %4219  ;;  %v11931_v55 = vadd.f32 %v9327_v34, %v5547_v40  ;;  %v9329_v40 = vld [vmem:[#allocation7 + $0x60] sm:$0xff] }
 0xc63   : > { %9188 = vrcp.f32 %v4220_v29 }
 0xc65   : > { %5585 = vmax.xlane.f32.xlu1 %v11923_v56  ;;  %5591 = vmax.xlane.f32.xlu0 %v11925_v60 }
 0xc66   : > { %v3237_v62 = vpop.xlane.xlu0 %3236  ;;  %v8093_v42 = vpop.f32.mrb[204].mxu1 }
 0xc67   : > { %v5560_v12 = vpop.f32.mrb[205].mxu1  ;;  %v11935_v1 = vadd.f32 %v9328_v28, %v8093_v42  ;;  %v12839_v28 = vld [vmem:[#allocation122_spill] sm:$0xff] }
 0xc68   : > { %v8094_v47 = vpop.f32.mrb[206].mxu1  ;;  %v11939_v34 = vadd.f32 %v9329_v40, %v5560_v12 }
 0xc69   : > { %v5563_v57 = vpop.f32.mrb[207].mxu1  ;;  %5593 = vmax.xlane.f32.xlu1 %v11931_v55  ;;  %5597 = vmax.xlane.f32.xlu0 %v11929_v11 }
 0xc6a   : > { %v4899_v43 = vpop.permute.xlu0 %4898 }
 0xc6b   : > { %4919 = vst.msk [vmem:[#allocation3 + $0x50] sm:$0xff] %vm3935_vm1, %v4899_v43  ;;  %v4218_v50 = vpop.xlane.xlu1 %4217 }
 0xc6c   : > { %9190 = vrcp.f32 %v4218_v50 }
 0xc6d   : > { %5603 = vmax.xlane.f32.xlu0 %v11935_v1  ;;  %9192 = vrcp.f32 %v3237_v62  ;;  %v9189_v42 = vpop.eup %9188 }
 0xc6e   : > { %v4359_v50 = vmul.f32 %v9189_v42, %v12839_v28  ;;  %v12846_v28 = vld [vmem:[#allocation119_spill] sm:$0xff] }
 0xc6f   : > { %v3239_v4 = vpop.xlane.xlu1 %3238 }
 0xc70   : > { %9194 = vrcp.f32 %v3239_v4  ;;  %v12841_v4 = vpack.c.bf16 %v11716_v51, %v11713_v32  ;;  %v8838_v32 = vld [vmem:[#allocation10 + $0x4] ss:$12 sps:$4 sm:$0xff]  }
 0xc71   : > { %5599 = vmax.xlane.f32.xlu0 %v11939_v34  ;;  %6425 = vmatprep.subr.bf16.mxu0 %v8838_v32 }
 0xc72   : > { %v11942_v23 = vld [vmem:[#allocation3 + $0x50] sm:$0xff] }
 0xc73   : > { %12838 = vst [vmem:[#allocation101_spill] sm:$0xff] %v11942_v23  ;;  %6707 = vmatprep.mubr.bf16.mxu1 %v11942_v23  ;;  %v3918_v29 = vpop.permute.xlu1 %3917 }
 0xc74   : > { %3939 = vst.msk [vmem:[#allocation3 + $0x48] sm:$0xff] %vm3935_vm1, %v3918_v29 }
 0xc76   : > { %v9191_v43 = vpop.eup %9190 }
 0xc77   : > { %v4358_v62 = vmul.f32 %v9191_v43, %v12840_v6  ;;  %v9193_v53 = vpop.eup %9192  ;;  %v12844_v6 = vpack.c.bf16 %v11705_v54, %v11702_v49 }
 0xc78   : > { %v3377_v20 = vmul.f32 %v9193_v53, %v12842_v61  ;;  %v9331_v53 = vld [vmem:[#allocation7 + $0x68] sm:$0xff] }
 0xc79   : > { %v4368_v12 = vpack.c.bf16 %v4359_v50, %v4358_v62 }
 0xc7a   : > { %v9195_v40 = vpop.eup %9194  ;;  %3919 = vrot.lane.b32.xlu1 %v12841_v4, %s9551_s24 }
 0xc7b   : > { %v3378_v23 = vmul.f32 %v9195_v40, %v12843_v37  ;;  %v11954_v45 = vld [vmem:[#allocation3 + $0x48] sm:$0xff]  ;;  %4376 = vst.msk [vmem:[#allocation3 + $0x98] sm:$0xff] %vm2986_vm0, %v4368_v12  ;;  %v9330_v37 = vld [vmem:[#allocation7 + $0x78] sm:$0xff] }
 0xc7c   : > { %6708 = vmatmul.mubr.bf16.gmra.mrb[212].mxu1 %v11954_v45  ;;  %v11964_v61 = vadd.f32 %v9330_v37, %v8094_v47  ;;  %v12845_v47 = vld [vmem:[#allocation121_spill] sm:$0xff]  ;;  %v12847_v40 = vld [vmem:[#allocation84_spill] sm:$0xff] }
 0xc7d   : > { %v3387_v29 = vpack.c.bf16 %v3378_v23, %v3377_v20  ;;  %v11967_v20 = vadd.f32 %v9331_v53, %v5563_v57 }
 0xc7f   : > { %3395 = vst.msk [vmem:[#allocation3 + $0x90] sm:$0xff] %vm2986_vm0, %v3387_v29  ;;  %v12848_v29 = vld [vmem:[#allocation86_spill] sm:$0xff] }
 0xc87   : > { %4900 = vrot.lane.b32.xlu0 %v12844_v6, %s9551_s24 }
 0xc9b   : > { %v4224_v51 = vpop.xlane.xlu0 %4223 }
 0xc9c   : > { %9196 = vrcp.f32 %v4224_v51  ;;  %v12850_v51 = vpack.c.bf16 %v11725_v44, %v11722_v18 }
 0xc9e   : > { %5175 = vadd.xlane.f32.xlu1 %v11522_v35 }
 0xc9f   : > { %v3241_v23 = vpop.xlane.xlu0 %3240 }
 0xca2   : > { %5605 = vmax.xlane.f32.xlu1 %v11964_v61 }
 0xca4   : > { %v4222_v42 = vpop.xlane.xlu1 %4221 }
 0xca5   : > { %9198 = vrcp.f32 %v4222_v42 }
 0xca6   : > { %5601 = vmax.xlane.f32.xlu1 %v11967_v20  ;;  %5173 = vadd.xlane.f32.xlu0 %v11519_v10  ;;  %9200 = vrcp.f32 %v3241_v23  ;;  %v9197_v35 = vpop.eup %9196  ;;  %v12849_v10 = vpack.c.bf16 %v11737_v52, %v11734_v3 }
 0xca7   : > { %v4361_v43 = vmul.f32 %v9197_v35, %v12845_v47 }
 0xca8   : > { %v3243_v49 = vpop.xlane.xlu1 %3242 }
 0xca9   : > { %9202 = vrcp.f32 %v3243_v49 }
 0xcaf   : > { %v9199_v54 = vpop.eup %9198 }
 0xcb0   : > { %v4360_v50 = vmul.f32 %v9199_v54, %v12846_v28  ;;  %v9201_v62 = vpop.eup %9200 }
 0xcb1   : > { %v3379_v4 = vmul.f32 %v9201_v62, %v12847_v40 }
 0xcb2   : > { %v4369_v12 = vpack.c.bf16 %v4361_v43, %v4360_v50  ;;  %v12852_v50 = vpack.c.bf16 %v11749_v27, %v11746_v63 }
 0xcb3   : > { %v9203_v57 = vpop.eup %9202 }
 0xcb4   : > { %v3380_v6 = vmul.f32 %v9203_v57, %v12848_v29  ;;  %4377 = vst.msk [vmem:[#allocation3 + $0xb0] sm:$0xff] %vm2986_vm0, %v4369_v12 }
 0xcb6   : > { %v3388_v32 = vpack.c.bf16 %v3380_v6, %v3379_v4 }
 0xcb7   : > { %3921 = vrot.lane.b32.xlu1 %v12849_v10, %s9551_s24 }
 0xcb8   : > { %3396 = vst.msk [vmem:[#allocation3 + $0xa8] sm:$0xff] %vm2986_vm0, %v3388_v32 }
 0xcbc   : > { %4902 = vrot.lane.b32.xlu0 %v12850_v51, %s9551_s24  ;;  %v8836_v51 = vld [vmem:[#allocation10] ss:$12 sps:$4 sm:$0xff]  }
 0xcdb   : > { %5177 = vadd.xlane.f32.xlu1 %v11524_v5  ;;  %5179 = vadd.xlane.f32.xlu0 %v11516_v19 }
 0xcde   : > { %v5580_v37 = vpop.xlane.xlu1 %5579 }
 0xcdf   : > { %v5576_v53 = vpop.xlane.xlu0 %5575  ;;  %v5609_v23 = vsub.f32 %v11899_v8, %v5580_v37  ;;  %v12851_v8 = vpack.c.bf16 %v11765_v9, %v11762_v2 }
 0xce0   : > { %v5607_v42 = vsub.f32 %v11901_v36, %v5576_v53  ;;  %v8841_v53 = vld [vmem:[#allocation10 + $0x1c] ss:$12 sps:$4 sm:$0xff]  }
 0xce1   : > { %v5627_v52 = vmul.f32 1.442695, %v5609_v23 }
 0xce2   : > { %v5582_v49 = vpop.xlane.xlu1 %5581  ;;  %v5623_v54 = vmul.f32 1.442695, %v5607_v42 }
 0xce3   : > { %v5610_v3 = vsub.f32 %v11905_v41, %v5582_v49  ;;  %9204 = vpow2.f32 %v5627_v52  ;;  %v8839_v52 = vld [vmem:[#allocation10 + $0x18] ss:$12 sps:$4 sm:$0xff]  }
 0xce5   : > { %v5629_v35 = vmul.f32 1.442695, %v5610_v3 }
 0xce6   : > { %v5578_v47 = vpop.xlane.xlu1 %5577 }
 0xce7   : > { %v5608_v18 = vsub.f32 %v11908_v26, %v5578_v47  ;;  %9206 = vpow2.f32 %v5629_v35  ;;  %v5584_v19 = vpop.xlane.xlu0 %5583  ;;  %v8842_v47 = vld [vmem:[#allocation10 + $0x30] ss:$12 sps:$4 sm:$0xff]  }
 0xce8   : > { %9208 = vpow2.f32 %v5623_v54  ;;  %v5611_v36 = vsub.f32 %v11910_v7, %v5584_v19 }
 0xce9   : > { %v5625_v5 = vmul.f32 1.442695, %v5608_v18 }
 0xcea   : > { %v5588_v44 = vpop.xlane.xlu1 %5587  ;;  %v5631_v12 = vmul.f32 1.442695, %v5611_v36 }
 0xceb   : > { %9210 = vpow2.f32 %v5625_v5  ;;  %v5613_v26 = vsub.f32 %v11914_v17, %v5588_v44 }
 0xcec   : > { %3923 = vrot.lane.b32.xlu1 %v12851_v8, %s9551_s24  ;;  %9212 = vpow2.f32 %v5631_v12 }
 0xced   : > { %v12002_v62 = vpop.eup %9204  ;;  %v5635_v29 = vmul.f32 1.442695, %v5613_v26 }
 0xcee   : > { %v5596_v41 = vpop.xlane.xlu0 %5595  ;;  %v5590_v43 = vpop.xlane.xlu1 %5589 }
 0xcef   : > { %v5614_v28 = vsub.f32 %v11917_v0, %v5590_v43  ;;  %v5617_v23 = vsub.f32 %v11919_v39, %v5596_v41  ;;  %v8847_v39 = vld [vmem:[#allocation10 + $0x4c] ss:$12 sps:$4 sm:$0xff]   ;;  %v8845_v41 = vld [vmem:[#allocation10 + $0x48] ss:$12 sps:$4 sm:$0xff]  }
 0xcf1   : > { %4904 = vrot.lane.b32.xlu0 %v12852_v50, %s9551_s24  ;;  %v12004_v2 = vpop.eup %9206  ;;  %v5637_v9 = vmul.f32 1.442695, %v5614_v28  ;;  %v8850_v28 = vld [vmem:[#allocation10 + $0x64] ss:$12 sps:$4 sm:$0xff]  }
 0xcf2   : > { %v5592_v57 = vpop.xlane.xlu0 %5591  ;;  %v5586_v40 = vpop.xlane.xlu1 %5585  ;;  %v5688_v10 = vpack.c.bf16 %v12004_v2, %v12002_v62 }
 0xcf3   : > { %v5615_v7 = vsub.f32 %v11925_v60, %v5592_v57  ;;  %v5612_v4 = vsub.f32 %v11923_v56, %v5586_v40  ;;  %v12008_v0 = vpop.eup %9208  ;;  %9214 = vpow2.f32 %v5637_v9  ;;  %v8848_v57 = vld [vmem:[#allocation10 + $0x60] ss:$12 sps:$4 sm:$0xff]   ;;  %v8853_v40 = vld [vmem:[#allocation10 + $0x7c] ss:$12 sps:$4 sm:$0xff]  }
 0xcf5   : > { %v12010_v17 = vpop.eup %9210  ;;  %v5633_v6 = vmul.f32 1.442695, %v5612_v4  ;;  %v5639_v60 = vmul.f32 1.442695, %v5615_v7 }
 0xcf6   : > { %v5598_v63 = vpop.xlane.xlu0 %5597  ;;  %v5594_v27 = vpop.xlane.xlu1 %5593  ;;  %v5687_v32 = vpack.c.bf16 %v12010_v17, %v12008_v0 }
 0xcf7   : > { %v5618_v56 = vsub.f32 %v11929_v11, %v5598_v63  ;;  %v5616_v37 = vsub.f32 %v11931_v55, %v5594_v27  ;;  %9216 = vpow2.f32 %v5633_v6  ;;  %v8844_v11 = vld [vmem:[#allocation10 + $0x34] ss:$12 sps:$4 sm:$0xff]   ;;  %v5643_v55 = vmul.f32 1.442695, %v5617_v23  ;;  %v12024_v18 = vpop.eup %9212  ;;  %v8851_v6 = vld [vmem:[#allocation10 + $0x78] ss:$12 sps:$4 sm:$0xff]  }
 0xcf8   : > { %8111 = vmatprep.mubr.bf16.mxu0 %v5687_v32  ;;  %9218 = vpow2.f32 %v5635_v29  ;;  %v8856_v27 = vld [vmem:[#allocation10 + $0x94] ss:$12 sps:$4 sm:$0xff]   ;;  %v8854_v32 = vld [vmem:[#allocation10 + $0x90] ss:$12 sps:$4 sm:$0xff]  }
 0xcf9   : > { %v5641_v42 = vmul.f32 1.442695, %v5616_v37  ;;  %8112 = vmatmul.mubr.bf16.vlgmr.msra.gmra.mrb[176].mxu0 %v5688_v10  ;;  %9220 = vpow2.f32 %v5639_v60  ;;  %v5645_v35 = vmul.f32 1.442695, %v5618_v56  ;;  %v8859_v10 = vld [vmem:[#allocation10 + $0xac] ss:$12 sps:$4 sm:$0xff]  }
 0xcfa   : > { %v12019_v49 = vpop.xlane.xlu0 %5603  ;;  %v3920_v3 = vpop.permute.xlu1 %3919  ;;  %6426 = vmatpush1.bf16.msra.mxu0 %v8836_v51  ;;  %v8857_v51 = vld [vmem:[#allocation10 + $0xa8] ss:$12 sps:$4 sm:$0xff]   ;;  %v8862_v60 = vld [vmem:[#allocation10 + $0xc4] ss:$12 sps:$4 sm:$0xff]  }
 0xcfb   : > { %3940 = vst.msk [vmem:[#allocation3 + $0x60] sm:$0xff] %vm3935_vm1, %v3920_v3  ;;  %6427 = vmatprep.subr.bf16.mxu0 %v8841_v53  ;;  %9222 = vpow2.f32 %v5641_v42  ;;  %v8860_v53 = vld [vmem:[#allocation10 + $0xc0] ss:$12 sps:$4 sm:$0xff]   ;;  %v8865_v3 = vld [vmem:[#allocation10 + $0xdc] ss:$12 sps:$4 sm:$0xff]  }
 0xcfc   : > { %9224 = vpow2.f32 %v5645_v35 }
 0xcfd   : > { %v12026_v5 = vpop.eup %9214  ;;  %9226 = vpow2.f32 %v5643_v55  ;;  %v8871_v55 = vld [vmem:[#allocation10 + $0x10c] ss:$12 sps:$4 sm:$0xff]  }
 0xcfe   : > { %v12022_v54 = vpop.xlane.xlu0 %5599  ;;  %6428 = vmatpush1.bf16.msra.mxu0 %v8839_v52 }
 0xcff   : > { %6429 = vmatprep.subr.bf16.mxu0 %v8844_v11  ;;  %v8866_v11 = vld [vmem:[#allocation10 + $0xf0] ss:$12 sps:$4 sm:$0xff]  }
 0xd01   : > { %v12028_v19 = vpop.eup %9216 }
 0xd02   : > { %v4901_v44 = vpop.permute.xlu0 %4900  ;;  %6430 = vmatpush1.bf16.msra.mxu0 %v8842_v47  ;;  %v12030_v8 = vpop.eup %9218  ;;  %v5689_v36 = vpack.c.bf16 %v12028_v19, %v12024_v18  ;;  %v12050_v29 = vld [vmem:[#allocation3 + $0x60] sm:$0xff]  ;;  %v12853_v47 = vpack.c.bf16 %v11785_v31, %v11782_v38  ;;  %v5619_v38 = vsub.f32 %v11939_v34, %v12022_v54 }
 0xd03   : > { %4920 = vst.msk [vmem:[#allocation3 + $0x68] sm:$0xff] %vm3935_vm1, %v4901_v44  ;;  %6431 = vmatprep.subr.bf16.mxu0 %v8847_v39  ;;  %v5690_v43 = vpack.c.bf16 %v12026_v5, %v12030_v8  ;;  %v12037_v26 = vpop.eup %9220  ;;  %v8869_v39 = vld [vmem:[#allocation10 + $0x108] ss:$12 sps:$4 sm:$0xff]   ;;  %v8874_v44 = vld [vmem:[#allocation10 + $0x124] ss:$12 sps:$4 sm:$0xff]  }
 0xd04   : > { %8115 = vmatprep.mubr.bf16.mxu0 %v5689_v36  ;;  %v12854_v36 = vpack.c.bf16 %v11773_v48, %v11770_v16  ;;  %v8883_v16 = vld [vmem:[#allocation10 + $0x16c] ss:$12 sps:$4 sm:$0xff]   ;;  %v5621_v48 = vsub.f32 %v11935_v1, %v12019_v49 }
 0xd05   : > { %v12039_v50 = vpop.eup %9222  ;;  %8116 = vmatmul.mubr.bf16.gmra.mrb[180].mxu0 %v5690_v43  ;;  %v8877_v43 = vld [vmem:[#allocation10 + $0x13c] ss:$12 sps:$4 sm:$0xff]  }
 0xd06   : > { %v5691_v12 = vpack.c.bf16 %v12039_v50, %v12037_v26  ;;  %6432 = vmatpush1.bf16.msra.mxu0 %v8845_v41  ;;  %v12043_v9 = vpop.eup %9224  ;;  %v8872_v41 = vld [vmem:[#allocation10 + $0x120] ss:$12 sps:$4 sm:$0xff]   ;;  %v5651_v34 = vmul.f32 1.442695, %v5621_v48  ;;  %v12862_v48 = vmov 0  }
 0xd07   : > { %6433 = vmatprep.subr.bf16.mxu0 %v8850_v28  ;;  %v12047_v4 = vpop.eup %9226 }
 0xd08   : > { %8119 = vmatprep.mubr.bf16.mxu0 %v5691_v12  ;;  %v5692_v63 = vpack.c.bf16 %v12043_v9, %v12047_v4  ;;  %v8875_v12 = vld [vmem:[#allocation10 + $0x138] ss:$12 sps:$4 sm:$0xff]  }
 0xd0a   : > { %v12045_v7 = vld [vmem:[#allocation3 + $0x68] sm:$0xff]  ;;  %6434 = vmatpush1.bf16.msra.mxu0 %v8848_v57  ;;  %v8880_v57 = vld [vmem:[#allocation10 + $0x154] ss:$12 sps:$4 sm:$0xff]  }
 0xd0b   : > { %6715 = vmatprep.mubr.bf16.mxu1 %v12045_v7  ;;  %6435 = vmatprep.subr.bf16.mxu0 %v8853_v40  ;;  %v8878_v40 = vld [vmem:[#allocation10 + $0x150] ss:$12 sps:$4 sm:$0xff]  }
 0xd0c   : > { %6716 = vmatmul.mubr.bf16.gmra.mrb[216].mxu1 %v12050_v29 }
 0xd0d   : > { %8120 = vmatmul.mubr.bf16.gmra.mrb[184].mxu0 %v5692_v63  ;;  %v5647_v63 = vmul.f32 1.442695, %v5619_v38 }
 0xd0e   : > { %6436 = vmatpush1.bf16.msra.mxu0 %v8851_v6 }
 0xd0f   : > { %6437 = vmatprep.subr.bf16.mxu0 %v8856_v27 }
 0xd10   : > { %5183 = vadd.xlane.f32.xlu0 %v11541_v33  ;;  %5181 = vadd.xlane.f32.xlu1 %v11539_v22  ;;  %v8863_v22 = vld [vmem:[#allocation10 + $0xd8] ss:$12 sps:$4 sm:$0xff]   ;;  %v8868_v33 = vld [vmem:[#allocation10 + $0xf4] ss:$12 sps:$4 sm:$0xff]  }
 0xd12   : > { %6438 = vmatpush1.bf16.msra.mxu0 %v8854_v32 }
 0xd13   : > { %6439 = vmatprep.subr.bf16.mxu0 %v8859_v10 }
 0xd16   : > { %v7659_v56 = vpop.f32.mrb[208].mxu1  ;;  %6440 = vmatpush1.bf16.msra.mxu0 %v8857_v51  ;;  %v8881_v51 = vld [vmem:[#allocation10 + $0x168] ss:$12 sps:$4 sm:$0xff]  }
 0xd17   : > { %v7660_v37 = vpop.f32.mrb[209].mxu1  ;;  %6441 = vmatprep.subr.bf16.mxu0 %v8862_v60 }
 0xd18   : > { %v12057_v23 = vadd.f32 %v7660_v37, %v7659_v56  ;;  %v7662_v42 = vpop.f32.mrb[210].mxu1 }
 0xd19   : > { %v7663_v52 = vpop.f32.mrb[211].mxu1 }
 0xd1a   : > { %v12059_v35 = vadd.f32 %v7663_v52, %v7662_v42  ;;  %6442 = vmatpush1.bf16.msra.mxu0 %v8860_v53 }
 0xd1b   : > { %6443 = vmatprep.subr.bf16.mxu0 %v8865_v3 }
 0xd1e   : > { %6444 = vmatpush1.bf16.msra.mxu0 %v8863_v22 }
 0xd1f   : > { %6445 = vmatprep.subr.bf16.mxu0 %v8868_v33 }
 0xd21   : > { %3925 = vrot.lane.b32.xlu1 %v12853_v47, %s9551_s24  ;;  %v12098_v47 = vld [vmem:[#allocation3] sm:$0xff] }
 0xd22   : > { %6446 = vmatpush1.bf16.msra.mxu0 %v8866_v11 }
 0xd23   : > { %6447 = vmatprep.subr.bf16.mxu0 %v8871_v55 }
 0xd26   : > { %4906 = vrot.lane.b32.xlu0 %v12854_v36, %s9551_s24  ;;  %6448 = vmatpush1.bf16.msra.mxu0 %v8869_v39 }
 0xd27   : > { %6449 = vmatprep.subr.bf16.mxu0 %v8874_v44 }
 0xd2a   : > { %6450 = vmatpush1.bf16.msra.mxu0 %v8872_v41 }
 0xd2b   : > { %v5176_v28 = vpop.xlane.xlu1 %5175  ;;  %6451 = vmatprep.subr.bf16.mxu0 %v8877_v43 }
 0xd2c   : > { %9228 = vrcp.f32 %v5176_v28 }
 0xd2e   : > { %6452 = vmatpush1.bf16.msra.mxu0 %v8875_v12 }
 0xd2f   : > { %v5606_v31 = vpop.xlane.xlu1 %5605  ;;  %6453 = vmatprep.subr.bf16.mxu0 %v8880_v57  ;;  %v12860_v57 = vld [vmem:[#allocation29_spill] sm:$0xff] }
 0xd30   : > { %v5622_v6 = vsub.f32 %v11964_v61, %v5606_v31 }
 0xd32   : > { %v5653_v27 = vmul.f32 1.442695, %v5622_v6  ;;  %6454 = vmatpush1.bf16.msra.mxu0 %v8878_v40  ;;  %v12861_v6 = vld [vmem:[#allocation25_spill] sm:$0xff] }
 0xd33   : > { %v5174_v32 = vpop.xlane.xlu0 %5173  ;;  %v5602_v10 = vpop.xlane.xlu1 %5601  ;;  %6455 = vmatprep.subr.bf16.mxu0 %v8883_v16 }
 0xd34   : > { %v5620_v60 = vsub.f32 %v11967_v20, %v5602_v10  ;;  %9230 = vrcp.f32 %v5174_v32  ;;  %v8884_v10 = vld [vmem:[#allocation10 + $0x180] ss:$12 sps:$4 sm:$0xff]  }
 0xd35   : > { %9232 = vpow2.f32 %v5647_v63 }
 0xd36   : > { %v5649_v54 = vmul.f32 1.442695, %v5620_v60  ;;  %9234 = vpow2.f32 %v5653_v27  ;;  %6456 = vmatpush1.bf16.msra.mxu0 %v8881_v51  ;;  %v9229_v1 = vpop.eup %9228  ;;  %v8886_v51 = vld [vmem:[#allocation10 + $0x184] ss:$12 sps:$4 sm:$0xff]  }
 0xd37   : > { %v4903_v61 = vpop.permute.xlu0 %4902  ;;  %v3922_v56 = vpop.permute.xlu1 %3921  ;;  %v5327_v42 = vmul.f32 %v9229_v1, %v11839_v14  ;;  %6538 = vmatprep.subr.bf16.mxu0 %v8886_v51  ;;  %v8888_v1 = vld [vmem:[#allocation10 + $0x198] ss:$12 sps:$4 sm:$0xff]  }
 0xd38   : > { %9236 = vpow2.f32 %v5649_v54  ;;  %4921 = vst.msk [vmem:[#allocation3 + $0x80] sm:$0xff] %vm3935_vm1, %v4903_v61  ;;  %3941 = vst.msk [vmem:[#allocation3 + $0x78] sm:$0xff] %vm3935_vm1, %v3922_v56  ;;  %v8890_v61 = vld [vmem:[#allocation10 + $0x19c] ss:$12 sps:$4 sm:$0xff]   ;;  %v8891_v56 = vld [vmem:[#allocation10 + $0x1a0] ss:$12 sps:$4 sm:$0xff]  }
 0xd39   : > { %9238 = vpow2.f32 %v5651_v34  ;;  %v8887_v34 = vld [vmem:[#allocation10 + $0x188] ss:$12 sps:$4 sm:$0xff]   ;;  %v12865_v51 = vld [vmem:[#allocation128_spill] sm:$0xff] }
 0xd3a   : > { %8127 = vmatprep.subr.bf16.mxu1 %v8887_v34 }
 0xd3b   : > { %8128 = vmatpush3.bf16.msra.mxu1 %v8887_v34 }
 0xd3c   : > { %8129 = vmatprep.subr.bf16.mxu1 %v8891_v56 }
 0xd3e   : > { %v9231_v49 = vpop.eup %9230 }
 0xd3f   : > { %v12077_v37 = vld [vmem:[#allocation3 + $0x80] sm:$0xff]  ;;  %v12079_v20 = vld [vmem:[#allocation3 + $0x78] sm:$0xff]  ;;  %v9233_v53 = vpop.eup %9232  ;;  %v5326_v3 = vmul.f32 %v9231_v49, %v11835_v25  ;;  %v12091_v25 = vld [vmem:[#allocation3 + $0x8] sm:$0xff]  ;;  %8130 = vmatpush3.bf16.msra.mxu1 %v8891_v56 }
 0xd40   : > { %6723 = vmatprep.mubr.bf16.mxu1 %v12077_v37  ;;  %v9235_v52 = vpop.eup %9234  ;;  %v8894_v49 = vld [vmem:[#allocation10 + $0x1b4] ss:$12 sps:$4 sm:$0xff]  }
 0xd41   : > { %6724 = vmatmul.mubr.bf16.gmra.mrb[220].mxu1 %v12079_v20  ;;  %v5342_v33 = vpack.c.bf16 %v5327_v42, %v5326_v3  ;;  %v8892_v42 = vld [vmem:[#allocation10 + $0x1b0] ss:$12 sps:$4 sm:$0xff]   ;;  %v8898_v3 = vld [vmem:[#allocation10 + $0x1cc] ss:$12 sps:$4 sm:$0xff]  }
 0xd42   : > { %v12085_v22 = vpop.eup %9236 }
 0xd43   : > { %v5693_v11 = vpack.c.bf16 %v12085_v22, %v9233_v53  ;;  %v9239_v55 = vpop.eup %9238  ;;  %5350 = vst.msk [vmem:[#allocation3 + $0x10] sm:$0xff] %vm2986_vm0, %v5342_v33  ;;  %v8899_v33 = vld [vmem:[#allocation10 + $0x1d0] ss:$12 sps:$4 sm:$0xff]  }
 0xd44   : > { %v5694_v14 = vpack.c.bf16 %v9235_v52, %v9239_v55 }
 0xd45   : > { %5185 = vadd.xlane.f32.xlu1 %v11654_v24  ;;  %5659 = vadd.xlane.f32.xlu0 %v12002_v62  ;;  %v12101_v24 = vld [vmem:[#allocation3 + $0x20] sm:$0xff] }
 0xd46   : > { %8123 = vmatprep.mubr.bf16.mxu0 %v5693_v11  ;;  %v8896_v11 = vld [vmem:[#allocation10 + $0x1c8] ss:$12 sps:$4 sm:$0xff]  }
 0xd47   : > { %8124 = vmatmul.mubr.bf16.gmra.mrb[188].mxu0 %v5694_v14  ;;  %v8902_v14 = vld [vmem:[#allocation10 + $0x1e4] ss:$12 sps:$4 sm:$0xff]  }
 0xd48   : > { %6457 = vmatprep.mubr.bf16.mxu0 %v12091_v25 }
 0xd49   : > { %5189 = vadd.xlane.f32.xlu1 %v11669_v59  ;;  %5655 = vadd.xlane.f32.xlu0 %v12008_v0 }
 0xd4d   : > { %5191 = vadd.xlane.f32.xlu1 %v11671_v21  ;;  %5187 = vadd.xlane.f32.xlu0 %v11652_v30  ;;  %v12112_v30 = vld [vmem:[#allocation3 + $0x18] sm:$0xff] }
 0xd4f   : > { %6458 = vmatmul.mubr.bf16.vlgmr.msra.gmra.mrb[192].mxu0 %v12098_v47  ;;  %v7665_v62 = vpop.f32.mrb[212].mxu1 }
 0xd50   : > { %6467 = vmatprep.mubr.bf16.mxu0 %v12101_v24  ;;  %v7666_v39 = vpop.f32.mrb[213].mxu1  ;;  %6539 = vmatpush1.bf16.msra.mxu0 %v8884_v10  ;;  %v8911_v10 = vld [vmem:[#allocation10 + $0x218] ss:$12 sps:$4 sm:$0xff]  }
 0xd51   : > { %v12104_v44 = vadd.f32 %v7666_v39, %v7665_v62  ;;  %v7668_v36 = vpop.f32.mrb[214].mxu1  ;;  %5193 = vadd.xlane.f32.xlu0 %v11661_v46  ;;  %5661 = vadd.xlane.f32.xlu1 %v12004_v2  ;;  %v12855_v46 = vld [vmem:[#allocation30_spill] sm:$0xff]  ;;  %v12856_v2 = vld [vmem:[#allocation101_spill] sm:$0xff] }
 0xd52   : > { %v7669_v59 = vpop.f32.mrb[215].mxu1  ;;  %6540 = vmatprep.subr.bf16.mxu0 %v8890_v61  ;;  %v12866_v61 = vld [vmem:[#allocation125_spill] sm:$0xff] }
 0xd53   : > { %v12108_v21 = vadd.f32 %v7669_v59, %v7668_v36  ;;  %v8903_v36 = vld [vmem:[#allocation10 + $0x1e8] ss:$12 sps:$4 sm:$0xff]  }
 0xd54   : > { %6541 = vmatpush1.bf16.msra.mxu0 %v8888_v1  ;;  %v8914_v1 = vld [vmem:[#allocation10 + $0x22c] ss:$12 sps:$4 sm:$0xff]  }
 0xd55   : > { %5657 = vadd.xlane.f32.xlu1 %v12010_v17  ;;  %5667 = vadd.xlane.f32.xlu0 %v12030_v8 }
 0xd56   : > { %6542 = vmatprep.subr.bf16.mxu0 %v8894_v49  ;;  %v8915_v49 = vld [vmem:[#allocation10 + $0x230] ss:$12 sps:$4 sm:$0xff]  }
 0xd57   : > { %6468 = vmatmul.mubr.bf16.gmra.mrb[196].mxu0 %v12112_v30 }
 0xd58   : > { %6477 = vmatprep.mubr.bf16.mxu0 %v11870_v13  ;;  %6543 = vmatpush1.bf16.msra.mxu0 %v8892_v42 }
 0xd59   : > { %5195 = vadd.xlane.f32.xlu1 %v11663_v15  ;;  %5663 = vadd.xlane.f32.xlu0 %v12024_v18 }
 0xd5a   : > { %6544 = vmatprep.subr.bf16.mxu0 %v8898_v3 }
 0xd5c   : > { %6545 = vmatpush1.bf16.msra.mxu0 %v8896_v11 }
 0xd5d   : > { %5197 = vadd.xlane.f32.xlu1 %v11677_v58  ;;  %5675 = vadd.xlane.f32.xlu0 %v12047_v4  ;;  %v12857_v58 = vld [vmem:[#allocation32_spill] sm:$0xff] }
 0xd5e   : > { %6546 = vmatprep.subr.bf16.mxu0 %v8902_v14 }
 0xd5f   : > { %6478 = vmatmul.mubr.bf16.gmra.mrb[200].mxu0 %v12855_v46 }
 0xd60   : > { %6487 = vmatprep.mubr.bf16.mxu0 %v12856_v2 }
 0xd61   : > { %5671 = vadd.xlane.f32.xlu0 %v12037_v26  ;;  %5669 = vadd.xlane.f32.xlu1 %v12026_v5  ;;  %v12858_v5 = vld [vmem:[#allocation45_spill] sm:$0xff] }
 0xd65   : > { %5679 = vadd.xlane.f32.xlu0 %v9233_v53  ;;  %5665 = vadd.xlane.f32.xlu1 %v12028_v19  ;;  %v8895_v53 = vld [vmem:[#allocation10 + $0x1b8] ss:$12 sps:$4 sm:$0xff]  }
 0xd66   : > { %8131 = vmatprep.subr.bf16.mxu1 %v8895_v53 }
 0xd67   : > { %6488 = vmatmul.mubr.bf16.gmra.mrb[204].mxu0 %v11954_v45  ;;  %8132 = vmatpush3.bf16.msra.mxu1 %v8895_v53  ;;  %v8912_v53 = vld [vmem:[#allocation10 + $0x228] ss:$12 sps:$4 sm:$0xff]  }
 0xd68   : > { %6497 = vmatprep.mubr.bf16.mxu0 %v12045_v7  ;;  %v5180_v15 = vpop.xlane.xlu0 %5179  ;;  %v5178_v13 = vpop.xlane.xlu1 %5177  ;;  %v12859_v7 = vld [vmem:[#allocation41_spill] sm:$0xff]  ;;  %8133 = vmatprep.subr.bf16.mxu1 %v8899_v33 }
 0xd69   : > { %9240 = vrcp.f32 %v5180_v15  ;;  %5199 = vadd.xlane.f32.xlu1 %v12857_v58  ;;  %5685 = vadd.xlane.f32.xlu0 %v9235_v52  ;;  %v8900_v15 = vld [vmem:[#allocation10 + $0x1e0] ss:$12 sps:$4 sm:$0xff]  }
 0xd6a   : > { %9242 = vrcp.f32 %v5178_v13  ;;  %6547 = vmatpush1.bf16.msra.mxu0 %v8900_v15 }
 0xd6b   : > { %8134 = vmatpush3.bf16.msra.mxu1 %v8899_v33 }
 0xd6c   : > { %v4905_v0 = vpop.permute.xlu0 %4904  ;;  %v3924_v17 = vpop.permute.xlu1 %3923  ;;  %8135 = vmatprep.subr.bf16.mxu1 %v8903_v36 }
 0xd6d   : > { %4922 = vst.msk [vmem:[#allocation3 + $0x98] sm:$0xff] %vm3935_vm1, %v4905_v0  ;;  %3942 = vst.msk [vmem:[#allocation3 + $0x90] sm:$0xff] %vm3935_vm1, %v3924_v17  ;;  %5677 = vadd.xlane.f32.xlu1 %v12043_v9 }
 0xd6f   : > { %6498 = vmatmul.mubr.bf16.gmra.mrb[208].mxu0 %v12050_v29  ;;  %8136 = vmatpush3.bf16.msra.mxu1 %v8903_v36 }
 0xd70   : > { %6507 = vmatprep.mubr.bf16.mxu0 %v12077_v37 }
 0xd71   : > { %5673 = vadd.xlane.f32.xlu1 %v12039_v50 }
 0xd73   : > { %v9241_v45 = vpop.eup %9240 }
 0xd74   : > { %v9243_v18 = vpop.eup %9242  ;;  %v5329_v19 = vmul.f32 %v9241_v45, %v12858_v5  ;;  %v5923_v8 = vld [vmem:[#allocation3 + $0x98] sm:$0xff]  ;;  %v5922_v26 = vld [vmem:[#allocation3 + $0x90] sm:$0xff] }
 0xd75   : > { %v5328_v4 = vmul.f32 %v9243_v18, %v12859_v7  ;;  %5683 = vadd.xlane.f32.xlu1 %v9239_v55  ;;  %6731 = vmatprep.mubr.bf16.mxu1 %v5923_v8  ;;  %v8906_v5 = vld [vmem:[#allocation10 + $0x1fc] ss:$12 sps:$4 sm:$0xff]   ;;  %v8907_v7 = vld [vmem:[#allocation10 + $0x200] ss:$12 sps:$4 sm:$0xff]  }
 0xd76   : > { %6732 = vmatmul.mubr.bf16.gmra.mrb[224].mxu1 %v5922_v26  ;;  %6548 = vmatprep.subr.bf16.mxu0 %v8906_v5 }
 0xd77   : > { %6508 = vmatmul.mubr.bf16.gmra.mrb[212].mxu0 %v12079_v20  ;;  %v5343_v9 = vpack.c.bf16 %v5329_v19, %v5328_v4  ;;  %8137 = vmatprep.subr.bf16.mxu1 %v8907_v7 }
 0xd78   : > { %6517 = vmatprep.mubr.bf16.mxu0 %v5923_v8  ;;  %8138 = vmatpush3.bf16.msra.mxu1 %v8907_v7  ;;  %v12868_v7 = vld [vmem:[#allocation126_spill] sm:$0xff] }
 0xd79   : > { %5681 = vadd.xlane.f32.xlu1 %v12085_v22  ;;  %5351 = vst.msk [vmem:[#allocation3 + $0x28] sm:$0xff] %vm2986_vm0, %v5343_v9  ;;  %8139 = vmatprep.subr.bf16.mxu1 %v8911_v10 }
 0xd7c   : > { %8140 = vmatpush3.bf16.msra.mxu1 %v8911_v10 }
 0xd7d   : > { %8141 = vmatprep.subr.bf16.mxu1 %v8915_v49 }
 0xd7f   : > { %6518 = vmatmul.mubr.bf16.gmra.mrb[216].mxu0 %v5922_v26  ;;  %v8904_v26 = vld [vmem:[#allocation10 + $0x1f8] ss:$12 sps:$4 sm:$0xff]  }
 0xd80   : > { %6549 = vmatpush1.bf16.msra.mxu0 %v8904_v26  ;;  %8142 = vmatpush3.bf16.msra.mxu1 %v8915_v49  ;;  %v12869_v49 = vld [vmem:[#allocation35_spill] sm:$0xff] }
 0xd9d   : > { %v5184_v50 = vpop.xlane.xlu0 %5183  ;;  %v5182_v29 = vpop.xlane.xlu1 %5181 }
 0xd9e   : > { %9244 = vrcp.f32 %v5184_v50 }
 0xd9f   : > { %9246 = vrcp.f32 %v5182_v29 }
 0xda1   : > { %v4907_v41 = vpop.permute.xlu0 %4906  ;;  %v3926_v43 = vpop.permute.xlu1 %3925 }
 0xda2   : > { %4923 = vst.msk [vmem:[#allocation3 + $0xb0] sm:$0xff] %vm3935_vm1, %v4907_v41  ;;  %3943 = vst.msk [vmem:[#allocation3 + $0xa8] sm:$0xff] %vm3935_vm1, %v3926_v43 }
 0xda8   : > { %v9245_v28 = vpop.eup %9244 }
 0xda9   : > { %v9247_v12 = vpop.eup %9246  ;;  %v5331_v38 = vmul.f32 %v9245_v28, %v12860_v57  ;;  %v5926_v31 = vld [vmem:[#allocation3 + $0xb0] sm:$0xff]  ;;  %v5925_v40 = vld [vmem:[#allocation3 + $0xa8] sm:$0xff] }
 0xdaa   : > { %v5330_v16 = vmul.f32 %v9247_v12, %v12861_v6  ;;  %6527 = vmatprep.mubr.bf16.mxu0 %v5926_v31  ;;  %6739 = vmatprep.mubr.bf16.mxu1 %v5926_v31  ;;  %v8910_v57 = vld [vmem:[#allocation10 + $0x214] ss:$12 sps:$4 sm:$0xff]  }
 0xdab   : > { %6528 = vmatmul.mubr.bf16.gmra.mrb[220].mxu0 %v5925_v40  ;;  %6740 = vmatmul.mubr.bf16.gmra.mrb[228].mxu1 %v5925_v40  ;;  %v12863_v31 = vld [vmem:[#allocation47_spill] sm:$0xff] }
 0xdac   : > { %6570 = vmatprep.mubr.bf16.mxu0 %v12862_v48  ;;  %v5344_v63 = vpack.c.bf16 %v5331_v38, %v5330_v16  ;;  %v12864_v6 = vld [vmem:[#allocation27_spill] sm:$0xff]  ;;  %6550 = vmatprep.subr.bf16.mxu0 %v8910_v57 }
 0xdae   : > { %5352 = vst.msk [vmem:[#allocation3 + $0x40] sm:$0xff] %vm2986_vm0, %v5344_v63  ;;  %v8908_v63 = vld [vmem:[#allocation10 + $0x210] ss:$12 sps:$4 sm:$0xff]  }
 0xdaf   : > { %6551 = vmatpush1.bf16.msra.mxu0 %v8908_v63 }
 0xdb0   : > { %6552 = vmatprep.subr.bf16.mxu0 %v8914_v1 }
 0xdb3   : > { %6553 = vmatpush1.bf16.msra.mxu0 %v8912_v53 }
 0xdcc   : > { %v12145_v27 = vpop.f32.mrb[176].mxu0 }
 0xdcd   : > { %v12147_v32 = vpop.f32.mrb[177].mxu0 }
 0xdce   : > { %v12149_v60 = vpop.f32.mrb[178].mxu0 }
 0xdcf   : > { %v12151_v54 = vpop.f32.mrb[179].mxu0 }
 0xdd2   : > { %v5660_v37 = vpop.xlane.xlu0 %5659  ;;  %v5186_v20 = vpop.xlane.xlu1 %5185 }
 0xdd3   : > { %9248 = vrcp.f32 %v5186_v20 }
 0xdd6   : > { %v5656_v52 = vpop.xlane.xlu0 %5655  ;;  %v5190_v22 = vpop.xlane.xlu1 %5189 }
 0xdd7   : > { %9250 = vrcp.f32 %v5190_v22 }
 0xdd8   : > { %v12153_v55 = vpop.f32.mrb[180].mxu0 }
 0xdd9   : > { %v12155_v62 = vpop.f32.mrb[181].mxu0 }
 0xdda   : > { %v5188_v39 = vpop.xlane.xlu0 %5187  ;;  %v12157_v59 = vpop.f32.mrb[182].mxu0 }
 0xddb   : > { %9252 = vrcp.f32 %v5188_v39  ;;  %v5192_v46 = vpop.xlane.xlu1 %5191  ;;  %v12159_v2 = vpop.f32.mrb[183].mxu0 }
 0xddc   : > { %9254 = vrcp.f32 %v5192_v46  ;;  %v9332_v46 = vld [vmem:[#allocation10 + $0xc8] ss:$12 sps:$4 sm:$0xff]  }
 0xddd   : > { %9256 = vrcp.f32 %v5660_v37  ;;  %v9249_v4 = vpop.eup %9248  ;;  %7631 = vmatprep.subr.bf16.mxu0 %v9332_v46 }
 0xdde   : > { %v5194_v19 = vpop.xlane.xlu0 %5193  ;;  %v5332_v40 = vmul.f32 %v9249_v4, %v12863_v31 }
 0xddf   : > { %v5662_v13 = vpop.xlane.xlu1 %5661  ;;  %v7671_v58 = vpop.f32.mrb[216].mxu1 }
 0xde0   : > { %9258 = vrcp.f32 %v5662_v13  ;;  %v7672_v0 = vpop.f32.mrb[217].mxu1  ;;  %v12161_v17 = vpop.f32.mrb[184].mxu0 }
 0xde1   : > { %v12163_v45 = vadd.f32 %v7672_v0, %v7671_v58  ;;  %v7674_v18 = vpop.f32.mrb[218].mxu1  ;;  %v12165_v8 = vpop.f32.mrb[185].mxu0  ;;  %9260 = vrcp.f32 %v5656_v52 }
 0xde2   : > { %v12167_v9 = vpop.f32.mrb[186].mxu0  ;;  %v7675_v50 = vpop.f32.mrb[219].mxu1 }
 0xde3   : > { %v9251_v29 = vpop.eup %9250  ;;  %v12169_v41 = vadd.f32 %v7675_v50, %v7674_v18  ;;  %v5658_v43 = vpop.xlane.xlu1 %5657 }
 0xde4   : > { %v12171_v28 = vpop.f32.mrb[187].mxu0  ;;  %9262 = vrcp.f32 %v5658_v43  ;;  %v5334_v34 = vmul.f32 %v9251_v29, %v12865_v51  ;;  %v5668_v22 = vpop.xlane.xlu0 %5667 }
 0xde5   : > { %v9253_v12 = vpop.eup %9252  ;;  %9264 = vrcp.f32 %v5194_v19  ;;  %v12867_v19 = vld [vmem:[#allocation34_spill] sm:$0xff] }
 0xde6   : > { %v9255_v38 = vpop.eup %9254  ;;  %v5333_v16 = vmul.f32 %v9253_v12, %v12864_v6 }
 0xde7   : > { %v5335_v56 = vmul.f32 %v9255_v38, %v12866_v61  ;;  %v9257_v37 = vpop.eup %9256  ;;  %v5196_v20 = vpop.xlane.xlu1 %5195 }
 0xde8   : > { %v5345_v42 = vpack.c.bf16 %v5333_v16, %v5332_v40  ;;  %9266 = vrcp.f32 %v5196_v20  ;;  %v5842_v33 = vmul.f32 %v9257_v37, %v12145_v27  ;;  %v5664_v13 = vpop.xlane.xlu0 %5663  ;;  %v12870_v37 = vld [vmem:[#allocation38_spill] sm:$0xff] }
 0xde9   : > { %v5346_v3 = vpack.c.bf16 %v5335_v56, %v5334_v34  ;;  %9268 = vrcp.f32 %v5668_v22 }
 0xdea   : > { %v9259_v52 = vpop.eup %9258  ;;  %5353 = vst.msk [vmem:[#allocation3 + $0x58] sm:$0xff] %vm2986_vm0, %v5345_v42 }
 0xdeb   : > { %v5843_v11 = vmul.f32 %v9259_v52, %v12149_v60  ;;  %5354 = vst.msk [vmem:[#allocation3 + $0x70] sm:$0xff] %vm2986_vm0, %v5346_v3  ;;  %v5198_v14 = vpop.xlane.xlu1 %5197  ;;  %v9261_v39 = vpop.eup %9260 }
 0xdec   : > { %v5840_v0 = vmul.f32 %v9261_v39, %v12147_v32  ;;  %v5676_v29 = vpop.xlane.xlu0 %5675 }
 0xded   : > { %v5857_v36 = vpack.c.bf16 %v5843_v11, %v5842_v33 }
 0xdee   : > { %v9263_v15 = vpop.eup %9262 }
 0xdef   : > { %5874 = vrot.lane.b32.xlu1 %v5857_v36, %s9551_s24  ;;  %v5670_v58 = vpop.xlane.xlu1 %5669  ;;  %v5841_v27 = vmul.f32 %v9263_v15, %v12151_v54  ;;  %v9265_v60 = vpop.eup %9264 }
 0xdf0   : > { %9270 = vrcp.f32 %v5670_v58  ;;  %v5336_v26 = vmul.f32 %v9265_v60, %v12867_v19  ;;  %v5672_v57 = vpop.xlane.xlu0 %5671 }
 0xdf1   : > { %v5856_v18 = vpack.c.bf16 %v5841_v27, %v5840_v0  ;;  %9272 = vrcp.f32 %v5664_v13 }
 0xdf2   : > { %v9267_v5 = vpop.eup %9266 }
 0xdf3   : > { %v5337_v4 = vmul.f32 %v9267_v5, %v12868_v7  ;;  %5872 = vrot.lane.b32.xlu0 %v5856_v18, %s9551_s24  ;;  %v5666_v50 = vpop.xlane.xlu1 %5665  ;;  %v9269_v32 = vpop.eup %9268 }
 0xdf4   : > { %9274 = vrcp.f32 %v5666_v50  ;;  %v5846_v31 = vmul.f32 %v9269_v32, %v12153_v55  ;;  %v5680_v3 = vpop.xlane.xlu0 %5679 }
 0xdf5   : > { %v5347_v43 = vpack.c.bf16 %v5337_v4, %v5336_v26  ;;  %9276 = vrcp.f32 %v5198_v14 }
 0xdf7   : > { %v5200_v12 = vpop.xlane.xlu1 %5199  ;;  %5355 = vst.msk [vmem:[#allocation3 + $0x88] sm:$0xff] %vm2986_vm0, %v5347_v43 }
 0xdf8   : > { %9278 = vrcp.f32 %v5200_v12  ;;  %v5686_v36 = vpop.xlane.xlu0 %5685 }
 0xdf9   : > { %9280 = vrcp.f32 %v5676_v29 }
 0xdfa   : > { %v9271_v54 = vpop.eup %9270 }
 0xdfb   : > { %v5678_v38 = vpop.xlane.xlu1 %5677  ;;  %v5847_v40 = vmul.f32 %v9271_v54, %v12157_v59  ;;  %v9273_v6 = vpop.eup %9272  ;;  %v12871_v54 = vld [vmem:[#allocation37_spill] sm:$0xff] }
 0xdfc   : > { %9282 = vrcp.f32 %v5678_v38  ;;  %v5844_v51 = vmul.f32 %v9273_v6, %v12155_v62 }
 0xdfd   : > { %v5859_v16 = vpack.c.bf16 %v5847_v40, %v5846_v31  ;;  %9284 = vrcp.f32 %v5672_v57  ;;  %v12872_v57 = vld [vmem:[#allocation36_spill] sm:$0xff] }
 0xdfe   : > { %v9275_v63 = vpop.eup %9274 }
 0xdff   : > { %5878 = vrot.lane.b32.xlu1 %v5859_v16, %s9551_s24  ;;  %v5674_v10 = vpop.xlane.xlu1 %5673  ;;  %v5845_v34 = vmul.f32 %v9275_v63, %v12159_v2  ;;  %v9277_v61 = vpop.eup %9276 }
 0xe00   : > { %9286 = vrcp.f32 %v5674_v10  ;;  %v5338_v55 = vmul.f32 %v9277_v61, %v12869_v49  ;;  %v9334_v49 = vld [vmem:[#allocation10 + $0xe0] ss:$12 sps:$4 sm:$0xff]  }
 0xe01   : > { %v5858_v56 = vpack.c.bf16 %v5845_v34, %v5844_v51  ;;  %9288 = vrcp.f32 %v5680_v3 }
 0xe02   : > { %v9279_v1 = vpop.eup %9278  ;;  %9290 = vrcp.f32 %v5686_v36 }
 0xe03   : > { %v5339_v59 = vmul.f32 %v9279_v1, %v12870_v37  ;;  %5876 = vrot.lane.b32.xlu0 %v5858_v56, %s9551_s24  ;;  %v9281_v20 = vpop.eup %9280  ;;  %v5684_v22 = vpop.xlane.xlu1 %5683  ;;  %v9333_v56 = vld [vmem:[#allocation10 + $0x8] ss:$12 sps:$4 sm:$0xff]  }
 0xe04   : > { %v5850_v52 = vmul.f32 %v9281_v20, %v12161_v17  ;;  %9292 = vrcp.f32 %v5684_v22  ;;  %v9337_v20 = vld [vmem:[#allocation10 + $0x38] ss:$12 sps:$4 sm:$0xff]  }
 0xe05   : > { %v5348_v53 = vpack.c.bf16 %v5339_v59, %v5338_v55  ;;  %v9335_v55 = vld [vmem:[#allocation10 + $0x20] ss:$12 sps:$4 sm:$0xff]   ;;  %v9336_v59 = vld [vmem:[#allocation10 + $0xf8] ss:$12 sps:$4 sm:$0xff]  }
 0xe06   : > { %v9283_v42 = vpop.eup %9282 }
 0xe07   : > { %v5851_v62 = vmul.f32 %v9283_v42, %v12167_v9  ;;  %5356 = vst.msk [vmem:[#allocation3 + $0xa0] sm:$0xff] %vm2986_vm0, %v5348_v53  ;;  %v9285_v2 = vpop.eup %9284  ;;  %v5682_v15 = vpop.xlane.xlu1 %5681  ;;  %v9338_v53 = vld [vmem:[#allocation10 + $0x110] ss:$12 sps:$4 sm:$0xff]  }
 0xe08   : > { %v5848_v14 = vmul.f32 %v9285_v2, %v12165_v8  ;;  %9294 = vrcp.f32 %v5682_v15  ;;  %v9339_v42 = vld [vmem:[#allocation10 + $0x50] ss:$12 sps:$4 sm:$0xff]   ;;  %v9343_v15 = vld [vmem:[#allocation10 + $0x80] ss:$12 sps:$4 sm:$0xff]  }
 0xe09   : > { %v5861_v33 = vpack.c.bf16 %v5851_v62, %v5850_v52  ;;  %v9340_v62 = vld [vmem:[#allocation10 + $0x128] ss:$12 sps:$4 sm:$0xff]  }
 0xe0a   : > { %v9287_v11 = vpop.eup %9286 }
 0xe0b   : > { %v5849_v39 = vmul.f32 %v9287_v11, %v12171_v28  ;;  %v9289_v60 = vpop.eup %9288 }
 0xe0c   : > { %v9291_v8 = vpop.eup %9290 }
 0xe0d   : > { %v5860_v46 = vpack.c.bf16 %v5849_v39, %v5848_v14  ;;  %v9341_v39 = vld [vmem:[#allocation10 + $0x68] ss:$12 sps:$4 sm:$0xff]  }
 0xe0e   : > { %v9293_v28 = vpop.eup %9292 }
 0xe12   : > { %v9295_v26 = vpop.eup %9294 }
 0xe14   : > { %v7677_v17 = vpop.f32.mrb[220].mxu1 }
 0xe15   : > { %v7678_v13 = vpop.f32.mrb[221].mxu1 }
 0xe16   : > { %v12201_v9 = vadd.f32 %v7678_v13, %v7677_v17  ;;  %v7680_v58 = vpop.f32.mrb[222].mxu1  ;;  %v9344_v17 = vld [vmem:[#allocation10 + $0x158] ss:$12 sps:$4 sm:$0xff]  }
 0xe17   : > { %v7681_v0 = vpop.f32.mrb[223].mxu1  ;;  %v9345_v13 = vld [vmem:[#allocation10 + $0x98] ss:$12 sps:$4 sm:$0xff]  }
 0xe18   : > { %v12203_v27 = vadd.f32 %v7681_v0, %v7680_v58  ;;  %v9346_v58 = vld [vmem:[#allocation10 + $0x170] ss:$12 sps:$4 sm:$0xff]  }
 0xe19   : > { %v9347_v0 = vld [vmem:[#allocation10 + $0xb0] ss:$12 sps:$4 sm:$0xff]  }
 0xe1a   : > { %v8125_v18 = vpop.f32.mrb[188].mxu0 }
 0xe1b   : > { %v5809_v5 = vpop.f32.mrb[189].mxu0  ;;  %v5854_v7 = vmul.f32 %v9293_v28, %v8125_v18 }
 0xe1c   : > { %v8126_v19 = vpop.f32.mrb[190].mxu0  ;;  %v5852_v29 = vmul.f32 %v9289_v60, %v5809_v5 }
 0xe1d   : > { %v5855_v4 = vmul.f32 %v9291_v8, %v8126_v19  ;;  %v5812_v50 = vpop.f32.mrb[191].mxu0 }
 0xe1e   : > { %v5853_v43 = vmul.f32 %v9295_v26, %v5812_v50 }
 0xe1f   : > { %v5863_v12 = vpack.c.bf16 %v5855_v4, %v5854_v7  ;;  %v12873_v7 = vld [vmem:[#allocation46_spill] sm:$0xff] }
 0xe20   : > { %v5862_v32 = vpack.c.bf16 %v5853_v43, %v5852_v29  ;;  %v12874_v29 = vld [vmem:[#allocation89_spill] sm:$0xff] }
 0xe22   : > { %5201 = vadd.xlane.f32.xlu0 %v12871_v54 }
 0xe23   : > { %5203 = vadd.xlane.f32.xlu1 %v12872_v57 }
 0xe34   : > { %5882 = vrot.lane.b32.xlu1 %v5861_v33, %s9551_s24 }
 0xe38   : > { %5880 = vrot.lane.b32.xlu0 %v5860_v46, %s9551_s24  ;;  %v9342_v46 = vld [vmem:[#allocation10 + $0x140] ss:$12 sps:$4 sm:$0xff]  }
 0xe3c   : > { %5884 = vrot.lane.b32.xlu0 %v5862_v32, %s9551_s24 }
 0xe40   : > { %5886 = vrot.lane.b32.xlu0 %v5863_v12, %s9551_s24 }
 0xe49   : > { %v7683_v38 = vpop.f32.mrb[224].mxu1 }
 0xe4a   : > { %v7684_v31 = vpop.f32.mrb[225].mxu1 }
 0xe4b   : > { %v12211_v40 = vadd.f32 %v7684_v31, %v7683_v38  ;;  %v7686_v6 = vpop.f32.mrb[226].mxu1  ;;  %v6026_v31 = vlaneseq }
 0xe4c   : > { %v7687_v16 = vpop.f32.mrb[227].mxu1 }
 0xe4d   : > { %v12213_v63 = vadd.f32 %v7687_v16, %v7686_v6  ;;  %v6027_v6 = vshrl.u32 %v6026_v31, 7 }
 0xe4f   : > { %v6028_v16 = vsub.s32 0, %v6027_v6 }
 0xe61   : > { %v5875_v10 = vpop.permute.xlu1 %5874 }
 0xe62   : > { %5897 = vst.msk [vmem:[#allocation3 + $0x28] sm:$0xff] %vm3935_vm1, %v5875_v10  ;;  %v6032_v10 = vsub.s32 1, %v6027_v6 }
 0xe65   : > { %v5873_v51 = vpop.permute.xlu0 %5872 }
 0xe66   : > { %5896 = vst.msk [vmem:[#allocation3 + $0x10] sm:$0xff] %vm3935_vm1, %v5873_v51  ;;  %v6024_v51 = vld [vmem:[%s12429_s4] sm:$0x7] }
 0xe69   : > { %v5909_v61 = vld [vmem:[#allocation3 + $0x28] sm:$0xff] }
 0xe6d   : > { %v5906_v34 = vld [vmem:[#allocation3 + $0x10] sm:$0xff] }
 0xe6e   : > { %6571 = vmatmul.mubr.bf16.vlgmr.msra.gmra.mrb[192].mxu0 %v5906_v34  ;;  %8143 = vmatprep.mubr.bf16.mxu1 %v5906_v34  ;;  %v12244_v34 = vrot.slane %v6024_v51, %v6028_v16 }
 0xe6f   : > { %8144 = vmatmul.mubr.bf16.vlgmr.msra.gmra.mrb[232].mxu1 %v5909_v61  ;;  %6580 = vmatprep.mubr.bf16.mxu0 %v12862_v48 }
 0xe70   : > { %7632 = vmatpush3.bf16.msra.mxu0 %v9333_v56 }
 0xe71   : > { %v5879_v1 = vpop.permute.xlu1 %5878  ;;  %7633 = vmatprep.subr.bf16.mxu0 %v9334_v49 }
 0xe72   : > { %5899 = vst.msk [vmem:[#allocation3 + $0x58] sm:$0xff] %vm3935_vm1, %v5879_v1 }
 0xe74   : > { %7634 = vmatpush3.bf16.msra.mxu0 %v9335_v55 }
 0xe75   : > { %v5877_v37 = vpop.permute.xlu0 %5876  ;;  %7635 = vmatprep.subr.bf16.mxu0 %v9336_v59 }
 0xe76   : > { %5898 = vst.msk [vmem:[#allocation3 + $0x40] sm:$0xff] %vm3935_vm1, %v5877_v37  ;;  %6581 = vmatmul.mubr.bf16.gmra.mrb[196].mxu0 %v5909_v61 }
 0xe77   : > { %6590 = vmatprep.mubr.bf16.mxu0 %v12862_v48 }
 0xe78   : > { %7636 = vmatpush3.bf16.msra.mxu0 %v9337_v20 }
 0xe79   : > { %7637 = vmatprep.subr.bf16.mxu0 %v9338_v53  ;;  %v5915_v2 = vld [vmem:[#allocation3 + $0x58] sm:$0xff] }
 0xe7c   : > { %7638 = vmatpush3.bf16.msra.mxu0 %v9339_v42 }
 0xe7d   : > { %v5912_v3 = vld [vmem:[#allocation3 + $0x40] sm:$0xff]  ;;  %7639 = vmatprep.subr.bf16.mxu0 %v9340_v62 }
 0xe7e   : > { %v7689_v52 = vpop.f32.mrb[228].mxu1  ;;  %6591 = vmatmul.mubr.bf16.gmra.mrb[200].mxu0 %v5912_v3  ;;  %8147 = vmatprep.mubr.bf16.mxu1 %v5912_v3 }
 0xe7f   : > { %v7690_v22 = vpop.f32.mrb[229].mxu1  ;;  %8148 = vmatmul.mubr.bf16.gmra.mrb[236].mxu1 %v5915_v2  ;;  %6600 = vmatprep.mubr.bf16.mxu0 %v12862_v48 }
 0xe80   : > { %v12221_v33 = vadd.f32 %v7690_v22, %v7689_v52  ;;  %v7692_v11 = vpop.f32.mrb[230].mxu1  ;;  %7640 = vmatpush3.bf16.msra.mxu0 %v9341_v39  ;;  %v6036_v52 = vsub.s32 2, %v6027_v6 }
 0xe81   : > { %v7693_v14 = vpop.f32.mrb[231].mxu1  ;;  %7641 = vmatprep.subr.bf16.mxu0 %v9342_v46 }
 0xe82   : > { %v12224_v36 = vadd.f32 %v7693_v14, %v7692_v11  ;;  %v12275_v39 = vrot.slane %v6024_v51, %v6036_v52 }
 0xe84   : > { %7642 = vmatpush3.bf16.msra.mxu0 %v9343_v15  ;;  %v6710_v15 = vadd.f32 %v12104_v44, %v12275_v39  ;;  %v6713_v44 = vadd.f32 %v12108_v21, %v12275_v39  ;;  %v6726_v16 = vadd.f32 %v12201_v9, %v12275_v39  ;;  %v6729_v9 = vadd.f32 %v12203_v27, %v12275_v39 }
 0xe85   : > { %7643 = vmatprep.subr.bf16.mxu0 %v9344_v17 }
 0xe86   : > { %6601 = vmatmul.mubr.bf16.gmra.mrb[204].mxu0 %v5915_v2 }
 0xe87   : > { %6610 = vmatprep.mubr.bf16.mxu0 %v12862_v48 }
 0xe88   : > { %7644 = vmatpush3.bf16.msra.mxu0 %v9345_v13 }
 0xe89   : > { %7645 = vmatprep.subr.bf16.mxu0 %v9346_v58 }
 0xe8c   : > { %7646 = vmatpush3.bf16.msra.mxu0 %v9347_v0  ;;  %v6702_v0 = vadd.f32 %v12057_v23, %v12275_v39  ;;  %v6705_v23 = vadd.f32 %v12059_v35, %v12275_v39 }
 0xeaf   : > { %v5202_v60 = vpop.xlane.xlu0 %5201 }
 0xeb0   : > { %9296 = vrcp.f32 %v5202_v60  ;;  %v5204_v18 = vpop.xlane.xlu1 %5203 }
 0xeb1   : > { %9298 = vrcp.f32 %v5204_v18 }
 0xeb3   : > { %v5881_v8 = vpop.permute.xlu0 %5880 }
 0xeb4   : > { %5900 = vst.msk [vmem:[#allocation3 + $0x70] sm:$0xff] %vm3935_vm1, %v5881_v8  ;;  %v5883_v5 = vpop.permute.xlu1 %5882 }
 0xeb5   : > { %5901 = vst.msk [vmem:[#allocation3 + $0x88] sm:$0xff] %vm3935_vm1, %v5883_v5 }
 0xeb7   : > { %v5885_v28 = vpop.permute.xlu0 %5884 }
 0xeb8   : > { %5902 = vst.msk [vmem:[#allocation3 + $0xa0] sm:$0xff] %vm3935_vm1, %v5885_v28 }
 0xeba   : > { %v9297_v19 = vpop.eup %9296 }
 0xebb   : > { %v9299_v26 = vpop.eup %9298  ;;  %v5340_v4 = vmul.f32 %v9297_v19, %v12873_v7  ;;  %v5918_v50 = vld [vmem:[#allocation3 + $0x70] sm:$0xff]  ;;  %v5887_v57 = vpop.permute.xlu0 %5886 }
 0xebc   : > { %v5341_v43 = vmul.f32 %v9299_v26, %v12874_v29  ;;  %6611 = vmatmul.mubr.bf16.gmra.mrb[208].mxu0 %v5918_v50  ;;  %8151 = vmatprep.mubr.bf16.mxu1 %v5918_v50  ;;  %v5921_v12 = vld [vmem:[#allocation3 + $0x88] sm:$0xff] }
 0xebd   : > { %8152 = vmatmul.mubr.bf16.gmra.mrb[240].mxu1 %v5921_v12  ;;  %6620 = vmatprep.mubr.bf16.mxu0 %v12862_v48 }
 0xebe   : > { %v5349_v32 = vpack.c.bf16 %v5341_v43, %v5340_v4 }
 0xebf   : > { %v5924_v54 = vld [vmem:[#allocation3 + $0xa0] sm:$0xff] }
 0xec0   : > { %5357 = vst.msk [vmem:[#allocation3 + $0xb8] sm:$0xff] %vm2986_vm0, %v5349_v32  ;;  %8155 = vmatprep.mubr.bf16.mxu1 %v5924_v54 }
 0xec1   : > { %5903 = vst.msk [vmem:[#allocation3 + $0xb8] sm:$0xff] %vm3935_vm1, %v5887_v57 }
 0xec4   : > { %6621 = vmatmul.mubr.bf16.gmra.mrb[212].mxu0 %v5921_v12 }
 0xec5   : > { %6630 = vmatprep.mubr.bf16.mxu0 %v12862_v48 }
 0xec8   : > { %v5927_v38 = vld [vmem:[#allocation3 + $0xb8] sm:$0xff] }
 0xec9   : > { %8156 = vmatmul.mubr.bf16.gmra.mrb[244].mxu1 %v5927_v38 }
 0xecc   : > { %6631 = vmatmul.mubr.bf16.gmra.mrb[216].mxu0 %v5924_v54 }
 0xecd   : > { %6640 = vmatprep.mubr.bf16.mxu0 %v12862_v48  ;;  %v12246_v48 = vrot.slane %v6024_v51, %v6032_v10 }
 0xed4   : > { %6641 = vmatmul.mubr.bf16.gmra.mrb[220].mxu0 %v5927_v38 }
 0xed5   : > { %6683 = vmatprep.mubr.bf16.mxu0 %v12091_v25 }
 0xedc   : > { %6684 = vmatmul.mubr.bf16.vlgmr.msra.gmra.mrb[224].mxu0 %v12098_v47 }
 0xedd   : > { %6691 = vmatprep.mubr.bf16.mxu0 %v12101_v24 }
 0xee4   : > { %6692 = vmatmul.mubr.bf16.gmra.mrb[228].mxu0 %v12112_v30 }
 0xf41   : > { %v6572_v25 = vpop.f32.mrb[192].mxu0 }
 0xf42   : > { %v8207_v47 = vadd.f32 %v6572_v25, %v12244_v34  ;;  %v6574_v61 = vpop.f32.mrb[193].mxu0  ;;  %v12249_v24 = vpop.f32.mrb[232].mxu1 }
 0xf43   : > { %v8208_v30 = vadd.f32 %v6574_v61, %v12246_v48  ;;  %v6576_v56 = vpop.f32.mrb[194].mxu0  ;;  %v12252_v1 = vpop.f32.mrb[233].mxu1 }
 0xf44   : > { %6845 = vst [vmem:[%s12256_s13] sm:$0xff] %v8207_v47  ;;  %v8209_v49 = vadd.f32 %v6576_v56, %v12244_v34  ;;  %v6578_v55 = vpop.f32.mrb[195].mxu0  ;;  %v12260_v37 = vpop.f32.mrb[234].mxu1  ;;  %v6718_v47 = vadd.f32 %v12163_v45, %v12275_v39  ;;  %v6721_v45 = vadd.f32 %v12169_v41, %v12275_v39 }
 0xf45   : > { %6846 = vst [vmem:[%s12256_s13 + $0x8] sm:$0xff] %v8208_v30  ;;  %v8210_v59 = vadd.f32 %v6578_v55, %v12246_v48  ;;  %v12264_v20 = vpop.f32.mrb[235].mxu1 }
 0xf46   : > { %6848 = vst [vmem:[%s12256_s13 + $0x18] sm:$0xff] %v8209_v49 }
 0xf47   : > { %6849 = vst [vmem:[%s12256_s13 + $0x20] sm:$0xff] %v8210_v59 }
 0xf49   : > { %v6582_v53 = vpop.f32.mrb[196].mxu0 }
 0xf4a   : > { %v8211_v42 = vadd.f32 %v6582_v53, %v12244_v34  ;;  %v6584_v3 = vpop.f32.mrb[197].mxu0 }
 0xf4b   : > { %v8212_v62 = vadd.f32 %v6584_v3, %v12246_v48  ;;  %v6586_v2 = vpop.f32.mrb[198].mxu0 }
 0xf4c   : > { %6851 = vst [vmem:[%s12256_s13 + $0x30] sm:$0xff] %v8211_v42  ;;  %v8213_v22 = vadd.f32 %v6586_v2, %v12244_v34  ;;  %v6588_v11 = vpop.f32.mrb[199].mxu0 }
 0xf4d   : > { %6852 = vst [vmem:[%s12256_s13 + $0x38] sm:$0xff] %v8212_v62  ;;  %v8214_v14 = vadd.f32 %v6588_v11, %v12246_v48 }
 0xf4e   : > { %6854 = vst [vmem:[%s12256_s13 + $0x48] sm:$0xff] %v8213_v22 }
 0xf4f   : > { %6855 = vst [vmem:[%s12256_s13 + $0x50] sm:$0xff] %v8214_v14 }
 0xf51   : > { %v6592_v46 = vpop.f32.mrb[200].mxu0 }
 0xf52   : > { %v8215_v17 = vadd.f32 %v6592_v46, %v12244_v34  ;;  %v6594_v13 = vpop.f32.mrb[201].mxu0  ;;  %v8149_v58 = vpop.f32.mrb[236].mxu1 }
 0xf53   : > { %v8216_v60 = vadd.f32 %v6594_v13, %v12246_v48  ;;  %v6807_v18 = vadd.f32 %v8149_v58, %v6710_v15  ;;  %v6596_v8 = vpop.f32.mrb[202].mxu0  ;;  %v6798_v5 = vpop.f32.mrb[237].mxu1  ;;  %v6742_v13 = vadd.f32 %v12221_v33, %v12275_v39 }
 0xf54   : > { %6857 = vst [vmem:[%s12256_s13 + $0x60] sm:$0xff] %v8215_v17  ;;  %v8217_v28 = vadd.f32 %v6596_v8, %v12244_v34  ;;  %v6799_v19 = vadd.f32 %v6798_v5, %v6702_v0  ;;  %v6598_v26 = vpop.f32.mrb[203].mxu0  ;;  %v8150_v7 = vpop.f32.mrb[238].mxu1  ;;  %v6734_v0 = vadd.f32 %v12211_v40, %v12275_v39  ;;  %v6745_v8 = vadd.f32 %v12224_v36, %v12275_v39 }
 0xf55   : > { %6858 = vst [vmem:[%s12256_s13 + $0x68] sm:$0xff] %v8216_v60  ;;  %6865 = vst [vmem:[%s12256_s13 + $0xa0] sm:$0xff] %v6807_v18  ;;  %v8218_v4 = vadd.f32 %v6598_v26, %v12246_v48  ;;  %v6810_v50 = vadd.f32 %v8150_v7, %v6713_v44  ;;  %v6801_v29 = vpop.f32.mrb[239].mxu1 }
 0xf56   : > { %6860 = vst [vmem:[%s12256_s13 + $0x78] sm:$0xff] %v8217_v28  ;;  %6859 = vst [vmem:[%s12256_s13 + $0x70] sm:$0xff] %v6799_v19  ;;  %v6802_v21 = vadd.f32 %v6801_v29, %v6705_v23  ;;  %v6737_v28 = vadd.f32 %v12213_v63, %v12275_v39 }
 0xf57   : > { %6861 = vst [vmem:[%s12256_s13 + $0x80] sm:$0xff] %v8218_v4  ;;  %6868 = vst [vmem:[%s12256_s13 + $0xb8] sm:$0xff] %v6810_v50 }
 0xf58   : > { %6862 = vst [vmem:[%s12256_s13 + $0x88] sm:$0xff] %v6802_v21 }
 0xf59   : > { %v6602_v43 = vpop.f32.mrb[204].mxu0 }
 0xf5a   : > { %v8219_v12 = vadd.f32 %v6602_v43, %v12244_v34  ;;  %v6604_v35 = vpop.f32.mrb[205].mxu0 }
 0xf5b   : > { %v8220_v32 = vadd.f32 %v6604_v35, %v12246_v48  ;;  %v6606_v54 = vpop.f32.mrb[206].mxu0 }
 0xf5c   : > { %6863 = vst [vmem:[%s12256_s13 + $0x90] sm:$0xff] %v8219_v12  ;;  %v8221_v57 = vadd.f32 %v6606_v54, %v12244_v34  ;;  %v6608_v38 = vpop.f32.mrb[207].mxu0 }
 0xf5d   : > { %6864 = vst [vmem:[%s12256_s13 + $0x98] sm:$0xff] %v8220_v32  ;;  %v8222_v31 = vadd.f32 %v6608_v38, %v12246_v48 }
 0xf5e   : > { %6866 = vst [vmem:[%s12256_s13 + $0xa8] sm:$0xff] %v8221_v57 }
 0xf5f   : > { %6867 = vst [vmem:[%s12256_s13 + $0xb0] sm:$0xff] %v8222_v31 }
 0xf8f   : > { %v6612_v6 = vpop.f32.mrb[208].mxu0 }
 0xf90   : > { %v8223_v10 = vadd.f32 %v6612_v6, %v12244_v34  ;;  %v6614_v51 = vpop.f32.mrb[209].mxu0  ;;  %v8153_v25 = vpop.f32.mrb[240].mxu1 }
 0xf91   : > { %v8224_v61 = vadd.f32 %v6614_v51, %v12246_v48  ;;  %v6823_v30 = vadd.f32 %v8153_v25, %v6726_v16  ;;  %v6616_v56 = vpop.f32.mrb[210].mxu0  ;;  %v6814_v49 = vpop.f32.mrb[241].mxu1 }
 0xf92   : > { %6869 = vst [vmem:[%s12256_s13 + $0xc0] sm:$0xff] %v8223_v10  ;;  %v8225_v55 = vadd.f32 %v6616_v56, %v12244_v34  ;;  %v6815_v59 = vadd.f32 %v6814_v49, %v6718_v47  ;;  %v6618_v53 = vpop.f32.mrb[211].mxu0  ;;  %v8154_v42 = vpop.f32.mrb[242].mxu1 }
 0xf93   : > { %6870 = vst [vmem:[%s12256_s13 + $0xc8] sm:$0xff] %v8224_v61  ;;  %6877 = vst [vmem:[%s12256_s13 + $0x100] sm:$0xff] %v6823_v30  ;;  %v8226_v3 = vadd.f32 %v6618_v53, %v12246_v48  ;;  %v6826_v52 = vadd.f32 %v8154_v42, %v6729_v9  ;;  %v6817_v62 = vpop.f32.mrb[243].mxu1 }
 0xf94   : > { %6872 = vst [vmem:[%s12256_s13 + $0xd8] sm:$0xff] %v8225_v55  ;;  %6871 = vst [vmem:[%s12256_s13 + $0xd0] sm:$0xff] %v6815_v59  ;;  %v6818_v27 = vadd.f32 %v6817_v62, %v6721_v45 }
 0xf95   : > { %6873 = vst [vmem:[%s12256_s13 + $0xe0] sm:$0xff] %v8226_v3  ;;  %6880 = vst [vmem:[%s12256_s13 + $0x118] sm:$0xff] %v6826_v52 }
 0xf96   : > { %6874 = vst [vmem:[%s12256_s13 + $0xe8] sm:$0xff] %v6818_v27 }
 0xf97   : > { %v6622_v2 = vpop.f32.mrb[212].mxu0 }
 0xf98   : > { %v8227_v22 = vadd.f32 %v6622_v2, %v12244_v34  ;;  %v6624_v41 = vpop.f32.mrb[213].mxu0 }
 0xf99   : > { %v8228_v11 = vadd.f32 %v6624_v41, %v12246_v48  ;;  %v6626_v14 = vpop.f32.mrb[214].mxu0 }
 0xf9a   : > { %6875 = vst [vmem:[%s12256_s13 + $0xf0] sm:$0xff] %v8227_v22  ;;  %v8229_v46 = vadd.f32 %v6626_v14, %v12244_v34  ;;  %v6628_v15 = vpop.f32.mrb[215].mxu0 }
 0xf9b   : > { %6876 = vst [vmem:[%s12256_s13 + $0xf8] sm:$0xff] %v8228_v11  ;;  %v8230_v17 = vadd.f32 %v6628_v15, %v12246_v48 }
 0xf9c   : > { %6878 = vst [vmem:[%s12256_s13 + $0x108] sm:$0xff] %v8229_v46  ;;  %v8157_v58 = vpop.f32.mrb[244].mxu1 }
 0xf9d   : > { %6879 = vst [vmem:[%s12256_s13 + $0x110] sm:$0xff] %v8230_v17  ;;  %v6839_v60 = vadd.f32 %v8157_v58, %v6742_v13  ;;  %v6830_v18 = vpop.f32.mrb[245].mxu1 }
 0xf9e   : > { %v6831_v5 = vadd.f32 %v6830_v18, %v6734_v0  ;;  %v8158_v44 = vpop.f32.mrb[246].mxu1 }
 0xf9f   : > { %6889 = vst [vmem:[%s12256_s13 + $0x160] sm:$0xff] %v6839_v60  ;;  %v6842_v33 = vadd.f32 %v8158_v44, %v6745_v8  ;;  %v6632_v19 = vpop.f32.mrb[216].mxu0  ;;  %v6833_v40 = vpop.f32.mrb[247].mxu1 }
 0xfa0   : > { %6883 = vst [vmem:[%s12256_s13 + $0x130] sm:$0xff] %v6831_v5  ;;  %v8231_v26 = vadd.f32 %v6632_v19, %v12244_v34  ;;  %v6834_v7 = vadd.f32 %v6833_v40, %v6737_v28  ;;  %v6634_v23 = vpop.f32.mrb[217].mxu0 }
 0xfa1   : > { %6892 = vst [vmem:[%s12256_s13 + $0x178] sm:$0xff] %v6842_v33  ;;  %v8232_v36 = vadd.f32 %v6634_v23, %v12246_v48  ;;  %v6636_v4 = vpop.f32.mrb[218].mxu0 }
 0xfa2   : > { %6881 = vst [vmem:[%s12256_s13 + $0x120] sm:$0xff] %v8231_v26  ;;  %6886 = vst [vmem:[%s12256_s13 + $0x148] sm:$0xff] %v6834_v7  ;;  %v8233_v63 = vadd.f32 %v6636_v4, %v12244_v34  ;;  %v6638_v50 = vpop.f32.mrb[219].mxu0 }
 0xfa3   : > { %6882 = vst [vmem:[%s12256_s13 + $0x128] sm:$0xff] %v8232_v36  ;;  %v8234_v29 = vadd.f32 %v6638_v50, %v12246_v48 }
 0xfa4   : > { %6884 = vst [vmem:[%s12256_s13 + $0x138] sm:$0xff] %v8233_v63 }
 0xfa5   : > { %6885 = vst [vmem:[%s12256_s13 + $0x140] sm:$0xff] %v8234_v29 }
 0xfa7   : > { %v6642_v21 = vpop.f32.mrb[220].mxu0 }
 0xfa8   : > { %v8235_v43 = vadd.f32 %v6642_v21, %v12244_v34  ;;  %v6644_v12 = vpop.f32.mrb[221].mxu0 }
 0xfa9   : > { %v8236_v35 = vadd.f32 %v6644_v12, %v12246_v48  ;;  %v6646_v32 = vpop.f32.mrb[222].mxu0 }
 0xfaa   : > { %6887 = vst [vmem:[%s12256_s13 + $0x150] sm:$0xff] %v8235_v43  ;;  %v8237_v54 = vadd.f32 %v6646_v32, %v12244_v34  ;;  %v6648_v57 = vpop.f32.mrb[223].mxu0 }
 0xfab   : > { %6888 = vst [vmem:[%s12256_s13 + $0x158] sm:$0xff] %v8236_v35  ;;  %v8238_v38 = vadd.f32 %v6648_v57, %v12246_v48 }
 0xfac   : > { %6890 = vst [vmem:[%s12256_s13 + $0x168] sm:$0xff] %v8237_v54 }
 0xfad   : > { %6891 = vst [vmem:[%s12256_s13 + $0x170] sm:$0xff] %v8238_v38 }
 0xfaf   : > { %v7647_v31 = vpop.f32.mrb[224].mxu0 }
 0xfb0   : > { %v7648_v6 = vpop.f32.mrb[225].mxu0 }
 0xfb1   : > { %v7649_v16 = vadd.f32 %v7648_v6, %v7647_v31  ;;  %v7650_v10 = vpop.f32.mrb[226].mxu0 }
 0xfb2   : > { %v7651_v51 = vpop.f32.mrb[227].mxu0 }
 0xfb3   : > { %v6686_v25 = vadd.f32 %v7649_v16, %v12275_v39  ;;  %v7652_v47 = vadd.f32 %v7651_v51, %v7650_v10 }
 0xfb5   : > { %v6783_v61 = vadd.f32 %v12252_v1, %v6686_v25  ;;  %v6689_v34 = vadd.f32 %v7652_v47, %v12275_v39 }
 0xfb7   : > { %6847 = vst [vmem:[%s12256_s13 + $0x10] sm:$0xff] %v6783_v61  ;;  %v6786_v48 = vadd.f32 %v12264_v20, %v6689_v34  ;;  %v7653_v30 = vpop.f32.mrb[228].mxu0 }
 0xfb8   : > { %v7654_v56 = vpop.f32.mrb[229].mxu0 }
 0xfb9   : > { %6850 = vst [vmem:[%s12256_s13 + $0x28] sm:$0xff] %v6786_v48  ;;  %v7655_v49 = vadd.f32 %v7654_v56, %v7653_v30  ;;  %v7656_v9 = vpop.f32.mrb[230].mxu0 }
 0xfba   : > { %v7657_v55 = vpop.f32.mrb[231].mxu0 }
 0xfbb   : > { %v6694_v59 = vadd.f32 %v7655_v49, %v12275_v39  ;;  %v7658_v53 = vadd.f32 %v7657_v55, %v7656_v9 }
 0xfbd   : > { %v6791_v1 = vadd.f32 %v12249_v24, %v6694_v59  ;;  %v6697_v42 = vadd.f32 %v7658_v53, %v12275_v39 }
 0xfbf   : > { %6853 = vst [vmem:[%s12256_s13 + $0x40] sm:$0xff] %v6791_v1  ;;  %v6794_v20 = vadd.f32 %v12260_v37, %v6697_v42 }
 0xfc1   : > { %6856 = vst [vmem:[%s12256_s13 + $0x58] sm:$0xff] %v6794_v20 }
 0xfc2   : > { %9475 = shalt.err (!%p9472_p4)
}
 0xfc3   : > { %s9476_s8 = scalar_lea.hbm %s12376_s10, 6144  ;;  %s9480_s26 = scalar_lea.hbm %s12430_s5, 12288 }
 0xfc4   : > { %p9477_p9 = scmp.ne.s32.totalorder %s12376_s10, %s9476_s8  ;;  %p9481_p8 = scmp.lt.u32.totalorder %s12376_s10, %s12430_s5 }
 0xfc5   : > { %p9482_p13 = scmp.lt.u32.totalorder %s9480_s26, %s9476_s8  ;;  %p9484_p10 = scmp.lt.u32.totalorder %s9476_s8, %s12376_s10 }
 0xfc6   : > { %p9478_p0 = pnand %p9477_p9, %p9727_p5 }
 0xfc7   : > { %p9483_p6 = por %p9482_p13, %p9481_p8 }
 0xfc8   : > { %p9479_p11 = pneg %p9478_p0 }
 0xfc9   : > { %p9485_p3 = por %p9484_p10, %p9483_p6 }
 0xfcb   : > { %p9486_p7 = pnand %p9485_p3, %p9479_p11 }
 0xfcd   : > { %9489 = shalt.err (!%p9486_p7)
}
 0xfce   : > { %s9553_s28 = smov 384   ;;  %s9554_s29 = smov 24  }
 0xfcf   : > { %8433 = dma.vmem_to_hbm [thread:$0]  (%p9727_p5), %s12378_s12, 6144, %s12376_s10, %s6894_s22, %s9553_s28, %s9553_s28, %s9554_s29  }
 0xfd0 PF: > { %s6922_s27 = sand.u32 1, %s9524_s18   ;;  %p12875_p12 = scmp.ne.s32.totalorder %s12530_s25, 0 }
 0xfd1   : > { %p12876_p2 = scmp.ge.s32.totalorder %s9536_s21, 2  ;;  %s6923_s6 = scalar_lea.sflag [#allocation6], %s6922_s27 }
 0xfd3   : > { %p8450_p1 = pnand %p12876_p2, %p12875_p12 }
 0xfd5   : > { %9519 = dma.done.wait (!%p8450_p1), %s6923_s6, 6144  }
 0xfd6   : > { %9521 = vsyncadd (!%p8450_p1), %s6923_s6, 4294961152  ;;  %p20_p4 = scmp.ge.s32.totalorder %s9713_s16, 4   ;;  %s12877_s18 = smov %s9528_s19 }
 0xfd7   : > { %s12878_s19 = smov %s9532_s20  ;;  %s12879_s20 = smov %s9723_s30 }
 0xfd8   : > { %s12880_s21 = smov %s9713_s16  ;;  %22 = sbr.rel (!%p20_p4) target bundleno = 7 (0x7), region = 97 }
 0xfdf   :  { %6928 = vsyncpa [#allocation5], 1 }
 0xfe0   :  { %6930 = vsyncpa [#allocation5 + $0x1], 1 }
 0xfe1   :  { %6931 = vsyncpa [#allocation8], 1 }
 0xfe2   :  { %6932 = vsyncpa [#allocation11], 1 }
 0xfe3   :  { %6933 = vsyncpa [#allocation6], 1 }
 0xfe4   :  { %6935 = vsyncpa [#allocation6 + $0x1], 1 }

</bundles_post_ra>
